<compile_context>
chip_gen: v5e
topology: v5e:2x2
jax: 0.10.0
libtpu: 0.0.40
codegen_flags: <defaults>
</compile_context>

<pallas_src>
import functools

import jax
import jax.numpy as jnp
from jax.experimental import pallas as pl
from jax.experimental.pallas import tpu as pltpu

HIDDEN = 512
N_LAYERS = 9          # 8 hidden Linear+ReLU, 1 output Linear
N_MID = N_LAYERS - 2  # 7 interior 512x512 layers


def _round_up(x, m):
    return (x + m - 1) // m * m


def dqn_kernel(x_ref, w1_ref, b1_ref, wm_ref, bm_ref, w9_ref, b9_ref,
               o_ref, xp_ref):
    """Whole 9-layer forward in a single grid step.

    x_ref  : (B, n_obs)      f32   raw (unpadded) input
    w1_ref : (Fp, 512)       bf16  layer-1 weight  (rows >= n_obs are zero)
    b1_ref : (1, 512)        f32
    wm_ref : (7, 512, 512)   bf16  interior weights (all VMEM resident)
    bm_ref : (7, 1, 512)     f32   interior biases  (resident)
    w9_ref : (512, Ap)       bf16  layer-9 weight  (cols >= n_actions are zero)
    b9_ref : (1, Ap)         f32
    o_ref  : (B, n_actions)  f32   output
    xp_ref : (Bp, Fp)        f32   scratch: zero-padded copy of x
    """
    B, n_obs = x_ref.shape
    _, n_actions = o_ref.shape

    # Zero-pad x inside VMEM.  The padded feature columns MUST be zero (scratch is
    # not zero-initialised; garbage * zero-weight could be NaN), padded batch rows
    # are dropped by the final output slice so their contents are irrelevant.
    xp_ref[...] = jnp.zeros_like(xp_ref)
    xp_ref[:B, :n_obs] = x_ref[...].astype(jnp.float32)

    # Layer 1: (Bp, Fp) @ (Fp, 512) + ReLU.  bf16 MXU operands, f32 accumulation.
    h = jnp.dot(xp_ref[...].astype(jnp.bfloat16), w1_ref[...],
                preferred_element_type=jnp.float32)
    h = jnp.maximum(h + b1_ref[...], 0.0)

    # Interior layers 2..8, fully unrolled; activation stays in vregs.
    for l in range(wm_ref.shape[0]):
        y = jnp.dot(h.astype(jnp.bfloat16), wm_ref[l],
                    preferred_element_type=jnp.float32)
        h = jnp.maximum(y + bm_ref[l], 0.0)

    # Layer 9 (512 -> n_actions), no ReLU; drop batch/feature padding in-kernel.
    out = jnp.dot(h.astype(jnp.bfloat16), w9_ref[...],
                  preferred_element_type=jnp.float32) + b9_ref[...]
    o_ref[...] = out[:B, :n_actions].astype(o_ref.dtype)


def make_dqn_params(key, n_observations, n_actions, dtype=jnp.float32):
    """PyTorch-like nn.Linear default init (uniform +/- 1/sqrt(fan_in)).
    Weights returned as (in, out) f32 (transpose of torch's (out, in) layout)."""
    dims = [n_observations] + [HIDDEN] * (N_LAYERS - 1) + [n_actions]
    ws, bs = [], []
    for i in range(N_LAYERS):
        fan_in, fan_out = dims[i], dims[i + 1]
        key, kw, kb = jax.random.split(key, 3)
        bound = 1.0 / (fan_in ** 0.5)
        ws.append(jax.random.uniform(kw, (fan_in, fan_out), dtype, -bound, bound))
        bs.append(jax.random.uniform(kb, (fan_out,), dtype, -bound, bound))
    return ws, bs


def pack_dqn_params(ws, bs, n_observations, n_actions,
                    weight_dtype=jnp.bfloat16):
    """One-time packing: pad boundary layers to (8,128)-friendly shapes with zeros,
    cast weights to bf16, stack interior layers/biases.  Done ONCE, not per forward."""
    Fp = _round_up(n_observations, 128)
    Ap = _round_up(n_actions, 128)

    w1 = (jnp.zeros((Fp, HIDDEN), weight_dtype)
          .at[:n_observations, :].set(ws[0].astype(weight_dtype)))
    b1 = bs[0].reshape(1, HIDDEN).astype(jnp.float32)

    wm = jnp.stack([w.astype(weight_dtype) for w in ws[1:N_LAYERS - 1]], axis=0)
    bm = jnp.stack([b.reshape(1, HIDDEN).astype(jnp.float32)
                    for b in bs[1:N_LAYERS - 1]], axis=0)

    w9 = (jnp.zeros((HIDDEN, Ap), weight_dtype)
          .at[:, :n_actions].set(ws[-1].astype(weight_dtype)))
    b9 = (jnp.zeros((1, Ap), jnp.float32)
          .at[0, :n_actions].set(bs[-1].astype(jnp.float32)))

    return (w1, b1, wm, bm, w9, b9)


@functools.partial(jax.jit, static_argnames=("n_actions",))
def dqn_forward(x, packed, *, n_actions):
    """x: (batch, n_observations) -> (batch, n_actions) f32.  Bare pallas_call:
    no per-call padding / slicing ops in the wrapper."""
    w1, b1, wm, bm, w9, b9 = packed
    B, n_obs = x.shape
    Fp = w1.shape[0]
    Bp = _round_up(B, 8)

    return pl.pallas_call(
        dqn_kernel,
        out_shape=jax.ShapeDtypeStruct((B, n_actions), jnp.float32),
        grid_spec=pltpu.PrefetchScalarGridSpec(
            num_scalar_prefetch=0,
            grid=(1,),  # whole network in one step: no per-layer grid overhead
            in_specs=[
                pl.BlockSpec(x.shape, lambda i: (0, 0)),           # x (raw)
                pl.BlockSpec(w1.shape, lambda i: (0, 0)),          # w1
                pl.BlockSpec(b1.shape, lambda i: (0, 0)),          # b1
                pl.BlockSpec(wm.shape, lambda i: (0, 0, 0)),       # wm (resident)
                pl.BlockSpec(bm.shape, lambda i: (0, 0, 0)),       # bm (resident)
                pl.BlockSpec(w9.shape, lambda i: (0, 0)),          # w9
                pl.BlockSpec(b9.shape, lambda i: (0, 0)),          # b9
            ],
            out_specs=pl.BlockSpec((B, n_actions), lambda i: (0, 0)),
            scratch_shapes=[pltpu.VMEM((Bp, Fp), jnp.float32)],    # padded-x scratch
        ),
        compiler_params=pltpu.CompilerParams(
            dimension_semantics=("arbitrary",),
        ),
    )(x, w1, b1, wm, bm, w9, b9)


def dqn_reference(x, ws, bs, weight_dtype=jnp.bfloat16):
    """Pure-JAX reference mimicking the kernel's numerics (bf16 matmul operands,
    f32 accumulation, f32 bias/ReLU)."""
    h = x.astype(jnp.float32)
    for i in range(N_LAYERS - 1):
        y = jnp.dot(h.astype(weight_dtype), ws[i].astype(weight_dtype),
                    preferred_element_type=jnp.float32) + bs[i]
        h = jnp.maximum(y, 0.0)
    return jnp.dot(h.astype(weight_dtype), ws[-1].astype(weight_dtype),
                   preferred_element_type=jnp.float32) + bs[-1]


if __name__ == "__main__":
    key = jax.random.PRNGKey(0)
    n_observations = 8   # small rich-observation vector
    n_actions = 4
    batch = 2

    kx, kp = jax.random.split(key)
    x = jax.random.normal(kx, (batch, n_observations), jnp.float32)

    ws, bs = make_dqn_params(kp, n_observations, n_actions)
    packed = pack_dqn_params(ws, bs, n_observations, n_actions)  # one-time packing

    out = dqn_forward(x, packed, n_actions=n_actions)
    out = jax.block_until_ready(out)

    ref = dqn_reference(x, ws, bs)
    assert out.shape == (batch, n_actions), out.shape
    assert jnp.allclose(out, ref, atol=1e-2, rtol=1e-2), (out, ref)

    print("KERNEL_OK")
</pallas_src>

<mosaic_0001>
module attributes {stable_mosaic.version = 11 : i64} {
  func.func @dqn_kernel(%arg0: i32, %arg1: memref<2x8xf32, #tpu.memory_space<vmem>>, %arg2: memref<128x512xbf16, #tpu.memory_space<vmem>>, %arg3: memref<1x512xf32, #tpu.memory_space<vmem>>, %arg4: memref<7x512x512xbf16, #tpu.memory_space<vmem>>, %arg5: memref<7x1x512xf32, #tpu.memory_space<vmem>>, %arg6: memref<512x128xbf16, #tpu.memory_space<vmem>>, %arg7: memref<1x128xf32, #tpu.memory_space<vmem>>, %arg8: memref<2x4xf32, #tpu.memory_space<vmem>>, %arg9: memref<8x128xf32, #tpu.memory_space<vmem>>) attributes {dimension_semantics = [#tpu.dimension_semantics<arbitrary>], iteration_bounds = array<i64: 1>, scalar_prefetch = 0 : i64, scratch_operands = 1 : i64, tpu.core_type = #tpu.core_type<tc>, window_params = [{pipeline_mode = #tpu.pipeline_mode<synchronous>, transform_indices = @transform_0, window_bounds = array<i64: 2, 8>}, {pipeline_mode = #tpu.pipeline_mode<synchronous>, transform_indices = @transform_1, window_bounds = array<i64: 128, 512>}, {pipeline_mode = #tpu.pipeline_mode<synchronous>, transform_indices = @transform_2, window_bounds = array<i64: 1, 512>}, {pipeline_mode = #tpu.pipeline_mode<synchronous>, transform_indices = @transform_3, window_bounds = array<i64: 7, 512, 512>}, {pipeline_mode = #tpu.pipeline_mode<synchronous>, transform_indices = @transform_4, window_bounds = array<i64: 7, 1, 512>}, {pipeline_mode = #tpu.pipeline_mode<synchronous>, transform_indices = @transform_5, window_bounds = array<i64: 512, 128>}, {pipeline_mode = #tpu.pipeline_mode<synchronous>, transform_indices = @transform_6, window_bounds = array<i64: 1, 128>}, {pipeline_mode = #tpu.pipeline_mode<synchronous>, transform_indices = @transform_7, window_bounds = array<i64: 2, 4>}]} {
    %cst = arith.constant 0.000000e+00 : f32
    %0 = vector.broadcast %cst : f32 to vector<8x128xf32>
    %c0 = arith.constant 0 : index
    %c0_0 = arith.constant 0 : index
    %1 = vector.load %arg9[%c0, %c0_0] : memref<8x128xf32, #tpu.memory_space<vmem>>, vector<8x128xf32>
    tpu.vector_store %arg9[%c0, %c0_0], %0 {strides = array<i32>} : memref<8x128xf32, #tpu.memory_space<vmem>>, vector<8x128xf32>,
    %c0_1 = arith.constant 0 : index
    %c0_2 = arith.constant 0 : index
    %2 = vector.load %arg1[%c0_1, %c0_2] : memref<2x8xf32, #tpu.memory_space<vmem>>, vector<2x8xf32>
    %c0_3 = arith.constant 0 : index
    %c0_4 = arith.constant 0 : index
    %3 = vector.load %arg9[%c0_3, %c0_4] : memref<8x128xf32, #tpu.memory_space<vmem>>, vector<2x8xf32>
    tpu.vector_store %arg9[%c0_3, %c0_4], %2 {strides = array<i32>} : memref<8x128xf32, #tpu.memory_space<vmem>>, vector<2x8xf32>,
    %c0_5 = arith.constant 0 : index
    %c0_6 = arith.constant 0 : index
    %4 = vector.load %arg9[%c0_5, %c0_6] : memref<8x128xf32, #tpu.memory_space<vmem>>, vector<8x128xf32>
    %5 = arith.truncf %4 : vector<8x128xf32> to vector<8x128xbf16>
    %c0_7 = arith.constant 0 : index
    %c0_8 = arith.constant 0 : index
    %6 = vector.load %arg2[%c0_7, %c0_8] : memref<128x512xbf16, #tpu.memory_space<vmem>>, vector<128x512xbf16>
    %cst_9 = arith.constant dense<0.000000e+00> : vector<8x512xf32>
    %7 = tpu.matmul %5, %6, %cst_9 {dimension_numbers = #tpu.dot_dimension_numbers<[1], [0], [0], [1], [0, 0, 1, 1], [], []>} : vector<8x128xbf16>, vector<128x512xbf16>, vector<8x512xf32> -> vector<8x512xf32>
    %c0_10 = arith.constant 0 : index
    %c0_11 = arith.constant 0 : index
    %8 = vector.load %arg3[%c0_10, %c0_11] : memref<1x512xf32, #tpu.memory_space<vmem>>, vector<1x512xf32>
    %9 = vector.broadcast %8 : vector<1x512xf32> to vector<8x512xf32>
    %10 = arith.addf %7, %9 : vector<8x512xf32>
    %cst_12 = arith.constant 0.000000e+00 : f32
    %11 = vector.broadcast %cst_12 : f32 to vector<8x512xf32>
    %12 = arith.maximumf %10, %11 : vector<8x512xf32>
    %13 = arith.truncf %12 : vector<8x512xf32> to vector<8x512xbf16>
    %c0_13 = arith.constant 0 : index
    %c0_14 = arith.constant 0 : index
    %c0_15 = arith.constant 0 : index
    %14 = vector.load %arg4[%c0_13, %c0_14, %c0_15] : memref<7x512x512xbf16, #tpu.memory_space<vmem>>, vector<1x512x512xbf16>
    %15 = vector.shape_cast %14 : vector<1x512x512xbf16> to vector<512x512xbf16>
    %cst_16 = arith.constant dense<0.000000e+00> : vector<8x512xf32>
    %16 = tpu.matmul %13, %15, %cst_16 {dimension_numbers = #tpu.dot_dimension_numbers<[1], [0], [0], [1], [0, 0, 1, 1], [], []>} : vector<8x512xbf16>, vector<512x512xbf16>, vector<8x512xf32> -> vector<8x512xf32>
    %c0_17 = arith.constant 0 : index
    %c0_18 = arith.constant 0 : index
    %c0_19 = arith.constant 0 : index
    %17 = vector.load %arg5[%c0_17, %c0_18, %c0_19] : memref<7x1x512xf32, #tpu.memory_space<vmem>>, vector<1x1x512xf32>
    %18 = vector.shape_cast %17 : vector<1x1x512xf32> to vector<1x512xf32>
    %19 = vector.broadcast %18 : vector<1x512xf32> to vector<8x512xf32>
    %20 = arith.addf %16, %19 : vector<8x512xf32>
    %cst_20 = arith.constant 0.000000e+00 : f32
    %21 = vector.broadcast %cst_20 : f32 to vector<8x512xf32>
    %22 = arith.maximumf %20, %21 : vector<8x512xf32>
    %23 = arith.truncf %22 : vector<8x512xf32> to vector<8x512xbf16>
    %c1 = arith.constant 1 : index
    %c0_21 = arith.constant 0 : index
    %c0_22 = arith.constant 0 : index
    %24 = vector.load %arg4[%c1, %c0_21, %c0_22] : memref<7x512x512xbf16, #tpu.memory_space<vmem>>, vector<1x512x512xbf16>
    %25 = vector.shape_cast %24 : vector<1x512x512xbf16> to vector<512x512xbf16>
    %cst_23 = arith.constant dense<0.000000e+00> : vector<8x512xf32>
    %26 = tpu.matmul %23, %25, %cst_23 {dimension_numbers = #tpu.dot_dimension_numbers<[1], [0], [0], [1], [0, 0, 1, 1], [], []>} : vector<8x512xbf16>, vector<512x512xbf16>, vector<8x512xf32> -> vector<8x512xf32>
    %c1_24 = arith.constant 1 : index
    %c0_25 = arith.constant 0 : index
    %c0_26 = arith.constant 0 : index
    %27 = vector.load %arg5[%c1_24, %c0_25, %c0_26] : memref<7x1x512xf32, #tpu.memory_space<vmem>>, vector<1x1x512xf32>
    %28 = vector.shape_cast %27 : vector<1x1x512xf32> to vector<1x512xf32>
    %29 = vector.broadcast %28 : vector<1x512xf32> to vector<8x512xf32>
    %30 = arith.addf %26, %29 : vector<8x512xf32>
    %cst_27 = arith.constant 0.000000e+00 : f32
    %31 = vector.broadcast %cst_27 : f32 to vector<8x512xf32>
    %32 = arith.maximumf %30, %31 : vector<8x512xf32>
    %33 = arith.truncf %32 : vector<8x512xf32> to vector<8x512xbf16>
    %c2 = arith.constant 2 : index
    %c0_28 = arith.constant 0 : index
    %c0_29 = arith.constant 0 : index
    %34 = vector.load %arg4[%c2, %c0_28, %c0_29] : memref<7x512x512xbf16, #tpu.memory_space<vmem>>, vector<1x512x512xbf16>
    %35 = vector.shape_cast %34 : vector<1x512x512xbf16> to vector<512x512xbf16>
    %cst_30 = arith.constant dense<0.000000e+00> : vector<8x512xf32>
    %36 = tpu.matmul %33, %35, %cst_30 {dimension_numbers = #tpu.dot_dimension_numbers<[1], [0], [0], [1], [0, 0, 1, 1], [], []>} : vector<8x512xbf16>, vector<512x512xbf16>, vector<8x512xf32> -> vector<8x512xf32>
    %c2_31 = arith.constant 2 : index
    %c0_32 = arith.constant 0 : index
    %c0_33 = arith.constant 0 : index
    %37 = vector.load %arg5[%c2_31, %c0_32, %c0_33] : memref<7x1x512xf32, #tpu.memory_space<vmem>>, vector<1x1x512xf32>
    %38 = vector.shape_cast %37 : vector<1x1x512xf32> to vector<1x512xf32>
    %39 = vector.broadcast %38 : vector<1x512xf32> to vector<8x512xf32>
    %40 = arith.addf %36, %39 : vector<8x512xf32>
    %cst_34 = arith.constant 0.000000e+00 : f32
    %41 = vector.broadcast %cst_34 : f32 to vector<8x512xf32>
    %42 = arith.maximumf %40, %41 : vector<8x512xf32>
    %43 = arith.truncf %42 : vector<8x512xf32> to vector<8x512xbf16>
    %c3 = arith.constant 3 : index
    %c0_35 = arith.constant 0 : index
    %c0_36 = arith.constant 0 : index
    %44 = vector.load %arg4[%c3, %c0_35, %c0_36] : memref<7x512x512xbf16, #tpu.memory_space<vmem>>, vector<1x512x512xbf16>
    %45 = vector.shape_cast %44 : vector<1x512x512xbf16> to vector<512x512xbf16>
    %cst_37 = arith.constant dense<0.000000e+00> : vector<8x512xf32>
    %46 = tpu.matmul %43, %45, %cst_37 {dimension_numbers = #tpu.dot_dimension_numbers<[1], [0], [0], [1], [0, 0, 1, 1], [], []>} : vector<8x512xbf16>, vector<512x512xbf16>, vector<8x512xf32> -> vector<8x512xf32>
    %c3_38 = arith.constant 3 : index
    %c0_39 = arith.constant 0 : index
    %c0_40 = arith.constant 0 : index
    %47 = vector.load %arg5[%c3_38, %c0_39, %c0_40] : memref<7x1x512xf32, #tpu.memory_space<vmem>>, vector<1x1x512xf32>
    %48 = vector.shape_cast %47 : vector<1x1x512xf32> to vector<1x512xf32>
    %49 = vector.broadcast %48 : vector<1x512xf32> to vector<8x512xf32>
    %50 = arith.addf %46, %49 : vector<8x512xf32>
    %cst_41 = arith.constant 0.000000e+00 : f32
    %51 = vector.broadcast %cst_41 : f32 to vector<8x512xf32>
    %52 = arith.maximumf %50, %51 : vector<8x512xf32>
    %53 = arith.truncf %52 : vector<8x512xf32> to vector<8x512xbf16>
    %c4 = arith.constant 4 : index
    %c0_42 = arith.constant 0 : index
    %c0_43 = arith.constant 0 : index
    %54 = vector.load %arg4[%c4, %c0_42, %c0_43] : memref<7x512x512xbf16, #tpu.memory_space<vmem>>, vector<1x512x512xbf16>
    %55 = vector.shape_cast %54 : vector<1x512x512xbf16> to vector<512x512xbf16>
    %cst_44 = arith.constant dense<0.000000e+00> : vector<8x512xf32>
    %56 = tpu.matmul %53, %55, %cst_44 {dimension_numbers = #tpu.dot_dimension_numbers<[1], [0], [0], [1], [0, 0, 1, 1], [], []>} : vector<8x512xbf16>, vector<512x512xbf16>, vector<8x512xf32> -> vector<8x512xf32>
    %c4_45 = arith.constant 4 : index
    %c0_46 = arith.constant 0 : index
    %c0_47 = arith.constant 0 : index
    %57 = vector.load %arg5[%c4_45, %c0_46, %c0_47] : memref<7x1x512xf32, #tpu.memory_space<vmem>>, vector<1x1x512xf32>
    %58 = vector.shape_cast %57 : vector<1x1x512xf32> to vector<1x512xf32>
    %59 = vector.broadcast %58 : vector<1x512xf32> to vector<8x512xf32>
    %60 = arith.addf %56, %59 : vector<8x512xf32>
    %cst_48 = arith.constant 0.000000e+00 : f32
    %61 = vector.broadcast %cst_48 : f32 to vector<8x512xf32>
    %62 = arith.maximumf %60, %61 : vector<8x512xf32>
    %63 = arith.truncf %62 : vector<8x512xf32> to vector<8x512xbf16>
    %c5 = arith.constant 5 : index
    %c0_49 = arith.constant 0 : index
    %c0_50 = arith.constant 0 : index
    %64 = vector.load %arg4[%c5, %c0_49, %c0_50] : memref<7x512x512xbf16, #tpu.memory_space<vmem>>, vector<1x512x512xbf16>
    %65 = vector.shape_cast %64 : vector<1x512x512xbf16> to vector<512x512xbf16>
    %cst_51 = arith.constant dense<0.000000e+00> : vector<8x512xf32>
    %66 = tpu.matmul %63, %65, %cst_51 {dimension_numbers = #tpu.dot_dimension_numbers<[1], [0], [0], [1], [0, 0, 1, 1], [], []>} : vector<8x512xbf16>, vector<512x512xbf16>, vector<8x512xf32> -> vector<8x512xf32>
    %c5_52 = arith.constant 5 : index
    %c0_53 = arith.constant 0 : index
    %c0_54 = arith.constant 0 : index
    %67 = vector.load %arg5[%c5_52, %c0_53, %c0_54] : memref<7x1x512xf32, #tpu.memory_space<vmem>>, vector<1x1x512xf32>
    %68 = vector.shape_cast %67 : vector<1x1x512xf32> to vector<1x512xf32>
    %69 = vector.broadcast %68 : vector<1x512xf32> to vector<8x512xf32>
    %70 = arith.addf %66, %69 : vector<8x512xf32>
    %cst_55 = arith.constant 0.000000e+00 : f32
    %71 = vector.broadcast %cst_55 : f32 to vector<8x512xf32>
    %72 = arith.maximumf %70, %71 : vector<8x512xf32>
    %73 = arith.truncf %72 : vector<8x512xf32> to vector<8x512xbf16>
    %c6 = arith.constant 6 : index
    %c0_56 = arith.constant 0 : index
    %c0_57 = arith.constant 0 : index
    %74 = vector.load %arg4[%c6, %c0_56, %c0_57] : memref<7x512x512xbf16, #tpu.memory_space<vmem>>, vector<1x512x512xbf16>
    %75 = vector.shape_cast %74 : vector<1x512x512xbf16> to vector<512x512xbf16>
    %cst_58 = arith.constant dense<0.000000e+00> : vector<8x512xf32>
    %76 = tpu.matmul %73, %75, %cst_58 {dimension_numbers = #tpu.dot_dimension_numbers<[1], [0], [0], [1], [0, 0, 1, 1], [], []>} : vector<8x512xbf16>, vector<512x512xbf16>, vector<8x512xf32> -> vector<8x512xf32>
    %c6_59 = arith.constant 6 : index
    %c0_60 = arith.constant 0 : index
    %c0_61 = arith.constant 0 : index
    %77 = vector.load %arg5[%c6_59, %c0_60, %c0_61] : memref<7x1x512xf32, #tpu.memory_space<vmem>>, vector<1x1x512xf32>
    %78 = vector.shape_cast %77 : vector<1x1x512xf32> to vector<1x512xf32>
    %79 = vector.broadcast %78 : vector<1x512xf32> to vector<8x512xf32>
    %80 = arith.addf %76, %79 : vector<8x512xf32>
    %cst_62 = arith.constant 0.000000e+00 : f32
    %81 = vector.broadcast %cst_62 : f32 to vector<8x512xf32>
    %82 = arith.maximumf %80, %81 : vector<8x512xf32>
    %83 = arith.truncf %82 : vector<8x512xf32> to vector<8x512xbf16>
    %c0_63 = arith.constant 0 : index
    %c0_64 = arith.constant 0 : index
    %84 = vector.load %arg6[%c0_63, %c0_64] : memref<512x128xbf16, #tpu.memory_space<vmem>>, vector<512x128xbf16>
    %cst_65 = arith.constant dense<0.000000e+00> : vector<8x128xf32>
    %85 = tpu.matmul %83, %84, %cst_65 {dimension_numbers = #tpu.dot_dimension_numbers<[1], [0], [0], [1], [0, 0, 1, 1], [], []>} : vector<8x512xbf16>, vector<512x128xbf16>, vector<8x128xf32> -> vector<8x128xf32>
    %c0_66 = arith.constant 0 : index
    %c0_67 = arith.constant 0 : index
    %86 = vector.load %arg7[%c0_66, %c0_67] : memref<1x128xf32, #tpu.memory_space<vmem>>, vector<1x128xf32>
    %87 = vector.broadcast %86 : vector<1x128xf32> to vector<8x128xf32>
    %88 = arith.addf %85, %87 : vector<8x128xf32>
    %89 = vector.extract_strided_slice %88 {offsets = [0, 0], sizes = [2, 4], strides = [1, 1]} : vector<8x128xf32> to vector<2x4xf32>
    %c0_68 = arith.constant 0 : index
    %c0_69 = arith.constant 0 : index
    %90 = vector.load %arg8[%c0_68, %c0_69] : memref<2x4xf32, #tpu.memory_space<vmem>>, vector<2x4xf32>
    tpu.vector_store %arg8[%c0_68, %c0_69], %89 {strides = array<i32>} : memref<2x4xf32, #tpu.memory_space<vmem>>, vector<2x4xf32>,
    return
  }
  func.func @transform_0(%arg0: i32) -> (i32, i32) {
    %c0_i32 = arith.constant 0 : i32
    %c0_i32_0 = arith.constant 0 : i32
    %c0_i32_1 = arith.constant 0 : i32
    return %c0_i32, %c0_i32_0 : i32, i32
  }
  func.func @transform_1(%arg0: i32) -> (i32, i32) {
    %c0_i32 = arith.constant 0 : i32
    %c0_i32_0 = arith.constant 0 : i32
    %c0_i32_1 = arith.constant 0 : i32
    return %c0_i32, %c0_i32_0 : i32, i32
  }
  func.func @transform_2(%arg0: i32) -> (i32, i32) {
    %c0_i32 = arith.constant 0 : i32
    %c0_i32_0 = arith.constant 0 : i32
    %c0_i32_1 = arith.constant 0 : i32
    return %c0_i32, %c0_i32_0 : i32, i32
  }
  func.func @transform_3(%arg0: i32) -> (i32, i32, i32) {
    %c0_i32 = arith.constant 0 : i32
    %c0_i32_0 = arith.constant 0 : i32
    %c0_i32_1 = arith.constant 0 : i32
    %c0_i32_2 = arith.constant 0 : i32
    return %c0_i32, %c0_i32_0, %c0_i32_1 : i32, i32, i32
  }
  func.func @transform_4(%arg0: i32) -> (i32, i32, i32) {
    %c0_i32 = arith.constant 0 : i32
    %c0_i32_0 = arith.constant 0 : i32
    %c0_i32_1 = arith.constant 0 : i32
    %c0_i32_2 = arith.constant 0 : i32
    return %c0_i32, %c0_i32_0, %c0_i32_1 : i32, i32, i32
  }
  func.func @transform_5(%arg0: i32) -> (i32, i32) {
    %c0_i32 = arith.constant 0 : i32
    %c0_i32_0 = arith.constant 0 : i32
    %c0_i32_1 = arith.constant 0 : i32
    return %c0_i32, %c0_i32_0 : i32, i32
  }
  func.func @transform_6(%arg0: i32) -> (i32, i32) {
    %c0_i32 = arith.constant 0 : i32
    %c0_i32_0 = arith.constant 0 : i32
    %c0_i32_1 = arith.constant 0 : i32
    return %c0_i32, %c0_i32_0 : i32, i32
  }
  func.func @transform_7(%arg0: i32) -> (i32, i32) {
    %c0_i32 = arith.constant 0 : i32
    %c0_i32_0 = arith.constant 0 : i32
    %c0_i32_1 = arith.constant 0 : i32
    return %c0_i32, %c0_i32_0 : i32, i32
  }
}

</mosaic_0001>

<bundles_post_ra>
// kernel: dqn_forward.1
= control target key start
LH: loop header
LB: loop body
LE: loop exit
PB: predicated region body
PF: predicated region fallthrough
CT: control target
= control target key end

     0   :  { %12 = vsyncpa [#allocation4], 0  ;;  %s13197_s0 = inlined_call_operand.hbm [shape: f32[2,8], index: 0, kind: input, shape index: {}]   ;;  %s13198_s1 = inlined_call_operand.hbm [shape: bf16[128,512], index: 1, kind: input, shape index: {}]   ;;  %s13199_s2 = inlined_call_operand.hbm [shape: f32[1,512], index: 2, kind: input, shape index: {}]   ;;  %s13200_s3 = inlined_call_operand.hbm [shape: bf16[7,512,512], index: 3, kind: input, shape index: {}]   ;;  %s13201_s4 = inlined_call_operand.hbm [shape: f32[7,1,512], index: 4, kind: input, shape index: {}]   ;;  %s13202_s5 = inlined_call_operand.hbm [shape: bf16[512,128], index: 5, kind: input, shape index: {}]   ;;  %s13203_s6 = inlined_call_operand.hbm [shape: f32[1,128], index: 6, kind: input, shape index: {}]   ;;  %s13204_s7 = inlined_call_operand.hbm [shape: f32[2,4], index: 7, kind: output, shape index: {}]  }
   0x1   :  { %13 = vsyncpa [#allocation7], 0 }
   0x2   :  { %14 = vsyncpa [#allocation10], 0 }
   0x3   :  { %15 = vsyncpa [#allocation13], 0  ;;  %s32_s26 = sshll.u32 %s13198_s1, 4  ;;  %s33_s26 = int_to_ptr.hbm [resolvable:$true] %s32_s26 }
   0x4   :  { %16 = vsyncpa [#allocation5], 0  ;;  %s12718_s27 = smov [#allocation6]   ;;  %s56_s8 = sshll.u32 %s13200_s3, 4  ;;  %s57_s8 = int_to_ptr.hbm [resolvable:$true] %s56_s8 }
   0x5   :  { %s34_s28 = sshll.u32 %s12718_s27, 4  ;;  %s12719_s9 = smov 256   ;;  %s35_s28 = int_to_ptr.vmem [resolvable:$true] %s34_s28 }
   0x6   :  { %s12720_s10 = smov 16   ;;  %s12721_s11 = smov [#allocation9]  }
   0x7   :  { %40 = dma.hbm_to_vmem [thread:$0]  %s33_s26, 4096, %s35_s28, [#allocation7], %s12719_s9, %s12719_s9, %s12720_s10  }
   0x8   :  { %s58_s12 = sshll.u32 %s12721_s11, 4  ;;  %s82_s1 = sshll.u32 %s13202_s5, 4  ;;  %s59_s12 = int_to_ptr.vmem [resolvable:$true] %s58_s12  ;;  %s83_s1 = int_to_ptr.hbm [resolvable:$true] %s82_s1 }
   0x9   :  { %64 = dma.hbm_to_vmem [thread:$0]  %s57_s8, 114688, %s59_s12, [#allocation10], %s12719_s9, %s12719_s9, %s12720_s10  }
   0xa   :  { %s12722_s15 = smov [#allocation12]   ;;  %s22_s3 = sshll.u32 %s13197_s0, 4  ;;  %s23_s3 = int_to_ptr.hbm [resolvable:$true] %s22_s3 }
   0xb   :  { %s84_s16 = sshll.u32 %s12722_s15, 4  ;;  %s12723_s19 = smov 64   ;;  %s85_s16 = int_to_ptr.vmem [resolvable:$true] %s84_s16 }
   0xc   :  { %s12724_s20 = smov 4   ;;  %s12725_s21 = smov [#allocation3]  }
   0xd   :  { %90 = dma.hbm_to_vmem [thread:$0]  %s83_s1, 4096, %s85_s16, [#allocation13], %s12723_s19, %s12723_s19, %s12724_s20  }
   0xe   :  { %s24_s22 = sshll.u32 %s12725_s21, 4  ;;  %s46_s25 = sshll.u32 %s13199_s2, 4  ;;  %s25_s22 = int_to_ptr.vmem [resolvable:$true] %s24_s22  ;;  %s47_s25 = int_to_ptr.hbm [resolvable:$true] %s46_s25 }
   0xf   :  { %27 = dma.hbm_to_vmem [thread:$0]  %s23_s3, 32, %s25_s22, [#allocation4]  }
  0x10   :  { %s69_s27 = sshll.u32 %s13201_s4, 4  ;;  %s12726_s28 = smov [#allocation8]   ;;  %s70_s27 = int_to_ptr.hbm [resolvable:$true] %s69_s27 }
  0x11   :  { %s48_s29 = sshll.u32 %s12726_s28, 4  ;;  %s12727_s0 = smov [#allocation11]   ;;  %s49_s29 = int_to_ptr.vmem [resolvable:$true] %s48_s29 }
  0x12   :  { %51 = dma.hbm_to_vmem [thread:$0]  %s47_s25, 64, %s49_s29, [#allocation7]  }
  0x13   :  { %s71_s30 = sshll.u32 %s12727_s0, 4  ;;  %s96_s10 = sshll.u32 %s13203_s6, 4  ;;  %s72_s30 = int_to_ptr.vmem [resolvable:$true] %s71_s30  ;;  %s97_s10 = int_to_ptr.hbm [resolvable:$true] %s96_s10 }
  0x14   :  { %77 = dma.hbm_to_vmem [thread:$0]  %s70_s27, 448, %s72_s30, [#allocation10], %s12723_s19, %s12723_s19, %s12724_s20  }
  0x15   :  { %s12728_s2 = smov [#allocation14]  }
  0x16   :  { %s98_s11 = sshll.u32 %s12728_s2, 4  ;;  %s99_s11 = int_to_ptr.vmem [resolvable:$true] %s98_s11 }
  0x17   :  { %101 = dma.hbm_to_vmem [thread:$0]  %s97_s10, 16, %s99_s11, [#allocation13]  }
  0x18   :  { %12708 = dma.done.wait [#allocation4], 32  }
  0x19   :  { %12709 = vsyncadd [#allocation4], 4294967264 }
  0x1a   :  { %12710 = dma.done.wait [#allocation7], 4160  }
  0x1b   :  { %12711 = vsyncadd [#allocation7], 4294963136 }
  0x1c   :  { %12712 = dma.done.wait [#allocation10], 115136  }
  0x1d   :  { %12713 = vsyncadd [#allocation10], 4294852160 }
  0x1e   :  { %12714 = dma.done.wait [#allocation13], 4112  }
  0x1f   :  { %12715 = vsyncadd [#allocation13], 4294963184  ;;  %v12729_v0 = vmov 0.0   ;;  %v7816_v1 = vld [vmem:[#allocation6 + $0xe0] sm:$0xf]  ;;  %vm132_vm0 = vcmask 58368  }
  0x20   :  { %130 = vst [vmem:[#allocation2] sm:$0xff] %v12729_v0  ;;  %v11572_v2 = vld [vmem:[#allocation6 + $0xec] sm:$0xf0]  ;;  %v11570_v3 = vld [vmem:[#allocation6 + $0xe4] sm:$0xf]  ;;  %s12730_s4 = smov [#allocation15]  }
  0x21   :  { %v7817_v4 = vor.u32 %v11572_v2, %v7816_v1  ;;  %v7818_v5 = vld [vmem:[#allocation6 + $0xf0] sm:$0xf0]  ;;  %v7824_v6 = vld [vmem:[#allocation6 + $0xe8] sm:$0xf]  ;;  %v11573_v7 = vld [vmem:[#allocation6 + $0xf4] sm:$0xf0] }
  0x22   :  { %v7821_v8 = vor.u32 %v11570_v3, %v7818_v5  ;;  %v7825_v9 = vor.u32 %v11573_v7, %v7824_v6  ;;  %v11571_v10 = vld [vmem:[#allocation6 + $0xec] sm:$0xf]  ;;  %v7826_v11 = vld [vmem:[#allocation6 + $0xf8] sm:$0xf0]  ;;  %v7800_v12 = vld [vmem:[#allocation6 + $0xc0] sm:$0xf] }
  0x23   :  { %338 = vmatpush.bf16.msra.mxu0 %v7817_v4  ;;  %v7829_v13 = vor.u32 %v11571_v10, %v7826_v11  ;;  %v11568_v14 = vld [vmem:[#allocation6 + $0xcc] sm:$0xf0]  ;;  %v11566_v15 = vld [vmem:[#allocation6 + $0xc4] sm:$0xf]  ;;  %v7802_v16 = vld [vmem:[#allocation6 + $0xd0] sm:$0xf0] }
  0x24   :  { %351 = vmatpush.bf16.msra.mxu1 %v7821_v8  ;;  %364 = vmatpush.bf16.msra.mxu2 %v7825_v9  ;;  %v7801_v17 = vor.u32 %v11568_v14, %v7800_v12  ;;  %v7805_v18 = vor.u32 %v11566_v15, %v7802_v16  ;;  %v7808_v19 = vld [vmem:[#allocation6 + $0xc8] sm:$0xf]  ;;  %v11569_v20 = vld [vmem:[#allocation6 + $0xd4] sm:$0xf0]  ;;  %v11567_v21 = vld [vmem:[#allocation6 + $0xcc] sm:$0xf] }
  0x25   :  { %377 = vmatpush.bf16.msra.mxu3 %v7829_v13  ;;  %v7809_v22 = vor.u32 %v11569_v20, %v7808_v19  ;;  %v7810_v23 = vld [vmem:[#allocation6 + $0xd8] sm:$0xf0]  ;;  %v7784_v24 = vld [vmem:[#allocation6 + $0xa0] sm:$0xf]  ;;  %v11564_v25 = vld [vmem:[#allocation6 + $0xac] sm:$0xf0] }
  0x26   :  { %v7813_v26 = vor.u32 %v11567_v21, %v7810_v23  ;;  %v11562_v27 = vld [vmem:[#allocation6 + $0xa4] sm:$0xf]  ;;  %v7786_v28 = vld [vmem:[#allocation6 + $0xb0] sm:$0xf0]  ;;  %v7792_v29 = vld [vmem:[#allocation6 + $0xa8] sm:$0xf]  ;;  %v7785_v30 = vor.u32 %v11564_v25, %v7784_v24 }
  0x27   :  { %339 = vmatpush.bf16.msra.mxu0 %v7801_v17  ;;  %v11565_v31 = vld [vmem:[#allocation6 + $0xb4] sm:$0xf0]  ;;  %v11563_v32 = vld [vmem:[#allocation6 + $0xac] sm:$0xf]  ;;  %v7794_v33 = vld [vmem:[#allocation6 + $0xb8] sm:$0xf0]  ;;  %v7789_v34 = vor.u32 %v11562_v27, %v7786_v28 }
  0x28   :  { %352 = vmatpush.bf16.msra.mxu1 %v7805_v18  ;;  %365 = vmatpush.bf16.msra.mxu2 %v7809_v22  ;;  %v7793_v35 = vor.u32 %v11565_v31, %v7792_v29  ;;  %v7768_v36 = vld [vmem:[#allocation6 + $0x80] sm:$0xf]  ;;  %v11560_v37 = vld [vmem:[#allocation6 + $0x8c] sm:$0xf0]  ;;  %v11558_v38 = vld [vmem:[#allocation6 + $0x84] sm:$0xf]  ;;  %v7797_v39 = vor.u32 %v11563_v32, %v7794_v33 }
  0x29   :  { %378 = vmatpush.bf16.msra.mxu3 %v7813_v26  ;;  %v7770_v40 = vld [vmem:[#allocation6 + $0x90] sm:$0xf0]  ;;  %v7776_v41 = vld [vmem:[#allocation6 + $0x88] sm:$0xf]  ;;  %v11561_v42 = vld [vmem:[#allocation6 + $0x94] sm:$0xf0]  ;;  %v7769_v45 = vor.u32 %v11560_v37, %v7768_v36 }
  0x2a   :  { %v11559_v43 = vld [vmem:[#allocation6 + $0x8c] sm:$0xf]  ;;  %v7778_v44 = vld [vmem:[#allocation6 + $0x98] sm:$0xf0]  ;;  %v7773_v46 = vor.u32 %v11558_v38, %v7770_v40  ;;  %v7777_v47 = vor.u32 %v11561_v42, %v7776_v41  ;;  %v7752_v48 = vld [vmem:[#allocation6 + $0x60] sm:$0xf] }
  0x2b   :  { %340 = vmatpush.bf16.msra.mxu0 %v7785_v30  ;;  %v11556_v49 = vld [vmem:[#allocation6 + $0x6c] sm:$0xf0]  ;;  %v11554_v50 = vld [vmem:[#allocation6 + $0x64] sm:$0xf]  ;;  %v7781_v51 = vor.u32 %v11559_v43, %v7778_v44  ;;  %v7754_v52 = vld [vmem:[#allocation6 + $0x70] sm:$0xf0] }
  0x2c   :  { %353 = vmatpush.bf16.msra.mxu1 %v7789_v34  ;;  %366 = vmatpush.bf16.msra.mxu2 %v7793_v35  ;;  %v7760_v53 = vld [vmem:[#allocation6 + $0x68] sm:$0xf]  ;;  %v11557_v54 = vld [vmem:[#allocation6 + $0x74] sm:$0xf0]  ;;  %v11555_v55 = vld [vmem:[#allocation6 + $0x6c] sm:$0xf]  ;;  %v7753_v57 = vor.u32 %v11556_v49, %v7752_v48  ;;  %v7757_v58 = vor.u32 %v11554_v50, %v7754_v52 }
  0x2d   :  { %379 = vmatpush.bf16.msra.mxu3 %v7797_v39  ;;  %v7762_v56 = vld [vmem:[#allocation6 + $0x78] sm:$0xf0]  ;;  %v7761_v59 = vor.u32 %v11557_v54, %v7760_v53  ;;  %v7736_v60 = vld [vmem:[#allocation6 + $0x40] sm:$0xf]  ;;  %v11552_v61 = vld [vmem:[#allocation6 + $0x4c] sm:$0xf0] }
  0x2e   :  { %v11550_v62 = vld [vmem:[#allocation6 + $0x44] sm:$0xf]  ;;  %v7765_v63 = vor.u32 %v11555_v55, %v7762_v56  ;;  %v7738_v0 = vld [vmem:[#allocation6 + $0x50] sm:$0xf0]  ;;  %v7744_v1 = vld [vmem:[#allocation6 + $0x48] sm:$0xf]  ;;  %v7737_v5 = vor.u32 %v11552_v61, %v7736_v60 }
  0x2f   :  { %341 = vmatpush.bf16.msra.mxu0 %v7769_v45  ;;  %v11553_v2 = vld [vmem:[#allocation6 + $0x54] sm:$0xf0]  ;;  %v11551_v3 = vld [vmem:[#allocation6 + $0x4c] sm:$0xf]  ;;  %v7746_v4 = vld [vmem:[#allocation6 + $0x58] sm:$0xf0]  ;;  %v7741_v7 = vor.u32 %v11550_v62, %v7738_v0 }
  0x30   :  { %354 = vmatpush.bf16.msra.mxu1 %v7773_v46  ;;  %367 = vmatpush.bf16.msra.mxu2 %v7777_v47  ;;  %v7720_v6 = vld [vmem:[#allocation6 + $0x20] sm:$0xf]  ;;  %v7745_v8 = vor.u32 %v11553_v2, %v7744_v1  ;;  %v11548_v9 = vld [vmem:[#allocation6 + $0x2c] sm:$0xf0]  ;;  %v11546_v10 = vld [vmem:[#allocation6 + $0x24] sm:$0xf]  ;;  %v7749_v12 = vor.u32 %v11551_v3, %v7746_v4 }
  0x31   :  { %380 = vmatpush.bf16.msra.mxu3 %v7781_v51  ;;  %v7722_v11 = vld [vmem:[#allocation6 + $0x30] sm:$0xf0]  ;;  %v7728_v13 = vld [vmem:[#allocation6 + $0x28] sm:$0xf]  ;;  %v11549_v14 = vld [vmem:[#allocation6 + $0x34] sm:$0xf0]  ;;  %v7721_v18 = vor.u32 %v11548_v9, %v7720_v6 }
  0x32   :  { %v131_v15 = vld [vmem:[#allocation3] sm:$0x3]  ;;  %v11547_v16 = vld [vmem:[#allocation6 + $0x2c] sm:$0xf]  ;;  %v7704_v19 = vld [vmem:[#allocation6] sm:$0xf]  ;;  %v7725_v20 = vor.u32 %v11546_v10, %v7722_v11  ;;  %v7729_v21 = vor.u32 %v11549_v14, %v7728_v13 }
  0x33   :  { %342 = vmatpush.bf16.msra.mxu0 %v7753_v57  ;;  %v7730_v17 = vld [vmem:[#allocation6 + $0x38] sm:$0xf0]  ;;  %133 = vst.msk [vmem:[#allocation2] sm:$0x3] %vm132_vm0, %v131_v15  ;;  %v11544_v22 = vld [vmem:[#allocation6 + $0xc] sm:$0xf0] }
  0x34   :  { %355 = vmatpush.bf16.msra.mxu1 %v7757_v58  ;;  %368 = vmatpush.bf16.msra.mxu2 %v7761_v59  ;;  %v11542_v23 = vld [vmem:[#allocation6 + $0x4] sm:$0xf]  ;;  %v7706_v24 = vld [vmem:[#allocation6 + $0x10] sm:$0xf0]  ;;  %v7733_v25 = vor.u32 %v11547_v16, %v7730_v17  ;;  %v7712_v26 = vld [vmem:[#allocation6 + $0x8] sm:$0xf]  ;;  %v7705_v32 = vor.u32 %v11544_v22, %v7704_v19 }
  0x35   :  { %381 = vmatpush.bf16.msra.mxu3 %v7765_v63  ;;  %v11545_v27 = vld [vmem:[#allocation6 + $0x14] sm:$0xf0]  ;;  %v11543_v28 = vld [vmem:[#allocation6 + $0xc] sm:$0xf]  ;;  %v7714_v29 = vld [vmem:[#allocation6 + $0x18] sm:$0xf0]  ;;  %v7709_v35 = vor.u32 %v11542_v23, %v7706_v24 }
  0x36   :  { %v7944_v30 = vld [vmem:[#allocation9 + $0xe0] sm:$0xf]  ;;  %v11604_v31 = vld [vmem:[#allocation9 + $0xec] sm:$0xf0]  ;;  %v7713_v36 = vor.u32 %v11545_v27, %v7712_v26  ;;  %v7717_v38 = vor.u32 %v11543_v28, %v7714_v29  ;;  %s7687_s6 = sshll.u32 %s12730_s4, 4  ;;  %s7689_s14 = sshll.u32 %s13204_s7, 4  ;;  %s7688_s6 = int_to_ptr.vmem [resolvable:$true] %s7687_s6  ;;  %s7690_s14 = int_to_ptr.hbm [resolvable:$true] %s7689_s14 }
  0x37   :  { %343 = vmatpush.bf16.msra.mxu0 %v7737_v5  ;;  %v8072_v33 = vld [vmem:[#allocation9 + $0x1e0] sm:$0xf]  ;;  %v11636_v34 = vld [vmem:[#allocation9 + $0x1ec] sm:$0xf0]  ;;  %v7945_v40 = vor.u32 %v11604_v31, %v7944_v30  ;;  %vm7680_vm1 = vcmask 25600  }
  0x38   :  { %356 = vmatpush.bf16.msra.mxu1 %v7741_v7  ;;  %369 = vmatpush.bf16.msra.mxu2 %v7745_v8  ;;  %v7928_v37 = vld [vmem:[#allocation9 + $0xc0] sm:$0xf]  ;;  %v11668_v42 = vld [vmem:[#allocation9 + $0x2ec] sm:$0xf0]  ;;  %v8073_v44 = vor.u32 %v11636_v34, %v8072_v33 }
  0x39   :  { %382 = vmatpush.bf16.msra.mxu3 %v7749_v12  ;;  %v8200_v41 = vld [vmem:[#allocation9 + $0x2e0] sm:$0xf]  ;;  %v11600_v45 = vld [vmem:[#allocation9 + $0xcc] sm:$0xf0] }
  0x3a   :  { %v134_v39 = vld [vmem:[#allocation2] sm:$0xff]  ;;  %v8328_v46 = vld [vmem:[#allocation9 + $0x3e0] sm:$0xf]  ;;  %v8201_v50 = vor.u32 %v11668_v42, %v8200_v41  ;;  %v7929_v51 = vor.u32 %v11600_v45, %v7928_v37 }
  0x3b   :  { %344 = vmatpush.bf16.msra.mxu0 %v7721_v18  ;;  %v135_v43 = vpack.c.bf16 %v134_v39, %v134_v39  ;;  %v11700_v47 = vld [vmem:[#allocation9 + $0x3ec] sm:$0xf0]  ;;  %v8056_v48 = vld [vmem:[#allocation9 + $0x1c0] sm:$0xf] }
  0x3c   :  { %357 = vmatpush.bf16.msra.mxu1 %v7725_v20  ;;  %370 = vmatpush.bf16.msra.mxu2 %v7729_v21  ;;  %v11632_v49 = vld [vmem:[#allocation9 + $0x1cc] sm:$0xf0]  ;;  %v8329_v52 = vor.u32 %v11700_v47, %v8328_v46  ;;  %v7912_v53 = vld [vmem:[#allocation9 + $0xa0] sm:$0xf] }
  0x3d   :  { %383 = vmatpush.bf16.msra.mxu3 %v7733_v25  ;;  %v8184_v54 = vld [vmem:[#allocation9 + $0x2c0] sm:$0xf]  ;;  %v11664_v55 = vld [vmem:[#allocation9 + $0x2cc] sm:$0xf0]  ;;  %v8057_v56 = vor.u32 %v11632_v49, %v8056_v48 }
  0x3e   :  { %v11596_v57 = vld [vmem:[#allocation9 + $0xac] sm:$0xf0]  ;;  %v8312_v58 = vld [vmem:[#allocation9 + $0x3c0] sm:$0xf]  ;;  %v8185_v62 = vor.u32 %v11664_v55, %v8184_v54 }
  0x3f   :  { %345 = vmatpush.bf16.msra.mxu0 %v7705_v32  ;;  %v11696_v59 = vld [vmem:[#allocation9 + $0x3cc] sm:$0xf0]  ;;  %v8040_v60 = vld [vmem:[#allocation9 + $0x1a0] sm:$0xf]  ;;  %v7913_v63 = vor.u32 %v11596_v57, %v7912_v53 }
  0x40   :  { %358 = vmatpush.bf16.msra.mxu1 %v7709_v35  ;;  %371 = vmatpush.bf16.msra.mxu2 %v7713_v36  ;;  %v11628_v61 = vld [vmem:[#allocation9 + $0x1ac] sm:$0xf0]  ;;  %v8313_v0 = vor.u32 %v11696_v59, %v8312_v58  ;;  %v7896_v1 = vld [vmem:[#allocation9 + $0x80] sm:$0xf]  ;;  %v11602_v58 = vld [vmem:[#allocation9 + $0xe4] sm:$0xf] }
  0x41   :  { %384 = vmatpush.bf16.msra.mxu3 %v7717_v38  ;;  %v8168_v2 = vld [vmem:[#allocation9 + $0x2a0] sm:$0xf]  ;;  %v11660_v3 = vld [vmem:[#allocation9 + $0x2ac] sm:$0xf0]  ;;  %v8041_v4 = vor.u32 %v11628_v61, %v8040_v60  ;;  %v7946_v59 = vld [vmem:[#allocation9 + $0xf0] sm:$0xf0] }
  0x42   :  { %346 = vmatmul.bf16.vlgmr.msra.gmra.mxu0 %v135_v43  ;;  %v11592_v5 = vld [vmem:[#allocation9 + $0x8c] sm:$0xf0]  ;;  %v8296_v6 = vld [vmem:[#allocation9 + $0x3a0] sm:$0xf]  ;;  %v8169_v10 = vor.u32 %v11660_v3, %v8168_v2  ;;  %v11634_v60 = vld [vmem:[#allocation9 + $0x1e4] sm:$0xf] }
  0x43   :  { %1176 = vmatpush.bf16.msrb.mxu0 %v7945_v40  ;;  %359 = vmatmul.bf16.vlgmr.msra.gmra.mxu1 %v135_v43  ;;  %v11692_v7 = vld [vmem:[#allocation9 + $0x3ac] sm:$0xf0]  ;;  %v8024_v8 = vld [vmem:[#allocation9 + $0x180] sm:$0xf]  ;;  %v7897_v11 = vor.u32 %v11592_v5, %v7896_v1  ;;  %v8074_v61 = vld [vmem:[#allocation9 + $0x1f0] sm:$0xf0] }
  0x44   :  { %1189 = vmatpush.bf16.msrb.mxu1 %v8073_v44  ;;  %372 = vmatmul.bf16.vlgmr.msra.gmra.mxu2 %v135_v43  ;;  %v11624_v9 = vld [vmem:[#allocation9 + $0x18c] sm:$0xf0]  ;;  %v8297_v12 = vor.u32 %v11692_v7, %v8296_v6  ;;  %v7880_v13 = vld [vmem:[#allocation9 + $0x60] sm:$0xf]  ;;  %v11598_v2 = vld [vmem:[#allocation9 + $0xc4] sm:$0xf]  ;;  %v7949_v6 = vor.u32 %v11602_v58, %v7946_v59 }
  0x45   :  { %385 = vmatmul.bf16.vlgmr.msra.gmra.mxu3 %v135_v43  ;;  %1202 = vmatpush.bf16.msrb.mxu2 %v8201_v50  ;;  %v8152_v14 = vld [vmem:[#allocation9 + $0x280] sm:$0xf]  ;;  %v11656_v15 = vld [vmem:[#allocation9 + $0x28c] sm:$0xf0]  ;;  %v8025_v16 = vor.u32 %v11624_v9, %v8024_v8  ;;  %v11666_v8 = vld [vmem:[#allocation9 + $0x2e4] sm:$0xf] }
  0x46   :  { %1215 = vmatpush.bf16.msrb.mxu3 %v8329_v52  ;;  %v11588_v17 = vld [vmem:[#allocation9 + $0x6c] sm:$0xf0]  ;;  %v8280_v18 = vld [vmem:[#allocation9 + $0x380] sm:$0xf]  ;;  %v8153_v22 = vor.u32 %v11656_v15, %v8152_v14  ;;  %v8202_v9 = vld [vmem:[#allocation9 + $0x2f0] sm:$0xf0] }
  0x47   :  { %1177 = vmatpush.bf16.msrb.mxu0 %v7929_v51  ;;  %v11688_v19 = vld [vmem:[#allocation9 + $0x38c] sm:$0xf0]  ;;  %v8008_v20 = vld [vmem:[#allocation9 + $0x160] sm:$0xf]  ;;  %v7881_v23 = vor.u32 %v11588_v17, %v7880_v13  ;;  %v8330_v13 = vld [vmem:[#allocation9 + $0x3f0] sm:$0xf0] }
  0x48   :  { %1190 = vmatpush.bf16.msrb.mxu1 %v8057_v56  ;;  %v11620_v21 = vld [vmem:[#allocation9 + $0x16c] sm:$0xf0]  ;;  %v8281_v24 = vor.u32 %v11688_v19, %v8280_v18  ;;  %v7864_v25 = vld [vmem:[#allocation9 + $0x40] sm:$0xf]  ;;  %v11630_v14 = vld [vmem:[#allocation9 + $0x1c4] sm:$0xf]  ;;  %v8205_v18 = vor.u32 %v11666_v8, %v8202_v9 }
  0x49   :  { %1203 = vmatpush.bf16.msrb.mxu2 %v8185_v62  ;;  %v8136_v26 = vld [vmem:[#allocation9 + $0x260] sm:$0xf]  ;;  %v11652_v27 = vld [vmem:[#allocation9 + $0x26c] sm:$0xf0]  ;;  %v8009_v28 = vor.u32 %v11620_v21, %v8008_v20  ;;  %v8058_v15 = vld [vmem:[#allocation9 + $0x1d0] sm:$0xf0] }
  0x4a   :  { %1216 = vmatpush.bf16.msrb.mxu3 %v8313_v0  ;;  %v11584_v29 = vld [vmem:[#allocation9 + $0x4c] sm:$0xf0]  ;;  %v8264_v30 = vld [vmem:[#allocation9 + $0x360] sm:$0xf]  ;;  %v8137_v34 = vor.u32 %v11652_v27, %v8136_v26  ;;  %v11594_v21 = vld [vmem:[#allocation9 + $0xa4] sm:$0xf] }
  0x4b   :  { %1178 = vmatpush.bf16.msrb.mxu0 %v7913_v63  ;;  %v11684_v31 = vld [vmem:[#allocation9 + $0x36c] sm:$0xf0]  ;;  %v7992_v32 = vld [vmem:[#allocation9 + $0x140] sm:$0xf]  ;;  %v7865_v35 = vor.u32 %v11584_v29, %v7864_v25  ;;  %v7914_v25 = vld [vmem:[#allocation9 + $0xb0] sm:$0xf0] }
  0x4c   :  { %1191 = vmatpush.bf16.msrb.mxu1 %v8041_v4  ;;  %v11616_v33 = vld [vmem:[#allocation9 + $0x14c] sm:$0xf0]  ;;  %v8265_v36 = vor.u32 %v11684_v31, %v8264_v30  ;;  %v7848_v37 = vld [vmem:[#allocation9 + $0x20] sm:$0xf]  ;;  %v11694_v26 = vld [vmem:[#allocation9 + $0x3c4] sm:$0xf]  ;;  %v7917_v31 = vor.u32 %v11594_v21, %v7914_v25 }
  0x4d   :  { %1204 = vmatpush.bf16.msrb.mxu2 %v8169_v10  ;;  %v8120_v38 = vld [vmem:[#allocation9 + $0x240] sm:$0xf]  ;;  %v11648_v39 = vld [vmem:[#allocation9 + $0x24c] sm:$0xf0]  ;;  %v7993_v40 = vor.u32 %v11616_v33, %v7992_v32  ;;  %v8077_v10 = vor.u32 %v11634_v60, %v8074_v61  ;;  %v8314_v27 = vld [vmem:[#allocation9 + $0x3d0] sm:$0xf0] }
  0x4e   :  { %1217 = vmatpush.bf16.msrb.mxu3 %v8297_v12  ;;  %v11580_v41 = vld [vmem:[#allocation9 + $0x2c] sm:$0xf0]  ;;  %v8248_v42 = vld [vmem:[#allocation9 + $0x340] sm:$0xf]  ;;  %v8121_v46 = vor.u32 %v11648_v39, %v8120_v38  ;;  %v11698_v12 = vld [vmem:[#allocation9 + $0x3e4] sm:$0xf]  ;;  %v8317_v32 = vor.u32 %v11694_v26, %v8314_v27 }
  0x4f   :  { %1179 = vmatpush.bf16.msrb.mxu0 %v7897_v11  ;;  %v11680_v43 = vld [vmem:[#allocation9 + $0x34c] sm:$0xf0]  ;;  %v7976_v44 = vld [vmem:[#allocation9 + $0x120] sm:$0xf]  ;;  %v7849_v48 = vor.u32 %v11580_v41, %v7848_v37  ;;  %v7930_v11 = vld [vmem:[#allocation9 + $0xd0] sm:$0xf0]  ;;  %v8333_v20 = vor.u32 %v11698_v12, %v8330_v13 }
  0x50   :  { %1192 = vmatpush.bf16.msrb.mxu1 %v8025_v16  ;;  %v11612_v45 = vld [vmem:[#allocation9 + $0x12c] sm:$0xf0]  ;;  %v7832_v47 = vld [vmem:[#allocation9] sm:$0xf]  ;;  %v8249_v49 = vor.u32 %v11680_v43, %v8248_v42  ;;  %v7933_v19 = vor.u32 %v11598_v2, %v7930_v11  ;;  %v8042_v29 = vld [vmem:[#allocation9 + $0x1b0] sm:$0xf0] }
  0x51   :  { %1205 = vmatpush.bf16.msrb.mxu2 %v8153_v22  ;;  %v11576_v50 = vld [vmem:[#allocation9 + $0xc] sm:$0xf0]  ;;  %v8104_v51 = vld [vmem:[#allocation9 + $0x220] sm:$0xf]  ;;  %v7977_v53 = vor.u32 %v11612_v45, %v7976_v44  ;;  %v11662_v22 = vld [vmem:[#allocation9 + $0x2c4] sm:$0xf] }
  0x52   :  { %1218 = vmatpush.bf16.msrb.mxu3 %v8281_v24  ;;  %v11644_v52 = vld [vmem:[#allocation9 + $0x22c] sm:$0xf0]  ;;  %v7960_v54 = vld [vmem:[#allocation9 + $0x100] sm:$0xf]  ;;  %v7833_v0 = vor.u32 %v11576_v50, %v7832_v47  ;;  %v8061_v24 = vor.u32 %v11630_v14, %v8058_v15  ;;  %v11590_v33 = vld [vmem:[#allocation9 + $0x84] sm:$0xf] }
  0x53   :  { %1180 = vmatpush.bf16.msrb.mxu0 %v7881_v23  ;;  %v8232_v55 = vld [vmem:[#allocation9 + $0x320] sm:$0xf]  ;;  %v11676_v56 = vld [vmem:[#allocation9 + $0x32c] sm:$0xf0]  ;;  %v8105_v62 = vor.u32 %v11644_v52, %v8104_v51  ;;  %v8186_v23 = vld [vmem:[#allocation9 + $0x2d0] sm:$0xf0] }
  0x54   :  { %1193 = vmatpush.bf16.msrb.mxu1 %v8009_v28  ;;  %v11608_v57 = vld [vmem:[#allocation9 + $0x10c] sm:$0xf0]  ;;  %v8088_v63 = vld [vmem:[#allocation9 + $0x200] sm:$0xf]  ;;  %v8233_v1 = vor.u32 %v11676_v56, %v8232_v55  ;;  %v11626_v28 = vld [vmem:[#allocation9 + $0x1a4] sm:$0xf]  ;;  %v8189_v30 = vor.u32 %v11662_v22, %v8186_v23 }
  0x55   :  { %1206 = vmatpush.bf16.msrb.mxu2 %v8137_v34  ;;  %v11640_v3 = vld [vmem:[#allocation9 + $0x20c] sm:$0xf0]  ;;  %v8216_v4 = vld [vmem:[#allocation9 + $0x300] sm:$0xf]  ;;  %v7961_v5 = vor.u32 %v11608_v57, %v7960_v54  ;;  %v11658_v34 = vld [vmem:[#allocation9 + $0x2a4] sm:$0xf] }
  0x56   :  { %1219 = vmatpush.bf16.msrb.mxu3 %v8265_v36  ;;  %v11672_v7 = vld [vmem:[#allocation9 + $0x30c] sm:$0xf0]  ;;  %v8089_v16 = vor.u32 %v11640_v3, %v8088_v63  ;;  %v8045_v36 = vor.u32 %v11626_v28, %v8042_v29  ;;  %v7898_v37 = vld [vmem:[#allocation9 + $0x90] sm:$0xf0]  ;;  %v11690_v38 = vld [vmem:[#allocation9 + $0x3a4] sm:$0xf] }
  0x57   :  { %1181 = vmatpush.bf16.msrb.mxu0 %v7865_v35  ;;  %v8217_v17 = vor.u32 %v11672_v7, %v8216_v4  ;;  %v8170_v35 = vld [vmem:[#allocation9 + $0x2b0] sm:$0xf0]  ;;  %v7901_v43 = vor.u32 %v11590_v33, %v7898_v37  ;;  %v11586_v45 = vld [vmem:[#allocation9 + $0x64] sm:$0xf] }
  0x58   :  { %1194 = vmatpush.bf16.msrb.mxu1 %v7993_v40  ;;  %v8298_v39 = vld [vmem:[#allocation9 + $0x3b0] sm:$0xf0]  ;;  %v11622_v40 = vld [vmem:[#allocation9 + $0x184] sm:$0xf]  ;;  %v8173_v42 = vor.u32 %v11658_v34, %v8170_v35 }
  0x59   :  { %1207 = vmatpush.bf16.msrb.mxu2 %v8121_v46  ;;  %v8026_v41 = vld [vmem:[#allocation9 + $0x190] sm:$0xf0]  ;;  %v8301_v44 = vor.u32 %v11690_v38, %v8298_v39  ;;  %v11654_v46 = vld [vmem:[#allocation9 + $0x284] sm:$0xf] }
  0x5a   :  { %1220 = vmatpush.bf16.msrb.mxu3 %v8249_v49  ;;  %v8154_v47 = vld [vmem:[#allocation9 + $0x290] sm:$0xf0]  ;;  %v11686_v50 = vld [vmem:[#allocation9 + $0x384] sm:$0xf] }
  0x5b   :  { %1182 = vmatpush.bf16.msrb.mxu0 %v7849_v48  ;;  %v8029_v48 = vor.u32 %v11622_v40, %v8026_v41  ;;  %v7882_v49 = vld [vmem:[#allocation9 + $0x70] sm:$0xf0]  ;;  %v11618_v52 = vld [vmem:[#allocation9 + $0x164] sm:$0xf]  ;;  %v8157_v54 = vor.u32 %v11654_v46, %v8154_v47  ;;  %v11637_v46 = vld [vmem:[#allocation9 + $0x1f4] sm:$0xf0] }
  0x5c   :  { %1195 = vmatpush.bf16.msrb.mxu1 %v7977_v53  ;;  %v8282_v51 = vld [vmem:[#allocation9 + $0x390] sm:$0xf0]  ;;  %v7885_v55 = vor.u32 %v11586_v45, %v7882_v49  ;;  %v11582_v58 = vld [vmem:[#allocation9 + $0x44] sm:$0xf]  ;;  %v8080_v45 = vld [vmem:[#allocation9 + $0x1e8] sm:$0xf] }
  0x5d   :  { %1208 = vmatpush.bf16.msrb.mxu2 %v8105_v62  ;;  %v8010_v53 = vld [vmem:[#allocation9 + $0x170] sm:$0xf0]  ;;  %v8285_v56 = vor.u32 %v11686_v50, %v8282_v51  ;;  %v11614_v60 = vld [vmem:[#allocation9 + $0x144] sm:$0xf] }
  0x5e   :  { %1221 = vmatpush.bf16.msrb.mxu3 %v8233_v1  ;;  %v8013_v57 = vor.u32 %v11618_v52, %v8010_v53  ;;  %v7866_v59 = vld [vmem:[#allocation9 + $0x50] sm:$0xf0]  ;;  %v11682_v2 = vld [vmem:[#allocation9 + $0x364] sm:$0xf]  ;;  %v8081_v53 = vor.u32 %v11637_v46, %v8080_v45 }
  0x5f   :  { %1183 = vmatpush.bf16.msrb.mxu0 %v7833_v0  ;;  %v7994_v61 = vld [vmem:[#allocation9 + $0x150] sm:$0xf0]  ;;  %v7869_v62 = vor.u32 %v11582_v58, %v7866_v59  ;;  %v11650_v0 = vld [vmem:[#allocation9 + $0x264] sm:$0xf]  ;;  %v11633_v58 = vld [vmem:[#allocation9 + $0x1d4] sm:$0xf0] }
  0x60   :  { %1196 = vmatpush.bf16.msrb.mxu1 %v7961_v5  ;;  %v7997_v63 = vor.u32 %v11614_v60, %v7994_v61  ;;  %v8138_v1 = vld [vmem:[#allocation9 + $0x270] sm:$0xf0]  ;;  %v11610_v9 = vld [vmem:[#allocation9 + $0x124] sm:$0xf] }
  0x61   :  { %1209 = vmatpush.bf16.msrb.mxu2 %v8089_v16  ;;  %v8141_v3 = vor.u32 %v11650_v0, %v8138_v1  ;;  %v8266_v4 = vld [vmem:[#allocation9 + $0x370] sm:$0xf0]  ;;  %v11646_v12 = vld [vmem:[#allocation9 + $0x244] sm:$0xf]  ;;  %v8208_v0 = vld [vmem:[#allocation9 + $0x2e8] sm:$0xf] }
  0x62   :  { %1222 = vmatpush.bf16.msrb.mxu3 %v8217_v17  ;;  %v8269_v5 = vor.u32 %v11682_v2, %v8266_v4  ;;  %v7850_v7 = vld [vmem:[#allocation9 + $0x30] sm:$0xf0]  ;;  %v11678_v14 = vld [vmem:[#allocation9 + $0x344] sm:$0xf]  ;;  %v11669_v1 = vld [vmem:[#allocation9 + $0x2f4] sm:$0xf0] }
  0x63   :  { %1228 = vmatpush.bf16.msra.mxu0 %v7949_v6  ;;  %v11578_v6 = vld [vmem:[#allocation9 + $0x24] sm:$0xf]  ;;  %v8122_v13 = vld [vmem:[#allocation9 + $0x250] sm:$0xf0]  ;;  %v8336_v2 = vld [vmem:[#allocation9 + $0x3e8] sm:$0xf] }
  0x64   :  { %1241 = vmatpush.bf16.msra.mxu1 %v8077_v10  ;;  %v7853_v8 = vor.u32 %v11578_v6, %v7850_v7  ;;  %v7978_v10 = vld [vmem:[#allocation9 + $0x130] sm:$0xf0]  ;;  %v8125_v15 = vor.u32 %v11646_v12, %v8122_v13  ;;  %v11674_v27 = vld [vmem:[#allocation9 + $0x324] sm:$0xf]  ;;  %v11701_v6 = vld [vmem:[#allocation9 + $0x3f4] sm:$0xf0]  ;;  %v8209_v13 = vor.u32 %v11669_v1, %v8208_v0 }
  0x65   :  { %1254 = vmatpush.bf16.msra.mxu2 %v8205_v18  ;;  %v7981_v11 = vor.u32 %v11610_v9, %v7978_v10  ;;  %v8250_v16 = vld [vmem:[#allocation9 + $0x350] sm:$0xf0]  ;;  %v11574_v18 = vld [vmem:[#allocation9 + $0x4] sm:$0xf]  ;;  %v7920_v7 = vld [vmem:[#allocation9 + $0xa8] sm:$0xf] }
  0x66   :  { %1267 = vmatpush.bf16.msra.mxu3 %v8333_v20  ;;  %v8253_v17 = vor.u32 %v11678_v14, %v8250_v16  ;;  %v11606_v20 = vld [vmem:[#allocation9 + $0x104] sm:$0xf]  ;;  %v7962_v22 = vld [vmem:[#allocation9 + $0x110] sm:$0xf0]  ;;  %v8048_v10 = vld [vmem:[#allocation9 + $0x1a8] sm:$0xf] }
  0x67   :  { %1229 = vmatpush.bf16.msra.mxu0 %v7933_v19  ;;  %v7834_v19 = vld [vmem:[#allocation9 + $0x10] sm:$0xf0]  ;;  %v7965_v23 = vor.u32 %v11606_v20, %v7962_v22  ;;  %v11670_v33 = vld [vmem:[#allocation9 + $0x304] sm:$0xf]  ;;  %v11697_v22 = vld [vmem:[#allocation9 + $0x3d4] sm:$0xf0] }
  0x68   :  { %1242 = vmatpush.bf16.msra.mxu1 %v8061_v24  ;;  %v7837_v21 = vor.u32 %v11574_v18, %v7834_v19  ;;  %v11642_v24 = vld [vmem:[#allocation9 + $0x224] sm:$0xf]  ;;  %v8106_v25 = vld [vmem:[#allocation9 + $0x230] sm:$0xf0]  ;;  %v11665_v18 = vld [vmem:[#allocation9 + $0x2d4] sm:$0xf0] }
  0x69   :  { %1255 = vmatpush.bf16.msra.mxu2 %v8189_v30  ;;  %v8109_v26 = vor.u32 %v11642_v24, %v8106_v25  ;;  %v8234_v28 = vld [vmem:[#allocation9 + $0x330] sm:$0xf0]  ;;  %v11638_v30 = vld [vmem:[#allocation9 + $0x204] sm:$0xf]  ;;  %v8320_v19 = vld [vmem:[#allocation9 + $0x3c8] sm:$0xf] }
  0x6a   :  { %1268 = vmatpush.bf16.msra.mxu3 %v8317_v32  ;;  %v8237_v29 = vor.u32 %v11674_v27, %v8234_v28  ;;  %v8218_v34 = vld [vmem:[#allocation9 + $0x310] sm:$0xf0]  ;;  %v11593_v24 = vld [vmem:[#allocation9 + $0x94] sm:$0xf0]  ;;  %v8032_v25 = vld [vmem:[#allocation9 + $0x188] sm:$0xf] }
  0x6b   :  { %1230 = vmatpush.bf16.msra.mxu0 %v7917_v31  ;;  %v8090_v31 = vld [vmem:[#allocation9 + $0x210] sm:$0xf0]  ;;  %v8221_v35 = vor.u32 %v11670_v33, %v8218_v34  ;;  %v11661_v33 = vld [vmem:[#allocation9 + $0x2b4] sm:$0xf0]  ;;  %v7984_v1 = vld [vmem:[#allocation9 + $0x128] sm:$0xf] }
  0x6c   :  { %1243 = vmatpush.bf16.msra.mxu1 %v8045_v36  ;;  %v8093_v32 = vor.u32 %v11638_v30, %v8090_v31  ;;  %v168_v36 = vld [vmem:[#allocation8] sm:$0xf]  ;;  %v8321_v30 = vor.u32 %v11697_v22, %v8320_v19  ;;  %v11581_v0 = vld [vmem:[#allocation9 + $0x34] sm:$0xf0]  ;;  %v11635_v19 = vld [vmem:[#allocation9 + $0x1ec] sm:$0xf] }
  0x6d   :  { %1256 = vmatpush.bf16.msra.mxu2 %v8173_v42  ;;  %v170_v37 = vperm.slane %v168_v36, 0  ;;  %v171_v38 = vperm.slane %v168_v36, 1  ;;  %v7952_v42 = vld [vmem:[#allocation9 + $0xe8] sm:$0xf]  ;;  %v172_v49 = vperm.slane %v168_v36, 2  ;;  %v173_v52 = vperm.slane %v168_v36, 3 }
  0x6e   :  { %1269 = vmatpush.bf16.msra.mxu3 %v8301_v44  ;;  %v11693_v36 = vld [vmem:[#allocation9 + $0x3b4] sm:$0xf0] }
  0x6f   :  { %1231 = vmatpush.bf16.msra.mxu0 %v7901_v43  ;;  %v11605_v43 = vld [vmem:[#allocation9 + $0xf4] sm:$0xf0] }
  0x70   :  { %1244 = vmatpush.bf16.msra.mxu1 %v8029_v48  ;;  %v7953_v50 = vor.u32 %v11605_v43, %v7952_v42  ;;  %v8160_v43 = vld [vmem:[#allocation9 + $0x288] sm:$0xf] }
  0x71   :  { %1257 = vmatpush.bf16.msra.mxu2 %v8157_v54  ;;  %v7936_v54 = vld [vmem:[#allocation9 + $0xc8] sm:$0xf] }
  0x72   :  { %1270 = vmatpush.bf16.msra.mxu3 %v8285_v56 }
  0x73   :  { %1232 = vmatpush.bf16.msra.mxu0 %v7885_v55  ;;  %v11601_v55 = vld [vmem:[#allocation9 + $0xd4] sm:$0xf0] }
  0x74   :  { %1245 = vmatpush.bf16.msra.mxu1 %v8013_v57  ;;  %v8064_v57 = vld [vmem:[#allocation9 + $0x1c8] sm:$0xf] }
  0x75   :  { %1258 = vmatpush.bf16.msra.mxu2 %v8141_v3 }
  0x76   :  { %1271 = vmatpush.bf16.msra.mxu3 %v8269_v5  ;;  %v8065_v5 = vor.u32 %v11633_v58, %v8064_v57  ;;  %v8144_v57 = vld [vmem:[#allocation9 + $0x268] sm:$0xf]  ;;  %v11653_v58 = vld [vmem:[#allocation9 + $0x274] sm:$0xf0] }
  0x77   :  { %1233 = vmatpush.bf16.msra.mxu0 %v7869_v62 }
  0x78   :  { %1246 = vmatpush.bf16.msra.mxu1 %v7997_v63  ;;  %v7937_v63 = vor.u32 %v11601_v55, %v7936_v54 }
  0x79   :  { %1259 = vmatpush.bf16.msra.mxu2 %v8125_v15  ;;  %v8337_v15 = vor.u32 %v11701_v6, %v8336_v2  ;;  %v11613_v2 = vld [vmem:[#allocation9 + $0x134] sm:$0xf0] }
  0x7a   :  { %1272 = vmatpush.bf16.msra.mxu3 %v8253_v17  ;;  %v8192_v17 = vld [vmem:[#allocation9 + $0x2c8] sm:$0xf]  ;;  %v11649_v6 = vld [vmem:[#allocation9 + $0x254] sm:$0xf0] }
  0x7b   :  { %1234 = vmatpush.bf16.msra.mxu0 %v7853_v8  ;;  %v11597_v8 = vld [vmem:[#allocation9 + $0xb4] sm:$0xf0]  ;;  %v8193_v28 = vor.u32 %v11665_v18, %v8192_v17  ;;  %v7954_v18 = vld [vmem:[#allocation9 + $0xf8] sm:$0xf0] }
  0x7c   :  { %1247 = vmatpush.bf16.msra.mxu1 %v7981_v11  ;;  %v11629_v11 = vld [vmem:[#allocation9 + $0x1b4] sm:$0xf0]  ;;  %v7921_v16 = vor.u32 %v11597_v8, %v7920_v7  ;;  %v8256_v7 = vld [vmem:[#allocation9 + $0x348] sm:$0xf] }
  0x7d   :  { %1260 = vmatpush.bf16.msra.mxu2 %v8109_v26  ;;  %v11625_v26 = vld [vmem:[#allocation9 + $0x194] sm:$0xf0] }
  0x7e   :  { %1273 = vmatpush.bf16.msra.mxu3 %v8237_v29  ;;  %v8033_v34 = vor.u32 %v11625_v26, %v8032_v25 }
  0x7f   :  { %1235 = vmatpush.bf16.msra.mxu0 %v7837_v21  ;;  %v8049_v21 = vor.u32 %v11629_v11, %v8048_v10  ;;  %v11681_v10 = vld [vmem:[#allocation9 + $0x354] sm:$0xf0]  ;;  %v7840_v11 = vld [vmem:[#allocation9 + $0x8] sm:$0xf] }
  0x80   :  { %1248 = vmatpush.bf16.msra.mxu1 %v7965_v23  ;;  %v7904_v23 = vld [vmem:[#allocation9 + $0x88] sm:$0xf]  ;;  %v8257_v22 = vor.u32 %v11681_v10, %v8256_v7  ;;  %v8306_v10 = vld [vmem:[#allocation9 + $0x3b8] sm:$0xf0] }
  0x81   :  { %1261 = vmatpush.bf16.msra.mxu2 %v8093_v32  ;;  %v7905_v31 = vor.u32 %v11593_v24, %v7904_v23  ;;  %v8176_v32 = vld [vmem:[#allocation9 + $0x2a8] sm:$0xf]  ;;  %v11645_v24 = vld [vmem:[#allocation9 + $0x234] sm:$0xf0] }
  0x82   :  { %1274 = vmatpush.bf16.msra.mxu3 %v8221_v35  ;;  %v8304_v35 = vld [vmem:[#allocation9 + $0x3a8] sm:$0xf] }
  0x83   :  { %v8305_v42 = vor.u32 %v11693_v36, %v8304_v35  ;;  %v8112_v23 = vld [vmem:[#allocation9 + $0x228] sm:$0xf]  ;;  %v8066_v35 = vld [vmem:[#allocation9 + $0x1d8] sm:$0xf0] }
  0xbf   :  { %v347_v39 = vpop.f32.mrf.mxu0 }
  0xc0   :  { %v348_v40 = vadd.f32 %v347_v39, %v170_v37  ;;  %v360_v41 = vpop.f32.mrf.mxu1  ;;  %v7888_v37 = vld [vmem:[#allocation9 + $0x68] sm:$0xf] }
  0xc1   :  { %v361_v44 = vadd.f32 %v360_v41, %v171_v38  ;;  %v11589_v38 = vld [vmem:[#allocation9 + $0x74] sm:$0xf0]  ;;  %v8016_v39 = vld [vmem:[#allocation9 + $0x168] sm:$0xf]  ;;  %v8177_v41 = vor.u32 %v11661_v33, %v8176_v32  ;;  %v8113_v32 = vor.u32 %v11645_v24, %v8112_v23  ;;  %v7938_v33 = vld [vmem:[#allocation9 + $0xd8] sm:$0xf0] }
  0xc2   :  { %v390_v47 = vmax.f32 %v348_v40, 0.0  ;;  %v11621_v40 = vld [vmem:[#allocation9 + $0x174] sm:$0xf0]  ;;  %v7889_v45 = vor.u32 %v11589_v38, %v7888_v37  ;;  %v8096_v37 = vld [vmem:[#allocation9 + $0x208] sm:$0xf] }
  0xc3   :  { %v391_v48 = vmax.f32 %v361_v44, 0.0  ;;  %v11657_v44 = vld [vmem:[#allocation9 + $0x294] sm:$0xf0]  ;;  %v8017_v46 = vor.u32 %v11621_v40, %v8016_v39  ;;  %v8224_v39 = vld [vmem:[#allocation9 + $0x308] sm:$0xf] }
  0xc4   :  { %v12792_v51 = vpack.c.bf16 %v390_v47, %v390_v47  ;;  %v8288_v47 = vld [vmem:[#allocation9 + $0x388] sm:$0xf]  ;;  %v8161_v54 = vor.u32 %v11657_v44, %v8160_v43  ;;  %v11641_v38 = vld [vmem:[#allocation9 + $0x214] sm:$0xf0]  ;;  %v11687_v23 = vld [vmem:[#allocation9 + $0x38c] sm:$0xf] }
  0xc5   :  { %v12794_v56 = vpack.c.bf16 %v391_v48, %v391_v48  ;;  %v11689_v48 = vld [vmem:[#allocation9 + $0x394] sm:$0xf0]  ;;  %v8290_v24 = vld [vmem:[#allocation9 + $0x398] sm:$0xf0] }
  0xc6   :  { %1184 = vmatmul.bf16.vlgmr.msrb.gmra.mxu0 %v12792_v51  ;;  %v8289_v55 = vor.u32 %v11689_v48, %v8288_v47  ;;  %v11673_v40 = vld [vmem:[#allocation9 + $0x314] sm:$0xf0]  ;;  %v11595_v47 = vld [vmem:[#allocation9 + $0xac] sm:$0xf]  ;;  %v8097_v48 = vor.u32 %v11641_v38, %v8096_v37  ;;  %v7858_v38 = vld [vmem:[#allocation9 + $0x38] sm:$0xf0] }
  0xc7   :  { %v373_v59 = vpop.f32.mrf.mxu2  ;;  %1197 = vmatmul.bf16.vlgmr.msrb.gmra.mxu1 %v12794_v56  ;;  %1280 = vmatpush.bf16.msrb.mxu0 %v7953_v50  ;;  %v349_v62 = vpop.f32.mrf.mxu0  ;;  %v11585_v50 = vld [vmem:[#allocation9 + $0x54] sm:$0xf0]  ;;  %v11579_v37 = vld [vmem:[#allocation9 + $0x2c] sm:$0xf] }
  0xc8   :  { %v374_v60 = vadd.f32 %v373_v59, %v172_v49  ;;  %v386_v61 = vpop.f32.mrf.mxu3  ;;  %1293 = vmatpush.bf16.msrb.mxu1 %v8081_v53  ;;  %v362_v4 = vpop.f32.mrf.mxu1  ;;  %v7872_v49 = vld [vmem:[#allocation9 + $0x48] sm:$0xf]  ;;  %v11617_v53 = vld [vmem:[#allocation9 + $0x154] sm:$0xf0] }
  0xc9   :  { %v387_v3 = vadd.f32 %v386_v61, %v173_v52  ;;  %v8000_v52 = vld [vmem:[#allocation9 + $0x148] sm:$0xf]  ;;  %v7873_v59 = vor.u32 %v11585_v50, %v7872_v49  ;;  %v11685_v62 = vld [vmem:[#allocation9 + $0x374] sm:$0xf0]  ;;  %v7922_v49 = vld [vmem:[#allocation9 + $0xb8] sm:$0xf0] }
  0xca   :  { %v392_v9 = vmax.f32 %v374_v60, 0.0  ;;  %v8001_v60 = vor.u32 %v11617_v53, %v8000_v52  ;;  %v8272_v61 = vld [vmem:[#allocation9 + $0x368] sm:$0xf]  ;;  %v11627_v50 = vld [vmem:[#allocation9 + $0x1ac] sm:$0xf]  ;;  %v8225_v53 = vor.u32 %v11673_v40, %v8224_v39 }
  0xcb   :  { %v393_v12 = vmax.f32 %v387_v3, 0.0  ;;  %1281 = vmatpush.bf16.msrb.mxu0 %v7937_v63  ;;  %v7856_v63 = vld [vmem:[#allocation9 + $0x28] sm:$0xf]  ;;  %v8145_v3 = vor.u32 %v11653_v58, %v8144_v57  ;;  %v8273_v4 = vor.u32 %v11685_v62, %v8272_v61  ;;  %v8050_v52 = vld [vmem:[#allocation9 + $0x1b8] sm:$0xf0] }
  0xcc   :  { %v12798_v14 = vpack.c.bf16 %v392_v9, %v392_v9  ;;  %1294 = vmatpush.bf16.msrb.mxu1 %v8065_v5  ;;  %v8128_v5 = vld [vmem:[#allocation9 + $0x248] sm:$0xf]  ;;  %v7857_v8 = vor.u32 %v11581_v0, %v7856_v63  ;;  %v7985_v9 = vor.u32 %v11613_v2, %v7984_v1  ;;  %v11663_v57 = vld [vmem:[#allocation9 + $0x2cc] sm:$0xf]  ;;  %v8194_v58 = vld [vmem:[#allocation9 + $0x2d8] sm:$0xf0] }
  0xcd   :  { %v12800_v20 = vpack.c.bf16 %v393_v12, %v393_v12  ;;  %v11577_v12 = vld [vmem:[#allocation9 + $0x14] sm:$0xf0]  ;;  %v8129_v17 = vor.u32 %v11649_v6, %v8128_v5  ;;  %v11695_v61 = vld [vmem:[#allocation9 + $0x3cc] sm:$0xf]  ;;  %v8322_v62 = vld [vmem:[#allocation9 + $0x3d8] sm:$0xf0] }
  0xce   :  { %1210 = vmatmul.bf16.vlgmr.msrb.gmra.mxu2 %v12798_v14  ;;  %v7841_v25 = vor.u32 %v11577_v12, %v7840_v11  ;;  %v11591_v63 = vld [vmem:[#allocation9 + $0x8c] sm:$0xf]  ;;  %v7906_v0 = vld [vmem:[#allocation9 + $0x98] sm:$0xf0] }
  0xcf   :  { %1223 = vmatmul.bf16.vlgmr.msrb.gmra.mxu3 %v12800_v20  ;;  %1306 = vmatpush.bf16.msrb.mxu2 %v8209_v13  ;;  %v375_v27 = vpop.f32.mrf.mxu2  ;;  %v7968_v13 = vld [vmem:[#allocation9 + $0x108] sm:$0xf]  ;;  %v11623_v1 = vld [vmem:[#allocation9 + $0x18c] sm:$0xf]  ;;  %v8034_v2 = vld [vmem:[#allocation9 + $0x198] sm:$0xf0]  ;;  %v7909_v7 = vor.u32 %v11591_v63, %v7906_v0 }
  0xd0   :  { %1319 = vmatpush.bf16.msrb.mxu3 %v8337_v15  ;;  %v388_v29 = vpop.f32.mrf.mxu3  ;;  %1282 = vmatpush.bf16.msrb.mxu0 %v7921_v16  ;;  %v11609_v15 = vld [vmem:[#allocation9 + $0x114] sm:$0xf0]  ;;  %v11603_v16 = vld [vmem:[#allocation9 + $0xec] sm:$0xf]  ;;  %v8240_v27 = vld [vmem:[#allocation9 + $0x328] sm:$0xf] }
  0xd1   :  { %1295 = vmatpush.bf16.msrb.mxu1 %v8049_v21  ;;  %v8082_v21 = vld [vmem:[#allocation9 + $0x1f8] sm:$0xf0]  ;;  %v7969_v26 = vor.u32 %v11609_v15, %v7968_v13  ;;  %v7957_v29 = vor.u32 %v11603_v16, %v7954_v18  ;;  %v11659_v5 = vld [vmem:[#allocation9 + $0x2ac] sm:$0xf] }
  0xd2   :  { %v8178_v6 = vld [vmem:[#allocation9 + $0x2b8] sm:$0xf0]  ;;  %v11587_v11 = vld [vmem:[#allocation9 + $0x6c] sm:$0xf] }
  0xd3   :  { %1307 = vmatpush.bf16.msrb.mxu2 %v8193_v28  ;;  %v11677_v28 = vld [vmem:[#allocation9 + $0x334] sm:$0xf0]  ;;  %v7890_v12 = vld [vmem:[#allocation9 + $0x78] sm:$0xf0]  ;;  %v11619_v13 = vld [vmem:[#allocation9 + $0x16c] sm:$0xf]  ;;  %v8181_v16 = vor.u32 %v11659_v5, %v8178_v6 }
  0xd4   :  { %1320 = vmatpush.bf16.msrb.mxu3 %v8321_v30  ;;  %1283 = vmatpush.bf16.msrb.mxu0 %v7905_v31  ;;  %v8085_v30 = vor.u32 %v11635_v19, %v8082_v21  ;;  %v11599_v31 = vld [vmem:[#allocation9 + $0xcc] sm:$0xf]  ;;  %v8241_v36 = vor.u32 %v11677_v28, %v8240_v27  ;;  %v8018_v15 = vld [vmem:[#allocation9 + $0x178] sm:$0xf0]  ;;  %v7893_v21 = vor.u32 %v11587_v11, %v7890_v12 }
  0xd5   :  { %1296 = vmatpush.bf16.msrb.mxu1 %v8033_v34  ;;  %v11631_v34 = vld [vmem:[#allocation9 + $0x1cc] sm:$0xf]  ;;  %v7941_v43 = vor.u32 %v11599_v31, %v7938_v33  ;;  %v8162_v19 = vld [vmem:[#allocation9 + $0x298] sm:$0xf0] }
  0xd6   :  { %1236 = vmatmul.bf16.vlgmr.msra.gmra.mxu0 %v12792_v51  ;;  %v8069_v44 = vor.u32 %v11631_v34, %v8066_v35  ;;  %v11655_v18 = vld [vmem:[#allocation9 + $0x28c] sm:$0xf]  ;;  %v8002_v28 = vld [vmem:[#allocation9 + $0x158] sm:$0xf0] }
  0xd7   :  { %1308 = vmatpush.bf16.msrb.mxu2 %v8177_v41  ;;  %1249 = vmatmul.bf16.vlgmr.msra.gmra.mxu1 %v12794_v56  ;;  %v11667_v41 = vld [vmem:[#allocation9 + $0x2ec] sm:$0xf]  ;;  %v7986_v40 = vld [vmem:[#allocation9 + $0x138] sm:$0xf0] }
  0xd8   :  { %1321 = vmatpush.bf16.msrb.mxu3 %v8305_v42  ;;  %1284 = vmatpush.bf16.msrb.mxu0 %v7889_v45  ;;  %v8210_v42 = vld [vmem:[#allocation9 + $0x2f8] sm:$0xf0]  ;;  %v11699_v45 = vld [vmem:[#allocation9 + $0x3ec] sm:$0xf] }
  0xd9   :  { %1297 = vmatpush.bf16.msrb.mxu1 %v8017_v46  ;;  %v8338_v46 = vld [vmem:[#allocation9 + $0x3f8] sm:$0xf0]  ;;  %v11615_v27 = vld [vmem:[#allocation9 + $0x14c] sm:$0xf] }
  0xda   :  { %v11651_v31 = vld [vmem:[#allocation9 + $0x26c] sm:$0xf]  ;;  %v8005_v34 = vor.u32 %v11615_v27, %v8002_v28  ;;  %v8098_v12 = vld [vmem:[#allocation9 + $0x218] sm:$0xf0]  ;;  %v8696_v28 = vld [vmem:[#allocation9 + $0x6c0] sm:$0xf] }
  0xdb   :  { %1309 = vmatpush.bf16.msrb.mxu2 %v8161_v54  ;;  %v8213_v54 = vor.u32 %v11667_v41, %v8210_v42  ;;  %v11683_v35 = vld [vmem:[#allocation9 + $0x36c] sm:$0xf] }
  0xdc   :  { %1322 = vmatpush.bf16.msrb.mxu3 %v8289_v55  ;;  %1285 = vmatpush.bf16.msrb.mxu0 %v7873_v59  ;;  %v8341_v55 = vor.u32 %v11699_v45, %v8338_v46  ;;  %v7925_v59 = vor.u32 %v11595_v47, %v7922_v49  ;;  %v11611_v39 = vld [vmem:[#allocation9 + $0x12c] sm:$0xf]  ;;  %v7861_v46 = vor.u32 %v11579_v37, %v7858_v38  ;;  %v11716_v37 = vld [vmem:[#allocation9 + $0x46c] sm:$0xf0] }
  0xdd   :  { %1298 = vmatpush.bf16.msrb.mxu1 %v8001_v60  ;;  %v8053_v60 = vor.u32 %v11627_v50, %v8050_v52  ;;  %v11679_v45 = vld [vmem:[#allocation9 + $0x34c] sm:$0xf]  ;;  %v7989_v47 = vor.u32 %v11611_v39, %v7986_v40  ;;  %v7842_v50 = vld [vmem:[#allocation9 + $0x18] sm:$0xf0]  ;;  %v8520_v39 = vld [vmem:[#allocation9 + $0x560] sm:$0xf] }
  0xde   :  { %1262 = vmatmul.bf16.vlgmr.msra.gmra.mxu2 %v12798_v14  ;;  %v11575_v49 = vld [vmem:[#allocation9 + $0xc] sm:$0xf]  ;;  %v11748_v40 = vld [vmem:[#allocation9 + $0x56c] sm:$0xf0] }
  0xdf   :  { %1275 = vmatmul.bf16.vlgmr.msra.gmra.mxu3 %v12800_v20  ;;  %1310 = vmatpush.bf16.msrb.mxu2 %v8145_v3  ;;  %v8197_v3 = vor.u32 %v11663_v57, %v8194_v58  ;;  %v11607_v52 = vld [vmem:[#allocation9 + $0x10c] sm:$0xf]  ;;  %v11732_v57 = vld [vmem:[#allocation9 + $0x4ec] sm:$0xf0]  ;;  %v8584_v58 = vld [vmem:[#allocation9 + $0x5e0] sm:$0xf]  ;;  %v7845_v63 = vor.u32 %v11575_v49, %v7842_v50 }
  0xe0   :  { %1323 = vmatpush.bf16.msrb.mxu3 %v8273_v4  ;;  %1286 = vmatpush.bf16.msrb.mxu0 %v7857_v8  ;;  %v8325_v4 = vor.u32 %v11695_v61, %v8322_v62  ;;  %v8037_v8 = vor.u32 %v11623_v1, %v8034_v2  ;;  %v11643_v61 = vld [vmem:[#allocation9 + $0x22c] sm:$0xf]  ;;  %v8114_v62 = vld [vmem:[#allocation9 + $0x238] sm:$0xf0]  ;;  %v8344_v50 = vld [vmem:[#allocation9 + $0x400] sm:$0xf] }
  0xe1   :  { %1299 = vmatpush.bf16.msrb.mxu1 %v7985_v9  ;;  %v11691_v9 = vld [vmem:[#allocation9 + $0x3ac] sm:$0xf]  ;;  %v8242_v2 = vld [vmem:[#allocation9 + $0x338] sm:$0xf0]  ;;  %v8117_v6 = vor.u32 %v11643_v61, %v8114_v62  ;;  %v11722_v61 = vld [vmem:[#allocation9 + $0x4a4] sm:$0xf] }
  0xe2   :  { %v11675_v1 = vld [vmem:[#allocation9 + $0x32c] sm:$0xf]  ;;  %v8426_v62 = vld [vmem:[#allocation9 + $0x4b0] sm:$0xf0] }
  0xe3   :  { %1311 = vmatpush.bf16.msrb.mxu2 %v8129_v17  ;;  %v8309_v17 = vor.u32 %v11691_v9, %v8306_v10  ;;  %v11760_v9 = vld [vmem:[#allocation9 + $0x5cc] sm:$0xf0]  ;;  %v8245_v10 = vor.u32 %v11675_v1, %v8242_v2  ;;  %v11639_v11 = vld [vmem:[#allocation9 + $0x20c] sm:$0xf]  ;;  %v8680_v2 = vld [vmem:[#allocation9 + $0x6a0] sm:$0xf] }
  0xe4   :  { %1324 = vmatpush.bf16.msrb.mxu3 %v8257_v22  ;;  %1287 = vmatpush.bf16.msrb.mxu0 %v7841_v25  ;;  %v8021_v22 = vor.u32 %v11619_v13, %v8018_v15  ;;  %v11583_v25 = vld [vmem:[#allocation9 + $0x4c] sm:$0xf]  ;;  %v8226_v15 = vld [vmem:[#allocation9 + $0x318] sm:$0xf0]  ;;  %v11740_v1 = vld [vmem:[#allocation9 + $0x52c] sm:$0xf0] }
  0xe5   :  { %1300 = vmatpush.bf16.msrb.mxu1 %v7969_v26  ;;  %v7874_v26 = vld [vmem:[#allocation9 + $0x58] sm:$0xf0]  ;;  %v11671_v13 = vld [vmem:[#allocation9 + $0x30c] sm:$0xf] }
  0xe6   :  { %v7877_v33 = vor.u32 %v11583_v25, %v7874_v26  ;;  %v8552_v25 = vld [vmem:[#allocation9 + $0x5a0] sm:$0xf]  ;;  %v11756_v26 = vld [vmem:[#allocation9 + $0x5ac] sm:$0xf0] }
  0xe7   :  { %1312 = vmatpush.bf16.msrb.mxu2 %v8113_v32  ;;  %1288 = vmatmul.bf16.vlgmr.msrb.gmra.mxu0 %v12792_v51  ;;  %v8146_v32 = vld [vmem:[#allocation9 + $0x278] sm:$0xf0] }
  0xe8   :  { %1332 = vmatpush.bf16.msra.mxu0 %v7957_v29  ;;  %1325 = vmatpush.bf16.msrb.mxu3 %v8241_v36  ;;  %v8165_v29 = vor.u32 %v11655_v18, %v8162_v19  ;;  %v8274_v36 = vld [vmem:[#allocation9 + $0x378] sm:$0xf0]  ;;  %v8149_v41 = vor.u32 %v11651_v31, %v8146_v32  ;;  %v8408_v31 = vld [vmem:[#allocation9 + $0x480] sm:$0xf]  ;;  %v11720_v32 = vld [vmem:[#allocation9 + $0x48c] sm:$0xf0] }
  0xe9   :  { %1345 = vmatpush.bf16.msra.mxu1 %v8085_v30  ;;  %v8293_v30 = vor.u32 %v11687_v23, %v8290_v24  ;;  %v8277_v42 = vor.u32 %v11683_v35, %v8274_v36  ;;  %v11724_v23 = vld [vmem:[#allocation9 + $0x4ac] sm:$0xf0]  ;;  %v8229_v24 = vor.u32 %v11671_v13, %v8226_v15  ;;  %v8409_v36 = vor.u32 %v11720_v32, %v8408_v31  ;;  %v8632_v32 = vld [vmem:[#allocation9 + $0x640] sm:$0xf] }
  0xea   :  { %1301 = vmatmul.bf16.vlgmr.msrb.gmra.mxu1 %v12794_v56  ;;  %v11752_v35 = vld [vmem:[#allocation9 + $0x58c] sm:$0xf0] }
  0xeb   :  { %1313 = vmatpush.bf16.msrb.mxu2 %v8097_v48  ;;  %v8258_v48 = vld [vmem:[#allocation9 + $0x358] sm:$0xf0]  ;;  %v11784_v13 = vld [vmem:[#allocation9 + $0x68c] sm:$0xf0] }
  0xec   :  { %1333 = vmatpush.bf16.msra.mxu0 %v7941_v43  ;;  %1326 = vmatpush.bf16.msrb.mxu3 %v8225_v53  ;;  %v11647_v43 = vld [vmem:[#allocation9 + $0x24c] sm:$0xf]  ;;  %v7970_v53 = vld [vmem:[#allocation9 + $0x118] sm:$0xf0] }
  0xed   :  { %1346 = vmatpush.bf16.msra.mxu1 %v8069_v44  ;;  %v8130_v44 = vld [vmem:[#allocation9 + $0x258] sm:$0xf0]  ;;  %v7973_v0 = vor.u32 %v11607_v52, %v7970_v53  ;;  %v11704_v52 = vld [vmem:[#allocation9 + $0x40c] sm:$0xf0]  ;;  %v11730_v53 = vld [vmem:[#allocation9 + $0x4e4] sm:$0xf] }
  0xee   :  { %1314 = vmatmul.bf16.vlgmr.msrb.gmra.mxu2 %v12798_v14 }
  0xef   :  { %1358 = vmatpush.bf16.msra.mxu2 %v8213_v54  ;;  %1327 = vmatmul.bf16.vlgmr.msrb.gmra.mxu3 %v12800_v20  ;;  %v8456_v54 = vld [vmem:[#allocation9 + $0x4e0] sm:$0xf] }
  0xf0   :  { %1371 = vmatpush.bf16.msra.mxu3 %v8341_v55  ;;  %1334 = vmatpush.bf16.msra.mxu0 %v7925_v59  ;;  %v8133_v55 = vor.u32 %v11647_v43, %v8130_v44  ;;  %v11764_v59 = vld [vmem:[#allocation9 + $0x5ec] sm:$0xf0]  ;;  %v8521_v44 = vor.u32 %v11748_v40, %v8520_v39  ;;  %v8616_v39 = vld [vmem:[#allocation9 + $0x620] sm:$0xf] }
  0xf1   :  { %1347 = vmatpush.bf16.msra.mxu1 %v8053_v60  ;;  %v8261_v60 = vor.u32 %v11679_v45, %v8258_v48  ;;  %v8585_v5 = vor.u32 %v11764_v59, %v8584_v58  ;;  %v11712_v43 = vld [vmem:[#allocation9 + $0x44c] sm:$0xf0]  ;;  %v8504_v45 = vld [vmem:[#allocation9 + $0x540] sm:$0xf]  ;;  %v11726_v58 = vld [vmem:[#allocation9 + $0x4c4] sm:$0xf] }
  0xf2   :  { %v11708_v48 = vld [vmem:[#allocation9 + $0x42c] sm:$0xf0]  ;;  %v8442_v59 = vld [vmem:[#allocation9 + $0x4d0] sm:$0xf0] }
  0xf3   :  { %1359 = vmatpush.bf16.msra.mxu2 %v8197_v3  ;;  %v8457_v3 = vor.u32 %v11732_v57, %v8456_v54  ;;  %v8458_v54 = vld [vmem:[#allocation9 + $0x4f0] sm:$0xf0]  ;;  %v11772_v40 = vld [vmem:[#allocation9 + $0x62c] sm:$0xf0] }
  0xf4   :  { %1372 = vmatpush.bf16.msra.mxu3 %v8325_v4  ;;  %1335 = vmatpush.bf16.msra.mxu0 %v7909_v7  ;;  %v8440_v4 = vld [vmem:[#allocation9 + $0x4c0] sm:$0xf]  ;;  %v11728_v7 = vld [vmem:[#allocation9 + $0x4cc] sm:$0xf0]  ;;  %v8461_v57 = vor.u32 %v11730_v53, %v8458_v54  ;;  %v8522_v53 = vld [vmem:[#allocation9 + $0x570] sm:$0xf0] }
  0xf5   :  { %1348 = vmatpush.bf16.msra.mxu1 %v8037_v8  ;;  %v8568_v8 = vld [vmem:[#allocation9 + $0x5c0] sm:$0xf]  ;;  %v8441_v18 = vor.u32 %v11728_v7, %v8440_v4  ;;  %v11788_v4 = vld [vmem:[#allocation9 + $0x6ac] sm:$0xf0] }
  0xf6   :  { %v8569_v19 = vor.u32 %v11760_v9, %v8568_v8  ;;  %v8681_v7 = vor.u32 %v11788_v4, %v8680_v2  ;;  %v8472_v9 = vld [vmem:[#allocation9 + $0x500] sm:$0xf] }
  0xf7   :  { %1360 = vmatpush.bf16.msra.mxu2 %v8181_v16  ;;  %v8712_v16 = vld [vmem:[#allocation9 + $0x6e0] sm:$0xf] }
  0xf8   :  { %1373 = vmatpush.bf16.msra.mxu3 %v8309_v17  ;;  %1336 = vmatpush.bf16.msra.mxu0 %v7893_v21  ;;  %v11796_v17 = vld [vmem:[#allocation9 + $0x6ec] sm:$0xf0]  ;;  %v8101_v21 = vor.u32 %v11639_v11, %v8098_v12  ;;  %v8664_v11 = vld [vmem:[#allocation9 + $0x680] sm:$0xf] }
  0xf9   :  { %1349 = vmatpush.bf16.msra.mxu1 %v8021_v22  ;;  %v8424_v22 = vld [vmem:[#allocation9 + $0x4a0] sm:$0xf]  ;;  %v8713_v27 = vor.u32 %v11796_v17, %v8712_v16  ;;  %v8665_v15 = vor.u32 %v11784_v13, %v8664_v11  ;;  %v11714_v16 = vld [vmem:[#allocation9 + $0x464] sm:$0xf]  ;;  %v8394_v17 = vld [vmem:[#allocation9 + $0x470] sm:$0xf0] }
  0xfa   :  { %v8490_v11 = vld [vmem:[#allocation9 + $0x530] sm:$0xf0] }
  0xfb   :  { %1361 = vmatpush.bf16.msra.mxu2 %v8165_v29  ;;  %v11792_v29 = vld [vmem:[#allocation9 + $0x6cc] sm:$0xf0] }
  0xfc   :  { %1374 = vmatpush.bf16.msra.mxu3 %v8293_v30  ;;  %1337 = vmatpush.bf16.msra.mxu0 %v7877_v33  ;;  %v8425_v30 = vor.u32 %v11724_v23, %v8424_v22  ;;  %v8553_v33 = vor.u32 %v11756_v26, %v8552_v25  ;;  %v8648_v22 = vld [vmem:[#allocation9 + $0x660] sm:$0xf]  ;;  %v11780_v23 = vld [vmem:[#allocation9 + $0x66c] sm:$0xf0]  ;;  %v11710_v26 = vld [vmem:[#allocation9 + $0x444] sm:$0xf] }
  0xfd   :  { %1350 = vmatpush.bf16.msra.mxu1 %v8005_v34  ;;  %v8536_v34 = vld [vmem:[#allocation9 + $0x580] sm:$0xf]  ;;  %v8649_v25 = vor.u32 %v11780_v23, %v8648_v22  ;;  %v11734_v23 = vld [vmem:[#allocation9 + $0x504] sm:$0xf] }
  0xfe   :  { %v8537_v38 = vor.u32 %v11752_v35, %v8536_v34  ;;  %v11706_v35 = vld [vmem:[#allocation9 + $0x424] sm:$0xf] }
  0xff   :  { %1362 = vmatpush.bf16.msra.mxu2 %v8149_v41 }
 0x100   :  { %1375 = vmatpush.bf16.msra.mxu3 %v8277_v42  ;;  %1338 = vmatpush.bf16.msra.mxu0 %v7861_v46  ;;  %v8376_v42 = vld [vmem:[#allocation9 + $0x440] sm:$0xf]  ;;  %v11744_v46 = vld [vmem:[#allocation9 + $0x54c] sm:$0xf0] }
 0x101   :  { %1351 = vmatpush.bf16.msra.mxu1 %v7989_v47  ;;  %v8360_v47 = vld [vmem:[#allocation9 + $0x420] sm:$0xf] }
 0x102   :  { %v8361_v49 = vor.u32 %v11708_v48, %v8360_v47  ;;  %v8600_v47 = vld [vmem:[#allocation9 + $0x600] sm:$0xf]  ;;  %v11768_v48 = vld [vmem:[#allocation9 + $0x60c] sm:$0xf0] }
 0x103   :  { %1363 = vmatpush.bf16.msra.mxu2 %v8133_v55  ;;  %v8345_v55 = vor.u32 %v11704_v52, %v8344_v50  ;;  %v11828_v50 = vld [vmem:[#allocation9 + $0x7ec] sm:$0xf0]  ;;  %v11746_v52 = vld [vmem:[#allocation9 + $0x564] sm:$0xf] }
 0x104   :  { %1376 = vmatpush.bf16.msra.mxu3 %v8261_v60  ;;  %1339 = vmatpush.bf16.msra.mxu0 %v7845_v63  ;;  %v8445_v60 = vor.u32 %v11726_v58, %v8442_v59  ;;  %v8429_v63 = vor.u32 %v11722_v61, %v8426_v62  ;;  %v8714_v58 = vld [vmem:[#allocation9 + $0x6f0] sm:$0xf0]  ;;  %v11824_v61 = vld [vmem:[#allocation9 + $0x7cc] sm:$0xf0] }
 0x105   :  { %1352 = vmatpush.bf16.msra.mxu1 %v7973_v0  ;;  %v8488_v0 = vld [vmem:[#allocation9 + $0x520] sm:$0xf] }
 0x107   :  { %1364 = vmatpush.bf16.msra.mxu2 %v8117_v6  ;;  %1340 = vmatmul.bf16.vlgmr.msra.gmra.mxu0 %v12792_v51  ;;  %v8697_v51 = vor.u32 %v11792_v29, %v8696_v28  ;;  %v8410_v6 = vld [vmem:[#allocation9 + $0x490] sm:$0xf0]  ;;  %v11758_v28 = vld [vmem:[#allocation9 + $0x5c4] sm:$0xf] }
 0x108   :  { %2172 = vmatpush.bf16.msrb.mxu0 %v8457_v3  ;;  %1377 = vmatpush.bf16.msra.mxu3 %v8245_v10  ;;  %v8489_v3 = vor.u32 %v11740_v1, %v8488_v0  ;;  %v11736_v10 = vld [vmem:[#allocation9 + $0x50c] sm:$0xf0]  ;;  %v8506_v0 = vld [vmem:[#allocation9 + $0x550] sm:$0xf0]  ;;  %v11790_v1 = vld [vmem:[#allocation9 + $0x6c4] sm:$0xf] }
 0x109   :  { %2185 = vmatpush.bf16.msrb.mxu1 %v8585_v5  ;;  %v11718_v5 = vld [vmem:[#allocation9 + $0x484] sm:$0xf]  ;;  %v8473_v12 = vor.u32 %v11736_v10, %v8472_v9 }
 0x10a   :  { %1353 = vmatmul.bf16.vlgmr.msra.gmra.mxu1 %v12794_v56  ;;  %v8392_v56 = vld [vmem:[#allocation9 + $0x460] sm:$0xf]  ;;  %v8413_v8 = vor.u32 %v11718_v5, %v8410_v6  ;;  %v11738_v10 = vld [vmem:[#allocation9 + $0x524] sm:$0xf] }
 0x10b   :  { %1365 = vmatpush.bf16.msra.mxu2 %v8101_v21  ;;  %v8393_v41 = vor.u32 %v11716_v37, %v8392_v56  ;;  %v8586_v21 = vld [vmem:[#allocation9 + $0x5f0] sm:$0xf0]  ;;  %v12816_v5 = vld [vmem:[#allocation11] sm:$0xf] }
 0x10c   :  { %2173 = vmatpush.bf16.msrb.mxu0 %v8441_v18  ;;  %1378 = vmatpush.bf16.msra.mxu3 %v8229_v24  ;;  %v11762_v18 = vld [vmem:[#allocation9 + $0x5e4] sm:$0xf]  ;;  %v8554_v37 = vld [vmem:[#allocation9 + $0x5b0] sm:$0xf0]  ;;  %v8808_v6 = vld [vmem:[#allocation9 + $0x7a0] sm:$0xf] }
 0x10d   :  { %2186 = vmatpush.bf16.msrb.mxu1 %v8569_v19  ;;  %v8397_v19 = vor.u32 %v11714_v16, %v8394_v17  ;;  %v8589_v24 = vor.u32 %v11762_v18, %v8586_v21  ;;  %v8682_v16 = vld [vmem:[#allocation9 + $0x6b0] sm:$0xf0]  ;;  %v528_v17 = vperm.slane %v12816_v5, 0  ;;  %v11816_v21 = vld [vmem:[#allocation9 + $0x78c] sm:$0xf0] }
 0x10e   :  { %1366 = vmatmul.bf16.vlgmr.msra.gmra.mxu2 %v12798_v14  ;;  %v8377_v14 = vor.u32 %v11712_v43, %v8376_v42  ;;  %v11702_v42 = vld [vmem:[#allocation9 + $0x404] sm:$0xf]  ;;  %v8346_v43 = vld [vmem:[#allocation9 + $0x410] sm:$0xf0] }
 0x10f   :  { %2198 = vmatpush.bf16.msrb.mxu2 %v8713_v27  ;;  %1379 = vmatmul.bf16.vlgmr.msra.gmra.mxu3 %v12800_v20  ;;  %v8505_v20 = vor.u32 %v11744_v46, %v8504_v45  ;;  %v8378_v27 = vld [vmem:[#allocation9 + $0x450] sm:$0xf0]  ;;  %v8349_v45 = vor.u32 %v11702_v42, %v8346_v43 }
 0x110   :  { %2174 = vmatpush.bf16.msrb.mxu0 %v8425_v30  ;;  %v8381_v29 = vor.u32 %v11710_v26, %v8378_v27  ;;  %v8570_v30 = vld [vmem:[#allocation9 + $0x5d0] sm:$0xf0] }
 0x111   :  { %2187 = vmatpush.bf16.msrb.mxu1 %v8553_v33  ;;  %v8573_v31 = vor.u32 %v11758_v28, %v8570_v30  ;;  %v11776_v33 = vld [vmem:[#allocation9 + $0x64c] sm:$0xf0]  ;;  %v8538_v46 = vld [vmem:[#allocation9 + $0x590] sm:$0xf0]  ;;  %v8776_v30 = vld [vmem:[#allocation9 + $0x760] sm:$0xf] }
 0x112   :  { %v8633_v34 = vor.u32 %v11776_v33, %v8632_v32  ;;  %v8666_v27 = vld [vmem:[#allocation9 + $0x690] sm:$0xf0] }
 0x113   :  { %2199 = vmatpush.bf16.msrb.mxu2 %v8697_v51  ;;  %v8362_v51 = vld [vmem:[#allocation9 + $0x430] sm:$0xf0] }
 0x114   :  { %2175 = vmatpush.bf16.msrb.mxu0 %v8409_v36  ;;  %v11754_v36 = vld [vmem:[#allocation9 + $0x5a4] sm:$0xf]  ;;  %v8365_v56 = vor.u32 %v11706_v35, %v8362_v51  ;;  %v8650_v35 = vld [vmem:[#allocation9 + $0x670] sm:$0xf0] }
 0x115   :  { %2188 = vmatpush.bf16.msrb.mxu1 %v8537_v38  ;;  %v8557_v38 = vor.u32 %v11754_v36, %v8554_v37  ;;  %v8760_v37 = vld [vmem:[#allocation9 + $0x740] sm:$0xf] }
 0x117   :  { %2200 = vmatpush.bf16.msrb.mxu2 %v8681_v7  ;;  %v11820_v7 = vld [vmem:[#allocation9 + $0x7ac] sm:$0xf0] }
 0x118   :  { %2176 = vmatpush.bf16.msrb.mxu0 %v8393_v41  ;;  %v8617_v41 = vor.u32 %v11772_v40, %v8616_v39  ;;  %v8809_v9 = vor.u32 %v11820_v7, %v8808_v6  ;;  %v11774_v40 = vld [vmem:[#allocation9 + $0x644] sm:$0xf] }
 0x119   :  { %2189 = vmatpush.bf16.msrb.mxu1 %v8521_v44  ;;  %v11750_v44 = vld [vmem:[#allocation9 + $0x584] sm:$0xf] }
 0x11b   :  { %2201 = vmatpush.bf16.msrb.mxu2 %v8665_v15  ;;  %v8493_v15 = vor.u32 %v11738_v10, %v8490_v11 }
 0x11c   :  { %2177 = vmatpush.bf16.msrb.mxu0 %v8377_v14  ;;  %v8541_v14 = vor.u32 %v11750_v44, %v8538_v46  ;;  %v8464_v46 = vld [vmem:[#allocation9 + $0x4e8] sm:$0xf] }
 0x11d   :  { %2190 = vmatpush.bf16.msrb.mxu1 %v8505_v20  ;;  %v8840_v20 = vld [vmem:[#allocation9 + $0x7e0] sm:$0xf] }
 0x11e   :  { %v8841_v54 = vor.u32 %v11828_v50, %v8840_v20 }
 0x11f   :  { %2202 = vmatpush.bf16.msrb.mxu2 %v8649_v25  ;;  %v11782_v25 = vld [vmem:[#allocation9 + $0x684] sm:$0xf] }
 0x120   :  { %2178 = vmatpush.bf16.msrb.mxu0 %v8361_v49  ;;  %v8601_v49 = vor.u32 %v11768_v48, %v8600_v47  ;;  %2211 = vmatpush.bf16.msrb.mxu3 %v8841_v54  ;;  %v11804_v47 = vld [vmem:[#allocation9 + $0x72c] sm:$0xf0] }
 0x121   :  { %2191 = vmatpush.bf16.msrb.mxu1 %v8489_v3  ;;  %v8698_v3 = vld [vmem:[#allocation9 + $0x6d0] sm:$0xf0] }
 0x122   :  { %v8701_v4 = vor.u32 %v11790_v1, %v8698_v3  ;;  %v8602_v3 = vld [vmem:[#allocation9 + $0x610] sm:$0xf0] }
 0x123   :  { %2203 = vmatpush.bf16.msrb.mxu2 %v8633_v34  ;;  %v11778_v34 = vld [vmem:[#allocation9 + $0x664] sm:$0xf] }
 0x124   :  { %2179 = vmatpush.bf16.msrb.mxu0 %v8345_v55  ;;  %v8525_v55 = vor.u32 %v11746_v52, %v8522_v53  ;;  %v8653_v36 = vor.u32 %v11778_v34, %v8650_v35  ;;  %v11770_v52 = vld [vmem:[#allocation9 + $0x624] sm:$0xf]  ;;  %v8618_v53 = vld [vmem:[#allocation9 + $0x630] sm:$0xf0]  ;;  %v11717_v34 = vld [vmem:[#allocation9 + $0x474] sm:$0xf0] }
 0x125   :  { %2192 = vmatpush.bf16.msrb.mxu1 %v8473_v12  ;;  %v11786_v12 = vld [vmem:[#allocation9 + $0x6a4] sm:$0xf]  ;;  %v8592_v35 = vld [vmem:[#allocation9 + $0x5e8] sm:$0xf] }
 0x126   :  { %v8685_v18 = vor.u32 %v11786_v12, %v8682_v16  ;;  %v8432_v12 = vld [vmem:[#allocation9 + $0x4a8] sm:$0xf]  ;;  %v11725_v16 = vld [vmem:[#allocation9 + $0x4b4] sm:$0xf0] }
 0x127   :  { %2204 = vmatpush.bf16.msrb.mxu2 %v8617_v41  ;;  %v8634_v41 = vld [vmem:[#allocation9 + $0x650] sm:$0xf0] }
 0x128   :  { %2224 = vmatpush.bf16.msra.mxu0 %v8461_v57  ;;  %v11794_v57 = vld [vmem:[#allocation9 + $0x6e4] sm:$0xf]  ;;  %v8637_v43 = vor.u32 %v11774_v40, %v8634_v41 }
 0x129   :  { %2237 = vmatpush.bf16.msra.mxu1 %v8589_v24  ;;  %v8717_v59 = vor.u32 %v11794_v57, %v8714_v58  ;;  %v8474_v24 = vld [vmem:[#allocation9 + $0x510] sm:$0xf0]  ;;  %v529_v58 = vperm.slane %v12816_v5, 1 }
 0x12a   :  { %v8477_v26 = vor.u32 %v11734_v23, %v8474_v24  ;;  %v8416_v23 = vld [vmem:[#allocation9 + $0x488] sm:$0xf] }
 0x12b   :  { %2205 = vmatpush.bf16.msrb.mxu2 %v8601_v49  ;;  %v11733_v49 = vld [vmem:[#allocation9 + $0x4f4] sm:$0xf0] }
 0x12c   :  { %2225 = vmatpush.bf16.msra.mxu0 %v8445_v60  ;;  %v8824_v60 = vld [vmem:[#allocation9 + $0x7c0] sm:$0xf] }
 0x12d   :  { %2238 = vmatpush.bf16.msra.mxu1 %v8573_v31  ;;  %v8825_v62 = vor.u32 %v11824_v61, %v8824_v60  ;;  %v11812_v31 = vld [vmem:[#allocation9 + $0x76c] sm:$0xf0]  ;;  %v8465_v60 = vor.u32 %v11733_v49, %v8464_v46  ;;  %v11729_v61 = vld [vmem:[#allocation9 + $0x4d4] sm:$0xf0]  ;;  %v8576_v46 = vld [vmem:[#allocation9 + $0x5c8] sm:$0xf] }
 0x12e   :  { %v8777_v33 = vor.u32 %v11812_v31, %v8776_v30  ;;  %v530_v49 = vperm.slane %v12816_v5, 2 }
 0x12f   :  { %2250 = vmatpush.bf16.msra.mxu2 %v8717_v59  ;;  %2212 = vmatpush.bf16.msrb.mxu3 %v8825_v62  ;;  %v8448_v59 = vld [vmem:[#allocation9 + $0x4c8] sm:$0xf]  ;;  %v8728_v62 = vld [vmem:[#allocation9 + $0x700] sm:$0xf] }
 0x130   :  { %2226 = vmatpush.bf16.msra.mxu0 %v8429_v63  ;;  %v11742_v63 = vld [vmem:[#allocation9 + $0x544] sm:$0xf]  ;;  %v8449_v11 = vor.u32 %v11729_v61, %v8448_v59  ;;  %v8560_v59 = vld [vmem:[#allocation9 + $0x5a8] sm:$0xf] }
 0x131   :  { %2239 = vmatpush.bf16.msra.mxu1 %v8557_v38  ;;  %v8509_v2 = vor.u32 %v11742_v63, %v8506_v0  ;;  %v11808_v38 = vld [vmem:[#allocation9 + $0x74c] sm:$0xf0]  ;;  %v11806_v61 = vld [vmem:[#allocation9 + $0x744] sm:$0xf] }
 0x132   :  { %v8761_v39 = vor.u32 %v11808_v38, %v8760_v37  ;;  %v11800_v63 = vld [vmem:[#allocation9 + $0x70c] sm:$0xf0]  ;;  %v8794_v37 = vld [vmem:[#allocation9 + $0x790] sm:$0xf0] }
 0x133   :  { %2251 = vmatpush.bf16.msra.mxu2 %v8701_v4  ;;  %2213 = vmatpush.bf16.msrb.mxu3 %v8809_v9  ;;  %v8729_v1 = vor.u32 %v11800_v63, %v8728_v62  ;;  %v11826_v4 = vld [vmem:[#allocation9 + $0x7e4] sm:$0xf]  ;;  %v8762_v62 = vld [vmem:[#allocation9 + $0x750] sm:$0xf0] }
 0x134   :  { %2227 = vmatpush.bf16.msra.mxu0 %v8413_v8 }
 0x135   :  { %2240 = vmatpush.bf16.msra.mxu1 %v8541_v14  ;;  %v8744_v14 = vld [vmem:[#allocation9 + $0x720] sm:$0xf] }
 0x136   :  { %v8745_v50 = vor.u32 %v11804_v47, %v8744_v14  ;;  %v11761_v47 = vld [vmem:[#allocation9 + $0x5d4] sm:$0xf0] }
 0x137   :  { %2252 = vmatpush.bf16.msra.mxu2 %v8685_v18  ;;  %v8826_v18 = vld [vmem:[#allocation9 + $0x7d0] sm:$0xf0] }
 0x138   :  { %2228 = vmatpush.bf16.msra.mxu0 %v8397_v19  ;;  %v8792_v19 = vld [vmem:[#allocation9 + $0x780] sm:$0xf] }
 0x139   :  { %2241 = vmatpush.bf16.msra.mxu1 %v8525_v55  ;;  %v8793_v22 = vor.u32 %v11816_v21, %v8792_v19  ;;  %v8621_v55 = vor.u32 %v11770_v52, %v8618_v53 }
 0x13b   :  { %2214 = vmatpush.bf16.msrb.mxu3 %v8793_v22  ;;  %v8433_v22 = vor.u32 %v11725_v16, %v8432_v12  ;;  %v8746_v12 = vld [vmem:[#allocation9 + $0x730] sm:$0xf0]  ;;  %v8466_v16 = vld [vmem:[#allocation9 + $0x4f8] sm:$0xf0] }
 0x13c   :  { %2229 = vmatpush.bf16.msra.mxu0 %v8381_v29  ;;  %v8669_v29 = vor.u32 %v11782_v25, %v8666_v27  ;;  %v11721_v25 = vld [vmem:[#allocation9 + $0x494] sm:$0xf0]  ;;  %v8810_v27 = vld [vmem:[#allocation9 + $0x7b0] sm:$0xf0] }
 0x13d   :  { %2242 = vmatpush.bf16.msra.mxu1 %v8509_v2  ;;  %v11766_v2 = vld [vmem:[#allocation9 + $0x604] sm:$0xf] }
 0x13e   :  { %2253 = vmatpush.bf16.msra.mxu2 %v8669_v29  ;;  %v8605_v7 = vor.u32 %v11766_v2, %v8602_v3  ;;  %v8765_v2 = vor.u32 %v11806_v61, %v8762_v62  ;;  %v8672_v61 = vld [vmem:[#allocation9 + $0x688] sm:$0xf]  ;;  %v11785_v62 = vld [vmem:[#allocation9 + $0x694] sm:$0xf0] }
 0x13f   :  { %2215 = vmatpush.bf16.msrb.mxu3 %v8777_v33  ;;  %v8400_v33 = vld [vmem:[#allocation9 + $0x468] sm:$0xf] }
 0x140   :  { %2230 = vmatpush.bf16.msra.mxu0 %v8365_v56 }
 0x141   :  { %2243 = vmatpush.bf16.msra.mxu1 %v8493_v15 }
 0x142   :  { %2254 = vmatpush.bf16.msra.mxu2 %v8653_v36  ;;  %v11765_v36 = vld [vmem:[#allocation9 + $0x5f4] sm:$0xf0] }
 0x143   :  { %v1185_v8 = vpop.f32.mrf.mxu0  ;;  %2216 = vmatpush.bf16.msrb.mxu3 %v8761_v39 }
 0x144   :  { %2231 = vmatpush.bf16.msra.mxu0 %v8349_v45  ;;  %v1198_v13 = vpop.f32.mrf.mxu1  ;;  %v1186_v28 = vadd.f32 %v1185_v8, %v528_v17  ;;  %v8842_v8 = vld [vmem:[#allocation9 + $0x7f0] sm:$0xf0]  ;;  %v11822_v17 = vld [vmem:[#allocation9 + $0x7c4] sm:$0xf] }
 0x145   :  { %2244 = vmatpush.bf16.msra.mxu1 %v8477_v26  ;;  %v8845_v10 = vor.u32 %v11826_v4, %v8842_v8  ;;  %v8829_v21 = vor.u32 %v11822_v17, %v8826_v18  ;;  %v11818_v26 = vld [vmem:[#allocation9 + $0x7a4] sm:$0xf]  ;;  %v11705_v8 = vld [vmem:[#allocation9 + $0x414] sm:$0xf0] }
 0x146   :  { %v1199_v56 = vadd.f32 %v1198_v13, %v1186_v28  ;;  %2255 = vmatpush.bf16.msra.mxu2 %v8637_v43  ;;  %v8813_v29 = vor.u32 %v11818_v26, %v8810_v27  ;;  %v8593_v43 = vor.u32 %v11765_v36, %v8592_v35  ;;  %v8720_v27 = vld [vmem:[#allocation9 + $0x6e8] sm:$0xf] }
 0x147   :  { %2217 = vmatpush.bf16.msrb.mxu3 %v8745_v50 }
 0x14a   :  { %2256 = vmatpush.bf16.msra.mxu2 %v8621_v55  ;;  %v8577_v55 = vor.u32 %v11761_v47, %v8576_v46 }
 0x14b   :  { %v1187_v32 = vpop.f32.mrf.mxu0  ;;  %2218 = vmatpush.bf16.msrb.mxu3 %v8729_v1 }
 0x14c   :  { %v1200_v51 = vpop.f32.mrf.mxu1  ;;  %v8417_v32 = vor.u32 %v11721_v25, %v8416_v23  ;;  %v11749_v25 = vld [vmem:[#allocation9 + $0x574] sm:$0xf0] }
 0x14e   :  { %2257 = vmatpush.bf16.msra.mxu2 %v8605_v7  ;;  %v8352_v7 = vld [vmem:[#allocation9 + $0x408] sm:$0xf] }
 0x14f   :  { %2263 = vmatpush.bf16.msra.mxu3 %v8845_v10  ;;  %v11753_v10 = vld [vmem:[#allocation9 + $0x594] sm:$0xf0] }
 0x151   :  { %v1211_v42 = vpop.f32.mrf.mxu2 }
 0x152   :  { %v1212_v44 = vadd.f32 %v1211_v42, %v1199_v56  ;;  %v1224_v45 = vpop.f32.mrf.mxu3  ;;  %v11814_v56 = vld [vmem:[#allocation9 + $0x784] sm:$0xf]  ;;  %v8401_v42 = vor.u32 %v11717_v34, %v8400_v33  ;;  %v8450_v33 = vld [vmem:[#allocation9 + $0x4d8] sm:$0xf0] }
 0x153   :  { %v1237_v20 = vpop.f32.mrf.mxu0  ;;  %2264 = vmatpush.bf16.msra.mxu3 %v8829_v21  ;;  %v8797_v39 = vor.u32 %v11814_v56, %v8794_v37  ;;  %v8512_v37 = vld [vmem:[#allocation9 + $0x548] sm:$0xf] }
 0x154   :  { %v1225_v48 = vadd.f32 %v1224_v45, %v1212_v44  ;;  %v1250_v54 = vpop.f32.mrf.mxu1  ;;  %v1238_v13 = vadd.f32 %v1237_v20, %v529_v58  ;;  %v8384_v44 = vld [vmem:[#allocation9 + $0x448] sm:$0xf]  ;;  %v11713_v45 = vld [vmem:[#allocation9 + $0x454] sm:$0xf0]  ;;  %v8778_v20 = vld [vmem:[#allocation9 + $0x770] sm:$0xf0] }
 0x155   :  { %v11709_v58 = vld [vmem:[#allocation9 + $0x434] sm:$0xf0] }
 0x156   :  { %v1384_v57 = vmax.f32 %v1225_v48, 0.0  ;;  %v1251_v24 = vadd.f32 %v1250_v54, %v1238_v13  ;;  %v11810_v48 = vld [vmem:[#allocation9 + $0x764] sm:$0xf]  ;;  %v8385_v54 = vor.u32 %v11713_v45, %v8384_v44 }
 0x157   :  { %2265 = vmatpush.bf16.msra.mxu3 %v8813_v29  ;;  %v8781_v52 = vor.u32 %v11810_v48, %v8778_v20  ;;  %v8730_v29 = vld [vmem:[#allocation9 + $0x710] sm:$0xf0]  ;;  %v8496_v20 = vld [vmem:[#allocation9 + $0x528] sm:$0xf] }
 0x158   :  { %v12820_v0 = vpack.c.bf16 %v1384_v57, %v1384_v57  ;;  %v8368_v57 = vld [vmem:[#allocation9 + $0x428] sm:$0xf] }
 0x159   :  { %v1213_v6 = vpop.f32.mrf.mxu2  ;;  %v8369_v4 = vor.u32 %v11709_v58, %v8368_v57 }
 0x15a   :  { %v1226_v9 = vpop.f32.mrf.mxu3  ;;  %2180 = vmatmul.bf16.vlgmr.msrb.gmra.mxu0 %v12820_v0 }
 0x15b   :  { %2276 = vmatpush.bf16.msrb.mxu0 %v8465_v60  ;;  %v1239_v15 = vpop.f32.mrf.mxu0  ;;  %2266 = vmatpush.bf16.msra.mxu3 %v8797_v39  ;;  %v11757_v60 = vld [vmem:[#allocation9 + $0x5b4] sm:$0xf0]  ;;  %v8544_v9 = vld [vmem:[#allocation9 + $0x588] sm:$0xf] }
 0x15c   :  { %v1252_v19 = vpop.f32.mrf.mxu1  ;;  %v8561_v6 = vor.u32 %v11757_v60, %v8560_v59  ;;  %v11731_v15 = vld [vmem:[#allocation9 + $0x4ec] sm:$0xf]  ;;  %v8545_v23 = vor.u32 %v11753_v10, %v8544_v9  ;;  %v8704_v39 = vld [vmem:[#allocation9 + $0x6c8] sm:$0xf]  ;;  %v11737_v60 = vld [vmem:[#allocation9 + $0x514] sm:$0xf0]  ;;  %v8673_v9 = vor.u32 %v11785_v62, %v8672_v61 }
 0x15d   :  { %v8469_v26 = vor.u32 %v11731_v15, %v8466_v16  ;;  %v8480_v59 = vld [vmem:[#allocation9 + $0x508] sm:$0xf]  ;;  %v11711_v15 = vld [vmem:[#allocation9 + $0x44c] sm:$0xf]  ;;  %v8386_v16 = vld [vmem:[#allocation9 + $0x458] sm:$0xf0] }
 0x15e   :  { %v8832_v62 = vld [vmem:[#allocation9 + $0x7c8] sm:$0xf] }
 0x15f   :  { %2277 = vmatpush.bf16.msrb.mxu0 %v8449_v11  ;;  %2267 = vmatpush.bf16.msra.mxu3 %v8781_v52  ;;  %v11802_v11 = vld [vmem:[#allocation9 + $0x724] sm:$0xf]  ;;  %v11789_v52 = vld [vmem:[#allocation9 + $0x6b4] sm:$0xf0] }
 0x160   :  { %v8749_v17 = vor.u32 %v11802_v11, %v8746_v12  ;;  %v8656_v11 = vld [vmem:[#allocation9 + $0x668] sm:$0xf] }
 0x161   :  { %v1263_v28 = vpop.f32.mrf.mxu2 }
 0x162   :  { %v1264_v30 = vadd.f32 %v1263_v28, %v1251_v24  ;;  %v1276_v31 = vpop.f32.mrf.mxu3  ;;  %v8528_v24 = vld [vmem:[#allocation9 + $0x568] sm:$0xf]  ;;  %v11798_v28 = vld [vmem:[#allocation9 + $0x704] sm:$0xf] }
 0x163   :  { %2278 = vmatpush.bf16.msrb.mxu0 %v8433_v22  ;;  %2268 = vmatpush.bf16.msra.mxu3 %v8765_v2  ;;  %v8353_v22 = vor.u32 %v11705_v8, %v8352_v7  ;;  %v8733_v34 = vor.u32 %v11798_v28, %v8730_v29  ;;  %v8481_v7 = vor.u32 %v11737_v60, %v8480_v59  ;;  %v531_v8 = vperm.slane %v12816_v5, 3  ;;  %v11755_v28 = vld [vmem:[#allocation9 + $0x5ac] sm:$0xf]  ;;  %v8562_v29 = vld [vmem:[#allocation9 + $0x5b8] sm:$0xf0] }
 0x164   :  { %v1277_v51 = vadd.f32 %v1276_v31, %v1264_v30  ;;  %v1289_v38 = vpop.f32.mrf.mxu0  ;;  %v11797_v31 = vld [vmem:[#allocation9 + $0x6f4] sm:$0xf0] }
 0x165   :  { %v1290_v63 = vadd.f32 %v1289_v38, %v530_v49  ;;  %v8721_v36 = vor.u32 %v11797_v31, %v8720_v27  ;;  %v11745_v38 = vld [vmem:[#allocation9 + $0x554] sm:$0xf0] }
 0x166   :  { %v1385_v40 = vmax.f32 %v1277_v51, 0.0  ;;  %v8529_v51 = vor.u32 %v11749_v25, %v8528_v24  ;;  %v8513_v46 = vor.u32 %v11745_v38, %v8512_v37  ;;  %v11741_v49 = vld [vmem:[#allocation9 + $0x534] sm:$0xf0]  ;;  %v11707_v25 = vld [vmem:[#allocation9 + $0x42c] sm:$0xf] }
 0x167   :  { %v1302_v41 = vpop.f32.mrf.mxu1  ;;  %2279 = vmatpush.bf16.msrb.mxu0 %v8417_v32  ;;  %2269 = vmatpush.bf16.msra.mxu3 %v8749_v17  ;;  %v11727_v32 = vld [vmem:[#allocation9 + $0x4cc] sm:$0xf]  ;;  %v11777_v24 = vld [vmem:[#allocation9 + $0x654] sm:$0xf0] }
 0x168   :  { %v12823_v14 = vpack.c.bf16 %v1385_v40, %v1385_v40  ;;  %v1303_v13 = vadd.f32 %v1302_v41, %v1290_v63  ;;  %v8453_v56 = vor.u32 %v11727_v32, %v8450_v33  ;;  %v11793_v41 = vld [vmem:[#allocation9 + $0x6d4] sm:$0xf0]  ;;  %v11715_v63 = vld [vmem:[#allocation9 + $0x46c] sm:$0xf]  ;;  %v8624_v33 = vld [vmem:[#allocation9 + $0x628] sm:$0xf] }
 0x169   :  { %v1265_v50 = vpop.f32.mrf.mxu2  ;;  %v8705_v47 = vor.u32 %v11793_v41, %v8704_v39  ;;  %v11759_v17 = vld [vmem:[#allocation9 + $0x5cc] sm:$0xf]  ;;  %v8546_v39 = vld [vmem:[#allocation9 + $0x598] sm:$0xf0] }
 0x16a   :  { %v1278_v53 = vpop.f32.mrf.mxu3  ;;  %2193 = vmatmul.bf16.vlgmr.msrb.gmra.mxu1 %v12823_v14  ;;  %2232 = vmatmul.bf16.vlgmr.msra.gmra.mxu0 %v12820_v0  ;;  %v8688_v50 = vld [vmem:[#allocation9 + $0x6a8] sm:$0xf]  ;;  %v11751_v38 = vld [vmem:[#allocation9 + $0x58c] sm:$0xf] }
 0x16b   :  { %2280 = vmatpush.bf16.msrb.mxu0 %v8401_v42  ;;  %2289 = vmatpush.bf16.msrb.mxu1 %v8593_v43  ;;  %v11723_v42 = vld [vmem:[#allocation9 + $0x4ac] sm:$0xf]  ;;  %v8434_v43 = vld [vmem:[#allocation9 + $0x4b8] sm:$0xf0]  ;;  %v8689_v57 = vor.u32 %v11789_v52, %v8688_v50 }
 0x16c   :  { %v1291_v1 = vpop.f32.mrf.mxu0  ;;  %2270 = vmatpush.bf16.msra.mxu3 %v8733_v34  ;;  %v8437_v48 = vor.u32 %v11723_v42, %v8434_v43  ;;  %v11719_v53 = vld [vmem:[#allocation9 + $0x48c] sm:$0xf]  ;;  %v8530_v52 = vld [vmem:[#allocation9 + $0x578] sm:$0xf0] }
 0x16d   :  { %v8402_v1 = vld [vmem:[#allocation9 + $0x478] sm:$0xf0]  ;;  %v11747_v50 = vld [vmem:[#allocation9 + $0x56c] sm:$0xf] }
 0x16e   :  { %v8405_v10 = vor.u32 %v11715_v63, %v8402_v1  ;;  %v8533_v60 = vor.u32 %v11747_v50, %v8530_v52  ;;  %v11825_v63 = vld [vmem:[#allocation9 + $0x7d4] sm:$0xf0]  ;;  %v11743_v1 = vld [vmem:[#allocation9 + $0x54c] sm:$0xf]  ;;  %v8850_v50 = vld [vmem:[#allocation9 + $0x7f8] sm:$0xf0] }
 0x16f   :  { %v1304_v3 = vpop.f32.mrf.mxu1  ;;  %2281 = vmatpush.bf16.msrb.mxu0 %v8385_v54  ;;  %2290 = vmatpush.bf16.msrb.mxu1 %v8577_v55  ;;  %v8418_v54 = vld [vmem:[#allocation9 + $0x498] sm:$0xf0]  ;;  %v8497_v55 = vor.u32 %v11741_v49, %v8496_v20  ;;  %v8848_v20 = vld [vmem:[#allocation9 + $0x7e8] sm:$0xf]  ;;  %v11829_v49 = vld [vmem:[#allocation9 + $0x7f4] sm:$0xf0] }
 0x170   :  { %v8421_v58 = vor.u32 %v11719_v53, %v8418_v54  ;;  %v11763_v3 = vld [vmem:[#allocation9 + $0x5ec] sm:$0xf]  ;;  %v8722_v54 = vld [vmem:[#allocation9 + $0x6f8] sm:$0xf0] }
 0x171   :  { %v1315_v18 = vpop.f32.mrf.mxu2  ;;  %v11795_v53 = vld [vmem:[#allocation9 + $0x6ec] sm:$0xf] }
 0x172   :  { %v1328_v19 = vpop.f32.mrf.mxu3  ;;  %v1316_v21 = vadd.f32 %v1315_v18, %v1303_v13  ;;  %v11781_v13 = vld [vmem:[#allocation9 + $0x674] sm:$0xf0]  ;;  %v8578_v18 = vld [vmem:[#allocation9 + $0x5d8] sm:$0xf0]  ;;  %v8725_v61 = vor.u32 %v11795_v53, %v8722_v54  ;;  %v11823_v54 = vld [vmem:[#allocation9 + $0x7cc] sm:$0xf] }
 0x173   :  { %2282 = vmatpush.bf16.msrb.mxu0 %v8369_v4  ;;  %2291 = vmatpush.bf16.msrb.mxu1 %v8561_v6  ;;  %v8594_v4 = vld [vmem:[#allocation9 + $0x5f8] sm:$0xf0]  ;;  %v8581_v5 = vor.u32 %v11759_v17, %v8578_v18 }
 0x174   :  { %v1329_v30 = vadd.f32 %v1328_v19, %v1316_v21  ;;  %v8597_v12 = vor.u32 %v11763_v3, %v8594_v4  ;;  %v8657_v19 = vor.u32 %v11781_v13, %v8656_v11  ;;  %v8389_v21 = vor.u32 %v11711_v15, %v8386_v16  ;;  %v8514_v3 = vld [vmem:[#allocation9 + $0x558] sm:$0xf0]  ;;  %v11791_v4 = vld [vmem:[#allocation9 + $0x6cc] sm:$0xf]  ;;  %v8816_v11 = vld [vmem:[#allocation9 + $0x7a8] sm:$0xf] }
 0x175   :  { %v11739_v13 = vld [vmem:[#allocation9 + $0x52c] sm:$0xf]  ;;  %v8498_v15 = vld [vmem:[#allocation9 + $0x538] sm:$0xf0] }
 0x176   :  { %v1386_v35 = vmax.f32 %v1329_v30, 0.0  ;;  %v11787_v16 = vld [vmem:[#allocation9 + $0x6ac] sm:$0xf]  ;;  %v8690_v17 = vld [vmem:[#allocation9 + $0x6b8] sm:$0xf0] }
 0x177   :  { %2283 = vmatpush.bf16.msrb.mxu0 %v8353_v22  ;;  %2292 = vmatpush.bf16.msrb.mxu1 %v8545_v23  ;;  %v8640_v22 = vld [vmem:[#allocation9 + $0x648] sm:$0xf] }
 0x178   :  { %v12828_v40 = vpack.c.bf16 %v1386_v35, %v1386_v35  ;;  %v8641_v31 = vor.u32 %v11777_v24, %v8640_v22  ;;  %v8565_v35 = vor.u32 %v11755_v28, %v8562_v29  ;;  %v11817_v22 = vld [vmem:[#allocation9 + $0x794] sm:$0xf0]  ;;  %v11783_v24 = vld [vmem:[#allocation9 + $0x68c] sm:$0xf]  ;;  %v8784_v29 = vld [vmem:[#allocation9 + $0x768] sm:$0xf] }
 0x179   :  { %v1317_v44 = vpop.f32.mrf.mxu2 }
 0x17a   :  { %v1330_v45 = vpop.f32.mrf.mxu3  ;;  %2245 = vmatmul.bf16.vlgmr.msra.gmra.mxu1 %v12823_v14  ;;  %2284 = vmatmul.bf16.vlgmr.msrb.gmra.mxu0 %v12820_v0 }
 0x17b   :  { %2328 = vmatpush.bf16.msra.mxu0 %v8469_v26  ;;  %2206 = vmatmul.bf16.vlgmr.msrb.gmra.mxu2 %v12828_v40  ;;  %v8370_v26 = vld [vmem:[#allocation9 + $0x438] sm:$0xf0]  ;;  %v8608_v45 = vld [vmem:[#allocation9 + $0x608] sm:$0xf] }
 0x17c   :  { %2293 = vmatpush.bf16.msrb.mxu1 %v8529_v51  ;;  %2302 = vmatpush.bf16.msrb.mxu2 %v8721_v36  ;;  %v8373_v32 = vor.u32 %v11707_v25, %v8370_v26  ;;  %v11773_v51 = vld [vmem:[#allocation9 + $0x634] sm:$0xf0]  ;;  %v11703_v36 = vld [vmem:[#allocation9 + $0x40c] sm:$0xf]  ;;  %v8674_v25 = vld [vmem:[#allocation9 + $0x698] sm:$0xf0] }
 0x17d   :  { %v8625_v43 = vor.u32 %v11773_v51, %v8624_v33  ;;  %v8677_v28 = vor.u32 %v11783_v24, %v8674_v25  ;;  %v11809_v51 = vld [vmem:[#allocation9 + $0x754] sm:$0xf0]  ;;  %v11848_v24 = vld [vmem:[#allocation9 + $0x88c] sm:$0xf0]  ;;  %v8904_v25 = vld [vmem:[#allocation9 + $0x860] sm:$0xf] }
 0x17f   :  { %2329 = vmatpush.bf16.msra.mxu0 %v8453_v56  ;;  %v8354_v56 = vld [vmem:[#allocation9 + $0x418] sm:$0xf0] }
 0x180   :  { %2294 = vmatpush.bf16.msrb.mxu1 %v8513_v46  ;;  %2303 = vmatpush.bf16.msrb.mxu2 %v8705_v47  ;;  %v8357_v44 = vor.u32 %v11703_v36, %v8354_v56  ;;  %v11769_v46 = vld [vmem:[#allocation9 + $0x614] sm:$0xf0]  ;;  %v11775_v36 = vld [vmem:[#allocation9 + $0x64c] sm:$0xf]  ;;  %v8642_v56 = vld [vmem:[#allocation9 + $0x658] sm:$0xf0] }
 0x183   :  { %2330 = vmatpush.bf16.msra.mxu0 %v8437_v48  ;;  %v8549_v48 = vor.u32 %v11751_v38, %v8546_v39  ;;  %v8645_v38 = vor.u32 %v11775_v36, %v8642_v56  ;;  %v8752_v39 = vld [vmem:[#allocation9 + $0x728] sm:$0xf]  ;;  %v11888_v36 = vld [vmem:[#allocation9 + $0x9cc] sm:$0xf0] }
 0x184   :  { %v1341_v2 = vpop.f32.mrf.mxu0  ;;  %2295 = vmatpush.bf16.msrb.mxu1 %v8497_v55  ;;  %2304 = vmatpush.bf16.msrb.mxu2 %v8689_v57  ;;  %v8609_v57 = vor.u32 %v11769_v46, %v8608_v45  ;;  %v8736_v46 = vld [vmem:[#allocation9 + $0x708] sm:$0xf] }
 0x185   :  { %v1342_v23 = vadd.f32 %v1341_v2, %v531_v8  ;;  %v8833_v8 = vor.u32 %v11825_v63, %v8832_v62  ;;  %v11815_v62 = vld [vmem:[#allocation9 + $0x78c] sm:$0xf]  ;;  %v8802_v63 = vld [vmem:[#allocation9 + $0x798] sm:$0xf0] }
 0x187   :  { %v1354_v6 = vpop.f32.mrf.mxu1  ;;  %2331 = vmatpush.bf16.msra.mxu0 %v8421_v58  ;;  %v8849_v58 = vor.u32 %v11829_v49, %v8848_v20  ;;  %v8610_v20 = vld [vmem:[#allocation9 + $0x618] sm:$0xf0]  ;;  %v11827_v49 = vld [vmem:[#allocation9 + $0x7ec] sm:$0xf] }
 0x188   :  { %2296 = vmatpush.bf16.msrb.mxu1 %v8481_v7  ;;  %2305 = vmatpush.bf16.msrb.mxu2 %v8673_v9  ;;  %v1355_v34 = vadd.f32 %v1354_v6, %v1342_v23  ;;  %v8706_v6 = vld [vmem:[#allocation9 + $0x6d8] sm:$0xf0]  ;;  %v8517_v9 = vor.u32 %v11743_v1, %v8514_v3  ;;  %v11735_v23 = vld [vmem:[#allocation9 + $0x50c] sm:$0xf]  ;;  %v8853_v53 = vor.u32 %v11827_v49, %v8850_v50  ;;  %v8970_v49 = vld [vmem:[#allocation9 + $0x8f0] sm:$0xf0] }
 0x189   :  { %v8805_v1 = vor.u32 %v11815_v62, %v8802_v63  ;;  %v8786_v3 = vld [vmem:[#allocation9 + $0x778] sm:$0xf0] }
 0x18b   :  { %2332 = vmatpush.bf16.msra.mxu0 %v8405_v10  ;;  %2297 = vmatmul.bf16.vlgmr.msrb.gmra.mxu1 %v12823_v14  ;;  %v8709_v10 = vor.u32 %v11791_v4, %v8706_v6  ;;  %v8968_v4 = vld [vmem:[#allocation9 + $0x8e0] sm:$0xf]  ;;  %v11860_v6 = vld [vmem:[#allocation9 + $0x8ec] sm:$0xf0] }
 0x18c   :  { %2341 = vmatpush.bf16.msra.mxu1 %v8597_v12  ;;  %v1343_v27 = vpop.f32.mrf.mxu0  ;;  %2258 = vmatmul.bf16.vlgmr.msra.gmra.mxu2 %v12828_v40  ;;  %v11821_v12 = vld [vmem:[#allocation9 + $0x7b4] sm:$0xf0] }
 0x18d   :  { %2306 = vmatpush.bf16.msrb.mxu2 %v8657_v19  ;;  %v8817_v18 = vor.u32 %v11821_v12, %v8816_v11  ;;  %v8693_v19 = vor.u32 %v11787_v16, %v8690_v17  ;;  %v11803_v12 = vld [vmem:[#allocation9 + $0x72c] sm:$0xf] }
 0x18f   :  { %v1356_v30 = vpop.f32.mrf.mxu1  ;;  %2333 = vmatpush.bf16.msra.mxu0 %v8389_v21  ;;  %v8800_v21 = vld [vmem:[#allocation9 + $0x788] sm:$0xf] }
 0x190   :  { %2342 = vmatpush.bf16.msra.mxu1 %v8581_v5  ;;  %v8482_v5 = vld [vmem:[#allocation9 + $0x518] sm:$0xf0]  ;;  %v8801_v26 = vor.u32 %v11817_v22, %v8800_v21  ;;  %v11813_v30 = vld [vmem:[#allocation9 + $0x774] sm:$0xf0] }
 0x191   :  { %v1367_v37 = vpop.f32.mrf.mxu2  ;;  %2307 = vmatpush.bf16.msrb.mxu2 %v8641_v31  ;;  %v8485_v27 = vor.u32 %v11735_v23, %v8482_v5  ;;  %v11779_v31 = vld [vmem:[#allocation9 + $0x66c] sm:$0xf]  ;;  %v8785_v33 = vor.u32 %v11813_v30, %v8784_v29  ;;  %v8738_v21 = vld [vmem:[#allocation9 + $0x718] sm:$0xf0]  ;;  %v8920_v5 = vld [vmem:[#allocation9 + $0x880] sm:$0xf] }
 0x192   :  { %v1368_v41 = vadd.f32 %v1367_v37, %v1355_v34  ;;  %v1380_v42 = vpop.f32.mrf.mxu3  ;;  %v11892_v29 = vld [vmem:[#allocation9 + $0x9ec] sm:$0xf0] }
 0x193   :  { %2334 = vmatpush.bf16.msra.mxu0 %v8373_v32  ;;  %v8658_v32 = vld [vmem:[#allocation9 + $0x678] sm:$0xf0] }
 0x194   :  { %v1381_v47 = vadd.f32 %v1380_v42, %v1368_v41  ;;  %2343 = vmatpush.bf16.msra.mxu1 %v8565_v35  ;;  %v8661_v34 = vor.u32 %v11779_v31, %v8658_v32  ;;  %v8768_v35 = vld [vmem:[#allocation9 + $0x748] sm:$0xf]  ;;  %v11805_v41 = vld [vmem:[#allocation9 + $0x734] sm:$0xf0]  ;;  %v11771_v42 = vld [vmem:[#allocation9 + $0x62c] sm:$0xf] }
 0x195   :  { %2308 = vmatpush.bf16.msrb.mxu2 %v8625_v43  ;;  %v8769_v37 = vor.u32 %v11809_v51, %v8768_v35  ;;  %v8626_v43 = vld [vmem:[#allocation9 + $0x638] sm:$0xf0]  ;;  %v9080_v51 = vld [vmem:[#allocation9 + $0x9c0] sm:$0xf] }
 0x196   :  { %v1387_v55 = vmax.f32 %v1381_v47, 0.0  ;;  %v8629_v45 = vor.u32 %v11771_v42, %v8626_v43  ;;  %v11801_v47 = vld [vmem:[#allocation9 + $0x714] sm:$0xf0]  ;;  %v9081_v56 = vor.u32 %v11888_v36, %v9080_v51  ;;  %v11884_v42 = vld [vmem:[#allocation9 + $0x9ac] sm:$0xf0] }
 0x197   :  { %2335 = vmatpush.bf16.msra.mxu0 %v8357_v44  ;;  %v8753_v44 = vor.u32 %v11805_v41, %v8752_v39  ;;  %v8737_v52 = vor.u32 %v11801_v47, %v8736_v46  ;;  %v9064_v39 = vld [vmem:[#allocation9 + $0x9a0] sm:$0xf]  ;;  %v11908_v51 = vld [vmem:[#allocation9 + $0xa6c] sm:$0xf0] }
 0x198   :  { %v12836_v59 = vpack.c.bf16 %v1387_v55, %v1387_v55  ;;  %2344 = vmatpush.bf16.msra.mxu1 %v8549_v48  ;;  %v11767_v48 = vld [vmem:[#allocation9 + $0x60c] sm:$0xf]  ;;  %v8834_v55 = vld [vmem:[#allocation9 + $0x7d8] sm:$0xf0]  ;;  %v9048_v46 = vld [vmem:[#allocation9 + $0x980] sm:$0xf] }
 0x199   :  { %v1369_v2 = vpop.f32.mrf.mxu2  ;;  %2309 = vmatpush.bf16.msrb.mxu2 %v8609_v57  ;;  %v8837_v57 = vor.u32 %v11823_v54, %v8834_v55  ;;  %v9224_v54 = vld [vmem:[#allocation9 + $0xae0] sm:$0xf] }
 0x19a   :  { %v1382_v7 = vpop.f32.mrf.mxu3  ;;  %2219 = vmatmul.bf16.vlgmr.msrb.gmra.mxu3 %v12836_v59  ;;  %2336 = vmatmul.bf16.vlgmr.msra.gmra.mxu0 %v12820_v0  ;;  %v8501_v0 = vor.u32 %v11739_v13, %v8498_v15  ;;  %v11811_v2 = vld [vmem:[#allocation9 + $0x76c] sm:$0xf]  ;;  %v8952_v13 = vld [vmem:[#allocation9 + $0x8c0] sm:$0xf]  ;;  %v11856_v15 = vld [vmem:[#allocation9 + $0x8cc] sm:$0xf0] }
 0x19b   :  { %2315 = vmatpush.bf16.msrb.mxu3 %v8849_v58  ;;  %v11819_v58 = vld [vmem:[#allocation9 + $0x7ac] sm:$0xf]  ;;  %v8969_v7 = vor.u32 %v11860_v6, %v8968_v4  ;;  %v8953_v17 = vor.u32 %v11856_v15, %v8952_v13  ;;  %v9208_v4 = vld [vmem:[#allocation9 + $0xac0] sm:$0xf] }
 0x19c   :  { %2345 = vmatpush.bf16.msra.mxu1 %v8533_v60  ;;  %2310 = vmatmul.bf16.vlgmr.msrb.gmra.mxu2 %v12828_v40  ;;  %v8818_v60 = vld [vmem:[#allocation9 + $0x7b8] sm:$0xf0]  ;;  %v9192_v13 = vld [vmem:[#allocation9 + $0xaa0] sm:$0xf] }
 0x19d   :  { %2354 = vmatpush.bf16.msra.mxu2 %v8725_v61  ;;  %v8821_v61 = vor.u32 %v11819_v58, %v8818_v60  ;;  %3168 = vmatpush.bf16.msrb.mxu0 %v8969_v7  ;;  %v11854_v58 = vld [vmem:[#allocation9 + $0x8c4] sm:$0xf]  ;;  %v8954_v60 = vld [vmem:[#allocation9 + $0x8d0] sm:$0xf0]  ;;  %v11920_v7 = vld [vmem:[#allocation9 + $0xacc] sm:$0xf0] }
 0x19f   :  { %2316 = vmatpush.bf16.msrb.mxu3 %v8833_v8  ;;  %v8789_v8 = vor.u32 %v11811_v2, %v8786_v3  ;;  %v9016_v2 = vld [vmem:[#allocation9 + $0x940] sm:$0xf]  ;;  %v11872_v3 = vld [vmem:[#allocation9 + $0x94c] sm:$0xf0] }
 0x1a0   :  { %2346 = vmatpush.bf16.msra.mxu1 %v8517_v9  ;;  %v11807_v9 = vld [vmem:[#allocation9 + $0x74c] sm:$0xf]  ;;  %v9017_v6 = vor.u32 %v11872_v3, %v9016_v2  ;;  %v9050_v3 = vld [vmem:[#allocation9 + $0x990] sm:$0xf0] }
 0x1a1   :  { %2355 = vmatpush.bf16.msra.mxu2 %v8709_v10  ;;  %v8770_v10 = vld [vmem:[#allocation9 + $0x758] sm:$0xf0]  ;;  %3169 = vmatpush.bf16.msrb.mxu0 %v8953_v17  ;;  %v11846_v17 = vld [vmem:[#allocation9 + $0x884] sm:$0xf] }
 0x1a2   :  { %v8773_v11 = vor.u32 %v11807_v9, %v8770_v10  ;;  %v8938_v9 = vld [vmem:[#allocation9 + $0x8b0] sm:$0xf0]  ;;  %v9209_v10 = vor.u32 %v11920_v7, %v9208_v4  ;;  %v11896_v7 = vld [vmem:[#allocation9 + $0xa0c] sm:$0xf0] }
 0x1a3   :  { %2317 = vmatpush.bf16.msrb.mxu3 %v8817_v18  ;;  %v8936_v18 = vld [vmem:[#allocation9 + $0x8a0] sm:$0xf] }
 0x1a4   :  { %2347 = vmatpush.bf16.msra.mxu1 %v8501_v0  ;;  %v11852_v0 = vld [vmem:[#allocation9 + $0x8ac] sm:$0xf0] }
 0x1a5   :  { %2356 = vmatpush.bf16.msra.mxu2 %v8693_v19  ;;  %v11799_v19 = vld [vmem:[#allocation9 + $0x70c] sm:$0xf]  ;;  %v8937_v22 = vor.u32 %v11852_v0, %v8936_v18  ;;  %v8922_v18 = vld [vmem:[#allocation9 + $0x890] sm:$0xf0] }
 0x1a6   :  { %v8741_v23 = vor.u32 %v11799_v19, %v8738_v21 }
 0x1a7   :  { %2318 = vmatpush.bf16.msrb.mxu3 %v8801_v26  ;;  %3170 = vmatpush.bf16.msrb.mxu0 %v8937_v22  ;;  %v8921_v26 = vor.u32 %v11848_v24, %v8920_v5  ;;  %v8925_v22 = vor.u32 %v11846_v17, %v8922_v18  ;;  %v11864_v5 = vld [vmem:[#allocation9 + $0x90c] sm:$0xf0]  ;;  %v9176_v24 = vld [vmem:[#allocation9 + $0xa80] sm:$0xf] }
 0x1a8   :  { %2348 = vmatpush.bf16.msra.mxu1 %v8485_v27  ;;  %v11844_v27 = vld [vmem:[#allocation9 + $0x86c] sm:$0xf0]  ;;  %v9336_v18 = vld [vmem:[#allocation9 + $0xbc0] sm:$0xf] }
 0x1a9   :  { %2357 = vmatpush.bf16.msra.mxu2 %v8677_v28  ;;  %v9096_v28 = vld [vmem:[#allocation9 + $0x9e0] sm:$0xf]  ;;  %v8905_v31 = vor.u32 %v11844_v27, %v8904_v25  ;;  %v11912_v25 = vld [vmem:[#allocation9 + $0xa8c] sm:$0xf0] }
 0x1aa   :  { %2271 = vmatmul.bf16.vlgmr.msra.gmra.mxu3 %v12836_v59  ;;  %v9097_v30 = vor.u32 %v11892_v29, %v9096_v28  ;;  %v9177_v27 = vor.u32 %v11912_v25, %v9176_v24  ;;  %v11842_v28 = vld [vmem:[#allocation9 + $0x864] sm:$0xf]  ;;  %v8906_v29 = vld [vmem:[#allocation9 + $0x870] sm:$0xf0] }
 0x1ab   :  { %2319 = vmatpush.bf16.msrb.mxu3 %v8785_v33  ;;  %2349 = vmatmul.bf16.vlgmr.msra.gmra.mxu1 %v12823_v14  ;;  %v8613_v14 = vor.u32 %v11767_v48, %v8610_v20  ;;  %v8888_v33 = vld [vmem:[#allocation9 + $0x840] sm:$0xf]  ;;  %v11880_v48 = vld [vmem:[#allocation9 + $0x98c] sm:$0xf0]  ;;  %v11858_v20 = vld [vmem:[#allocation9 + $0x8e4] sm:$0xf] }
 0x1ac   :  { %3171 = vmatpush.bf16.msrb.mxu0 %v8921_v26  ;;  %3181 = vmatpush.bf16.msrb.mxu1 %v9097_v30  ;;  %v9049_v50 = vor.u32 %v11880_v48, %v9048_v46  ;;  %v11890_v30 = vld [vmem:[#allocation9 + $0x9e4] sm:$0xf]  ;;  %v8874_v48 = vld [vmem:[#allocation9 + $0x830] sm:$0xf0] }
 0x1ad   :  { %2358 = vmatpush.bf16.msra.mxu2 %v8661_v34  ;;  %v11840_v34 = vld [vmem:[#allocation9 + $0x84c] sm:$0xf0] }
 0x1ae   :  { %v8889_v35 = vor.u32 %v11840_v34, %v8888_v33  ;;  %v9098_v33 = vld [vmem:[#allocation9 + $0x9f0] sm:$0xf0] }
 0x1af   :  { %2320 = vmatpush.bf16.msrb.mxu3 %v8769_v37  ;;  %v8872_v37 = vld [vmem:[#allocation9 + $0x820] sm:$0xf]  ;;  %v9101_v34 = vor.u32 %v11890_v30, %v9098_v33  ;;  %v9002_v33 = vld [vmem:[#allocation9 + $0x930] sm:$0xf0] }
 0x1b0   :  { %3172 = vmatpush.bf16.msrb.mxu0 %v8905_v31  ;;  %3182 = vmatpush.bf16.msrb.mxu1 %v9081_v56  ;;  %v8909_v31 = vor.u32 %v11842_v28, %v8906_v29  ;;  %v11838_v56 = vld [vmem:[#allocation9 + $0x844] sm:$0xf]  ;;  %v9320_v28 = vld [vmem:[#allocation9 + $0xba0] sm:$0xf]  ;;  %v11948_v29 = vld [vmem:[#allocation9 + $0xbac] sm:$0xf0] }
 0x1b1   :  { %2359 = vmatpush.bf16.msra.mxu2 %v8645_v38  ;;  %v11836_v38 = vld [vmem:[#allocation9 + $0x82c] sm:$0xf0]  ;;  %v9321_v30 = vor.u32 %v11948_v29, %v9320_v28  ;;  %v8960_v28 = vld [vmem:[#allocation9 + $0x8c8] sm:$0xf]  ;;  %v11857_v29 = vld [vmem:[#allocation9 + $0x8d4] sm:$0xf0] }
 0x1b2   :  { %v8873_v41 = vor.u32 %v11836_v38, %v8872_v37  ;;  %v8890_v37 = vld [vmem:[#allocation9 + $0x850] sm:$0xf0]  ;;  %v11886_v38 = vld [vmem:[#allocation9 + $0x9c4] sm:$0xf] }
 0x1b3   :  { %2321 = vmatpush.bf16.msrb.mxu3 %v8753_v44  ;;  %v9065_v44 = vor.u32 %v11884_v42, %v9064_v39  ;;  %v8893_v42 = vor.u32 %v11838_v56, %v8890_v37  ;;  %v12860_v56 = vld [vmem:[#allocation11 + $0x4] sm:$0xf]  ;;  %v9304_v37 = vld [vmem:[#allocation9 + $0xb80] sm:$0xf] }
 0x1b4   :  { %3173 = vmatpush.bf16.msrb.mxu0 %v8889_v35  ;;  %v9160_v35 = vld [vmem:[#allocation9 + $0xa60] sm:$0xf] }
 0x1b5   :  { %2360 = vmatpush.bf16.msra.mxu2 %v8629_v45  ;;  %v8856_v45 = vld [vmem:[#allocation9 + $0x800] sm:$0xf]  ;;  %3183 = vmatpush.bf16.msrb.mxu1 %v9065_v44  ;;  %v9161_v36 = vor.u32 %v11908_v51, %v9160_v35  ;;  %v9194_v51 = vld [vmem:[#allocation9 + $0xab0] sm:$0xf0] }
 0x1b7   :  { %2322 = vmatpush.bf16.msrb.mxu3 %v8737_v52  ;;  %v8973_v52 = vor.u32 %v11858_v20, %v8970_v49  ;;  %v11882_v20 = vld [vmem:[#allocation9 + $0x9a4] sm:$0xf] }
 0x1b8   :  { %3174 = vmatpush.bf16.msrb.mxu0 %v8873_v41 }
 0x1b9   :  { %2361 = vmatpush.bf16.msra.mxu2 %v8613_v14  ;;  %3184 = vmatpush.bf16.msrb.mxu1 %v9049_v50  ;;  %v9032_v14 = vld [vmem:[#allocation9 + $0x960] sm:$0xf]  ;;  %v9066_v50 = vld [vmem:[#allocation9 + $0x9b0] sm:$0xf0] }
 0x1ba   :  { %2323 = vmatmul.bf16.vlgmr.msrb.gmra.mxu3 %v12836_v59 }
 0x1bb   :  { %2367 = vmatpush.bf16.msra.mxu3 %v8853_v53  ;;  %v11876_v53 = vld [vmem:[#allocation9 + $0x96c] sm:$0xf0] }
 0x1bc   :  { %2362 = vmatmul.bf16.vlgmr.msra.gmra.mxu2 %v12828_v40  ;;  %v8754_v40 = vld [vmem:[#allocation9 + $0x738] sm:$0xf0]  ;;  %v9033_v55 = vor.u32 %v11876_v53, %v9032_v14  ;;  %v9128_v14 = vld [vmem:[#allocation9 + $0xa20] sm:$0xf]  ;;  %v11900_v53 = vld [vmem:[#allocation9 + $0xa2c] sm:$0xf0] }
 0x1bd   :  { %v8757_v16 = vor.u32 %v11803_v12, %v8754_v40  ;;  %v9000_v12 = vld [vmem:[#allocation9 + $0x920] sm:$0xf]  ;;  %v11868_v40 = vld [vmem:[#allocation9 + $0x92c] sm:$0xf0] }
 0x1be   :  { %3185 = vmatpush.bf16.msrb.mxu1 %v9033_v55  ;;  %v9001_v15 = vor.u32 %v11868_v40, %v9000_v12  ;;  %v9129_v55 = vor.u32 %v11900_v53, %v9128_v14  ;;  %v9034_v12 = vld [vmem:[#allocation9 + $0x970] sm:$0xf0]  ;;  %v11906_v53 = vld [vmem:[#allocation9 + $0xa64] sm:$0xf] }
 0x1bf   :  { %2368 = vmatpush.bf16.msra.mxu3 %v8837_v57  ;;  %v11924_v57 = vld [vmem:[#allocation9 + $0xaec] sm:$0xf0] }
 0x1c0   :  { %v9225_v63 = vor.u32 %v11924_v57, %v9224_v54  ;;  %v11830_v57 = vld [vmem:[#allocation9 + $0x804] sm:$0xf] }
 0x1c2   :  { %3194 = vmatpush.bf16.msrb.mxu2 %v9225_v63  ;;  %3186 = vmatpush.bf16.msrb.mxu1 %v9017_v6  ;;  %v9112_v6 = vld [vmem:[#allocation9 + $0xa00] sm:$0xf] }
 0x1c3   :  { %2369 = vmatpush.bf16.msra.mxu3 %v8821_v61 }
 0x1c6   :  { %3195 = vmatpush.bf16.msrb.mxu2 %v9209_v10  ;;  %3187 = vmatpush.bf16.msrb.mxu1 %v9001_v15  ;;  %v11956_v10 = vld [vmem:[#allocation9 + $0xbec] sm:$0xf0]  ;;  %v11922_v15 = vld [vmem:[#allocation9 + $0xae4] sm:$0xf] }
 0x1c7   :  { %2370 = vmatpush.bf16.msra.mxu3 %v8805_v1  ;;  %v8957_v1 = vor.u32 %v11854_v58, %v8954_v60  ;;  %v8858_v58 = vld [vmem:[#allocation9 + $0x810] sm:$0xf0]  ;;  %v11878_v60 = vld [vmem:[#allocation9 + $0x984] sm:$0xf] }
 0x1c8   :  { %v8861_v2 = vor.u32 %v11830_v57, %v8858_v58  ;;  %v9053_v4 = vor.u32 %v11878_v60, %v9050_v3 }
 0x1cb   :  { %2371 = vmatpush.bf16.msra.mxu3 %v8789_v8  ;;  %v11850_v8 = vld [vmem:[#allocation9 + $0x8a4] sm:$0xf] }
 0x1cf   :  { %2372 = vmatpush.bf16.msra.mxu3 %v8773_v11  ;;  %v8941_v11 = vor.u32 %v11850_v8, %v8938_v9  ;;  %v9352_v8 = vld [vmem:[#allocation9 + $0xbe0] sm:$0xf]  ;;  %v9113_v9 = vor.u32 %v11896_v7, %v9112_v6  ;;  %v9146_v6 = vld [vmem:[#allocation9 + $0xa50] sm:$0xf0] }
 0x1d0   :  { %v9353_v40 = vor.u32 %v11956_v10, %v9352_v8  ;;  %v9256_v10 = vld [vmem:[#allocation9 + $0xb20] sm:$0xf] }
 0x1d3   :  { %2373 = vmatpush.bf16.msra.mxu3 %v8757_v16  ;;  %v11916_v16 = vld [vmem:[#allocation9 + $0xaac] sm:$0xf0] }
 0x1d4   :  { %v9193_v21 = vor.u32 %v11916_v16, %v9192_v13  ;;  %v9226_v16 = vld [vmem:[#allocation9 + $0xaf0] sm:$0xf0] }
 0x1d5   :  { %v9229_v17 = vor.u32 %v11922_v15, %v9226_v16  ;;  %v8976_v16 = vld [vmem:[#allocation9 + $0x8e8] sm:$0xf] }
 0x1d6   :  { %3196 = vmatpush.bf16.msrb.mxu2 %v9193_v21 }
 0x1d7   :  { %2374 = vmatpush.bf16.msra.mxu3 %v8741_v23  ;;  %v12846_v32 = vpop.f32.mrf.mxu0  ;;  %v8984_v23 = vld [vmem:[#allocation9 + $0x900] sm:$0xf] }
 0x1d8   :  { %v8985_v26 = vor.u32 %v11864_v5, %v8984_v23  ;;  %v9018_v23 = vld [vmem:[#allocation9 + $0x950] sm:$0xf0]  ;;  %v11918_v5 = vld [vmem:[#allocation9 + $0xac4] sm:$0xf] }
 0x1da   :  { %2375 = vmatmul.bf16.vlgmr.msra.gmra.mxu3 %v12836_v59  ;;  %v11832_v59 = vld [vmem:[#allocation9 + $0x80c] sm:$0xf0]  ;;  %3188 = vmatpush.bf16.msrb.mxu1 %v8985_v26  ;;  %v9210_v26 = vld [vmem:[#allocation9 + $0xad0] sm:$0xf0] }
 0x1db   :  { %v8857_v47 = vor.u32 %v11832_v59, %v8856_v45  ;;  %3197 = vmatpush.bf16.msrb.mxu2 %v9177_v27  ;;  %v9144_v45 = vld [vmem:[#allocation9 + $0xa40] sm:$0xf]  ;;  %v11904_v59 = vld [vmem:[#allocation9 + $0xa4c] sm:$0xf0]  ;;  %3207 = vmatpush.bf16.msrb.mxu3 %v9353_v40  ;;  %v9213_v27 = vor.u32 %v11918_v5, %v9210_v26  ;;  %v11894_v5 = vld [vmem:[#allocation9 + $0xa04] sm:$0xf] }
 0x1dc   :  { %v9145_v46 = vor.u32 %v11904_v59, %v9144_v45  ;;  %v8986_v45 = vld [vmem:[#allocation9 + $0x910] sm:$0xf0]  ;;  %v11910_v59 = vld [vmem:[#allocation9 + $0xa84] sm:$0xf] }
 0x1dd   :  { %3175 = vmatpush.bf16.msrb.mxu0 %v8857_v47  ;;  %v11834_v47 = vld [vmem:[#allocation9 + $0x824] sm:$0xf] }
 0x1de   :  { %3233 = vmatpush.bf16.msra.mxu1 %v9101_v34  ;;  %v8877_v49 = vor.u32 %v11834_v47, %v8874_v48  ;;  %v11914_v34 = vld [vmem:[#allocation9 + $0xaa4] sm:$0xf]  ;;  %v9178_v48 = vld [vmem:[#allocation9 + $0xa90] sm:$0xf0] }
 0x1df   :  { %v2183_v43 = vpop.f32.mrf.mxu0  ;;  %3198 = vmatpush.bf16.msrb.mxu2 %v9161_v36  ;;  %v9197_v36 = vor.u32 %v11914_v34, %v9194_v51  ;;  %v11954_v26 = vld [vmem:[#allocation9 + $0xbe4] sm:$0xf]  ;;  %v1525_v34 = vperm.slane %v12860_v56, 1  ;;  %v8961_v51 = vor.u32 %v11857_v29, %v8960_v28 }
 0x1e0   :  { %v9082_v43 = vld [vmem:[#allocation9 + $0x9d0] sm:$0xf0] }
 0x1e1   :  { %3220 = vmatpush.bf16.msra.mxu0 %v8973_v52  ;;  %v9085_v44 = vor.u32 %v11886_v38, %v9082_v43  ;;  %v9069_v52 = vor.u32 %v11882_v20, %v9066_v50  ;;  %v11944_v38 = vld [vmem:[#allocation9 + $0xb8c] sm:$0xf0]  ;;  %v9181_v20 = vor.u32 %v11910_v59, %v9178_v48  ;;  %v9288_v50 = vld [vmem:[#allocation9 + $0xb60] sm:$0xf]  ;;  %v8928_v48 = vld [vmem:[#allocation9 + $0x888] sm:$0xf] }
 0x1e2   :  { %v9305_v43 = vor.u32 %v11944_v38, %v9304_v37  ;;  %v11853_v37 = vld [vmem:[#allocation9 + $0x8b4] sm:$0xf0]  ;;  %v11950_v38 = vld [vmem:[#allocation9 + $0xbc4] sm:$0xf] }
 0x1e3   :  { %3234 = vmatpush.bf16.msra.mxu1 %v9085_v44  ;;  %3199 = vmatpush.bf16.msrb.mxu2 %v9145_v46  ;;  %v11862_v44 = vld [vmem:[#allocation9 + $0x904] sm:$0xf] }
 0x1e4   :  { %v8989_v47 = vor.u32 %v11862_v44, %v8986_v45 }
 0x1e5   :  { %3221 = vmatpush.bf16.msra.mxu0 %v8957_v1 }
 0x1e7   :  { %v12848_v61 = vpop.f32.mrf.mxu1  ;;  %v12850_v62 = vpop.f32.mrf.mxu0  ;;  %3235 = vmatpush.bf16.msra.mxu1 %v9069_v52  ;;  %3200 = vmatpush.bf16.msrb.mxu2 %v9129_v55  ;;  %v11940_v52 = vld [vmem:[#allocation9 + $0xb6c] sm:$0xf0]  ;;  %v9162_v55 = vld [vmem:[#allocation9 + $0xa70] sm:$0xf0] }
 0x1e8   :  { %v9289_v14 = vor.u32 %v11940_v52, %v9288_v50  ;;  %v9165_v57 = vor.u32 %v11906_v53, %v9162_v55  ;;  %v2234_v45 = vadd.f32 %v12850_v62, %v1525_v34  ;;  %v11946_v50 = vld [vmem:[#allocation9 + $0xba4] sm:$0xf]  ;;  %v9322_v52 = vld [vmem:[#allocation9 + $0xbb0] sm:$0xf0]  ;;  %v11845_v62 = vld [vmem:[#allocation9 + $0x874] sm:$0xf0] }
 0x1e9   :  { %3222 = vmatpush.bf16.msra.mxu0 %v8941_v11  ;;  %v11874_v11 = vld [vmem:[#allocation9 + $0x964] sm:$0xf] }
 0x1ea   :  { %v9037_v13 = vor.u32 %v11874_v11, %v9034_v12  ;;  %v11932_v11 = vld [vmem:[#allocation9 + $0xb2c] sm:$0xf0] }
 0x1eb   :  { %3236 = vmatpush.bf16.msra.mxu1 %v9053_v4  ;;  %3201 = vmatpush.bf16.msrb.mxu2 %v9113_v9  ;;  %v11902_v4 = vld [vmem:[#allocation9 + $0xa44] sm:$0xf]  ;;  %v9257_v40 = vor.u32 %v11932_v11, %v9256_v10  ;;  %v8896_v10 = vld [vmem:[#allocation9 + $0x848] sm:$0xf]  ;;  %v11841_v11 = vld [vmem:[#allocation9 + $0x854] sm:$0xf0] }
 0x1ec   :  { %v9149_v8 = vor.u32 %v11902_v4, %v9146_v6  ;;  %v9306_v4 = vld [vmem:[#allocation9 + $0xb90] sm:$0xf0] }
 0x1ed   :  { %3223 = vmatpush.bf16.msra.mxu0 %v8925_v22  ;;  %v11870_v22 = vld [vmem:[#allocation9 + $0x944] sm:$0xf] }
 0x1ee   :  { %v9021_v25 = vor.u32 %v11870_v22, %v9018_v23 }
 0x1ef   :  { %v2196_v0 = vpop.f32.mrf.mxu1  ;;  %v2235_v19 = vpop.f32.mrf.mxu0  ;;  %3237 = vmatpush.bf16.msra.mxu1 %v9037_v13  ;;  %3246 = vmatpush.bf16.msra.mxu2 %v9229_v17  ;;  %v9130_v13 = vld [vmem:[#allocation9 + $0xa30] sm:$0xf0]  ;;  %v11861_v17 = vld [vmem:[#allocation9 + $0x8f4] sm:$0xf0] }
 0x1f0   :  { %v11952_v0 = vld [vmem:[#allocation9 + $0xbcc] sm:$0xf0] }
 0x1f1   :  { %3224 = vmatpush.bf16.msra.mxu0 %v8909_v31  ;;  %v9337_v21 = vor.u32 %v11952_v0, %v9336_v18  ;;  %v11866_v31 = vld [vmem:[#allocation9 + $0x924] sm:$0xf] }
 0x1f2   :  { %v9005_v35 = vor.u32 %v11866_v31, %v9002_v33  ;;  %v9354_v31 = vld [vmem:[#allocation9 + $0xbf0] sm:$0xf0] }
 0x1f3   :  { %3208 = vmatpush.bf16.msrb.mxu3 %v9337_v21  ;;  %3238 = vmatpush.bf16.msra.mxu1 %v9021_v25  ;;  %v9240_v21 = vld [vmem:[#allocation9 + $0xb00] sm:$0xf]  ;;  %v9114_v25 = vld [vmem:[#allocation9 + $0xa10] sm:$0xf0]  ;;  %v9357_v33 = vor.u32 %v11954_v26, %v9354_v31  ;;  %v11833_v31 = vld [vmem:[#allocation9 + $0x814] sm:$0xf0] }
 0x1f4   :  { %3247 = vmatpush.bf16.msra.mxu2 %v9213_v27 }
 0x1f5   :  { %3225 = vmatpush.bf16.msra.mxu0 %v8893_v42 }
 0x1f7   :  { %v12852_v39 = vpop.f32.mrf.mxu1  ;;  %v12854_v41 = vpop.f32.mrf.mxu0  ;;  %3209 = vmatpush.bf16.msrb.mxu3 %v9321_v30  ;;  %3239 = vmatpush.bf16.msra.mxu1 %v9005_v35  ;;  %v9117_v30 = vor.u32 %v11894_v5, %v9114_v25  ;;  %v9274_v5 = vld [vmem:[#allocation9 + $0xb50] sm:$0xf0] }
 0x1f8   :  { %3248 = vmatpush.bf16.msra.mxu2 %v9197_v36  ;;  %v8944_v36 = vld [vmem:[#allocation9 + $0x8a8] sm:$0xf] }
 0x1f9   :  { %3226 = vmatpush.bf16.msra.mxu0 %v8877_v49  ;;  %v1524_v49 = vperm.slane %v12860_v56, 0 }
 0x1fb   :  { %3210 = vmatpush.bf16.msrb.mxu3 %v9305_v43  ;;  %3240 = vmatpush.bf16.msra.mxu1 %v8989_v47  ;;  %v2182_v60 = vadd.f32 %v12846_v32, %v1524_v49  ;;  %v11898_v32 = vld [vmem:[#allocation9 + $0xa24] sm:$0xf]  ;;  %v9338_v43 = vld [vmem:[#allocation9 + $0xbd0] sm:$0xf0]  ;;  %v8945_v47 = vor.u32 %v11853_v37, %v8944_v36  ;;  %v11849_v49 = vld [vmem:[#allocation9 + $0x894] sm:$0xf0] }
 0x1fc   :  { %3249 = vmatpush.bf16.msra.mxu2 %v9181_v20  ;;  %v9133_v18 = vor.u32 %v11898_v32, %v9130_v13  ;;  %v9341_v44 = vor.u32 %v11950_v38, %v9338_v43  ;;  %v2247_v20 = vadd.f32 %v12852_v39, %v2234_v45  ;;  %v11938_v32 = vld [vmem:[#allocation9 + $0xb64] sm:$0xf]  ;;  %v9290_v13 = vld [vmem:[#allocation9 + $0xb70] sm:$0xf0]  ;;  %v11859_v37 = vld [vmem:[#allocation9 + $0x8ec] sm:$0xf] }
 0x1fd   :  { %3227 = vmatpush.bf16.msra.mxu0 %v8861_v2  ;;  %v2195_v7 = vadd.f32 %v12848_v61, %v2182_v60  ;;  %v11928_v61 = vld [vmem:[#allocation9 + $0xb0c] sm:$0xf0]  ;;  %v8912_v60 = vld [vmem:[#allocation9 + $0x868] sm:$0xf]  ;;  %v9258_v36 = vld [vmem:[#allocation9 + $0xb30] sm:$0xf0] }
 0x1fe   :  { %v12856_v54 = vpop.f32.mrf.mxu2  ;;  %v9241_v23 = vor.u32 %v11928_v61, %v9240_v21  ;;  %v11837_v21 = vld [vmem:[#allocation9 + $0x834] sm:$0xf0]  ;;  %v9072_v61 = vld [vmem:[#allocation9 + $0x9a8] sm:$0xf]  ;;  %v8978_v38 = vld [vmem:[#allocation9 + $0x8f8] sm:$0xf0] }
 0x1ff   :  { %v2248_v63 = vpop.f32.mrf.mxu1  ;;  %v2287_v1 = vpop.f32.mrf.mxu0  ;;  %3211 = vmatpush.bf16.msrb.mxu3 %v9289_v14  ;;  %v2208_v9 = vadd.f32 %v12856_v54, %v2195_v7  ;;  %v8977_v54 = vor.u32 %v11861_v17, %v8976_v16  ;;  %v9325_v14 = vor.u32 %v11946_v50, %v9322_v52  ;;  %v1526_v16 = vperm.slane %v12860_v56, 2  ;;  %v9232_v50 = vld [vmem:[#allocation9 + $0xae8] sm:$0xf]  ;;  %v11926_v52 = vld [vmem:[#allocation9 + $0xb04] sm:$0xf] }
 0x200   :  { %v9272_v63 = vld [vmem:[#allocation9 + $0xb40] sm:$0xf]  ;;  %v11936_v1 = vld [vmem:[#allocation9 + $0xb4c] sm:$0xf0]  ;;  %3250 = vmatpush.bf16.msra.mxu2 %v9165_v57  ;;  %v8929_v57 = vor.u32 %v11849_v49, %v8928_v48  ;;  %v11877_v48 = vld [vmem:[#allocation9 + $0x974] sm:$0xf0] }
 0x201   :  { %v9273_v3 = vor.u32 %v11936_v1, %v9272_v63  ;;  %v9104_v63 = vld [vmem:[#allocation9 + $0x9e8] sm:$0xf]  ;;  %v2286_v26 = vadd.f32 %v12854_v41, %v1526_v16  ;;  %v11917_v16 = vld [vmem:[#allocation9 + $0xab4] sm:$0xf0] }
 0x203   :  { %3212 = vmatpush.bf16.msrb.mxu3 %v9273_v3  ;;  %v11942_v3 = vld [vmem:[#allocation9 + $0xb84] sm:$0xf] }
 0x204   :  { %3251 = vmatpush.bf16.msra.mxu2 %v9149_v8  ;;  %v9309_v6 = vor.u32 %v11942_v3, %v9306_v4  ;;  %v8913_v8 = vor.u32 %v11845_v62, %v8912_v60  ;;  %v9024_v3 = vld [vmem:[#allocation9 + $0x948] sm:$0xf]  ;;  %v11873_v4 = vld [vmem:[#allocation9 + $0x954] sm:$0xf0] }
 0x206   :  { %v2209_v19 = vpop.f32.mrf.mxu2 }
 0x207   :  { %3213 = vmatpush.bf16.msrb.mxu3 %v9257_v40  ;;  %v11889_v40 = vld [vmem:[#allocation9 + $0x9d4] sm:$0xf0] }
 0x208   :  { %v12858_v24 = vpop.f32.mrf.mxu1  ;;  %3252 = vmatpush.bf16.msra.mxu2 %v9133_v18  ;;  %v8897_v18 = vor.u32 %v11841_v11, %v8896_v10  ;;  %v9025_v10 = vor.u32 %v11873_v4, %v9024_v3  ;;  %v9058_v3 = vld [vmem:[#allocation9 + $0x998] sm:$0xf0] }
 0x209   :  { %v2299_v34 = vadd.f32 %v12858_v24, %v2286_v26  ;;  %v8981_v24 = vor.u32 %v11859_v37, %v8978_v38  ;;  %v8914_v26 = vld [vmem:[#allocation9 + $0x878] sm:$0xf0]  ;;  %v11887_v38 = vld [vmem:[#allocation9 + $0x9cc] sm:$0xf] }
 0x20a   :  { %v8898_v37 = vld [vmem:[#allocation9 + $0x858] sm:$0xf0] }
 0x20b   :  { %3214 = vmatpush.bf16.msrb.mxu3 %v9241_v23  ;;  %v11934_v23 = vld [vmem:[#allocation9 + $0xb44] sm:$0xf] }
 0x20c   :  { %3253 = vmatpush.bf16.msra.mxu2 %v9117_v30  ;;  %v9277_v25 = vor.u32 %v11934_v23, %v9274_v5  ;;  %v8864_v30 = vld [vmem:[#allocation9 + $0x808] sm:$0xf]  ;;  %v11913_v5 = vld [vmem:[#allocation9 + $0xa94] sm:$0xf0] }
 0x20d   :  { %v8865_v45 = vor.u32 %v11833_v31, %v8864_v30  ;;  %v9184_v23 = vld [vmem:[#allocation9 + $0xa88] sm:$0xf] }
 0x20e   :  { %v9185_v31 = vor.u32 %v11913_v5, %v9184_v23  ;;  %v11919_v23 = vld [vmem:[#allocation9 + $0xacc] sm:$0xf]  ;;  %v9218_v5 = vld [vmem:[#allocation9 + $0xad8] sm:$0xf0] }
 0x20f   :  { %v12862_v42 = vpop.f32.mrf.mxu2  ;;  %3259 = vmatpush.bf16.msra.mxu3 %v9357_v33  ;;  %v9056_v33 = vld [vmem:[#allocation9 + $0x988] sm:$0xf] }
 0x210   :  { %v2300_v46 = vpop.f32.mrf.mxu1  ;;  %v2260_v53 = vadd.f32 %v12862_v42, %v2247_v20  ;;  %v9088_v42 = vld [vmem:[#allocation9 + $0x9c8] sm:$0xf] }
 0x213   :  { %3260 = vmatpush.bf16.msra.mxu3 %v9341_v44 }
 0x217   :  { %v12865_v58 = vpop.f32.mrf.mxu0  ;;  %v2261_v2 = vpop.f32.mrf.mxu2  ;;  %3261 = vmatpush.bf16.msra.mxu3 %v9325_v14  ;;  %v9242_v14 = vld [vmem:[#allocation9 + $0xb10] sm:$0xf0] }
 0x218   :  { %v11893_v2 = vld [vmem:[#allocation9 + $0x9f4] sm:$0xf0]  ;;  %v9245_v60 = vor.u32 %v11926_v52, %v9242_v14  ;;  %v9074_v52 = vld [vmem:[#allocation9 + $0x9b8] sm:$0xf0] }
 0x21b   :  { %3262 = vmatpush.bf16.msra.mxu3 %v9309_v6  ;;  %v9216_v6 = vld [vmem:[#allocation9 + $0xac8] sm:$0xf] }
 0x21d   :  { %v2220_v12 = vpop.f32.mrf.mxu3 }
 0x21e   :  { %v2221_v15 = vadd.f32 %v2220_v12, %v2208_v9  ;;  %v9105_v9 = vor.u32 %v11893_v2, %v9104_v63 }
 0x21f   :  { %v2339_v0 = vpop.f32.mrf.mxu0  ;;  %v12870_v22 = vpop.f32.mrf.mxu2 }
 0x220   :  { %v2380_v19 = vmax.f32 %v2221_v15, 0.0  ;;  %v9293_v15 = vor.u32 %v11938_v32, %v9290_v13  ;;  %v9089_v0 = vor.u32 %v11889_v40, %v9088_v42  ;;  %v2312_v44 = vadd.f32 %v12870_v22, %v2299_v34  ;;  %v9008_v32 = vld [vmem:[#allocation9 + $0x928] sm:$0xf]  ;;  %v11869_v13 = vld [vmem:[#allocation9 + $0x934] sm:$0xf0] }
 0x221   :  { %v9168_v34 = vld [vmem:[#allocation9 + $0xa68] sm:$0xf] }
 0x222   :  { %v12872_v27 = vpack.c.bf16 %v2380_v19, %v2380_v19  ;;  %v8880_v19 = vld [vmem:[#allocation9 + $0x828] sm:$0xf]  ;;  %3263 = vmatpush.bf16.msra.mxu3 %v9293_v15 }
 0x223   :  { %v8881_v28 = vor.u32 %v11837_v21, %v8880_v19  ;;  %v9200_v15 = vld [vmem:[#allocation9 + $0xaa8] sm:$0xf] }
 0x224   :  { %3176 = vmatmul.bf16.vlgmr.msrb.gmra.mxu0 %v12872_v27  ;;  %v9201_v19 = vor.u32 %v11917_v16, %v9200_v15 }
 0x225   :  { %3272 = vmatpush.bf16.msrb.mxu0 %v8977_v54  ;;  %v2222_v35 = vpop.f32.mrf.mxu3  ;;  %v11885_v54 = vld [vmem:[#allocation9 + $0x9b4] sm:$0xf0] }
 0x226   :  { %v9073_v29 = vor.u32 %v11885_v54, %v9072_v61  ;;  %v11881_v35 = vld [vmem:[#allocation9 + $0x994] sm:$0xf0]  ;;  %3264 = vmatpush.bf16.msra.mxu3 %v9277_v25  ;;  %v8992_v61 = vld [vmem:[#allocation9 + $0x908] sm:$0xf]  ;;  %v11843_v25 = vld [vmem:[#allocation9 + $0x86c] sm:$0xf] }
 0x227   :  { %v2313_v46 = vpop.f32.mrf.mxu2  ;;  %v11865_v54 = vld [vmem:[#allocation9 + $0x914] sm:$0xf0] }
 0x228   :  { %v12877_v59 = vpop.f32.mrf.mxu1  ;;  %v9057_v46 = vor.u32 %v11881_v35, %v9056_v33  ;;  %v8993_v30 = vor.u32 %v11865_v54, %v8992_v61  ;;  %v8917_v33 = vor.u32 %v11843_v25, %v8914_v26  ;;  %v11871_v61 = vld [vmem:[#allocation9 + $0x94c] sm:$0xf]  ;;  %v9026_v54 = vld [vmem:[#allocation9 + $0x958] sm:$0xf0] }
 0x229   :  { %3273 = vmatpush.bf16.msrb.mxu0 %v8961_v51  ;;  %v11930_v51 = vld [vmem:[#allocation9 + $0xb24] sm:$0xf] }
 0x22a   :  { %v9261_v43 = vor.u32 %v11930_v51, %v9258_v36  ;;  %v11909_v51 = vld [vmem:[#allocation9 + $0xa74] sm:$0xf0]  ;;  %v11839_v36 = vld [vmem:[#allocation9 + $0x84c] sm:$0xf] }
 0x22c   :  { %3265 = vmatpush.bf16.msra.mxu3 %v9261_v43  ;;  %v9090_v43 = vld [vmem:[#allocation9 + $0x9d8] sm:$0xf0] }
 0x22d   :  { %3274 = vmatpush.bf16.msrb.mxu0 %v8945_v47  ;;  %v2272_v55 = vpop.f32.mrf.mxu3  ;;  %v9040_v47 = vld [vmem:[#allocation9 + $0x968] sm:$0xf] }
 0x22e   :  { %v2273_v1 = vadd.f32 %v2272_v55, %v2260_v53  ;;  %v11925_v53 = vld [vmem:[#allocation9 + $0xaf4] sm:$0xf0]  ;;  %v11855_v55 = vld [vmem:[#allocation9 + $0x8cc] sm:$0xf]  ;;  %v9041_v62 = vor.u32 %v11877_v48, %v9040_v47  ;;  %v9093_v47 = vor.u32 %v11887_v38, %v9090_v43  ;;  %v9312_v38 = vld [vmem:[#allocation9 + $0xb88] sm:$0xf] }
 0x22f   :  { %v11905_v48 = vld [vmem:[#allocation9 + $0xa54] sm:$0xf0] }
 0x230   :  { %v2381_v39 = vmax.f32 %v2273_v1, 0.0  ;;  %v2352_v7 = vpop.f32.mrf.mxu1  ;;  %v9233_v1 = vor.u32 %v11925_v53, %v9232_v50  ;;  %3266 = vmatpush.bf16.msra.mxu3 %v9245_v60  ;;  %v11883_v50 = vld [vmem:[#allocation9 + $0x9ac] sm:$0xf]  ;;  %v11945_v43 = vld [vmem:[#allocation9 + $0xb94] sm:$0xf0] }
 0x231   :  { %3275 = vmatpush.bf16.msrb.mxu0 %v8929_v57  ;;  %v8962_v57 = vld [vmem:[#allocation9 + $0x8d8] sm:$0xf0]  ;;  %v11851_v7 = vld [vmem:[#allocation9 + $0x8ac] sm:$0xf]  ;;  %v9077_v60 = vor.u32 %v11883_v50, %v9074_v52  ;;  %v11941_v50 = vld [vmem:[#allocation9 + $0xb74] sm:$0xf0] }
 0x232   :  { %v12881_v12 = vpack.c.bf16 %v2381_v39, %v2381_v39  ;;  %v8965_v2 = vor.u32 %v11855_v55, %v8962_v57  ;;  %v11921_v39 = vld [vmem:[#allocation9 + $0xad4] sm:$0xf0]  ;;  %v9136_v55 = vld [vmem:[#allocation9 + $0xa28] sm:$0xf]  ;;  %v11907_v52 = vld [vmem:[#allocation9 + $0xa6c] sm:$0xf] }
 0x233   :  { %v9217_v42 = vor.u32 %v11921_v39, %v9216_v6 }
 0x234   :  { %3189 = vmatmul.bf16.vlgmr.msrb.gmra.mxu1 %v12881_v12  ;;  %3228 = vmatmul.bf16.vlgmr.msra.gmra.mxu0 %v12872_v27 }
 0x235   :  { %3276 = vmatpush.bf16.msrb.mxu0 %v8913_v8  ;;  %3285 = vmatpush.bf16.msrb.mxu1 %v9105_v9  ;;  %v2274_v17 = vpop.f32.mrf.mxu3  ;;  %v8946_v8 = vld [vmem:[#allocation9 + $0x8b8] sm:$0xf0] }
 0x236   :  { %v8949_v40 = vor.u32 %v11851_v7, %v8946_v8  ;;  %v11847_v17 = vld [vmem:[#allocation9 + $0x88c] sm:$0xf]  ;;  %v9120_v7 = vld [vmem:[#allocation9 + $0xa08] sm:$0xf]  ;;  %v11897_v8 = vld [vmem:[#allocation9 + $0xa14] sm:$0xf0] }
 0x239   :  { %3277 = vmatpush.bf16.msrb.mxu0 %v8897_v18  ;;  %3286 = vmatpush.bf16.msrb.mxu1 %v9089_v0  ;;  %v8930_v18 = vld [vmem:[#allocation9 + $0x898] sm:$0xf0]  ;;  %v9009_v0 = vor.u32 %v11869_v13, %v9008_v32  ;;  %v11923_v32 = vld [vmem:[#allocation9 + $0xaec] sm:$0xf] }
 0x23a   :  { %v8933_v21 = vor.u32 %v11847_v17, %v8930_v18  ;;  %v9234_v13 = vld [vmem:[#allocation9 + $0xaf8] sm:$0xf0] }
 0x23d   :  { %3278 = vmatpush.bf16.msrb.mxu0 %v8881_v28  ;;  %3287 = vmatpush.bf16.msrb.mxu1 %v9073_v29  ;;  %v2324_v41 = vpop.f32.mrf.mxu3  ;;  %v11891_v28 = vld [vmem:[#allocation9 + $0x9ec] sm:$0xf]  ;;  %v9106_v29 = vld [vmem:[#allocation9 + $0x9f8] sm:$0xf0] }
 0x23e   :  { %v2325_v20 = vadd.f32 %v2324_v41, %v2312_v44  ;;  %v9109_v35 = vor.u32 %v11891_v28, %v9106_v29  ;;  %v1527_v44 = vperm.slane %v12860_v56, 3  ;;  %v9169_v41 = vor.u32 %v11909_v51, %v9168_v34  ;;  %v9010_v34 = vld [vmem:[#allocation9 + $0x938] sm:$0xf0] }
 0x23f   :  { %v12889_v49 = vpop.f32.mrf.mxu2  ;;  %v9029_v28 = vor.u32 %v11871_v61, %v9026_v54  ;;  %v9221_v29 = vor.u32 %v11919_v23, %v9218_v5  ;;  %v9202_v51 = vld [vmem:[#allocation9 + $0xab8] sm:$0xf0]  ;;  %v11939_v61 = vld [vmem:[#allocation9 + $0xb6c] sm:$0xf]  ;;  %v9480_v23 = vld [vmem:[#allocation9 + $0xce0] sm:$0xf] }
 0x240   :  { %v2382_v22 = vmax.f32 %v2325_v20, 0.0  ;;  %v11835_v20 = vld [vmem:[#allocation9 + $0x82c] sm:$0xf]  ;;  %v2338_v14 = vadd.f32 %v12865_v58, %v1527_v44  ;;  %v9298_v54 = vld [vmem:[#allocation9 + $0xb78] sm:$0xf0] }
 0x241   :  { %3279 = vmatpush.bf16.msrb.mxu0 %v8865_v45  ;;  %3288 = vmatpush.bf16.msrb.mxu1 %v9057_v46  ;;  %v8901_v45 = vor.u32 %v11839_v36, %v8898_v37  ;;  %v9152_v46 = vld [vmem:[#allocation9 + $0xa48] sm:$0xf]  ;;  %v11863_v44 = vld [vmem:[#allocation9 + $0x90c] sm:$0xf]  ;;  %v11988_v5 = vld [vmem:[#allocation9 + $0xcec] sm:$0xf0] }
 0x242   :  { %v12891_v63 = vpack.c.bf16 %v2382_v22, %v2382_v22  ;;  %v9153_v56 = vor.u32 %v11905_v48, %v9152_v46  ;;  %v2351_v57 = vadd.f32 %v12877_v59, %v2338_v14  ;;  %v11901_v22 = vld [vmem:[#allocation9 + $0xa34] sm:$0xf0]  ;;  %v9360_v59 = vld [vmem:[#allocation9 + $0xbe8] sm:$0xf]  ;;  %v9186_v46 = vld [vmem:[#allocation9 + $0xa98] sm:$0xf0] }
 0x243   :  { %v9137_v58 = vor.u32 %v11901_v22, %v9136_v55  ;;  %v9170_v14 = vld [vmem:[#allocation9 + $0xa78] sm:$0xf0]  ;;  %v9280_v55 = vld [vmem:[#allocation9 + $0xb48] sm:$0xf] }
 0x244   :  { %3202 = vmatmul.bf16.vlgmr.msrb.gmra.mxu2 %v12891_v63  ;;  %3241 = vmatmul.bf16.vlgmr.msra.gmra.mxu1 %v12881_v12  ;;  %v2364_v4 = vadd.f32 %v12889_v49, %v2351_v57  ;;  %v9121_v49 = vor.u32 %v11897_v8, %v9120_v7  ;;  %v11937_v57 = vld [vmem:[#allocation9 + $0xb54] sm:$0xf0]  ;;  %v9154_v22 = vld [vmem:[#allocation9 + $0xa58] sm:$0xf0]  ;;  %v9248_v7 = vld [vmem:[#allocation9 + $0xb08] sm:$0xf] }
 0x245   :  { %3324 = vmatpush.bf16.msra.mxu0 %v8981_v24  ;;  %3289 = vmatpush.bf16.msrb.mxu1 %v9041_v62  ;;  %v2326_v9 = vpop.f32.mrf.mxu3  ;;  %v8882_v24 = vld [vmem:[#allocation9 + $0x838] sm:$0xf0]  ;;  %v11831_v62 = vld [vmem:[#allocation9 + $0x80c] sm:$0xf]  ;;  %v11929_v8 = vld [vmem:[#allocation9 + $0xb14] sm:$0xf0] }
 0x246   :  { %3280 = vmatmul.bf16.vlgmr.msrb.gmra.mxu0 %v12872_v27  ;;  %3298 = vmatpush.bf16.msrb.mxu2 %v9233_v1  ;;  %v8885_v53 = vor.u32 %v11835_v20, %v8882_v24  ;;  %v8866_v1 = vld [vmem:[#allocation9 + $0x818] sm:$0xf0]  ;;  %v9296_v24 = vld [vmem:[#allocation9 + $0xb68] sm:$0xf] }
 0x247   :  { %v2365_v11 = vpop.f32.mrf.mxu2  ;;  %v8869_v39 = vor.u32 %v11831_v62, %v8866_v1  ;;  %v9281_v62 = vor.u32 %v11937_v57, %v9280_v55  ;;  %v9592_v55 = vld [vmem:[#allocation9 + $0xdc0] sm:$0xf] }
 0x248   :  { %v11957_v11 = vld [vmem:[#allocation9 + $0xbf4] sm:$0xf0] }
 0x249   :  { %3325 = vmatpush.bf16.msra.mxu0 %v8965_v2  ;;  %3290 = vmatpush.bf16.msrb.mxu1 %v9025_v10  ;;  %v11879_v2 = vld [vmem:[#allocation9 + $0x98c] sm:$0xf]  ;;  %v9361_v16 = vor.u32 %v11957_v11, %v9360_v59  ;;  %v9362_v11 = vld [vmem:[#allocation9 + $0xbf8] sm:$0xf0] }
 0x24a   :  { %3299 = vmatpush.bf16.msrb.mxu2 %v9217_v42  ;;  %v9061_v10 = vor.u32 %v11879_v2, %v9058_v3  ;;  %v11875_v42 = vld [vmem:[#allocation9 + $0x96c] sm:$0xf]  ;;  %v9264_v2 = vld [vmem:[#allocation9 + $0xb28] sm:$0xf]  ;;  %v11933_v3 = vld [vmem:[#allocation9 + $0xb34] sm:$0xf0] }
 0x24b   :  { %v11955_v59 = vld [vmem:[#allocation9 + $0xbec] sm:$0xf] }
 0x24d   :  { %3326 = vmatpush.bf16.msra.mxu0 %v8949_v40  ;;  %3291 = vmatpush.bf16.msrb.mxu1 %v9009_v0  ;;  %v9042_v40 = vld [vmem:[#allocation9 + $0x978] sm:$0xf0]  ;;  %v9237_v0 = vor.u32 %v11923_v32, %v9234_v13  ;;  %v11951_v32 = vld [vmem:[#allocation9 + $0xbcc] sm:$0xf] }
 0x24e   :  { %3300 = vmatpush.bf16.msrb.mxu2 %v9201_v19  ;;  %v9045_v18 = vor.u32 %v11875_v42, %v9042_v40  ;;  %v9344_v19 = vld [vmem:[#allocation9 + $0xbc8] sm:$0xf]  ;;  %v9249_v42 = vor.u32 %v11929_v8, %v9248_v7  ;;  %v9365_v40 = vor.u32 %v11955_v59, %v9362_v11  ;;  %v9346_v13 = vld [vmem:[#allocation9 + $0xbd8] sm:$0xf0]  ;;  %v9560_v7 = vld [vmem:[#allocation9 + $0xd80] sm:$0xf] }
 0x24f   :  { %v9482_v59 = vld [vmem:[#allocation9 + $0xcf0] sm:$0xf0] }
 0x251   :  { %3327 = vmatpush.bf16.msra.mxu0 %v8933_v21  ;;  %3292 = vmatpush.bf16.msrb.mxu1 %v8993_v30  ;;  %v11953_v21 = vld [vmem:[#allocation9 + $0xbd4] sm:$0xf0]  ;;  %v9328_v30 = vld [vmem:[#allocation9 + $0xba8] sm:$0xf] }
 0x252   :  { %3301 = vmatpush.bf16.msrb.mxu2 %v9185_v31  ;;  %v9345_v26 = vor.u32 %v11953_v21, %v9344_v19  ;;  %v11949_v31 = vld [vmem:[#allocation9 + $0xbb4] sm:$0xf0]  ;;  %v9314_v19 = vld [vmem:[#allocation9 + $0xb98] sm:$0xf0] }
 0x253   :  { %v9329_v36 = vor.u32 %v11949_v31, %v9328_v30  ;;  %v11931_v31 = vld [vmem:[#allocation9 + $0xb2c] sm:$0xf] }
 0x254   :  { %3254 = vmatmul.bf16.vlgmr.msra.gmra.mxu2 %v12891_v63  ;;  %3293 = vmatmul.bf16.vlgmr.msrb.gmra.mxu1 %v12881_v12 }
 0x255   :  { %3328 = vmatpush.bf16.msra.mxu0 %v8917_v33  ;;  %3337 = vmatpush.bf16.msra.mxu1 %v9109_v35  ;;  %v11867_v33 = vld [vmem:[#allocation9 + $0x92c] sm:$0xf] }
 0x256   :  { %3302 = vmatpush.bf16.msrb.mxu2 %v9169_v41  ;;  %v11915_v35 = vld [vmem:[#allocation9 + $0xaac] sm:$0xf]  ;;  %v8994_v41 = vld [vmem:[#allocation9 + $0x918] sm:$0xf0] }
 0x257   :  { %v9205_v37 = vor.u32 %v11915_v35, %v9202_v51  ;;  %v8997_v48 = vor.u32 %v11863_v44, %v8994_v41  ;;  %v9432_v41 = vld [vmem:[#allocation9 + $0xc80] sm:$0xf] }
 0x259   :  { %3329 = vmatpush.bf16.msra.mxu0 %v8901_v45  ;;  %3338 = vmatpush.bf16.msra.mxu1 %v9093_v47  ;;  %v11911_v45 = vld [vmem:[#allocation9 + $0xa8c] sm:$0xf]  ;;  %v9313_v47 = vor.u32 %v11945_v43, %v9312_v38  ;;  %v9250_v38 = vld [vmem:[#allocation9 + $0xb18] sm:$0xf0] }
 0x25a   :  { %3303 = vmatpush.bf16.msrb.mxu2 %v9153_v56  ;;  %v9189_v20 = vor.u32 %v11911_v45, %v9186_v46  ;;  %v9297_v56 = vor.u32 %v11941_v50, %v9296_v24  ;;  %v11976_v45 = vld [vmem:[#allocation9 + $0xc8c] sm:$0xf0]  ;;  %v9416_v46 = vld [vmem:[#allocation9 + $0xc60] sm:$0xf] }
 0x25b   :  { %v12020_v24 = vld [vmem:[#allocation9 + $0xdec] sm:$0xf0] }
 0x25d   :  { %v2376_v6 = vpop.f32.mrf.mxu3  ;;  %3330 = vmatpush.bf16.msra.mxu0 %v8885_v53  ;;  %3339 = vmatpush.bf16.msra.mxu1 %v9077_v60  ;;  %v9173_v53 = vor.u32 %v11907_v52, %v9170_v14  ;;  %v11903_v60 = vld [vmem:[#allocation9 + $0xa4c] sm:$0xf] }
 0x25e   :  { %v2377_v9 = vadd.f32 %v2376_v6, %v2364_v4  ;;  %3304 = vmatpush.bf16.msrb.mxu2 %v9137_v58  ;;  %v9157_v1 = vor.u32 %v11903_v60, %v9154_v22  ;;  %v11899_v4 = vld [vmem:[#allocation9 + $0xa2c] sm:$0xf]  ;;  %v9138_v6 = vld [vmem:[#allocation9 + $0xa38] sm:$0xf0]  ;;  %v9265_v58 = vor.u32 %v11933_v3, %v9264_v2  ;;  %v12016_v60 = vld [vmem:[#allocation9 + $0xdcc] sm:$0xf0] }
 0x25f   :  { %v9593_v22 = vor.u32 %v12016_v60, %v9592_v55  ;;  %v9576_v2 = vld [vmem:[#allocation9 + $0xda0] sm:$0xf]  ;;  %v11966_v60 = vld [vmem:[#allocation9 + $0xc44] sm:$0xf] }
 0x260   :  { %v2383_v15 = vmax.f32 %v2377_v9, 0.0  ;;  %v11895_v9 = vld [vmem:[#allocation9 + $0xa0c] sm:$0xf]  ;;  %v9672_v55 = vld [vmem:[#allocation9 + $0xe60] sm:$0xf] }
 0x261   :  { %3331 = vmatpush.bf16.msra.mxu0 %v8869_v39  ;;  %3340 = vmatpush.bf16.msra.mxu1 %v9061_v10  ;;  %v9141_v39 = vor.u32 %v11899_v4, %v9138_v6  ;;  %v9122_v10 = vld [vmem:[#allocation9 + $0xa18] sm:$0xf0]  ;;  %v12012_v4 = vld [vmem:[#allocation9 + $0xdac] sm:$0xf0] }
 0x262   :  { %v12902_v17 = vpack.c.bf16 %v2383_v15, %v2383_v15  ;;  %3305 = vmatpush.bf16.msrb.mxu2 %v9121_v49  ;;  %v9349_v15 = vor.u32 %v11951_v32, %v9346_v13  ;;  %v11947_v49 = vld [vmem:[#allocation9 + $0xbac] sm:$0xf]  ;;  %v9736_v32 = vld [vmem:[#allocation9 + $0xee0] sm:$0xf] }
 0x264   :  { %3215 = vmatmul.bf16.vlgmr.msrb.gmra.mxu3 %v12902_v17  ;;  %3332 = vmatmul.bf16.vlgmr.msra.gmra.mxu0 %v12872_v27  ;;  %v9013_v27 = vor.u32 %v11867_v33, %v9010_v34  ;;  %v9464_v33 = vld [vmem:[#allocation9 + $0xcc0] sm:$0xf]  ;;  %v11984_v34 = vld [vmem:[#allocation9 + $0xccc] sm:$0xf0] }
 0x265   :  { %3311 = vmatpush.bf16.msrb.mxu3 %v9361_v16  ;;  %v2378_v25 = vpop.f32.mrf.mxu3  ;;  %3341 = vmatpush.bf16.msra.mxu1 %v9045_v18  ;;  %v9330_v16 = vld [vmem:[#allocation9 + $0xbb8] sm:$0xf0]  ;;  %v9465_v51 = vor.u32 %v11984_v34, %v9464_v33  ;;  %v9704_v33 = vld [vmem:[#allocation9 + $0xea0] sm:$0xf] }
 0x266   :  { %3350 = vmatpush.bf16.msra.mxu2 %v9237_v0  ;;  %v9333_v18 = vor.u32 %v11947_v49, %v9330_v16  ;;  %v11943_v0 = vld [vmem:[#allocation9 + $0xb8c] sm:$0xf]  ;;  %v9481_v25 = vor.u32 %v11988_v5, %v9480_v23  ;;  %v11982_v49 = vld [vmem:[#allocation9 + $0xcc4] sm:$0xf]  ;;  %v9466_v16 = vld [vmem:[#allocation9 + $0xcd0] sm:$0xf0] }
 0x267   :  { %3306 = vmatmul.bf16.vlgmr.msrb.gmra.mxu2 %v12891_v63  ;;  %v9317_v21 = vor.u32 %v11943_v0, %v9314_v19  ;;  %v9720_v23 = vld [vmem:[#allocation9 + $0xec0] sm:$0xf] }
 0x268   :  { %4164 = vmatpush.bf16.msrb.mxu0 %v9481_v25  ;;  %v12048_v25 = vld [vmem:[#allocation9 + $0xecc] sm:$0xf0] }
 0x269   :  { %3312 = vmatpush.bf16.msrb.mxu3 %v9345_v26  ;;  %3342 = vmatpush.bf16.msra.mxu1 %v9029_v28  ;;  %v9301_v26 = vor.u32 %v11939_v61, %v9298_v54  ;;  %v11935_v28 = vld [vmem:[#allocation9 + $0xb4c] sm:$0xf]  ;;  %v9528_v61 = vld [vmem:[#allocation9 + $0xd40] sm:$0xf]  ;;  %v12000_v54 = vld [vmem:[#allocation9 + $0xd4c] sm:$0xf0] }
 0x26a   :  { %3351 = vmatpush.bf16.msra.mxu2 %v9221_v29  ;;  %v9282_v29 = vld [vmem:[#allocation9 + $0xb58] sm:$0xf0]  ;;  %v9529_v5 = vor.u32 %v12000_v54, %v9528_v61  ;;  %v9562_v61 = vld [vmem:[#allocation9 + $0xd90] sm:$0xf0] }
 0x26b   :  { %v9285_v30 = vor.u32 %v11935_v28, %v9282_v29  ;;  %v9450_v28 = vld [vmem:[#allocation9 + $0xcb0] sm:$0xf0]  ;;  %v9721_v29 = vor.u32 %v12048_v25, %v9720_v23  ;;  %v12024_v25 = vld [vmem:[#allocation9 + $0xe0c] sm:$0xf0] }
 0x26c   :  { %4165 = vmatpush.bf16.msrb.mxu0 %v9465_v51  ;;  %v11974_v51 = vld [vmem:[#allocation9 + $0xc84] sm:$0xf] }
 0x26d   :  { %3313 = vmatpush.bf16.msrb.mxu3 %v9329_v36  ;;  %3343 = vmatpush.bf16.msra.mxu1 %v9013_v27  ;;  %v9448_v36 = vld [vmem:[#allocation9 + $0xca0] sm:$0xf]  ;;  %v11980_v27 = vld [vmem:[#allocation9 + $0xcac] sm:$0xf0] }
 0x26e   :  { %3352 = vmatpush.bf16.msra.mxu2 %v9205_v37  ;;  %v11927_v37 = vld [vmem:[#allocation9 + $0xb0c] sm:$0xf]  ;;  %v9449_v43 = vor.u32 %v11980_v27, %v9448_v36  ;;  %v9434_v36 = vld [vmem:[#allocation9 + $0xc90] sm:$0xf0] }
 0x26f   :  { %v9253_v44 = vor.u32 %v11927_v37, %v9250_v38 }
 0x270   :  { %4166 = vmatpush.bf16.msrb.mxu0 %v9449_v43  ;;  %v9437_v43 = vor.u32 %v11974_v51, %v9434_v36 }
 0x271   :  { %3314 = vmatpush.bf16.msrb.mxu3 %v9313_v47  ;;  %3344 = vmatpush.bf16.msra.mxu1 %v8997_v48  ;;  %v9433_v47 = vor.u32 %v11976_v45, %v9432_v41  ;;  %v11972_v48 = vld [vmem:[#allocation9 + $0xc6c] sm:$0xf0]  ;;  %v9688_v45 = vld [vmem:[#allocation9 + $0xe80] sm:$0xf] }
 0x272   :  { %3353 = vmatpush.bf16.msra.mxu2 %v9189_v20  ;;  %v9608_v20 = vld [vmem:[#allocation9 + $0xde0] sm:$0xf]  ;;  %v9417_v52 = vor.u32 %v11972_v48, %v9416_v46  ;;  %v11992_v41 = vld [vmem:[#allocation9 + $0xd0c] sm:$0xf0] }
 0x273   :  { %v9609_v50 = vor.u32 %v12020_v24, %v9608_v20  ;;  %v12040_v46 = vld [vmem:[#allocation9 + $0xe8c] sm:$0xf0]  ;;  %v11970_v20 = vld [vmem:[#allocation9 + $0xc64] sm:$0xf]  ;;  %v9418_v24 = vld [vmem:[#allocation9 + $0xc70] sm:$0xf0] }
 0x274   :  { %3267 = vmatmul.bf16.vlgmr.msra.gmra.mxu3 %v12902_v17  ;;  %3345 = vmatmul.bf16.vlgmr.msra.gmra.mxu1 %v12881_v12  ;;  %v9125_v12 = vor.u32 %v11895_v9, %v9122_v10  ;;  %v12008_v9 = vld [vmem:[#allocation9 + $0xd8c] sm:$0xf0]  ;;  %v11986_v10 = vld [vmem:[#allocation9 + $0xce4] sm:$0xf]  ;;  %v9689_v48 = vor.u32 %v12040_v46, %v9688_v45 }
 0x275   :  { %3315 = vmatpush.bf16.msrb.mxu3 %v9297_v56  ;;  %4167 = vmatpush.bf16.msrb.mxu0 %v9433_v47  ;;  %v9400_v56 = vld [vmem:[#allocation9 + $0xc40] sm:$0xf]  ;;  %v9561_v11 = vor.u32 %v12008_v9, %v9560_v7  ;;  %v9386_v9 = vld [vmem:[#allocation9 + $0xc30] sm:$0xf0] }
 0x276   :  { %3354 = vmatpush.bf16.msra.mxu2 %v9173_v53  ;;  %4177 = vmatpush.bf16.msrb.mxu1 %v9609_v50  ;;  %v11968_v53 = vld [vmem:[#allocation9 + $0xc4c] sm:$0xf0]  ;;  %v12018_v50 = vld [vmem:[#allocation9 + $0xde4] sm:$0xf] }
 0x277   :  { %v9401_v57 = vor.u32 %v11968_v53, %v9400_v56  ;;  %v9610_v56 = vld [vmem:[#allocation9 + $0xdf0] sm:$0xf0] }
 0x278   :  { %v9613_v53 = vor.u32 %v12018_v50, %v9610_v56  ;;  %v9514_v56 = vld [vmem:[#allocation9 + $0xd30] sm:$0xf0] }
 0x279   :  { %3316 = vmatpush.bf16.msrb.mxu3 %v9281_v62  ;;  %4168 = vmatpush.bf16.msrb.mxu0 %v9417_v52  ;;  %v9384_v62 = vld [vmem:[#allocation9 + $0xc20] sm:$0xf]  ;;  %v9421_v52 = vor.u32 %v11970_v20, %v9418_v24  ;;  %v12076_v24 = vld [vmem:[#allocation9 + $0xfac] sm:$0xf0] }
 0x27a   :  { %3355 = vmatpush.bf16.msra.mxu2 %v9157_v1  ;;  %4178 = vmatpush.bf16.msrb.mxu1 %v9593_v22  ;;  %v11964_v1 = vld [vmem:[#allocation9 + $0xc2c] sm:$0xf0]  ;;  %v9832_v20 = vld [vmem:[#allocation9 + $0xfa0] sm:$0xf] }
 0x27b   :  { %v9385_v3 = vor.u32 %v11964_v1, %v9384_v62  ;;  %v9402_v62 = vld [vmem:[#allocation9 + $0xc50] sm:$0xf0]  ;;  %v12014_v1 = vld [vmem:[#allocation9 + $0xdc4] sm:$0xf]  ;;  %v9833_v50 = vor.u32 %v12076_v24, %v9832_v20  ;;  %v9472_v20 = vld [vmem:[#allocation9 + $0xcc8] sm:$0xf] }
 0x27c   :  { %v11985_v24 = vld [vmem:[#allocation9 + $0xcd4] sm:$0xf0] }
 0x27d   :  { %3317 = vmatpush.bf16.msrb.mxu3 %v9265_v58  ;;  %4169 = vmatpush.bf16.msrb.mxu0 %v9401_v57  ;;  %v9577_v58 = vor.u32 %v12012_v4, %v9576_v2  ;;  %v12036_v57 = vld [vmem:[#allocation9 + $0xe6c] sm:$0xf0]  ;;  %v9594_v2 = vld [vmem:[#allocation9 + $0xdd0] sm:$0xf0]  ;;  %v9405_v4 = vor.u32 %v11966_v60, %v9402_v62 }
 0x27e   :  { %3356 = vmatpush.bf16.msra.mxu2 %v9141_v39  ;;  %v11960_v39 = vld [vmem:[#allocation9 + $0xc0c] sm:$0xf0]  ;;  %v9673_v22 = vor.u32 %v12036_v57, %v9672_v55  ;;  %v9706_v57 = vld [vmem:[#allocation9 + $0xeb0] sm:$0xf0] }
 0x27f   :  { %4179 = vmatpush.bf16.msrb.mxu1 %v9577_v58 }
 0x281   :  { %3318 = vmatpush.bf16.msrb.mxu3 %v9249_v42  ;;  %4170 = vmatpush.bf16.msrb.mxu0 %v9385_v3  ;;  %v9485_v42 = vor.u32 %v11986_v10, %v9482_v59  ;;  %v12010_v10 = vld [vmem:[#allocation9 + $0xda4] sm:$0xf] }
 0x282   :  { %3357 = vmatpush.bf16.msra.mxu2 %v9125_v12  ;;  %v9544_v12 = vld [vmem:[#allocation9 + $0xd60] sm:$0xf] }
 0x283   :  { %4180 = vmatpush.bf16.msrb.mxu1 %v9561_v11  ;;  %v9578_v11 = vld [vmem:[#allocation9 + $0xdb0] sm:$0xf0] }
 0x284   :  { %3319 = vmatmul.bf16.vlgmr.msrb.gmra.mxu3 %v12902_v17 }
 0x285   :  { %3363 = vmatpush.bf16.msra.mxu3 %v9365_v40  ;;  %3358 = vmatmul.bf16.vlgmr.msra.gmra.mxu2 %v12891_v63  ;;  %v9266_v63 = vld [vmem:[#allocation9 + $0xb38] sm:$0xf0]  ;;  %v12004_v40 = vld [vmem:[#allocation9 + $0xd6c] sm:$0xf0] }
 0x286   :  { %v9269_v35 = vor.u32 %v11931_v31, %v9266_v63  ;;  %v9545_v13 = vor.u32 %v12004_v40, %v9544_v12  ;;  %v9512_v31 = vld [vmem:[#allocation9 + $0xd20] sm:$0xf]  ;;  %v11996_v63 = vld [vmem:[#allocation9 + $0xd2c] sm:$0xf0] }
 0x287   :  { %v9513_v34 = vor.u32 %v11996_v63, %v9512_v31  ;;  %v9640_v40 = vld [vmem:[#allocation9 + $0xe20] sm:$0xf]  ;;  %v9546_v31 = vld [vmem:[#allocation9 + $0xd70] sm:$0xf0] }
 0x288   :  { %4181 = vmatpush.bf16.msrb.mxu1 %v9545_v13 }
 0x289   :  { %3364 = vmatpush.bf16.msra.mxu3 %v9349_v15  ;;  %v12052_v15 = vld [vmem:[#allocation9 + $0xeec] sm:$0xf0] }
 0x28a   :  { %v9737_v19 = vor.u32 %v12052_v15, %v9736_v32  ;;  %v12028_v32 = vld [vmem:[#allocation9 + $0xe2c] sm:$0xf0]  ;;  %v11958_v15 = vld [vmem:[#allocation9 + $0xc04] sm:$0xf] }
 0x28b   :  { %v9641_v13 = vor.u32 %v12028_v32, %v9640_v40  ;;  %v12034_v32 = vld [vmem:[#allocation9 + $0xe64] sm:$0xf] }
 0x28c   :  { %4190 = vmatpush.bf16.msrb.mxu2 %v9737_v19  ;;  %4182 = vmatpush.bf16.msrb.mxu1 %v9529_v5  ;;  %v9624_v5 = vld [vmem:[#allocation9 + $0xe00] sm:$0xf] }
 0x28d   :  { %3365 = vmatpush.bf16.msra.mxu3 %v9333_v18 }
 0x290   :  { %4191 = vmatpush.bf16.msrb.mxu2 %v9721_v29  ;;  %4183 = vmatpush.bf16.msrb.mxu1 %v9513_v34  ;;  %v12084_v29 = vld [vmem:[#allocation9 + $0xfec] sm:$0xf0]  ;;  %v12050_v34 = vld [vmem:[#allocation9 + $0xee4] sm:$0xf] }
 0x291   :  { %3366 = vmatpush.bf16.msra.mxu3 %v9317_v21  ;;  %v9469_v21 = vor.u32 %v11982_v49, %v9466_v16  ;;  %v9370_v49 = vld [vmem:[#allocation9 + $0xc10] sm:$0xf0]  ;;  %v12006_v16 = vld [vmem:[#allocation9 + $0xd84] sm:$0xf] }
 0x292   :  { %v9565_v23 = vor.u32 %v12006_v16, %v9562_v61  ;;  %v12064_v61 = vld [vmem:[#allocation9 + $0xf4c] sm:$0xf0] }
 0x295   :  { %3367 = vmatpush.bf16.msra.mxu3 %v9301_v26  ;;  %v11978_v26 = vld [vmem:[#allocation9 + $0xca4] sm:$0xf] }
 0x299   :  { %3368 = vmatpush.bf16.msra.mxu3 %v9285_v30  ;;  %v9453_v30 = vor.u32 %v11978_v26, %v9450_v28  ;;  %v9864_v26 = vld [vmem:[#allocation9 + $0xfe0] sm:$0xf]  ;;  %v9625_v28 = vor.u32 %v12024_v25, %v9624_v5  ;;  %v9658_v5 = vld [vmem:[#allocation9 + $0xe50] sm:$0xf0] }
 0x29a   :  { %v9865_v63 = vor.u32 %v12084_v29, %v9864_v26  ;;  %v9768_v29 = vld [vmem:[#allocation9 + $0xf20] sm:$0xf] }
 0x29d   :  { %3369 = vmatpush.bf16.msra.mxu3 %v9269_v35  ;;  %v12044_v35 = vld [vmem:[#allocation9 + $0xeac] sm:$0xf0] }
 0x29e   :  { %v9705_v38 = vor.u32 %v12044_v35, %v9704_v33  ;;  %v9738_v35 = vld [vmem:[#allocation9 + $0xef0] sm:$0xf0] }
 0x29f   :  { %v9741_v51 = vor.u32 %v12050_v34, %v9738_v35  ;;  %v9488_v35 = vld [vmem:[#allocation9 + $0xce8] sm:$0xf] }
 0x2a0   :  { %4192 = vmatpush.bf16.msrb.mxu2 %v9705_v38 }
 0x2a1   :  { %3370 = vmatpush.bf16.msra.mxu3 %v9253_v44  ;;  %v12912_v14 = vpop.f32.mrf.mxu0  ;;  %v9496_v44 = vld [vmem:[#allocation9 + $0xd00] sm:$0xf] }
 0x2a2   :  { %v9497_v47 = vor.u32 %v11992_v41, %v9496_v44  ;;  %v9530_v44 = vld [vmem:[#allocation9 + $0xd50] sm:$0xf0]  ;;  %v12046_v41 = vld [vmem:[#allocation9 + $0xec4] sm:$0xf] }
 0x2a4   :  { %3371 = vmatmul.bf16.vlgmr.msra.gmra.mxu3 %v12902_v17  ;;  %v9368_v17 = vld [vmem:[#allocation9 + $0xc00] sm:$0xf]  ;;  %4184 = vmatpush.bf16.msrb.mxu1 %v9497_v47  ;;  %v9722_v47 = vld [vmem:[#allocation9 + $0xed0] sm:$0xf0] }
 0x2a5   :  { %v9369_v8 = vor.u32 %v11960_v39, %v9368_v17  ;;  %4193 = vmatpush.bf16.msrb.mxu2 %v9689_v48  ;;  %v9656_v17 = vld [vmem:[#allocation9 + $0xe40] sm:$0xf]  ;;  %v12032_v39 = vld [vmem:[#allocation9 + $0xe4c] sm:$0xf0]  ;;  %4203 = vmatpush.bf16.msrb.mxu3 %v9865_v63  ;;  %v9725_v48 = vor.u32 %v12046_v41, %v9722_v47  ;;  %v12022_v41 = vld [vmem:[#allocation9 + $0xe04] sm:$0xf] }
 0x2a6   :  { %v9657_v7 = vor.u32 %v12032_v39, %v9656_v17  ;;  %v9498_v17 = vld [vmem:[#allocation9 + $0xd10] sm:$0xf0]  ;;  %v12038_v39 = vld [vmem:[#allocation9 + $0xe84] sm:$0xf] }
 0x2a7   :  { %4171 = vmatpush.bf16.msrb.mxu0 %v9369_v8  ;;  %v11962_v8 = vld [vmem:[#allocation9 + $0xc24] sm:$0xf] }
 0x2a8   :  { %4229 = vmatpush.bf16.msra.mxu1 %v9613_v53  ;;  %v9389_v59 = vor.u32 %v11962_v8, %v9386_v9  ;;  %v12042_v53 = vld [vmem:[#allocation9 + $0xea4] sm:$0xf]  ;;  %v9690_v9 = vld [vmem:[#allocation9 + $0xe90] sm:$0xf0] }
 0x2a9   :  { %v3179_v6 = vpop.f32.mrf.mxu0  ;;  %4194 = vmatpush.bf16.msrb.mxu2 %v9673_v22  ;;  %v9709_v60 = vor.u32 %v12042_v53, %v9706_v57  ;;  %v12926_v22 = vld [vmem:[#allocation11 + $0x8] sm:$0xf]  ;;  %v12082_v47 = vld [vmem:[#allocation9 + $0xfe4] sm:$0xf]  ;;  %v9473_v57 = vor.u32 %v11985_v24, %v9472_v20 }
 0x2aa   :  { %v9597_v6 = vor.u32 %v12014_v1, %v9594_v2  ;;  %v9816_v1 = vld [vmem:[#allocation9 + $0xf80] sm:$0xf]  ;;  %v12072_v2 = vld [vmem:[#allocation9 + $0xf8c] sm:$0xf0]  ;;  %v2521_v53 = vperm.slane %v12926_v22, 1 }
 0x2ab   :  { %4216 = vmatpush.bf16.msra.mxu0 %v9485_v42  ;;  %v9581_v42 = vor.u32 %v12010_v10, %v9578_v11  ;;  %v9693_v10 = vor.u32 %v12038_v39, %v9690_v9  ;;  %v9800_v11 = vld [vmem:[#allocation9 + $0xf60] sm:$0xf]  ;;  %v9440_v9 = vld [vmem:[#allocation9 + $0xc88] sm:$0xf] }
 0x2ac   :  { %4230 = vmatpush.bf16.msra.mxu1 %v9597_v6  ;;  %v11990_v6 = vld [vmem:[#allocation9 + $0xd04] sm:$0xf] }
 0x2ad   :  { %4195 = vmatpush.bf16.msrb.mxu2 %v9657_v7  ;;  %v9501_v8 = vor.u32 %v11990_v6, %v9498_v17 }
 0x2af   :  { %4217 = vmatpush.bf16.msra.mxu0 %v9469_v21  ;;  %v9373_v21 = vor.u32 %v11958_v15, %v9370_v49 }
 0x2b0   :  { %4231 = vmatpush.bf16.msra.mxu1 %v9581_v42  ;;  %v12068_v42 = vld [vmem:[#allocation9 + $0xf6c] sm:$0xf0] }
 0x2b1   :  { %v12914_v18 = vpop.f32.mrf.mxu1  ;;  %v12916_v0 = vpop.f32.mrf.mxu0  ;;  %4196 = vmatpush.bf16.msrb.mxu2 %v9641_v13  ;;  %v9801_v40 = vor.u32 %v12068_v42, %v9800_v11  ;;  %v9674_v13 = vld [vmem:[#allocation9 + $0xe70] sm:$0xf0]  ;;  %v12074_v11 = vld [vmem:[#allocation9 + $0xfa4] sm:$0xf] }
 0x2b2   :  { %v9677_v15 = vor.u32 %v12034_v32, %v9674_v13  ;;  %v3230_v17 = vadd.f32 %v12916_v0, %v2521_v53  ;;  %v9834_v42 = vld [vmem:[#allocation9 + $0xfb0] sm:$0xf0]  ;;  %v11973_v0 = vld [vmem:[#allocation9 + $0xc74] sm:$0xf0] }
 0x2b3   :  { %4218 = vmatpush.bf16.msra.mxu0 %v9453_v30  ;;  %v12002_v30 = vld [vmem:[#allocation9 + $0xd64] sm:$0xf] }
 0x2b4   :  { %4232 = vmatpush.bf16.msra.mxu1 %v9565_v23  ;;  %v9549_v33 = vor.u32 %v12002_v30, %v9546_v31  ;;  %v12030_v23 = vld [vmem:[#allocation9 + $0xe44] sm:$0xf]  ;;  %v12060_v30 = vld [vmem:[#allocation9 + $0xf2c] sm:$0xf0] }
 0x2b5   :  { %4197 = vmatpush.bf16.msrb.mxu2 %v9625_v28  ;;  %v9661_v26 = vor.u32 %v12030_v23, %v9658_v5  ;;  %v9769_v63 = vor.u32 %v12060_v30, %v9768_v29  ;;  %v9818_v23 = vld [vmem:[#allocation9 + $0xf90] sm:$0xf0]  ;;  %v9408_v29 = vld [vmem:[#allocation9 + $0xc48] sm:$0xf]  ;;  %v11969_v30 = vld [vmem:[#allocation9 + $0xc54] sm:$0xf0] }
 0x2b7   :  { %4219 = vmatpush.bf16.msra.mxu0 %v9437_v43  ;;  %v11998_v43 = vld [vmem:[#allocation9 + $0xd44] sm:$0xf] }
 0x2b8   :  { %4233 = vmatpush.bf16.msra.mxu1 %v9549_v33  ;;  %v9533_v46 = vor.u32 %v11998_v43, %v9530_v44  ;;  %v9642_v33 = vld [vmem:[#allocation9 + $0xe30] sm:$0xf0] }
 0x2b9   :  { %v3192_v27 = vpop.f32.mrf.mxu1  ;;  %v3231_v37 = vpop.f32.mrf.mxu0  ;;  %4242 = vmatpush.bf16.msra.mxu2 %v9741_v51  ;;  %v11989_v51 = vld [vmem:[#allocation9 + $0xcf4] sm:$0xf0] }
 0x2ba   :  { %v9848_v27 = vld [vmem:[#allocation9 + $0xfc0] sm:$0xf]  ;;  %v12080_v37 = vld [vmem:[#allocation9 + $0xfcc] sm:$0xf0] }
 0x2bb   :  { %4220 = vmatpush.bf16.msra.mxu0 %v9421_v52  ;;  %v9849_v38 = vor.u32 %v12080_v37, %v9848_v27  ;;  %v11994_v52 = vld [vmem:[#allocation9 + $0xd24] sm:$0xf] }
 0x2bc   :  { %4234 = vmatpush.bf16.msra.mxu1 %v9533_v46  ;;  %v9517_v55 = vor.u32 %v11994_v52, %v9514_v56  ;;  %v9626_v46 = vld [vmem:[#allocation9 + $0xe10] sm:$0xf0] }
 0x2bd   :  { %4204 = vmatpush.bf16.msrb.mxu3 %v9849_v38  ;;  %4243 = vmatpush.bf16.msra.mxu2 %v9725_v48  ;;  %v9752_v38 = vld [vmem:[#allocation9 + $0xf00] sm:$0xf]  ;;  %v9866_v52 = vld [vmem:[#allocation9 + $0xff0] sm:$0xf0] }
 0x2be   :  { %v9869_v56 = vor.u32 %v12082_v47, %v9866_v52  ;;  %v11961_v52 = vld [vmem:[#allocation9 + $0xc14] sm:$0xf0] }
 0x2bf   :  { %4221 = vmatpush.bf16.msra.mxu0 %v9405_v4  ;;  %v9817_v4 = vor.u32 %v12072_v2, %v9816_v1  ;;  %v11981_v1 = vld [vmem:[#allocation9 + $0xcb4] sm:$0xf0]  ;;  %v12078_v2 = vld [vmem:[#allocation9 + $0xfc4] sm:$0xf] }
 0x2c0   :  { %4235 = vmatpush.bf16.msra.mxu1 %v9517_v55 }
 0x2c1   :  { %v12918_v3 = vpop.f32.mrf.mxu1  ;;  %4205 = vmatpush.bf16.msrb.mxu3 %v9833_v50  ;;  %4244 = vmatpush.bf16.msra.mxu2 %v9709_v60  ;;  %v9629_v50 = vor.u32 %v12022_v41, %v9626_v46  ;;  %v9456_v60 = vld [vmem:[#allocation9 + $0xca8] sm:$0xf]  ;;  %v9786_v41 = vld [vmem:[#allocation9 + $0xf50] sm:$0xf0] }
 0x2c3   :  { %v12920_v58 = vpop.f32.mrf.mxu0  ;;  %4222 = vmatpush.bf16.msra.mxu0 %v9389_v59  ;;  %v2520_v59 = vperm.slane %v12926_v22, 0 }
 0x2c4   :  { %4236 = vmatpush.bf16.msra.mxu1 %v9501_v8  ;;  %v9457_v8 = vor.u32 %v11981_v1, %v9456_v60  ;;  %v9770_v60 = vld [vmem:[#allocation9 + $0xf30] sm:$0xf0]  ;;  %v11987_v1 = vld [vmem:[#allocation9 + $0xcec] sm:$0xf] }
 0x2c5   :  { %4206 = vmatpush.bf16.msrb.mxu3 %v9817_v4  ;;  %4245 = vmatpush.bf16.msra.mxu2 %v9693_v10  ;;  %v3178_v16 = vadd.f32 %v12912_v14, %v2520_v59  ;;  %v12026_v14 = vld [vmem:[#allocation9 + $0xe24] sm:$0xf]  ;;  %v9850_v4 = vld [vmem:[#allocation9 + $0xfd0] sm:$0xf0]  ;;  %v3243_v10 = vadd.f32 %v12918_v3, %v3230_v17  ;;  %v11977_v59 = vld [vmem:[#allocation9 + $0xc94] sm:$0xf0] }
 0x2c6   :  { %v9853_v6 = vor.u32 %v12078_v2, %v9850_v4  ;;  %v9490_v2 = vld [vmem:[#allocation9 + $0xcf8] sm:$0xf0] }
 0x2c7   :  { %v12922_v12 = vpop.f32.mrf.mxu2  ;;  %4223 = vmatpush.bf16.msra.mxu0 %v9373_v21  ;;  %v9784_v21 = vld [vmem:[#allocation9 + $0xf40] sm:$0xf]  ;;  %v3191_v25 = vadd.f32 %v12914_v18, %v3178_v16  ;;  %v12056_v18 = vld [vmem:[#allocation9 + $0xf0c] sm:$0xf0]  ;;  %v9424_v16 = vld [vmem:[#allocation9 + $0xc68] sm:$0xf] }
 0x2c8   :  { %v9753_v44 = vor.u32 %v12056_v18, %v9752_v38  ;;  %v11965_v38 = vld [vmem:[#allocation9 + $0xc34] sm:$0xf0]  ;;  %v9584_v18 = vld [vmem:[#allocation9 + $0xda8] sm:$0xf] }
 0x2c9   :  { %v3244_v19 = vpop.f32.mrf.mxu1  ;;  %4207 = vmatpush.bf16.msrb.mxu3 %v9801_v40  ;;  %4246 = vmatpush.bf16.msra.mxu2 %v9677_v15  ;;  %v3204_v28 = vadd.f32 %v12922_v12, %v3191_v25  ;;  %v9489_v12 = vor.u32 %v11989_v51, %v9488_v35  ;;  %v9837_v40 = vor.u32 %v12074_v11, %v9834_v42  ;;  %v2522_v35 = vperm.slane %v12926_v22, 2  ;;  %v9744_v11 = vld [vmem:[#allocation9 + $0xee8] sm:$0xf]  ;;  %v12054_v42 = vld [vmem:[#allocation9 + $0xf04] sm:$0xf] }
 0x2ca   :  { %v9441_v15 = vor.u32 %v11977_v59, %v9440_v9  ;;  %v12005_v9 = vld [vmem:[#allocation9 + $0xd74] sm:$0xf0] }
 0x2cb   :  { %v3283_v54 = vpop.f32.mrf.mxu0  ;;  %v3282_v47 = vadd.f32 %v12920_v58, %v2522_v35  ;;  %v12045_v35 = vld [vmem:[#allocation9 + $0xeb4] sm:$0xf0] }
 0x2cc   :  { %v9785_v54 = vor.u32 %v12064_v61, %v9784_v21  ;;  %v12021_v61 = vld [vmem:[#allocation9 + $0xdf4] sm:$0xf0] }
 0x2cd   :  { %4247 = vmatpush.bf16.msra.mxu2 %v9661_v26  ;;  %v9425_v26 = vor.u32 %v11973_v0, %v9424_v16 }
 0x2ce   :  { %4208 = vmatpush.bf16.msrb.mxu3 %v9785_v54  ;;  %v12070_v54 = vld [vmem:[#allocation9 + $0xf84] sm:$0xf] }
 0x2cf   :  { %v3205_v36 = vpop.f32.mrf.mxu2  ;;  %v9821_v5 = vor.u32 %v12070_v54, %v9818_v23  ;;  %v9536_v54 = vld [vmem:[#allocation9 + $0xd48] sm:$0xf]  ;;  %v12001_v23 = vld [vmem:[#allocation9 + $0xd54] sm:$0xf0] }
 0x2d0   :  { %v9645_v36 = vor.u32 %v12026_v14, %v9642_v33  ;;  %v12066_v14 = vld [vmem:[#allocation9 + $0xf64] sm:$0xf]  ;;  %v9802_v33 = vld [vmem:[#allocation9 + $0xf70] sm:$0xf0] }
 0x2d1   :  { %v12924_v45 = vpop.f32.mrf.mxu1 }
 0x2d2   :  { %4209 = vmatpush.bf16.msrb.mxu3 %v9769_v63  ;;  %4248 = vmatpush.bf16.msra.mxu2 %v9645_v36  ;;  %v12017_v63 = vld [vmem:[#allocation9 + $0xdd4] sm:$0xf0]  ;;  %v9409_v36 = vor.u32 %v11969_v30, %v9408_v29  ;;  %v3295_v53 = vadd.f32 %v12924_v45, %v3282_v47  ;;  %v9493_v45 = vor.u32 %v11987_v1, %v9490_v2  ;;  %v9426_v47 = vld [vmem:[#allocation9 + $0xc78] sm:$0xf0]  ;;  %v12015_v2 = vld [vmem:[#allocation9 + $0xdcc] sm:$0xf] }
 0x2d3   :  { %v9537_v29 = vor.u32 %v12001_v23, %v9536_v54  ;;  %v9410_v1 = vld [vmem:[#allocation9 + $0xc58] sm:$0xf0] }
 0x2d4   :  { %v9570_v54 = vld [vmem:[#allocation9 + $0xd98] sm:$0xf0] }
 0x2d6   :  { %4210 = vmatpush.bf16.msrb.mxu3 %v9753_v44  ;;  %4249 = vmatpush.bf16.msra.mxu2 %v9629_v50  ;;  %v12062_v44 = vld [vmem:[#allocation9 + $0xf44] sm:$0xf]  ;;  %v9376_v50 = vld [vmem:[#allocation9 + $0xc08] sm:$0xf] }
 0x2d7   :  { %v12928_v62 = vpop.f32.mrf.mxu2  ;;  %v9789_v46 = vor.u32 %v12062_v44, %v9786_v41  ;;  %v9377_v17 = vor.u32 %v11961_v52, %v9376_v50  ;;  %v9696_v44 = vld [vmem:[#allocation9 + $0xe88] sm:$0xf]  ;;  %v12041_v41 = vld [vmem:[#allocation9 + $0xe94] sm:$0xf0] }
 0x2d8   :  { %v3256_v32 = vadd.f32 %v12928_v62, %v3243_v10  ;;  %v9600_v62 = vld [vmem:[#allocation9 + $0xdc8] sm:$0xf]  ;;  %v9697_v52 = vor.u32 %v12041_v41, %v9696_v44  ;;  %v12047_v44 = vld [vmem:[#allocation9 + $0xecc] sm:$0xf]  ;;  %v9730_v41 = vld [vmem:[#allocation9 + $0xed8] sm:$0xf0] }
 0x2d9   :  { %v3296_v7 = vpop.f32.mrf.mxu1 }
 0x2da   :  { %4255 = vmatpush.bf16.msra.mxu3 %v9869_v56  ;;  %v9568_v56 = vld [vmem:[#allocation9 + $0xd88] sm:$0xf] }
 0x2de   :  { %4256 = vmatpush.bf16.msra.mxu3 %v9853_v6 }
 0x2df   :  { %v3257_v19 = vpop.f32.mrf.mxu2 }
 0x2e0   :  { %v9616_v19 = vld [vmem:[#allocation9 + $0xde8] sm:$0xf] }
 0x2e1   :  { %v12931_v49 = vpop.f32.mrf.mxu0 }
 0x2e2   :  { %4257 = vmatpush.bf16.msra.mxu3 %v9837_v40  ;;  %v9754_v40 = vld [vmem:[#allocation9 + $0xf10] sm:$0xf0] }
 0x2e3   :  { %v9757_v16 = vor.u32 %v12054_v42, %v9754_v40  ;;  %v9586_v42 = vld [vmem:[#allocation9 + $0xdb8] sm:$0xf0] }
 0x2e6   :  { %4258 = vmatpush.bf16.msra.mxu3 %v9821_v5  ;;  %v9728_v5 = vld [vmem:[#allocation9 + $0xec8] sm:$0xf] }
 0x2e7   :  { %v3216_v31 = vpop.f32.mrf.mxu3 }
 0x2e8   :  { %v3217_v34 = vadd.f32 %v3216_v31, %v3204_v28  ;;  %v9617_v28 = vor.u32 %v12021_v61, %v9616_v19 }
 0x2e9   :  { %v3335_v27 = vpop.f32.mrf.mxu0 }
 0x2ea   :  { %v3376_v37 = vmax.f32 %v3217_v34, 0.0  ;;  %v12936_v43 = vpop.f32.mrf.mxu2  ;;  %v9805_v34 = vor.u32 %v12066_v14, %v9802_v33  ;;  %v9601_v27 = vor.u32 %v12017_v63, %v9600_v62  ;;  %v9520_v14 = vld [vmem:[#allocation9 + $0xd28] sm:$0xf]  ;;  %v11997_v33 = vld [vmem:[#allocation9 + $0xd34] sm:$0xf0] }
 0x2eb   :  { %v3308_v6 = vadd.f32 %v12936_v43, %v3295_v53  ;;  %v9680_v53 = vld [vmem:[#allocation9 + $0xe68] sm:$0xf] }
 0x2ec   :  { %v12938_v48 = vpack.c.bf16 %v3376_v37, %v3376_v37  ;;  %v9392_v37 = vld [vmem:[#allocation9 + $0xc28] sm:$0xf]  ;;  %4259 = vmatpush.bf16.msra.mxu3 %v9805_v34 }
 0x2ed   :  { %v9393_v20 = vor.u32 %v11965_v38, %v9392_v37  ;;  %v9712_v34 = vld [vmem:[#allocation9 + $0xea8] sm:$0xf] }
 0x2ee   :  { %4172 = vmatmul.bf16.vlgmr.msrb.gmra.mxu0 %v12938_v48  ;;  %v9713_v37 = vor.u32 %v12045_v35, %v9712_v34 }
 0x2ef   :  { %4268 = vmatpush.bf16.msrb.mxu0 %v9489_v12  ;;  %v3218_v55 = vpop.f32.mrf.mxu3  ;;  %v12013_v12 = vld [vmem:[#allocation9 + $0xdb4] sm:$0xf0] }
 0x2f0   :  { %v9585_v24 = vor.u32 %v12013_v12, %v9584_v18  ;;  %v12009_v55 = vld [vmem:[#allocation9 + $0xd94] sm:$0xf0]  ;;  %4260 = vmatpush.bf16.msra.mxu3 %v9789_v46  ;;  %v9504_v18 = vld [vmem:[#allocation9 + $0xd08] sm:$0xf]  ;;  %v11971_v46 = vld [vmem:[#allocation9 + $0xc6c] sm:$0xf] }
 0x2f1   :  { %v12943_v39 = vpop.f32.mrf.mxu1  ;;  %v11993_v12 = vld [vmem:[#allocation9 + $0xd14] sm:$0xf0] }
 0x2f2   :  { %v3309_v7 = vpop.f32.mrf.mxu2  ;;  %v9505_v50 = vor.u32 %v11993_v12, %v9504_v18  ;;  %v11999_v18 = vld [vmem:[#allocation9 + $0xd4c] sm:$0xf]  ;;  %v9538_v12 = vld [vmem:[#allocation9 + $0xd58] sm:$0xf0] }
 0x2f3   :  { %4269 = vmatpush.bf16.msrb.mxu0 %v9473_v57  ;;  %v12058_v57 = vld [vmem:[#allocation9 + $0xf24] sm:$0xf]  ;;  %v9569_v7 = vor.u32 %v12009_v55, %v9568_v56  ;;  %v9429_v56 = vor.u32 %v11971_v46, %v9426_v47 }
 0x2f4   :  { %v9773_v4 = vor.u32 %v12058_v57, %v9770_v60  ;;  %v12037_v57 = vld [vmem:[#allocation9 + $0xe74] sm:$0xf0]  ;;  %v11967_v60 = vld [vmem:[#allocation9 + $0xc4c] sm:$0xf] }
 0x2f6   :  { %4261 = vmatpush.bf16.msra.mxu3 %v9773_v4  ;;  %v9602_v4 = vld [vmem:[#allocation9 + $0xdd8] sm:$0xf0] }
 0x2f7   :  { %4270 = vmatpush.bf16.msrb.mxu0 %v9457_v8  ;;  %v3268_v13 = vpop.f32.mrf.mxu3  ;;  %v9552_v8 = vld [vmem:[#allocation9 + $0xd68] sm:$0xf] }
 0x2f8   :  { %v3269_v21 = vadd.f32 %v3268_v13, %v3256_v32  ;;  %v12053_v32 = vld [vmem:[#allocation9 + $0xef4] sm:$0xf0]  ;;  %v11983_v13 = vld [vmem:[#allocation9 + $0xccc] sm:$0xf]  ;;  %v9553_v0 = vor.u32 %v12005_v9, %v9552_v8  ;;  %v9605_v8 = vor.u32 %v12015_v2, %v9602_v4  ;;  %v9824_v2 = vld [vmem:[#allocation9 + $0xf88] sm:$0xf] }
 0x2f9   :  { %v3348_v25 = vpop.f32.mrf.mxu1  ;;  %v12033_v9 = vld [vmem:[#allocation9 + $0xe54] sm:$0xf0] }
 0x2fa   :  { %v3377_v3 = vmax.f32 %v3269_v21, 0.0  ;;  %v9745_v21 = vor.u32 %v12053_v32, %v9744_v11  ;;  %4262 = vmatpush.bf16.msra.mxu3 %v9757_v16  ;;  %v11979_v25 = vld [vmem:[#allocation9 + $0xcac] sm:$0xf]  ;;  %v12073_v4 = vld [vmem:[#allocation9 + $0xf94] sm:$0xf0] }
 0x2fb   :  { %4271 = vmatpush.bf16.msrb.mxu0 %v9441_v15  ;;  %v9474_v15 = vld [vmem:[#allocation9 + $0xcd8] sm:$0xf0]  ;;  %v12011_v11 = vld [vmem:[#allocation9 + $0xdac] sm:$0xf] }
 0x2fc   :  { %v12947_v31 = vpack.c.bf16 %v3377_v3, %v3377_v3  ;;  %v9477_v61 = vor.u32 %v11983_v13, %v9474_v15  ;;  %v12049_v3 = vld [vmem:[#allocation9 + $0xed4] sm:$0xf0]  ;;  %v9648_v13 = vld [vmem:[#allocation9 + $0xe28] sm:$0xf]  ;;  %v9589_v16 = vor.u32 %v12011_v11, %v9586_v42  ;;  %v12035_v42 = vld [vmem:[#allocation9 + $0xe6c] sm:$0xf] }
 0x2fd   :  { %v9729_v62 = vor.u32 %v12049_v3, %v9728_v5  ;;  %v12069_v11 = vld [vmem:[#allocation9 + $0xf74] sm:$0xf0] }
 0x2fe   :  { %4185 = vmatmul.bf16.vlgmr.msrb.gmra.mxu1 %v12947_v31  ;;  %4224 = vmatmul.bf16.vlgmr.msra.gmra.mxu0 %v12938_v48 }
 0x2ff   :  { %4272 = vmatpush.bf16.msrb.mxu0 %v9425_v26  ;;  %4281 = vmatpush.bf16.msrb.mxu1 %v9617_v28  ;;  %v3270_v51 = vpop.f32.mrf.mxu3  ;;  %v9458_v26 = vld [vmem:[#allocation9 + $0xcb8] sm:$0xf0] }
 0x300   :  { %v9461_v63 = vor.u32 %v11979_v25, %v9458_v26  ;;  %v11975_v51 = vld [vmem:[#allocation9 + $0xc8c] sm:$0xf]  ;;  %v9632_v25 = vld [vmem:[#allocation9 + $0xe08] sm:$0xf]  ;;  %v12025_v26 = vld [vmem:[#allocation9 + $0xe14] sm:$0xf0] }
 0x303   :  { %4273 = vmatpush.bf16.msrb.mxu0 %v9409_v36  ;;  %4282 = vmatpush.bf16.msrb.mxu1 %v9601_v27  ;;  %v9442_v36 = vld [vmem:[#allocation9 + $0xc98] sm:$0xf0]  ;;  %v9521_v27 = vor.u32 %v11997_v33, %v9520_v14  ;;  %v12051_v14 = vld [vmem:[#allocation9 + $0xeec] sm:$0xf] }
 0x304   :  { %v9445_v38 = vor.u32 %v11975_v51, %v9442_v36  ;;  %v9746_v33 = vld [vmem:[#allocation9 + $0xef8] sm:$0xf0] }
 0x307   :  { %4274 = vmatpush.bf16.msrb.mxu0 %v9393_v20  ;;  %4283 = vmatpush.bf16.msrb.mxu1 %v9585_v24  ;;  %v3320_v58 = vpop.f32.mrf.mxu3  ;;  %v12019_v20 = vld [vmem:[#allocation9 + $0xdec] sm:$0xf]  ;;  %v9618_v24 = vld [vmem:[#allocation9 + $0xdf8] sm:$0xf0] }
 0x308   :  { %v3321_v10 = vadd.f32 %v3320_v58, %v3308_v6  ;;  %v12955_v59 = vpop.f32.mrf.mxu2  ;;  %v9621_v55 = vor.u32 %v12019_v20, %v9618_v24  ;;  %v2523_v6 = vperm.slane %v12926_v22, 3  ;;  %v9681_v58 = vor.u32 %v12037_v57, %v9680_v53  ;;  %v9522_v53 = vld [vmem:[#allocation9 + $0xd38] sm:$0xf0] }
 0x309   :  { %v9541_v20 = vor.u32 %v11999_v18, %v9538_v12  ;;  %v9733_v24 = vor.u32 %v12047_v44, %v9730_v41  ;;  %v9714_v57 = vld [vmem:[#allocation9 + $0xeb8] sm:$0xf0]  ;;  %v12067_v18 = vld [vmem:[#allocation9 + $0xf6c] sm:$0xf]  ;;  %v9992_v44 = vld [vmem:[#allocation9 + $0x10e0] sm:$0xf] }
 0x30a   :  { %v3378_v43 = vmax.f32 %v3321_v10, 0.0  ;;  %v11963_v10 = vld [vmem:[#allocation9 + $0xc2c] sm:$0xf]  ;;  %v3334_v40 = vadd.f32 %v12931_v49, %v2523_v6  ;;  %v9810_v12 = vld [vmem:[#allocation9 + $0xf78] sm:$0xf0] }
 0x30b   :  { %4275 = vmatpush.bf16.msrb.mxu0 %v9377_v17  ;;  %4284 = vmatpush.bf16.msrb.mxu1 %v9569_v7  ;;  %v9413_v17 = vor.u32 %v11967_v60, %v9410_v1  ;;  %v9664_v7 = vld [vmem:[#allocation9 + $0xe48] sm:$0xf]  ;;  %v11991_v6 = vld [vmem:[#allocation9 + $0xd0c] sm:$0xf]  ;;  %v12116_v41 = vld [vmem:[#allocation9 + $0x10ec] sm:$0xf0] }
 0x30c   :  { %v12957_v19 = vpack.c.bf16 %v3378_v43, %v3378_v43  ;;  %v9665_v22 = vor.u32 %v12033_v9, %v9664_v7  ;;  %v3347_v15 = vadd.f32 %v12943_v39, %v3334_v40  ;;  %v12029_v43 = vld [vmem:[#allocation9 + $0xe34] sm:$0xf0]  ;;  %v9872_v39 = vld [vmem:[#allocation9 + $0xfe8] sm:$0xf]  ;;  %v9698_v7 = vld [vmem:[#allocation9 + $0xe98] sm:$0xf0] }
 0x30d   :  { %v9649_v49 = vor.u32 %v12029_v43, %v9648_v13  ;;  %v9682_v40 = vld [vmem:[#allocation9 + $0xe78] sm:$0xf0]  ;;  %v9792_v13 = vld [vmem:[#allocation9 + $0xf48] sm:$0xf] }
 0x30e   :  { %4198 = vmatmul.bf16.vlgmr.msrb.gmra.mxu2 %v12957_v19  ;;  %4237 = vmatmul.bf16.vlgmr.msra.gmra.mxu1 %v12947_v31  ;;  %v3360_v23 = vadd.f32 %v12955_v59, %v3347_v15  ;;  %v9633_v59 = vor.u32 %v12025_v26, %v9632_v25  ;;  %v12065_v15 = vld [vmem:[#allocation9 + $0xf54] sm:$0xf0]  ;;  %v9666_v43 = vld [vmem:[#allocation9 + $0xe58] sm:$0xf0]  ;;  %v9760_v25 = vld [vmem:[#allocation9 + $0xf08] sm:$0xf] }
 0x30f   :  { %4320 = vmatpush.bf16.msra.mxu0 %v9493_v45  ;;  %4285 = vmatpush.bf16.msrb.mxu1 %v9553_v0  ;;  %v3322_v28 = vpop.f32.mrf.mxu3  ;;  %v9394_v45 = vld [vmem:[#allocation9 + $0xc38] sm:$0xf0]  ;;  %v11959_v0 = vld [vmem:[#allocation9 + $0xc0c] sm:$0xf]  ;;  %v12057_v26 = vld [vmem:[#allocation9 + $0xf14] sm:$0xf0] }
 0x310   :  { %4276 = vmatmul.bf16.vlgmr.msrb.gmra.mxu0 %v12938_v48  ;;  %4294 = vmatpush.bf16.msrb.mxu2 %v9745_v21  ;;  %v3361_v30 = vpop.f32.mrf.mxu2  ;;  %v9397_v32 = vor.u32 %v11963_v10, %v9394_v45  ;;  %v9378_v21 = vld [vmem:[#allocation9 + $0xc18] sm:$0xf0]  ;;  %v9808_v45 = vld [vmem:[#allocation9 + $0xf68] sm:$0xf] }
 0x311   :  { %v9381_v3 = vor.u32 %v11959_v0, %v9378_v21  ;;  %v12085_v30 = vld [vmem:[#allocation9 + $0xff4] sm:$0xf0]  ;;  %v9793_v0 = vor.u32 %v12065_v15, %v9792_v13  ;;  %v10104_v13 = vld [vmem:[#allocation9 + $0x11c0] sm:$0xf] }
 0x312   :  { %v9873_v35 = vor.u32 %v12085_v30, %v9872_v39  ;;  %v12083_v39 = vld [vmem:[#allocation9 + $0xfec] sm:$0xf]  ;;  %v9874_v30 = vld [vmem:[#allocation9 + $0xff8] sm:$0xf0] }
 0x313   :  { %4321 = vmatpush.bf16.msra.mxu0 %v9477_v61  ;;  %4286 = vmatpush.bf16.msrb.mxu1 %v9537_v29  ;;  %v12007_v61 = vld [vmem:[#allocation9 + $0xd8c] sm:$0xf] }
 0x314   :  { %4295 = vmatpush.bf16.msrb.mxu2 %v9729_v62  ;;  %v9573_v29 = vor.u32 %v12007_v61, %v9570_v54  ;;  %v12003_v62 = vld [vmem:[#allocation9 + $0xd6c] sm:$0xf]  ;;  %v9776_v61 = vld [vmem:[#allocation9 + $0xf28] sm:$0xf]  ;;  %v12061_v54 = vld [vmem:[#allocation9 + $0xf34] sm:$0xf0] }
 0x317   :  { %4322 = vmatpush.bf16.msra.mxu0 %v9461_v63  ;;  %4287 = vmatpush.bf16.msrb.mxu1 %v9521_v27  ;;  %v9554_v63 = vld [vmem:[#allocation9 + $0xd78] sm:$0xf0]  ;;  %v9749_v27 = vor.u32 %v12051_v14, %v9746_v33  ;;  %v12079_v14 = vld [vmem:[#allocation9 + $0xfcc] sm:$0xf] }
 0x318   :  { %4296 = vmatpush.bf16.msrb.mxu2 %v9713_v37  ;;  %v9557_v36 = vor.u32 %v12003_v62, %v9554_v63  ;;  %v9856_v37 = vld [vmem:[#allocation9 + $0xfc8] sm:$0xf]  ;;  %v9761_v62 = vor.u32 %v12057_v26, %v9760_v25  ;;  %v9877_v63 = vor.u32 %v12083_v39, %v9874_v30  ;;  %v9858_v33 = vld [vmem:[#allocation9 + $0xfd8] sm:$0xf0]  ;;  %v10072_v25 = vld [vmem:[#allocation9 + $0x1180] sm:$0xf] }
 0x319   :  { %v9994_v39 = vld [vmem:[#allocation9 + $0x10f0] sm:$0xf0] }
 0x31b   :  { %4323 = vmatpush.bf16.msra.mxu0 %v9445_v38  ;;  %4288 = vmatpush.bf16.msrb.mxu1 %v9505_v50  ;;  %v12081_v38 = vld [vmem:[#allocation9 + $0xfd4] sm:$0xf0]  ;;  %v9840_v50 = vld [vmem:[#allocation9 + $0xfa8] sm:$0xf] }
 0x31c   :  { %4297 = vmatpush.bf16.msrb.mxu2 %v9697_v52  ;;  %v9857_v47 = vor.u32 %v12081_v38, %v9856_v37  ;;  %v12077_v52 = vld [vmem:[#allocation9 + $0xfb4] sm:$0xf0]  ;;  %v9826_v37 = vld [vmem:[#allocation9 + $0xf98] sm:$0xf0] }
 0x31d   :  { %v9841_v60 = vor.u32 %v12077_v52, %v9840_v50  ;;  %v12059_v52 = vld [vmem:[#allocation9 + $0xf2c] sm:$0xf] }
 0x31e   :  { %4250 = vmatmul.bf16.vlgmr.msra.gmra.mxu2 %v12957_v19  ;;  %4289 = vmatmul.bf16.vlgmr.msrb.gmra.mxu1 %v12947_v31 }
 0x31f   :  { %4324 = vmatpush.bf16.msra.mxu0 %v9429_v56  ;;  %4333 = vmatpush.bf16.msra.mxu1 %v9621_v55  ;;  %v11995_v56 = vld [vmem:[#allocation9 + $0xd2c] sm:$0xf] }
 0x320   :  { %4298 = vmatpush.bf16.msrb.mxu2 %v9681_v58  ;;  %v12043_v55 = vld [vmem:[#allocation9 + $0xeac] sm:$0xf]  ;;  %v9506_v58 = vld [vmem:[#allocation9 + $0xd18] sm:$0xf0] }
 0x321   :  { %v9717_v1 = vor.u32 %v12043_v55, %v9714_v57  ;;  %v9509_v9 = vor.u32 %v11991_v6, %v9506_v58  ;;  %v9944_v58 = vld [vmem:[#allocation9 + $0x1080] sm:$0xf] }
 0x323   :  { %4325 = vmatpush.bf16.msra.mxu0 %v9413_v17  ;;  %4334 = vmatpush.bf16.msra.mxu1 %v9605_v8  ;;  %v12039_v17 = vld [vmem:[#allocation9 + $0xe8c] sm:$0xf]  ;;  %v9825_v8 = vor.u32 %v12073_v4, %v9824_v2  ;;  %v9762_v2 = vld [vmem:[#allocation9 + $0xf18] sm:$0xf0] }
 0x324   :  { %4299 = vmatpush.bf16.msrb.mxu2 %v9665_v22  ;;  %v9701_v10 = vor.u32 %v12039_v17, %v9698_v7  ;;  %v9809_v22 = vor.u32 %v12069_v11, %v9808_v45  ;;  %v12104_v17 = vld [vmem:[#allocation9 + $0x108c] sm:$0xf0]  ;;  %v9928_v7 = vld [vmem:[#allocation9 + $0x1060] sm:$0xf] }
 0x325   :  { %v12148_v45 = vld [vmem:[#allocation9 + $0x11ec] sm:$0xf0] }
 0x327   :  { %v3372_v5 = vpop.f32.mrf.mxu3  ;;  %4326 = vmatpush.bf16.msra.mxu0 %v9397_v32  ;;  %4335 = vmatpush.bf16.msra.mxu1 %v9589_v16  ;;  %v9685_v32 = vor.u32 %v12035_v42, %v9682_v40  ;;  %v12031_v16 = vld [vmem:[#allocation9 + $0xe4c] sm:$0xf] }
 0x328   :  { %v3373_v28 = vadd.f32 %v3372_v5, %v3360_v23  ;;  %4300 = vmatpush.bf16.msrb.mxu2 %v9649_v49  ;;  %v9669_v21 = vor.u32 %v12031_v16, %v9666_v43  ;;  %v12027_v23 = vld [vmem:[#allocation9 + $0xe2c] sm:$0xf]  ;;  %v9650_v5 = vld [vmem:[#allocation9 + $0xe38] sm:$0xf0]  ;;  %v9777_v49 = vor.u32 %v12061_v54, %v9776_v61  ;;  %v12144_v16 = vld [vmem:[#allocation9 + $0x11cc] sm:$0xf0] }
 0x329   :  { %v10105_v43 = vor.u32 %v12144_v16, %v10104_v13  ;;  %v10088_v61 = vld [vmem:[#allocation9 + $0x11a0] sm:$0xf]  ;;  %v12094_v16 = vld [vmem:[#allocation9 + $0x1044] sm:$0xf] }
 0x32a   :  { %v3379_v34 = vmax.f32 %v3373_v28, 0.0  ;;  %v12023_v28 = vld [vmem:[#allocation9 + $0xe0c] sm:$0xf]  ;;  %v10184_v13 = vld [vmem:[#allocation9 + $0x1260] sm:$0xf] }
 0x32b   :  { %4327 = vmatpush.bf16.msra.mxu0 %v9381_v3  ;;  %4336 = vmatpush.bf16.msra.mxu1 %v9573_v29  ;;  %v9653_v3 = vor.u32 %v12027_v23, %v9650_v5  ;;  %v9634_v29 = vld [vmem:[#allocation9 + $0xe18] sm:$0xf0]  ;;  %v12140_v23 = vld [vmem:[#allocation9 + $0x11ac] sm:$0xf0] }
 0x32c   :  { %v12968_v51 = vpack.c.bf16 %v3379_v34, %v3379_v34  ;;  %4301 = vmatpush.bf16.msrb.mxu2 %v9633_v59  ;;  %v9861_v34 = vor.u32 %v12079_v14, %v9858_v33  ;;  %v12075_v59 = vld [vmem:[#allocation9 + $0xfac] sm:$0xf]  ;;  %v10248_v14 = vld [vmem:[#allocation9 + $0x12e0] sm:$0xf] }
 0x32e   :  { %4211 = vmatmul.bf16.vlgmr.msrb.gmra.mxu3 %v12968_v51  ;;  %4328 = vmatmul.bf16.vlgmr.msra.gmra.mxu0 %v12938_v48  ;;  %v9525_v48 = vor.u32 %v11995_v56, %v9522_v53  ;;  %v9976_v56 = vld [vmem:[#allocation9 + $0x10c0] sm:$0xf]  ;;  %v12112_v53 = vld [vmem:[#allocation9 + $0x10cc] sm:$0xf0] }
 0x32f   :  { %4307 = vmatpush.bf16.msrb.mxu3 %v9873_v35  ;;  %v3374_v46 = vpop.f32.mrf.mxu3  ;;  %4337 = vmatpush.bf16.msra.mxu1 %v9557_v36  ;;  %v9842_v35 = vld [vmem:[#allocation9 + $0xfb8] sm:$0xf0]  ;;  %v9977_v57 = vor.u32 %v12112_v53, %v9976_v56  ;;  %v10216_v56 = vld [vmem:[#allocation9 + $0x12a0] sm:$0xf] }
 0x330   :  { %4346 = vmatpush.bf16.msra.mxu2 %v9749_v27  ;;  %v9845_v36 = vor.u32 %v12075_v59, %v9842_v35  ;;  %v12071_v27 = vld [vmem:[#allocation9 + $0xf8c] sm:$0xf]  ;;  %v9993_v46 = vor.u32 %v12116_v41, %v9992_v44  ;;  %v12110_v59 = vld [vmem:[#allocation9 + $0x10c4] sm:$0xf]  ;;  %v9978_v35 = vld [vmem:[#allocation9 + $0x10d0] sm:$0xf0] }
 0x331   :  { %4302 = vmatmul.bf16.vlgmr.msrb.gmra.mxu2 %v12957_v19  ;;  %v9829_v38 = vor.u32 %v12071_v27, %v9826_v37  ;;  %v10232_v44 = vld [vmem:[#allocation9 + $0x12c0] sm:$0xf] }
 0x332   :  { %5160 = vmatpush.bf16.msrb.mxu0 %v9993_v46  ;;  %v12176_v46 = vld [vmem:[#allocation9 + $0x12cc] sm:$0xf0] }
 0x333   :  { %4308 = vmatpush.bf16.msrb.mxu3 %v9857_v47  ;;  %4338 = vmatpush.bf16.msra.mxu1 %v9541_v20  ;;  %v9813_v47 = vor.u32 %v12067_v18, %v9810_v12  ;;  %v12063_v20 = vld [vmem:[#allocation9 + $0xf4c] sm:$0xf]  ;;  %v10040_v18 = vld [vmem:[#allocation9 + $0x1140] sm:$0xf]  ;;  %v12128_v12 = vld [vmem:[#allocation9 + $0x114c] sm:$0xf0] }
 0x334   :  { %4347 = vmatpush.bf16.msra.mxu2 %v9733_v24  ;;  %v9794_v24 = vld [vmem:[#allocation9 + $0xf58] sm:$0xf0]  ;;  %v10041_v41 = vor.u32 %v12128_v12, %v10040_v18  ;;  %v10074_v18 = vld [vmem:[#allocation9 + $0x1190] sm:$0xf0] }
 0x335   :  { %v9797_v50 = vor.u32 %v12063_v20, %v9794_v24  ;;  %v9962_v20 = vld [vmem:[#allocation9 + $0x10b0] sm:$0xf0]  ;;  %v10233_v24 = vor.u32 %v12176_v46, %v10232_v44  ;;  %v12152_v46 = vld [vmem:[#allocation9 + $0x120c] sm:$0xf0] }
 0x336   :  { %5161 = vmatpush.bf16.msrb.mxu0 %v9977_v57  ;;  %v12102_v57 = vld [vmem:[#allocation9 + $0x1084] sm:$0xf] }
 0x337   :  { %4309 = vmatpush.bf16.msrb.mxu3 %v9841_v60  ;;  %4339 = vmatpush.bf16.msra.mxu1 %v9525_v48  ;;  %v9960_v60 = vld [vmem:[#allocation9 + $0x10a0] sm:$0xf]  ;;  %v12108_v48 = vld [vmem:[#allocation9 + $0x10ac] sm:$0xf0] }
 0x338   :  { %4348 = vmatpush.bf16.msra.mxu2 %v9717_v1  ;;  %v12055_v1 = vld [vmem:[#allocation9 + $0xf0c] sm:$0xf]  ;;  %v9961_v4 = vor.u32 %v12108_v48, %v9960_v60  ;;  %v9946_v60 = vld [vmem:[#allocation9 + $0x1090] sm:$0xf0] }
 0x339   :  { %v9765_v6 = vor.u32 %v12055_v1, %v9762_v2 }
 0x33a   :  { %5162 = vmatpush.bf16.msrb.mxu0 %v9961_v4  ;;  %v9949_v4 = vor.u32 %v12102_v57, %v9946_v60 }
 0x33b   :  { %4310 = vmatpush.bf16.msrb.mxu3 %v9825_v8  ;;  %4340 = vmatpush.bf16.msra.mxu1 %v9509_v9  ;;  %v9945_v8 = vor.u32 %v12104_v17, %v9944_v58  ;;  %v12100_v9 = vld [vmem:[#allocation9 + $0x106c] sm:$0xf0]  ;;  %v10200_v17 = vld [vmem:[#allocation9 + $0x1280] sm:$0xf] }
 0x33c   :  { %4349 = vmatpush.bf16.msra.mxu2 %v9701_v10  ;;  %v10120_v10 = vld [vmem:[#allocation9 + $0x11e0] sm:$0xf]  ;;  %v9929_v42 = vor.u32 %v12100_v9, %v9928_v7  ;;  %v12120_v58 = vld [vmem:[#allocation9 + $0x110c] sm:$0xf0] }
 0x33d   :  { %v10121_v11 = vor.u32 %v12148_v45, %v10120_v10  ;;  %v12168_v7 = vld [vmem:[#allocation9 + $0x128c] sm:$0xf0]  ;;  %v12098_v10 = vld [vmem:[#allocation9 + $0x1064] sm:$0xf]  ;;  %v9930_v45 = vld [vmem:[#allocation9 + $0x1070] sm:$0xf0] }
 0x33e   :  { %4263 = vmatmul.bf16.vlgmr.msra.gmra.mxu3 %v12968_v51  ;;  %4341 = vmatmul.bf16.vlgmr.msra.gmra.mxu1 %v12947_v31  ;;  %v9637_v31 = vor.u32 %v12023_v28, %v9634_v29  ;;  %v12136_v28 = vld [vmem:[#allocation9 + $0x118c] sm:$0xf0]  ;;  %v12114_v29 = vld [vmem:[#allocation9 + $0x10e4] sm:$0xf]  ;;  %v10201_v9 = vor.u32 %v12168_v7, %v10200_v17 }
 0x33f   :  { %4311 = vmatpush.bf16.msrb.mxu3 %v9809_v22  ;;  %5163 = vmatpush.bf16.msrb.mxu0 %v9945_v8  ;;  %v9912_v22 = vld [vmem:[#allocation9 + $0x1040] sm:$0xf]  ;;  %v10073_v30 = vor.u32 %v12136_v28, %v10072_v25  ;;  %v9898_v28 = vld [vmem:[#allocation9 + $0x1030] sm:$0xf0] }
 0x340   :  { %4350 = vmatpush.bf16.msra.mxu2 %v9685_v32  ;;  %5173 = vmatpush.bf16.msrb.mxu1 %v10121_v11  ;;  %v12096_v32 = vld [vmem:[#allocation9 + $0x104c] sm:$0xf0]  ;;  %v12146_v11 = vld [vmem:[#allocation9 + $0x11e4] sm:$0xf] }
 0x341   :  { %v9913_v15 = vor.u32 %v12096_v32, %v9912_v22  ;;  %v10122_v22 = vld [vmem:[#allocation9 + $0x11f0] sm:$0xf0] }
 0x342   :  { %v10125_v32 = vor.u32 %v12146_v11, %v10122_v22  ;;  %v10026_v22 = vld [vmem:[#allocation9 + $0x1130] sm:$0xf0] }
 0x343   :  { %4312 = vmatpush.bf16.msrb.mxu3 %v9793_v0  ;;  %5164 = vmatpush.bf16.msrb.mxu0 %v9929_v42  ;;  %v9896_v0 = vld [vmem:[#allocation9 + $0x1020] sm:$0xf]  ;;  %v9933_v42 = vor.u32 %v12098_v10, %v9930_v45  ;;  %v12204_v45 = vld [vmem:[#allocation9 + $0x13ac] sm:$0xf0] }
 0x344   :  { %4351 = vmatpush.bf16.msra.mxu2 %v9669_v21  ;;  %5174 = vmatpush.bf16.msrb.mxu1 %v10105_v43  ;;  %v12092_v21 = vld [vmem:[#allocation9 + $0x102c] sm:$0xf0]  ;;  %v10344_v10 = vld [vmem:[#allocation9 + $0x13a0] sm:$0xf] }
 0x345   :  { %v9897_v54 = vor.u32 %v12092_v21, %v9896_v0  ;;  %v9914_v0 = vld [vmem:[#allocation9 + $0x1050] sm:$0xf0]  ;;  %v12142_v21 = vld [vmem:[#allocation9 + $0x11c4] sm:$0xf]  ;;  %v10345_v11 = vor.u32 %v12204_v45, %v10344_v10  ;;  %v9984_v10 = vld [vmem:[#allocation9 + $0x10c8] sm:$0xf] }
 0x346   :  { %v12113_v45 = vld [vmem:[#allocation9 + $0x10d4] sm:$0xf0] }
 0x347   :  { %4313 = vmatpush.bf16.msrb.mxu3 %v9777_v49  ;;  %5165 = vmatpush.bf16.msrb.mxu0 %v9913_v15  ;;  %v10089_v49 = vor.u32 %v12140_v23, %v10088_v61  ;;  %v12164_v15 = vld [vmem:[#allocation9 + $0x126c] sm:$0xf0]  ;;  %v10106_v61 = vld [vmem:[#allocation9 + $0x11d0] sm:$0xf0]  ;;  %v9917_v23 = vor.u32 %v12094_v16, %v9914_v0 }
 0x348   :  { %4352 = vmatpush.bf16.msra.mxu2 %v9653_v3  ;;  %v12088_v3 = vld [vmem:[#allocation9 + $0x100c] sm:$0xf0]  ;;  %v10185_v43 = vor.u32 %v12164_v15, %v10184_v13  ;;  %v10218_v15 = vld [vmem:[#allocation9 + $0x12b0] sm:$0xf0] }
 0x349   :  { %5175 = vmatpush.bf16.msrb.mxu1 %v10089_v49 }
 0x34b   :  { %4314 = vmatpush.bf16.msrb.mxu3 %v9761_v62  ;;  %5166 = vmatpush.bf16.msrb.mxu0 %v9897_v54  ;;  %v9997_v62 = vor.u32 %v12114_v29, %v9994_v39  ;;  %v12138_v29 = vld [vmem:[#allocation9 + $0x11a4] sm:$0xf] }
 0x34c   :  { %4353 = vmatpush.bf16.msra.mxu2 %v9637_v31  ;;  %v10056_v31 = vld [vmem:[#allocation9 + $0x1160] sm:$0xf] }
 0x34d   :  { %5176 = vmatpush.bf16.msrb.mxu1 %v10073_v30  ;;  %v10090_v30 = vld [vmem:[#allocation9 + $0x11b0] sm:$0xf0] }
 0x34e   :  { %4315 = vmatmul.bf16.vlgmr.msrb.gmra.mxu3 %v12968_v51 }
 0x34f   :  { %4359 = vmatpush.bf16.msra.mxu3 %v9877_v63  ;;  %4354 = vmatmul.bf16.vlgmr.msra.gmra.mxu2 %v12957_v19  ;;  %v9778_v19 = vld [vmem:[#allocation9 + $0xf38] sm:$0xf0]  ;;  %v12132_v63 = vld [vmem:[#allocation9 + $0x116c] sm:$0xf0] }
 0x350   :  { %v9781_v55 = vor.u32 %v12059_v52, %v9778_v19  ;;  %v10057_v33 = vor.u32 %v12132_v63, %v10056_v31  ;;  %v10024_v52 = vld [vmem:[#allocation9 + $0x1120] sm:$0xf]  ;;  %v12124_v19 = vld [vmem:[#allocation9 + $0x112c] sm:$0xf0] }
 0x351   :  { %v10025_v53 = vor.u32 %v12124_v19, %v10024_v52  ;;  %v10152_v63 = vld [vmem:[#allocation9 + $0x1220] sm:$0xf]  ;;  %v10058_v52 = vld [vmem:[#allocation9 + $0x1170] sm:$0xf0] }
 0x352   :  { %5177 = vmatpush.bf16.msrb.mxu1 %v10057_v33 }
 0x353   :  { %4360 = vmatpush.bf16.msra.mxu3 %v9861_v34  ;;  %v12180_v34 = vld [vmem:[#allocation9 + $0x12ec] sm:$0xf0] }
 0x354   :  { %v10249_v37 = vor.u32 %v12180_v34, %v10248_v14  ;;  %v12156_v14 = vld [vmem:[#allocation9 + $0x122c] sm:$0xf0]  ;;  %v12086_v34 = vld [vmem:[#allocation9 + $0x1004] sm:$0xf] }
 0x355   :  { %v10153_v33 = vor.u32 %v12156_v14, %v10152_v63  ;;  %v12162_v14 = vld [vmem:[#allocation9 + $0x1264] sm:$0xf] }
 0x356   :  { %5186 = vmatpush.bf16.msrb.mxu2 %v10249_v37  ;;  %5178 = vmatpush.bf16.msrb.mxu1 %v10041_v41  ;;  %v10136_v41 = vld [vmem:[#allocation9 + $0x1200] sm:$0xf] }
 0x357   :  { %4361 = vmatpush.bf16.msra.mxu3 %v9845_v36 }
 0x35a   :  { %5187 = vmatpush.bf16.msrb.mxu2 %v10233_v24  ;;  %5179 = vmatpush.bf16.msrb.mxu1 %v10025_v53  ;;  %v12212_v24 = vld [vmem:[#allocation9 + $0x13ec] sm:$0xf0]  ;;  %v12178_v53 = vld [vmem:[#allocation9 + $0x12e4] sm:$0xf] }
 0x35b   :  { %4362 = vmatpush.bf16.msra.mxu3 %v9829_v38  ;;  %v9981_v38 = vor.u32 %v12110_v59, %v9978_v35  ;;  %v9882_v59 = vld [vmem:[#allocation9 + $0x1010] sm:$0xf0]  ;;  %v12134_v35 = vld [vmem:[#allocation9 + $0x1184] sm:$0xf] }
 0x35c   :  { %v10077_v44 = vor.u32 %v12134_v35, %v10074_v18  ;;  %v12192_v18 = vld [vmem:[#allocation9 + $0x134c] sm:$0xf0] }
 0x35f   :  { %4363 = vmatpush.bf16.msra.mxu3 %v9813_v47  ;;  %v12106_v47 = vld [vmem:[#allocation9 + $0x10a4] sm:$0xf] }
 0x363   :  { %4364 = vmatpush.bf16.msra.mxu3 %v9797_v50  ;;  %v9965_v50 = vor.u32 %v12106_v47, %v9962_v20  ;;  %v10376_v47 = vld [vmem:[#allocation9 + $0x13e0] sm:$0xf]  ;;  %v10137_v20 = vor.u32 %v12152_v46, %v10136_v41  ;;  %v10170_v41 = vld [vmem:[#allocation9 + $0x1250] sm:$0xf0] }
 0x364   :  { %v10377_v19 = vor.u32 %v12212_v24, %v10376_v47  ;;  %v10280_v24 = vld [vmem:[#allocation9 + $0x1320] sm:$0xf] }
 0x367   :  { %4365 = vmatpush.bf16.msra.mxu3 %v9781_v55  ;;  %v12172_v55 = vld [vmem:[#allocation9 + $0x12ac] sm:$0xf0] }
 0x368   :  { %v10217_v2 = vor.u32 %v12172_v55, %v10216_v56  ;;  %v10250_v55 = vld [vmem:[#allocation9 + $0x12f0] sm:$0xf0] }
 0x369   :  { %v10253_v57 = vor.u32 %v12178_v53, %v10250_v55  ;;  %v10000_v55 = vld [vmem:[#allocation9 + $0x10e8] sm:$0xf] }
 0x36a   :  { %5188 = vmatpush.bf16.msrb.mxu2 %v10217_v2 }
 0x36b   :  { %4366 = vmatpush.bf16.msra.mxu3 %v9765_v6  ;;  %v12978_v40 = vpop.f32.mrf.mxu0  ;;  %v10008_v6 = vld [vmem:[#allocation9 + $0x1100] sm:$0xf] }
 0x36c   :  { %v10009_v8 = vor.u32 %v12120_v58, %v10008_v6  ;;  %v10042_v6 = vld [vmem:[#allocation9 + $0x1150] sm:$0xf0]  ;;  %v12174_v58 = vld [vmem:[#allocation9 + $0x12c4] sm:$0xf] }
 0x36e   :  { %4367 = vmatmul.bf16.vlgmr.msra.gmra.mxu3 %v12968_v51  ;;  %v9880_v51 = vld [vmem:[#allocation9 + $0x1000] sm:$0xf]  ;;  %5180 = vmatpush.bf16.msrb.mxu1 %v10009_v8  ;;  %v10234_v8 = vld [vmem:[#allocation9 + $0x12d0] sm:$0xf0] }
 0x36f   :  { %v9881_v26 = vor.u32 %v12088_v3, %v9880_v51  ;;  %5189 = vmatpush.bf16.msrb.mxu2 %v10201_v9  ;;  %v10168_v51 = vld [vmem:[#allocation9 + $0x1240] sm:$0xf]  ;;  %v12160_v3 = vld [vmem:[#allocation9 + $0x124c] sm:$0xf0]  ;;  %5199 = vmatpush.bf16.msrb.mxu3 %v10377_v19  ;;  %v10237_v9 = vor.u32 %v12174_v58, %v10234_v8  ;;  %v12150_v58 = vld [vmem:[#allocation9 + $0x1204] sm:$0xf] }
 0x370   :  { %v10169_v25 = vor.u32 %v12160_v3, %v10168_v51  ;;  %v10010_v51 = vld [vmem:[#allocation9 + $0x1110] sm:$0xf0]  ;;  %v12166_v3 = vld [vmem:[#allocation9 + $0x1284] sm:$0xf] }
 0x371   :  { %5167 = vmatpush.bf16.msrb.mxu0 %v9881_v26  ;;  %v12090_v26 = vld [vmem:[#allocation9 + $0x1024] sm:$0xf] }
 0x372   :  { %5225 = vmatpush.bf16.msra.mxu1 %v10125_v32  ;;  %v9901_v39 = vor.u32 %v12090_v26, %v9898_v28  ;;  %v12170_v32 = vld [vmem:[#allocation9 + $0x12a4] sm:$0xf]  ;;  %v10202_v28 = vld [vmem:[#allocation9 + $0x1290] sm:$0xf0] }
 0x373   :  { %v4175_v5 = vpop.f32.mrf.mxu0  ;;  %5190 = vmatpush.bf16.msrb.mxu2 %v10185_v43  ;;  %v10221_v16 = vor.u32 %v12170_v32, %v10218_v15  ;;  %v12992_v43 = vld [vmem:[#allocation11 + $0xc] sm:$0xf]  ;;  %v12210_v8 = vld [vmem:[#allocation9 + $0x13e4] sm:$0xf]  ;;  %v9985_v15 = vor.u32 %v12113_v45, %v9984_v10 }
 0x374   :  { %v10109_v5 = vor.u32 %v12142_v21, %v10106_v61  ;;  %v10328_v21 = vld [vmem:[#allocation9 + $0x1380] sm:$0xf]  ;;  %v12200_v61 = vld [vmem:[#allocation9 + $0x138c] sm:$0xf0]  ;;  %v3517_v32 = vperm.slane %v12992_v43, 1 }
 0x375   :  { %5212 = vmatpush.bf16.msra.mxu0 %v9997_v62  ;;  %v10093_v62 = vor.u32 %v12138_v29, %v10090_v30  ;;  %v10205_v29 = vor.u32 %v12166_v3, %v10202_v28  ;;  %v10312_v30 = vld [vmem:[#allocation9 + $0x1360] sm:$0xf]  ;;  %v9952_v28 = vld [vmem:[#allocation9 + $0x1088] sm:$0xf] }
 0x376   :  { %5226 = vmatpush.bf16.msra.mxu1 %v10109_v5  ;;  %v12118_v5 = vld [vmem:[#allocation9 + $0x1104] sm:$0xf] }
 0x377   :  { %5191 = vmatpush.bf16.msrb.mxu2 %v10169_v25  ;;  %v10013_v26 = vor.u32 %v12118_v5, %v10010_v51 }
 0x379   :  { %5213 = vmatpush.bf16.msra.mxu0 %v9981_v38  ;;  %v9885_v38 = vor.u32 %v12086_v34, %v9882_v59 }
 0x37a   :  { %5227 = vmatpush.bf16.msra.mxu1 %v10093_v62  ;;  %v12196_v62 = vld [vmem:[#allocation9 + $0x136c] sm:$0xf0] }
 0x37b   :  { %v12980_v36 = vpop.f32.mrf.mxu1  ;;  %v12982_v27 = vpop.f32.mrf.mxu0  ;;  %5192 = vmatpush.bf16.msrb.mxu2 %v10153_v33  ;;  %v10313_v63 = vor.u32 %v12196_v62, %v10312_v30  ;;  %v10186_v33 = vld [vmem:[#allocation9 + $0x1270] sm:$0xf0]  ;;  %v12202_v30 = vld [vmem:[#allocation9 + $0x13a4] sm:$0xf] }
 0x37c   :  { %v10189_v34 = vor.u32 %v12162_v14, %v10186_v33  ;;  %v4226_v51 = vadd.f32 %v12982_v27, %v3517_v32  ;;  %v10346_v62 = vld [vmem:[#allocation9 + $0x13b0] sm:$0xf0]  ;;  %v12101_v27 = vld [vmem:[#allocation9 + $0x1074] sm:$0xf0] }
 0x37d   :  { %5214 = vmatpush.bf16.msra.mxu0 %v9965_v50  ;;  %v12130_v50 = vld [vmem:[#allocation9 + $0x1164] sm:$0xf] }
 0x37e   :  { %5228 = vmatpush.bf16.msra.mxu1 %v10077_v44  ;;  %v10061_v56 = vor.u32 %v12130_v50, %v10058_v52  ;;  %v12158_v44 = vld [vmem:[#allocation9 + $0x1244] sm:$0xf]  ;;  %v12188_v50 = vld [vmem:[#allocation9 + $0x132c] sm:$0xf0] }
 0x37f   :  { %5193 = vmatpush.bf16.msrb.mxu2 %v10137_v20  ;;  %v10173_v47 = vor.u32 %v12158_v44, %v10170_v41  ;;  %v10281_v19 = vor.u32 %v12188_v50, %v10280_v24  ;;  %v10330_v44 = vld [vmem:[#allocation9 + $0x1390] sm:$0xf0]  ;;  %v9920_v24 = vld [vmem:[#allocation9 + $0x1048] sm:$0xf]  ;;  %v12097_v50 = vld [vmem:[#allocation9 + $0x1054] sm:$0xf0] }
 0x381   :  { %5215 = vmatpush.bf16.msra.mxu0 %v9949_v4  ;;  %v12126_v4 = vld [vmem:[#allocation9 + $0x1144] sm:$0xf] }
 0x382   :  { %5229 = vmatpush.bf16.msra.mxu1 %v10061_v56  ;;  %v10045_v7 = vor.u32 %v12126_v4, %v10042_v6  ;;  %v10154_v56 = vld [vmem:[#allocation9 + $0x1230] sm:$0xf0] }
 0x383   :  { %v4188_v48 = vpop.f32.mrf.mxu1  ;;  %v4227_v1 = vpop.f32.mrf.mxu0  ;;  %5238 = vmatpush.bf16.msra.mxu2 %v10253_v57  ;;  %v12117_v57 = vld [vmem:[#allocation9 + $0x10f4] sm:$0xf0] }
 0x384   :  { %v10360_v48 = vld [vmem:[#allocation9 + $0x13c0] sm:$0xf]  ;;  %v12208_v1 = vld [vmem:[#allocation9 + $0x13cc] sm:$0xf0] }
 0x385   :  { %5216 = vmatpush.bf16.msra.mxu0 %v9933_v42  ;;  %v10361_v2 = vor.u32 %v12208_v1, %v10360_v48  ;;  %v12122_v42 = vld [vmem:[#allocation9 + $0x1124] sm:$0xf] }
 0x386   :  { %5230 = vmatpush.bf16.msra.mxu1 %v10045_v7  ;;  %v10029_v13 = vor.u32 %v12122_v42, %v10026_v22  ;;  %v10138_v7 = vld [vmem:[#allocation9 + $0x1210] sm:$0xf0] }
 0x387   :  { %5200 = vmatpush.bf16.msrb.mxu3 %v10361_v2  ;;  %5239 = vmatpush.bf16.msra.mxu2 %v10237_v9  ;;  %v10264_v2 = vld [vmem:[#allocation9 + $0x1300] sm:$0xf]  ;;  %v10378_v42 = vld [vmem:[#allocation9 + $0x13f0] sm:$0xf0] }
 0x388   :  { %v10381_v22 = vor.u32 %v12210_v8, %v10378_v42  ;;  %v12089_v42 = vld [vmem:[#allocation9 + $0x1014] sm:$0xf0] }
 0x389   :  { %5217 = vmatpush.bf16.msra.mxu0 %v9917_v23  ;;  %v10329_v23 = vor.u32 %v12200_v61, %v10328_v21  ;;  %v12109_v21 = vld [vmem:[#allocation9 + $0x10b4] sm:$0xf0]  ;;  %v12206_v61 = vld [vmem:[#allocation9 + $0x13c4] sm:$0xf] }
 0x38a   :  { %5231 = vmatpush.bf16.msra.mxu1 %v10029_v13 }
 0x38b   :  { %v12984_v54 = vpop.f32.mrf.mxu1  ;;  %5201 = vmatpush.bf16.msrb.mxu3 %v10345_v11  ;;  %5240 = vmatpush.bf16.msra.mxu2 %v10221_v16  ;;  %v10141_v11 = vor.u32 %v12150_v58, %v10138_v7  ;;  %v9968_v16 = vld [vmem:[#allocation9 + $0x10a8] sm:$0xf]  ;;  %v10298_v58 = vld [vmem:[#allocation9 + $0x1350] sm:$0xf0] }
 0x38d   :  { %v12986_v49 = vpop.f32.mrf.mxu0  ;;  %5218 = vmatpush.bf16.msra.mxu0 %v9901_v39  ;;  %v3516_v39 = vperm.slane %v12992_v43, 0 }
 0x38e   :  { %5232 = vmatpush.bf16.msra.mxu1 %v10013_v26  ;;  %v9969_v26 = vor.u32 %v12109_v21, %v9968_v16  ;;  %v10282_v16 = vld [vmem:[#allocation9 + $0x1330] sm:$0xf0]  ;;  %v12115_v21 = vld [vmem:[#allocation9 + $0x10ec] sm:$0xf] }
 0x38f   :  { %5202 = vmatpush.bf16.msrb.mxu3 %v10329_v23  ;;  %5241 = vmatpush.bf16.msra.mxu2 %v10205_v29  ;;  %v4174_v35 = vadd.f32 %v12978_v40, %v3516_v39  ;;  %v12154_v40 = vld [vmem:[#allocation9 + $0x1224] sm:$0xf]  ;;  %v10362_v23 = vld [vmem:[#allocation9 + $0x13d0] sm:$0xf0]  ;;  %v4239_v29 = vadd.f32 %v12984_v54, %v4226_v51  ;;  %v12105_v39 = vld [vmem:[#allocation9 + $0x1094] sm:$0xf0] }
 0x390   :  { %v10365_v5 = vor.u32 %v12206_v61, %v10362_v23  ;;  %v10002_v61 = vld [vmem:[#allocation9 + $0x10f8] sm:$0xf0] }
 0x391   :  { %v12988_v31 = vpop.f32.mrf.mxu2  ;;  %5219 = vmatpush.bf16.msra.mxu0 %v9885_v38  ;;  %v10296_v38 = vld [vmem:[#allocation9 + $0x1340] sm:$0xf]  ;;  %v4187_v46 = vadd.f32 %v12980_v36, %v4174_v35  ;;  %v12184_v36 = vld [vmem:[#allocation9 + $0x130c] sm:$0xf0]  ;;  %v9936_v35 = vld [vmem:[#allocation9 + $0x1068] sm:$0xf] }
 0x392   :  { %v10265_v6 = vor.u32 %v12184_v36, %v10264_v2  ;;  %v12093_v2 = vld [vmem:[#allocation9 + $0x1034] sm:$0xf0]  ;;  %v10096_v36 = vld [vmem:[#allocation9 + $0x11a8] sm:$0xf] }
 0x393   :  { %v4240_v37 = vpop.f32.mrf.mxu1  ;;  %5203 = vmatpush.bf16.msrb.mxu3 %v10313_v63  ;;  %5242 = vmatpush.bf16.msra.mxu2 %v10189_v34  ;;  %v4200_v20 = vadd.f32 %v12988_v31, %v4187_v46  ;;  %v10001_v31 = vor.u32 %v12117_v57, %v10000_v55  ;;  %v10349_v63 = vor.u32 %v12202_v30, %v10346_v62  ;;  %v3518_v55 = vperm.slane %v12992_v43, 2  ;;  %v10256_v30 = vld [vmem:[#allocation9 + $0x12e8] sm:$0xf]  ;;  %v12182_v62 = vld [vmem:[#allocation9 + $0x1304] sm:$0xf] }
 0x394   :  { %v9953_v34 = vor.u32 %v12105_v39, %v9952_v28  ;;  %v12133_v28 = vld [vmem:[#allocation9 + $0x1174] sm:$0xf0] }
 0x395   :  { %v4279_v12 = vpop.f32.mrf.mxu0  ;;  %v4278_v8 = vadd.f32 %v12986_v49, %v3518_v55  ;;  %v12173_v55 = vld [vmem:[#allocation9 + $0x12b4] sm:$0xf0] }
 0x396   :  { %v10297_v12 = vor.u32 %v12192_v18, %v10296_v38  ;;  %v12149_v18 = vld [vmem:[#allocation9 + $0x11f4] sm:$0xf0] }
 0x397   :  { %5243 = vmatpush.bf16.msra.mxu2 %v10173_v47  ;;  %v9937_v47 = vor.u32 %v12101_v27, %v9936_v35 }
 0x398   :  { %5204 = vmatpush.bf16.msrb.mxu3 %v10297_v12  ;;  %v12198_v12 = vld [vmem:[#allocation9 + $0x1384] sm:$0xf] }
 0x399   :  { %v4201_v60 = vpop.f32.mrf.mxu2  ;;  %v10333_v41 = vor.u32 %v12198_v12, %v10330_v44  ;;  %v10048_v12 = vld [vmem:[#allocation9 + $0x1148] sm:$0xf]  ;;  %v12129_v44 = vld [vmem:[#allocation9 + $0x1154] sm:$0xf0] }
 0x39a   :  { %v10157_v60 = vor.u32 %v12154_v40, %v10154_v56  ;;  %v12194_v40 = vld [vmem:[#allocation9 + $0x1364] sm:$0xf]  ;;  %v10314_v56 = vld [vmem:[#allocation9 + $0x1370] sm:$0xf0] }
 0x39b   :  { %v12990_v17 = vpop.f32.mrf.mxu1 }
 0x39c   :  { %5205 = vmatpush.bf16.msrb.mxu3 %v10281_v19  ;;  %5244 = vmatpush.bf16.msra.mxu2 %v10157_v60  ;;  %v12145_v19 = vld [vmem:[#allocation9 + $0x11d4] sm:$0xf0]  ;;  %v9921_v60 = vor.u32 %v12097_v50, %v9920_v24  ;;  %v4291_v32 = vadd.f32 %v12990_v17, %v4278_v8  ;;  %v10005_v17 = vor.u32 %v12115_v21, %v10002_v61  ;;  %v9938_v8 = vld [vmem:[#allocation9 + $0x1078] sm:$0xf0]  ;;  %v12143_v61 = vld [vmem:[#allocation9 + $0x11cc] sm:$0xf] }
 0x39d   :  { %v10049_v24 = vor.u32 %v12129_v44, %v10048_v12  ;;  %v9922_v21 = vld [vmem:[#allocation9 + $0x1058] sm:$0xf0] }
 0x39e   :  { %v10082_v12 = vld [vmem:[#allocation9 + $0x1198] sm:$0xf0] }
 0x3a0   :  { %5206 = vmatpush.bf16.msrb.mxu3 %v10265_v6  ;;  %5245 = vmatpush.bf16.msra.mxu2 %v10141_v11  ;;  %v12190_v6 = vld [vmem:[#allocation9 + $0x1344] sm:$0xf]  ;;  %v9888_v11 = vld [vmem:[#allocation9 + $0x1008] sm:$0xf] }
 0x3a1   :  { %v12994_v0 = vpop.f32.mrf.mxu2  ;;  %v10301_v7 = vor.u32 %v12190_v6, %v10298_v58  ;;  %v9889_v51 = vor.u32 %v12089_v42, %v9888_v11  ;;  %v10208_v6 = vld [vmem:[#allocation9 + $0x1288] sm:$0xf]  ;;  %v12169_v58 = vld [vmem:[#allocation9 + $0x1294] sm:$0xf0] }
 0x3a2   :  { %v4252_v14 = vadd.f32 %v12994_v0, %v4239_v29  ;;  %v10112_v0 = vld [vmem:[#allocation9 + $0x11c8] sm:$0xf]  ;;  %v10209_v42 = vor.u32 %v12169_v58, %v10208_v6  ;;  %v12175_v6 = vld [vmem:[#allocation9 + $0x12cc] sm:$0xf]  ;;  %v10242_v58 = vld [vmem:[#allocation9 + $0x12d8] sm:$0xf0] }
 0x3a3   :  { %v4292_v25 = vpop.f32.mrf.mxu1 }
 0x3a4   :  { %5251 = vmatpush.bf16.msra.mxu3 %v10381_v22  ;;  %v10080_v22 = vld [vmem:[#allocation9 + $0x1188] sm:$0xf] }
 0x3a8   :  { %5252 = vmatpush.bf16.msra.mxu3 %v10365_v5 }
 0x3a9   :  { %v4253_v37 = vpop.f32.mrf.mxu2 }
 0x3aa   :  { %v10128_v37 = vld [vmem:[#allocation9 + $0x11e8] sm:$0xf] }
 0x3ab   :  { %v12997_v59 = vpop.f32.mrf.mxu0 }
 0x3ac   :  { %5253 = vmatpush.bf16.msra.mxu3 %v10349_v63  ;;  %v10266_v63 = vld [vmem:[#allocation9 + $0x1310] sm:$0xf0] }
 0x3ad   :  { %v10269_v35 = vor.u32 %v12182_v62, %v10266_v63  ;;  %v10098_v62 = vld [vmem:[#allocation9 + $0x11b8] sm:$0xf0] }
 0x3b0   :  { %5254 = vmatpush.bf16.msra.mxu3 %v10333_v41  ;;  %v10240_v41 = vld [vmem:[#allocation9 + $0x12c8] sm:$0xf] }
 0x3b1   :  { %v4212_v52 = vpop.f32.mrf.mxu3 }
 0x3b2   :  { %v4213_v53 = vadd.f32 %v4212_v52, %v4200_v20  ;;  %v10129_v20 = vor.u32 %v12149_v18, %v10128_v37 }
 0x3b3   :  { %v4331_v48 = vpop.f32.mrf.mxu0 }
 0x3b4   :  { %v4372_v1 = vmax.f32 %v4213_v53, 0.0  ;;  %v13002_v4 = vpop.f32.mrf.mxu2  ;;  %v10317_v53 = vor.u32 %v12194_v40, %v10314_v56  ;;  %v10113_v48 = vor.u32 %v12145_v19, %v10112_v0  ;;  %v10032_v40 = vld [vmem:[#allocation9 + $0x1128] sm:$0xf]  ;;  %v12125_v56 = vld [vmem:[#allocation9 + $0x1134] sm:$0xf0] }
 0x3b5   :  { %v4304_v5 = vadd.f32 %v13002_v4, %v4291_v32  ;;  %v10192_v32 = vld [vmem:[#allocation9 + $0x1268] sm:$0xf] }
 0x3b6   :  { %v13004_v9 = vpack.c.bf16 %v4372_v1, %v4372_v1  ;;  %v9904_v1 = vld [vmem:[#allocation9 + $0x1028] sm:$0xf]  ;;  %5255 = vmatpush.bf16.msra.mxu3 %v10317_v53 }
 0x3b7   :  { %v9905_v10 = vor.u32 %v12093_v2, %v9904_v1  ;;  %v10224_v53 = vld [vmem:[#allocation9 + $0x12a8] sm:$0xf] }
 0x3b8   :  { %5168 = vmatmul.bf16.vlgmr.msrb.gmra.mxu0 %v13004_v9  ;;  %v10225_v1 = vor.u32 %v12173_v55, %v10224_v53 }
 0x3b9   :  { %5264 = vmatpush.bf16.msrb.mxu0 %v10001_v31  ;;  %v4214_v13 = vpop.f32.mrf.mxu3  ;;  %v12141_v31 = vld [vmem:[#allocation9 + $0x11b4] sm:$0xf0] }
 0x3ba   :  { %v10097_v45 = vor.u32 %v12141_v31, %v10096_v36  ;;  %v12137_v13 = vld [vmem:[#allocation9 + $0x1194] sm:$0xf0]  ;;  %5256 = vmatpush.bf16.msra.mxu3 %v10301_v7  ;;  %v10016_v36 = vld [vmem:[#allocation9 + $0x1108] sm:$0xf]  ;;  %v12099_v7 = vld [vmem:[#allocation9 + $0x106c] sm:$0xf] }
 0x3bb   :  { %v13009_v3 = vpop.f32.mrf.mxu1  ;;  %v12121_v31 = vld [vmem:[#allocation9 + $0x1114] sm:$0xf0] }
 0x3bc   :  { %v4305_v25 = vpop.f32.mrf.mxu2  ;;  %v10017_v11 = vor.u32 %v12121_v31, %v10016_v36  ;;  %v12127_v36 = vld [vmem:[#allocation9 + $0x114c] sm:$0xf]  ;;  %v10050_v31 = vld [vmem:[#allocation9 + $0x1158] sm:$0xf0] }
 0x3bd   :  { %5265 = vmatpush.bf16.msrb.mxu0 %v9985_v15  ;;  %v12186_v15 = vld [vmem:[#allocation9 + $0x1324] sm:$0xf]  ;;  %v10081_v25 = vor.u32 %v12137_v13, %v10080_v22  ;;  %v9941_v22 = vor.u32 %v12099_v7, %v9938_v8 }
 0x3be   :  { %v10285_v23 = vor.u32 %v12186_v15, %v10282_v16  ;;  %v12165_v15 = vld [vmem:[#allocation9 + $0x1274] sm:$0xf0]  ;;  %v12095_v16 = vld [vmem:[#allocation9 + $0x104c] sm:$0xf] }
 0x3c0   :  { %5257 = vmatpush.bf16.msra.mxu3 %v10285_v23  ;;  %v10114_v23 = vld [vmem:[#allocation9 + $0x11d8] sm:$0xf0] }
 0x3c1   :  { %5266 = vmatpush.bf16.msrb.mxu0 %v9969_v26  ;;  %v4264_v33 = vpop.f32.mrf.mxu3  ;;  %v10064_v26 = vld [vmem:[#allocation9 + $0x1168] sm:$0xf] }
 0x3c2   :  { %v4265_v38 = vadd.f32 %v4264_v33, %v4252_v14  ;;  %v12181_v14 = vld [vmem:[#allocation9 + $0x12f4] sm:$0xf0]  ;;  %v12111_v33 = vld [vmem:[#allocation9 + $0x10cc] sm:$0xf]  ;;  %v10065_v27 = vor.u32 %v12133_v28, %v10064_v26  ;;  %v10117_v26 = vor.u32 %v12143_v61, %v10114_v23  ;;  %v10336_v61 = vld [vmem:[#allocation9 + $0x1388] sm:$0xf] }
 0x3c3   :  { %v4344_v46 = vpop.f32.mrf.mxu1  ;;  %v12161_v28 = vld [vmem:[#allocation9 + $0x1254] sm:$0xf0] }
 0x3c4   :  { %v4373_v54 = vmax.f32 %v4265_v38, 0.0  ;;  %v10257_v38 = vor.u32 %v12181_v14, %v10256_v30  ;;  %5258 = vmatpush.bf16.msra.mxu3 %v10269_v35  ;;  %v12107_v46 = vld [vmem:[#allocation9 + $0x10ac] sm:$0xf]  ;;  %v12201_v23 = vld [vmem:[#allocation9 + $0x1394] sm:$0xf0] }
 0x3c5   :  { %5267 = vmatpush.bf16.msrb.mxu0 %v9953_v34  ;;  %v9986_v34 = vld [vmem:[#allocation9 + $0x10d8] sm:$0xf0]  ;;  %v12139_v30 = vld [vmem:[#allocation9 + $0x11ac] sm:$0xf] }
 0x3c6   :  { %v13013_v52 = vpack.c.bf16 %v4373_v54, %v4373_v54  ;;  %v9989_v18 = vor.u32 %v12111_v33, %v9986_v34  ;;  %v12177_v54 = vld [vmem:[#allocation9 + $0x12d4] sm:$0xf0]  ;;  %v10160_v33 = vld [vmem:[#allocation9 + $0x1228] sm:$0xf]  ;;  %v10101_v35 = vor.u32 %v12139_v30, %v10098_v62  ;;  %v12163_v62 = vld [vmem:[#allocation9 + $0x126c] sm:$0xf] }
 0x3c7   :  { %v10241_v0 = vor.u32 %v12177_v54, %v10240_v41  ;;  %v12197_v30 = vld [vmem:[#allocation9 + $0x1374] sm:$0xf0] }
 0x3c8   :  { %5181 = vmatmul.bf16.vlgmr.msrb.gmra.mxu1 %v13013_v52  ;;  %5220 = vmatmul.bf16.vlgmr.msra.gmra.mxu0 %v13004_v9 }
 0x3c9   :  { %5268 = vmatpush.bf16.msrb.mxu0 %v9937_v47  ;;  %5277 = vmatpush.bf16.msrb.mxu1 %v10129_v20  ;;  %v4266_v57 = vpop.f32.mrf.mxu3  ;;  %v9970_v47 = vld [vmem:[#allocation9 + $0x10b8] sm:$0xf0] }
 0x3ca   :  { %v9973_v19 = vor.u32 %v12107_v46, %v9970_v47  ;;  %v12103_v57 = vld [vmem:[#allocation9 + $0x108c] sm:$0xf]  ;;  %v10144_v46 = vld [vmem:[#allocation9 + $0x1208] sm:$0xf]  ;;  %v12153_v47 = vld [vmem:[#allocation9 + $0x1214] sm:$0xf0] }
 0x3cd   :  { %5269 = vmatpush.bf16.msrb.mxu0 %v9921_v60  ;;  %5278 = vmatpush.bf16.msrb.mxu1 %v10113_v48  ;;  %v9954_v60 = vld [vmem:[#allocation9 + $0x1098] sm:$0xf0]  ;;  %v10033_v48 = vor.u32 %v12125_v56, %v10032_v40  ;;  %v12179_v40 = vld [vmem:[#allocation9 + $0x12ec] sm:$0xf] }
 0x3ce   :  { %v9957_v2 = vor.u32 %v12103_v57, %v9954_v60  ;;  %v10258_v56 = vld [vmem:[#allocation9 + $0x12f8] sm:$0xf0] }
 0x3d1   :  { %5270 = vmatpush.bf16.msrb.mxu0 %v9905_v10  ;;  %5279 = vmatpush.bf16.msrb.mxu1 %v10097_v45  ;;  %v4316_v49 = vpop.f32.mrf.mxu3  ;;  %v12147_v10 = vld [vmem:[#allocation9 + $0x11ec] sm:$0xf]  ;;  %v10130_v45 = vld [vmem:[#allocation9 + $0x11f8] sm:$0xf0] }
 0x3d2   :  { %v4317_v29 = vadd.f32 %v4316_v49, %v4304_v5  ;;  %v13021_v39 = vpop.f32.mrf.mxu2  ;;  %v10133_v13 = vor.u32 %v12147_v10, %v10130_v45  ;;  %v3519_v5 = vperm.slane %v12992_v43, 3  ;;  %v10193_v49 = vor.u32 %v12165_v15, %v10192_v32  ;;  %v10034_v32 = vld [vmem:[#allocation9 + $0x1138] sm:$0xf0] }
 0x3d3   :  { %v10053_v10 = vor.u32 %v12127_v36, %v10050_v31  ;;  %v10245_v45 = vor.u32 %v12175_v6, %v10242_v58  ;;  %v10226_v15 = vld [vmem:[#allocation9 + $0x12b8] sm:$0xf0]  ;;  %v12195_v36 = vld [vmem:[#allocation9 + $0x136c] sm:$0xf]  ;;  %v10504_v6 = vld [vmem:[#allocation9 + $0x14e0] sm:$0xf] }
 0x3d4   :  { %v4374_v4 = vmax.f32 %v4317_v29, 0.0  ;;  %v12091_v29 = vld [vmem:[#allocation9 + $0x102c] sm:$0xf]  ;;  %v4330_v63 = vadd.f32 %v12997_v59, %v3519_v5  ;;  %v10322_v31 = vld [vmem:[#allocation9 + $0x1378] sm:$0xf0] }
 0x3d5   :  { %5271 = vmatpush.bf16.msrb.mxu0 %v9889_v51  ;;  %5280 = vmatpush.bf16.msrb.mxu1 %v10081_v25  ;;  %v9925_v51 = vor.u32 %v12095_v16, %v9922_v21  ;;  %v10176_v25 = vld [vmem:[#allocation9 + $0x1248] sm:$0xf]  ;;  %v12119_v5 = vld [vmem:[#allocation9 + $0x110c] sm:$0xf]  ;;  %v12244_v58 = vld [vmem:[#allocation9 + $0x14ec] sm:$0xf0] }
 0x3d6   :  { %v13023_v37 = vpack.c.bf16 %v4374_v4, %v4374_v4  ;;  %v10177_v43 = vor.u32 %v12161_v28, %v10176_v25  ;;  %v4343_v34 = vadd.f32 %v13009_v3, %v4330_v63  ;;  %v12157_v4 = vld [vmem:[#allocation9 + $0x1234] sm:$0xf0]  ;;  %v10384_v3 = vld [vmem:[#allocation9 + $0x13e8] sm:$0xf]  ;;  %v10210_v25 = vld [vmem:[#allocation9 + $0x1298] sm:$0xf0] }
 0x3d7   :  { %v10161_v59 = vor.u32 %v12157_v4, %v10160_v33  ;;  %v10194_v63 = vld [vmem:[#allocation9 + $0x1278] sm:$0xf0]  ;;  %v10304_v33 = vld [vmem:[#allocation9 + $0x1348] sm:$0xf] }
 0x3d8   :  { %5194 = vmatmul.bf16.vlgmr.msrb.gmra.mxu2 %v13023_v37  ;;  %5233 = vmatmul.bf16.vlgmr.msra.gmra.mxu1 %v13013_v52  ;;  %v4356_v44 = vadd.f32 %v13021_v39, %v4343_v34  ;;  %v10145_v39 = vor.u32 %v12153_v47, %v10144_v46  ;;  %v12193_v34 = vld [vmem:[#allocation9 + $0x1354] sm:$0xf0]  ;;  %v10178_v4 = vld [vmem:[#allocation9 + $0x1258] sm:$0xf0]  ;;  %v10272_v46 = vld [vmem:[#allocation9 + $0x1308] sm:$0xf] }
 0x3d9   :  { %5316 = vmatpush.bf16.msra.mxu0 %v10005_v17  ;;  %5281 = vmatpush.bf16.msrb.mxu1 %v10065_v27  ;;  %v4318_v20 = vpop.f32.mrf.mxu3  ;;  %v9906_v17 = vld [vmem:[#allocation9 + $0x1038] sm:$0xf0]  ;;  %v12087_v27 = vld [vmem:[#allocation9 + $0x100c] sm:$0xf]  ;;  %v12185_v47 = vld [vmem:[#allocation9 + $0x1314] sm:$0xf0] }
 0x3da   :  { %5272 = vmatmul.bf16.vlgmr.msrb.gmra.mxu0 %v13004_v9  ;;  %5290 = vmatpush.bf16.msrb.mxu2 %v10257_v38  ;;  %v4357_v50 = vpop.f32.mrf.mxu2  ;;  %v9909_v14 = vor.u32 %v12091_v29, %v9906_v17  ;;  %v9890_v38 = vld [vmem:[#allocation9 + $0x1018] sm:$0xf0]  ;;  %v10320_v17 = vld [vmem:[#allocation9 + $0x1368] sm:$0xf] }
 0x3db   :  { %v9893_v54 = vor.u32 %v12087_v27, %v9890_v38  ;;  %v12213_v50 = vld [vmem:[#allocation9 + $0x13f4] sm:$0xf0]  ;;  %v10305_v27 = vor.u32 %v12193_v34, %v10304_v33  ;;  %v10616_v33 = vld [vmem:[#allocation9 + $0x15c0] sm:$0xf] }
 0x3dc   :  { %v10385_v55 = vor.u32 %v12213_v50, %v10384_v3  ;;  %v12211_v3 = vld [vmem:[#allocation9 + $0x13ec] sm:$0xf]  ;;  %v10386_v50 = vld [vmem:[#allocation9 + $0x13f8] sm:$0xf0] }
 0x3dd   :  { %5317 = vmatpush.bf16.msra.mxu0 %v9989_v18  ;;  %5282 = vmatpush.bf16.msrb.mxu1 %v10049_v24  ;;  %v12135_v18 = vld [vmem:[#allocation9 + $0x118c] sm:$0xf] }
 0x3de   :  { %5291 = vmatpush.bf16.msrb.mxu2 %v10241_v0  ;;  %v10085_v24 = vor.u32 %v12135_v18, %v10082_v12  ;;  %v12131_v0 = vld [vmem:[#allocation9 + $0x116c] sm:$0xf]  ;;  %v10288_v18 = vld [vmem:[#allocation9 + $0x1328] sm:$0xf]  ;;  %v12189_v12 = vld [vmem:[#allocation9 + $0x1334] sm:$0xf0] }
 0x3e1   :  { %5318 = vmatpush.bf16.msra.mxu0 %v9973_v19  ;;  %5283 = vmatpush.bf16.msrb.mxu1 %v10033_v48  ;;  %v10066_v19 = vld [vmem:[#allocation9 + $0x1178] sm:$0xf0]  ;;  %v10261_v48 = vor.u32 %v12179_v40, %v10258_v56  ;;  %v12207_v40 = vld [vmem:[#allocation9 + $0x13cc] sm:$0xf] }
 0x3e2   :  { %5292 = vmatpush.bf16.msrb.mxu2 %v10225_v1  ;;  %v10069_v60 = vor.u32 %v12131_v0, %v10066_v19  ;;  %v10368_v1 = vld [vmem:[#allocation9 + $0x13c8] sm:$0xf]  ;;  %v10273_v0 = vor.u32 %v12185_v47, %v10272_v46  ;;  %v10389_v19 = vor.u32 %v12211_v3, %v10386_v50  ;;  %v10370_v56 = vld [vmem:[#allocation9 + $0x13d8] sm:$0xf0]  ;;  %v10584_v46 = vld [vmem:[#allocation9 + $0x1580] sm:$0xf] }
 0x3e3   :  { %v10506_v3 = vld [vmem:[#allocation9 + $0x14f0] sm:$0xf0] }
 0x3e5   :  { %5319 = vmatpush.bf16.msra.mxu0 %v9957_v2  ;;  %5284 = vmatpush.bf16.msrb.mxu1 %v10017_v11  ;;  %v12209_v2 = vld [vmem:[#allocation9 + $0x13d4] sm:$0xf0]  ;;  %v10352_v11 = vld [vmem:[#allocation9 + $0x13a8] sm:$0xf] }
 0x3e6   :  { %5293 = vmatpush.bf16.msrb.mxu2 %v10209_v42  ;;  %v10369_v8 = vor.u32 %v12209_v2, %v10368_v1  ;;  %v12205_v42 = vld [vmem:[#allocation9 + $0x13b4] sm:$0xf0]  ;;  %v10338_v1 = vld [vmem:[#allocation9 + $0x1398] sm:$0xf0] }
 0x3e7   :  { %v10353_v16 = vor.u32 %v12205_v42, %v10352_v11  ;;  %v12187_v42 = vld [vmem:[#allocation9 + $0x132c] sm:$0xf] }
 0x3e8   :  { %5246 = vmatmul.bf16.vlgmr.msra.gmra.mxu2 %v13023_v37  ;;  %5285 = vmatmul.bf16.vlgmr.msrb.gmra.mxu1 %v13013_v52 }
 0x3e9   :  { %5320 = vmatpush.bf16.msra.mxu0 %v9941_v22  ;;  %5329 = vmatpush.bf16.msra.mxu1 %v10133_v13  ;;  %v12123_v22 = vld [vmem:[#allocation9 + $0x112c] sm:$0xf] }
 0x3ea   :  { %5294 = vmatpush.bf16.msrb.mxu2 %v10193_v49  ;;  %v12171_v13 = vld [vmem:[#allocation9 + $0x12ac] sm:$0xf]  ;;  %v10018_v49 = vld [vmem:[#allocation9 + $0x1118] sm:$0xf0] }
 0x3eb   :  { %v10229_v21 = vor.u32 %v12171_v13, %v10226_v15  ;;  %v10021_v28 = vor.u32 %v12119_v5, %v10018_v49  ;;  %v10456_v49 = vld [vmem:[#allocation9 + $0x1480] sm:$0xf] }
 0x3ed   :  { %5321 = vmatpush.bf16.msra.mxu0 %v9925_v51  ;;  %5330 = vmatpush.bf16.msra.mxu1 %v10117_v26  ;;  %v12167_v51 = vld [vmem:[#allocation9 + $0x128c] sm:$0xf]  ;;  %v10337_v26 = vor.u32 %v12201_v23, %v10336_v61  ;;  %v10274_v61 = vld [vmem:[#allocation9 + $0x1318] sm:$0xf0] }
 0x3ee   :  { %5295 = vmatpush.bf16.msrb.mxu2 %v10177_v43  ;;  %v10213_v29 = vor.u32 %v12167_v51, %v10210_v25  ;;  %v10321_v43 = vor.u32 %v12197_v30, %v10320_v17  ;;  %v12232_v51 = vld [vmem:[#allocation9 + $0x148c] sm:$0xf0]  ;;  %v10440_v25 = vld [vmem:[#allocation9 + $0x1460] sm:$0xf] }
 0x3ef   :  { %v12276_v17 = vld [vmem:[#allocation9 + $0x15ec] sm:$0xf0] }
 0x3f1   :  { %v4368_v41 = vpop.f32.mrf.mxu3  ;;  %5322 = vmatpush.bf16.msra.mxu0 %v9909_v14  ;;  %5331 = vmatpush.bf16.msra.mxu1 %v10101_v35  ;;  %v10197_v14 = vor.u32 %v12163_v62, %v10194_v63  ;;  %v12159_v35 = vld [vmem:[#allocation9 + $0x124c] sm:$0xf] }
 0x3f2   :  { %v4369_v20 = vadd.f32 %v4368_v41, %v4356_v44  ;;  %5296 = vmatpush.bf16.msrb.mxu2 %v10161_v59  ;;  %v10181_v38 = vor.u32 %v12159_v35, %v10178_v4  ;;  %v12155_v44 = vld [vmem:[#allocation9 + $0x122c] sm:$0xf]  ;;  %v10162_v41 = vld [vmem:[#allocation9 + $0x1238] sm:$0xf0]  ;;  %v10289_v59 = vor.u32 %v12189_v12, %v10288_v18  ;;  %v12272_v35 = vld [vmem:[#allocation9 + $0x15cc] sm:$0xf0] }
 0x3f3   :  { %v10617_v4 = vor.u32 %v12272_v35, %v10616_v33  ;;  %v10600_v18 = vld [vmem:[#allocation9 + $0x15a0] sm:$0xf]  ;;  %v12222_v35 = vld [vmem:[#allocation9 + $0x1444] sm:$0xf] }
 0x3f4   :  { %v4375_v53 = vmax.f32 %v4369_v20, 0.0  ;;  %v12151_v20 = vld [vmem:[#allocation9 + $0x120c] sm:$0xf]  ;;  %v10696_v33 = vld [vmem:[#allocation9 + $0x1660] sm:$0xf] }
 0x3f5   :  { %5323 = vmatpush.bf16.msra.mxu0 %v9893_v54  ;;  %5332 = vmatpush.bf16.msra.mxu1 %v10085_v24  ;;  %v10165_v54 = vor.u32 %v12155_v44, %v10162_v41  ;;  %v10146_v24 = vld [vmem:[#allocation9 + $0x1218] sm:$0xf0]  ;;  %v12268_v44 = vld [vmem:[#allocation9 + $0x15ac] sm:$0xf0] }
 0x3f6   :  { %v13034_v57 = vpack.c.bf16 %v4375_v53, %v4375_v53  ;;  %5297 = vmatpush.bf16.msrb.mxu2 %v10145_v39  ;;  %v10373_v53 = vor.u32 %v12207_v40, %v10370_v56  ;;  %v12203_v39 = vld [vmem:[#allocation9 + $0x13ac] sm:$0xf]  ;;  %v10760_v40 = vld [vmem:[#allocation9 + $0x16e0] sm:$0xf] }
 0x3f8   :  { %5207 = vmatmul.bf16.vlgmr.msrb.gmra.mxu3 %v13034_v57  ;;  %5324 = vmatmul.bf16.vlgmr.msra.gmra.mxu0 %v13004_v9  ;;  %v10037_v9 = vor.u32 %v12123_v22, %v10034_v32  ;;  %v10488_v22 = vld [vmem:[#allocation9 + $0x14c0] sm:$0xf]  ;;  %v12240_v32 = vld [vmem:[#allocation9 + $0x14cc] sm:$0xf0] }
 0x3f9   :  { %5303 = vmatpush.bf16.msrb.mxu3 %v10385_v55  ;;  %v4370_v7 = vpop.f32.mrf.mxu3  ;;  %5333 = vmatpush.bf16.msra.mxu1 %v10069_v60  ;;  %v10354_v55 = vld [vmem:[#allocation9 + $0x13b8] sm:$0xf0]  ;;  %v10489_v15 = vor.u32 %v12240_v32, %v10488_v22  ;;  %v10728_v22 = vld [vmem:[#allocation9 + $0x16a0] sm:$0xf] }
 0x3fa   :  { %5342 = vmatpush.bf16.msra.mxu2 %v10261_v48  ;;  %v10357_v60 = vor.u32 %v12203_v39, %v10354_v55  ;;  %v12199_v48 = vld [vmem:[#allocation9 + $0x138c] sm:$0xf]  ;;  %v10505_v7 = vor.u32 %v12244_v58, %v10504_v6  ;;  %v12238_v39 = vld [vmem:[#allocation9 + $0x14c4] sm:$0xf]  ;;  %v10490_v55 = vld [vmem:[#allocation9 + $0x14d0] sm:$0xf0] }
 0x3fb   :  { %5298 = vmatmul.bf16.vlgmr.msrb.gmra.mxu2 %v13023_v37  ;;  %v10341_v2 = vor.u32 %v12199_v48, %v10338_v1  ;;  %v10744_v6 = vld [vmem:[#allocation9 + $0x16c0] sm:$0xf] }
 0x3fc   :  { %6156 = vmatpush.bf16.msrb.mxu0 %v10505_v7  ;;  %v12304_v7 = vld [vmem:[#allocation9 + $0x16cc] sm:$0xf0] }
 0x3fd   :  { %5304 = vmatpush.bf16.msrb.mxu3 %v10369_v8  ;;  %5334 = vmatpush.bf16.msra.mxu1 %v10053_v10  ;;  %v10325_v8 = vor.u32 %v12195_v36, %v10322_v31  ;;  %v12191_v10 = vld [vmem:[#allocation9 + $0x134c] sm:$0xf]  ;;  %v10552_v36 = vld [vmem:[#allocation9 + $0x1540] sm:$0xf]  ;;  %v12256_v31 = vld [vmem:[#allocation9 + $0x154c] sm:$0xf0] }
 0x3fe   :  { %5343 = vmatpush.bf16.msra.mxu2 %v10245_v45  ;;  %v10306_v45 = vld [vmem:[#allocation9 + $0x1358] sm:$0xf0]  ;;  %v10553_v58 = vor.u32 %v12256_v31, %v10552_v36  ;;  %v10586_v36 = vld [vmem:[#allocation9 + $0x1590] sm:$0xf0] }
 0x3ff   :  { %v10309_v11 = vor.u32 %v12191_v10, %v10306_v45  ;;  %v10474_v10 = vld [vmem:[#allocation9 + $0x14b0] sm:$0xf0]  ;;  %v10745_v45 = vor.u32 %v12304_v7, %v10744_v6  ;;  %v12280_v7 = vld [vmem:[#allocation9 + $0x160c] sm:$0xf0] }
 0x400   :  { %6157 = vmatpush.bf16.msrb.mxu0 %v10489_v15  ;;  %v12230_v15 = vld [vmem:[#allocation9 + $0x1484] sm:$0xf] }
 0x401   :  { %5305 = vmatpush.bf16.msrb.mxu3 %v10353_v16  ;;  %5335 = vmatpush.bf16.msra.mxu1 %v10037_v9  ;;  %v10472_v16 = vld [vmem:[#allocation9 + $0x14a0] sm:$0xf]  ;;  %v12236_v9 = vld [vmem:[#allocation9 + $0x14ac] sm:$0xf0] }
 0x402   :  { %5344 = vmatpush.bf16.msra.mxu2 %v10229_v21  ;;  %v12183_v21 = vld [vmem:[#allocation9 + $0x130c] sm:$0xf]  ;;  %v10473_v23 = vor.u32 %v12236_v9, %v10472_v16  ;;  %v10458_v16 = vld [vmem:[#allocation9 + $0x1490] sm:$0xf0] }
 0x403   :  { %v10277_v5 = vor.u32 %v12183_v21, %v10274_v61 }
 0x404   :  { %6158 = vmatpush.bf16.msrb.mxu0 %v10473_v23  ;;  %v10461_v23 = vor.u32 %v12230_v15, %v10458_v16 }
 0x405   :  { %5306 = vmatpush.bf16.msrb.mxu3 %v10337_v26  ;;  %5336 = vmatpush.bf16.msra.mxu1 %v10021_v28  ;;  %v10457_v26 = vor.u32 %v12232_v51, %v10456_v49  ;;  %v12228_v28 = vld [vmem:[#allocation9 + $0x146c] sm:$0xf0]  ;;  %v10712_v51 = vld [vmem:[#allocation9 + $0x1680] sm:$0xf] }
 0x406   :  { %5345 = vmatpush.bf16.msra.mxu2 %v10213_v29  ;;  %v10632_v29 = vld [vmem:[#allocation9 + $0x15e0] sm:$0xf]  ;;  %v10441_v62 = vor.u32 %v12228_v28, %v10440_v25  ;;  %v12248_v49 = vld [vmem:[#allocation9 + $0x150c] sm:$0xf0] }
 0x407   :  { %v10633_v30 = vor.u32 %v12276_v17, %v10632_v29  ;;  %v12296_v25 = vld [vmem:[#allocation9 + $0x168c] sm:$0xf0]  ;;  %v12226_v29 = vld [vmem:[#allocation9 + $0x1464] sm:$0xf]  ;;  %v10442_v17 = vld [vmem:[#allocation9 + $0x1470] sm:$0xf0] }
 0x408   :  { %5259 = vmatmul.bf16.vlgmr.msra.gmra.mxu3 %v13034_v57  ;;  %5337 = vmatmul.bf16.vlgmr.msra.gmra.mxu1 %v13013_v52  ;;  %v10149_v52 = vor.u32 %v12151_v20, %v10146_v24  ;;  %v12264_v20 = vld [vmem:[#allocation9 + $0x158c] sm:$0xf0]  ;;  %v12242_v24 = vld [vmem:[#allocation9 + $0x14e4] sm:$0xf]  ;;  %v10713_v28 = vor.u32 %v12296_v25, %v10712_v51 }
 0x409   :  { %5307 = vmatpush.bf16.msrb.mxu3 %v10321_v43  ;;  %6159 = vmatpush.bf16.msrb.mxu0 %v10457_v26  ;;  %v10424_v43 = vld [vmem:[#allocation9 + $0x1440] sm:$0xf]  ;;  %v10585_v50 = vor.u32 %v12264_v20, %v10584_v46  ;;  %v10410_v20 = vld [vmem:[#allocation9 + $0x1430] sm:$0xf0] }
 0x40a   :  { %5346 = vmatpush.bf16.msra.mxu2 %v10197_v14  ;;  %6169 = vmatpush.bf16.msrb.mxu1 %v10633_v30  ;;  %v12224_v14 = vld [vmem:[#allocation9 + $0x144c] sm:$0xf0]  ;;  %v12274_v30 = vld [vmem:[#allocation9 + $0x15e4] sm:$0xf] }
 0x40b   :  { %v10425_v34 = vor.u32 %v12224_v14, %v10424_v43  ;;  %v10634_v43 = vld [vmem:[#allocation9 + $0x15f0] sm:$0xf0] }
 0x40c   :  { %v10637_v14 = vor.u32 %v12274_v30, %v10634_v43  ;;  %v10538_v43 = vld [vmem:[#allocation9 + $0x1530] sm:$0xf0] }
 0x40d   :  { %5308 = vmatpush.bf16.msrb.mxu3 %v10305_v27  ;;  %6160 = vmatpush.bf16.msrb.mxu0 %v10441_v62  ;;  %v10408_v27 = vld [vmem:[#allocation9 + $0x1420] sm:$0xf]  ;;  %v10445_v62 = vor.u32 %v12226_v29, %v10442_v17  ;;  %v12332_v17 = vld [vmem:[#allocation9 + $0x17ac] sm:$0xf0] }
 0x40e   :  { %5347 = vmatpush.bf16.msra.mxu2 %v10181_v38  ;;  %6170 = vmatpush.bf16.msrb.mxu1 %v10617_v4  ;;  %v12220_v38 = vld [vmem:[#allocation9 + $0x142c] sm:$0xf0]  ;;  %v10856_v29 = vld [vmem:[#allocation9 + $0x17a0] sm:$0xf] }
 0x40f   :  { %v10409_v12 = vor.u32 %v12220_v38, %v10408_v27  ;;  %v10426_v27 = vld [vmem:[#allocation9 + $0x1450] sm:$0xf0]  ;;  %v12270_v38 = vld [vmem:[#allocation9 + $0x15c4] sm:$0xf]  ;;  %v10857_v30 = vor.u32 %v12332_v17, %v10856_v29  ;;  %v10496_v29 = vld [vmem:[#allocation9 + $0x14c8] sm:$0xf] }
 0x410   :  { %v12241_v17 = vld [vmem:[#allocation9 + $0x14d4] sm:$0xf0] }
 0x411   :  { %5309 = vmatpush.bf16.msrb.mxu3 %v10289_v59  ;;  %6161 = vmatpush.bf16.msrb.mxu0 %v10425_v34  ;;  %v10601_v59 = vor.u32 %v12268_v44, %v10600_v18  ;;  %v12292_v34 = vld [vmem:[#allocation9 + $0x166c] sm:$0xf0]  ;;  %v10618_v18 = vld [vmem:[#allocation9 + $0x15d0] sm:$0xf0]  ;;  %v10429_v44 = vor.u32 %v12222_v35, %v10426_v27 }
 0x412   :  { %5348 = vmatpush.bf16.msra.mxu2 %v10165_v54  ;;  %v12216_v54 = vld [vmem:[#allocation9 + $0x140c] sm:$0xf0]  ;;  %v10697_v4 = vor.u32 %v12292_v34, %v10696_v33  ;;  %v10730_v34 = vld [vmem:[#allocation9 + $0x16b0] sm:$0xf0] }
 0x413   :  { %6171 = vmatpush.bf16.msrb.mxu1 %v10601_v59 }
 0x415   :  { %5310 = vmatpush.bf16.msrb.mxu3 %v10273_v0  ;;  %6162 = vmatpush.bf16.msrb.mxu0 %v10409_v12  ;;  %v10509_v0 = vor.u32 %v12242_v24, %v10506_v3  ;;  %v12266_v24 = vld [vmem:[#allocation9 + $0x15a4] sm:$0xf] }
 0x416   :  { %5349 = vmatpush.bf16.msra.mxu2 %v10149_v52  ;;  %v10568_v52 = vld [vmem:[#allocation9 + $0x1560] sm:$0xf] }
 0x417   :  { %6172 = vmatpush.bf16.msrb.mxu1 %v10585_v50  ;;  %v10602_v50 = vld [vmem:[#allocation9 + $0x15b0] sm:$0xf0] }
 0x418   :  { %5311 = vmatmul.bf16.vlgmr.msrb.gmra.mxu3 %v13034_v57 }
 0x419   :  { %5355 = vmatpush.bf16.msra.mxu3 %v10389_v19  ;;  %5350 = vmatmul.bf16.vlgmr.msra.gmra.mxu2 %v13023_v37  ;;  %v10290_v37 = vld [vmem:[#allocation9 + $0x1338] sm:$0xf0]  ;;  %v12260_v19 = vld [vmem:[#allocation9 + $0x156c] sm:$0xf0] }
 0x41a   :  { %v10293_v13 = vor.u32 %v12187_v42, %v10290_v37  ;;  %v10569_v56 = vor.u32 %v12260_v19, %v10568_v52  ;;  %v10536_v42 = vld [vmem:[#allocation9 + $0x1520] sm:$0xf]  ;;  %v12252_v37 = vld [vmem:[#allocation9 + $0x152c] sm:$0xf0] }
 0x41b   :  { %v10537_v32 = vor.u32 %v12252_v37, %v10536_v42  ;;  %v10664_v19 = vld [vmem:[#allocation9 + $0x1620] sm:$0xf]  ;;  %v10570_v42 = vld [vmem:[#allocation9 + $0x1570] sm:$0xf0] }
 0x41c   :  { %6173 = vmatpush.bf16.msrb.mxu1 %v10569_v56 }
 0x41d   :  { %5356 = vmatpush.bf16.msra.mxu3 %v10373_v53  ;;  %v12308_v53 = vld [vmem:[#allocation9 + $0x16ec] sm:$0xf0] }
 0x41e   :  { %v10761_v1 = vor.u32 %v12308_v53, %v10760_v40  ;;  %v12284_v40 = vld [vmem:[#allocation9 + $0x162c] sm:$0xf0]  ;;  %v12214_v53 = vld [vmem:[#allocation9 + $0x1404] sm:$0xf] }
 0x41f   :  { %v10665_v56 = vor.u32 %v12284_v40, %v10664_v19  ;;  %v12290_v40 = vld [vmem:[#allocation9 + $0x1664] sm:$0xf] }
 0x420   :  { %6182 = vmatpush.bf16.msrb.mxu2 %v10761_v1  ;;  %6174 = vmatpush.bf16.msrb.mxu1 %v10553_v58  ;;  %v10648_v58 = vld [vmem:[#allocation9 + $0x1600] sm:$0xf] }
 0x421   :  { %5357 = vmatpush.bf16.msra.mxu3 %v10357_v60 }
 0x424   :  { %6183 = vmatpush.bf16.msrb.mxu2 %v10745_v45  ;;  %6175 = vmatpush.bf16.msrb.mxu1 %v10537_v32  ;;  %v12340_v45 = vld [vmem:[#allocation9 + $0x17ec] sm:$0xf0]  ;;  %v12306_v32 = vld [vmem:[#allocation9 + $0x16e4] sm:$0xf] }
 0x425   :  { %5358 = vmatpush.bf16.msra.mxu3 %v10341_v2  ;;  %v10493_v2 = vor.u32 %v12238_v39, %v10490_v55  ;;  %v10394_v39 = vld [vmem:[#allocation9 + $0x1410] sm:$0xf0]  ;;  %v12262_v55 = vld [vmem:[#allocation9 + $0x1584] sm:$0xf] }
 0x426   :  { %v10589_v6 = vor.u32 %v12262_v55, %v10586_v36  ;;  %v12320_v36 = vld [vmem:[#allocation9 + $0x174c] sm:$0xf0] }
 0x429   :  { %5359 = vmatpush.bf16.msra.mxu3 %v10325_v8  ;;  %v12234_v8 = vld [vmem:[#allocation9 + $0x14a4] sm:$0xf] }
 0x42d   :  { %5360 = vmatpush.bf16.msra.mxu3 %v10309_v11  ;;  %v10477_v11 = vor.u32 %v12234_v8, %v10474_v10  ;;  %v10888_v8 = vld [vmem:[#allocation9 + $0x17e0] sm:$0xf]  ;;  %v10649_v10 = vor.u32 %v12280_v7, %v10648_v58  ;;  %v10682_v58 = vld [vmem:[#allocation9 + $0x1650] sm:$0xf0] }
 0x42e   :  { %v10889_v37 = vor.u32 %v12340_v45, %v10888_v8  ;;  %v10792_v45 = vld [vmem:[#allocation9 + $0x1720] sm:$0xf] }
 0x431   :  { %5361 = vmatpush.bf16.msra.mxu3 %v10293_v13  ;;  %v12300_v13 = vld [vmem:[#allocation9 + $0x16ac] sm:$0xf0] }
 0x432   :  { %v10729_v61 = vor.u32 %v12300_v13, %v10728_v22  ;;  %v10762_v13 = vld [vmem:[#allocation9 + $0x16f0] sm:$0xf0] }
 0x433   :  { %v10765_v15 = vor.u32 %v12306_v32, %v10762_v13  ;;  %v10512_v13 = vld [vmem:[#allocation9 + $0x14e8] sm:$0xf] }
 0x434   :  { %6184 = vmatpush.bf16.msrb.mxu2 %v10729_v61 }
 0x435   :  { %5362 = vmatpush.bf16.msra.mxu3 %v10277_v5  ;;  %v13044_v63 = vpop.f32.mrf.mxu0  ;;  %v10520_v5 = vld [vmem:[#allocation9 + $0x1500] sm:$0xf] }
 0x436   :  { %v10521_v26 = vor.u32 %v12248_v49, %v10520_v5  ;;  %v10554_v5 = vld [vmem:[#allocation9 + $0x1550] sm:$0xf0]  ;;  %v12302_v49 = vld [vmem:[#allocation9 + $0x16c4] sm:$0xf] }
 0x438   :  { %5363 = vmatmul.bf16.vlgmr.msra.gmra.mxu3 %v13034_v57  ;;  %v10392_v57 = vld [vmem:[#allocation9 + $0x1400] sm:$0xf]  ;;  %6176 = vmatpush.bf16.msrb.mxu1 %v10521_v26  ;;  %v10746_v26 = vld [vmem:[#allocation9 + $0x16d0] sm:$0xf0] }
 0x439   :  { %v10393_v47 = vor.u32 %v12216_v54, %v10392_v57  ;;  %6185 = vmatpush.bf16.msrb.mxu2 %v10713_v28  ;;  %v10680_v57 = vld [vmem:[#allocation9 + $0x1640] sm:$0xf]  ;;  %v12288_v54 = vld [vmem:[#allocation9 + $0x164c] sm:$0xf0]  ;;  %6195 = vmatpush.bf16.msrb.mxu3 %v10889_v37  ;;  %v10749_v28 = vor.u32 %v12302_v49, %v10746_v26  ;;  %v12278_v49 = vld [vmem:[#allocation9 + $0x1604] sm:$0xf] }
 0x43a   :  { %v10681_v46 = vor.u32 %v12288_v54, %v10680_v57  ;;  %v10522_v57 = vld [vmem:[#allocation9 + $0x1510] sm:$0xf0]  ;;  %v12294_v54 = vld [vmem:[#allocation9 + $0x1684] sm:$0xf] }
 0x43b   :  { %6163 = vmatpush.bf16.msrb.mxu0 %v10393_v47  ;;  %v12218_v47 = vld [vmem:[#allocation9 + $0x1424] sm:$0xf] }
 0x43c   :  { %6221 = vmatpush.bf16.msra.mxu1 %v10637_v14  ;;  %v10413_v3 = vor.u32 %v12218_v47, %v10410_v20  ;;  %v12298_v14 = vld [vmem:[#allocation9 + $0x16a4] sm:$0xf]  ;;  %v10714_v20 = vld [vmem:[#allocation9 + $0x1690] sm:$0xf0] }
 0x43d   :  { %v5171_v41 = vpop.f32.mrf.mxu0  ;;  %6186 = vmatpush.bf16.msrb.mxu2 %v10697_v4  ;;  %v10733_v35 = vor.u32 %v12298_v14, %v10730_v34  ;;  %v13058_v4 = vld [vmem:[#allocation11 + $0x10] sm:$0xf]  ;;  %v12338_v26 = vld [vmem:[#allocation9 + $0x17e4] sm:$0xf]  ;;  %v10497_v34 = vor.u32 %v12241_v17, %v10496_v29 }
 0x43e   :  { %v10621_v41 = vor.u32 %v12270_v38, %v10618_v18  ;;  %v10840_v38 = vld [vmem:[#allocation9 + $0x1780] sm:$0xf]  ;;  %v12328_v18 = vld [vmem:[#allocation9 + $0x178c] sm:$0xf0]  ;;  %v4513_v14 = vperm.slane %v13058_v4, 1 }
 0x43f   :  { %6208 = vmatpush.bf16.msra.mxu0 %v10509_v0  ;;  %v10605_v0 = vor.u32 %v12266_v24, %v10602_v50  ;;  %v10717_v24 = vor.u32 %v12294_v54, %v10714_v20  ;;  %v10824_v50 = vld [vmem:[#allocation9 + $0x1760] sm:$0xf]  ;;  %v10464_v20 = vld [vmem:[#allocation9 + $0x1488] sm:$0xf] }
 0x440   :  { %6222 = vmatpush.bf16.msra.mxu1 %v10621_v41  ;;  %v12246_v41 = vld [vmem:[#allocation9 + $0x1504] sm:$0xf] }
 0x441   :  { %6187 = vmatpush.bf16.msrb.mxu2 %v10681_v46  ;;  %v10525_v47 = vor.u32 %v12246_v41, %v10522_v57 }
 0x443   :  { %6209 = vmatpush.bf16.msra.mxu0 %v10493_v2  ;;  %v10397_v2 = vor.u32 %v12214_v53, %v10394_v39 }
 0x444   :  { %6223 = vmatpush.bf16.msra.mxu1 %v10605_v0  ;;  %v12324_v0 = vld [vmem:[#allocation9 + $0x176c] sm:$0xf0] }
 0x445   :  { %v13046_v60 = vpop.f32.mrf.mxu1  ;;  %v13048_v48 = vpop.f32.mrf.mxu0  ;;  %6188 = vmatpush.bf16.msrb.mxu2 %v10665_v56  ;;  %v10825_v19 = vor.u32 %v12324_v0, %v10824_v50  ;;  %v10698_v56 = vld [vmem:[#allocation9 + $0x1670] sm:$0xf0]  ;;  %v12330_v50 = vld [vmem:[#allocation9 + $0x17a4] sm:$0xf] }
 0x446   :  { %v10701_v53 = vor.u32 %v12290_v40, %v10698_v56  ;;  %v5222_v57 = vadd.f32 %v13048_v48, %v4513_v14  ;;  %v10858_v0 = vld [vmem:[#allocation9 + $0x17b0] sm:$0xf0]  ;;  %v12229_v48 = vld [vmem:[#allocation9 + $0x1474] sm:$0xf0] }
 0x447   :  { %6210 = vmatpush.bf16.msra.mxu0 %v10477_v11  ;;  %v12258_v11 = vld [vmem:[#allocation9 + $0x1564] sm:$0xf] }
 0x448   :  { %6224 = vmatpush.bf16.msra.mxu1 %v10589_v6  ;;  %v10573_v22 = vor.u32 %v12258_v11, %v10570_v42  ;;  %v12286_v6 = vld [vmem:[#allocation9 + $0x1644] sm:$0xf]  ;;  %v12316_v11 = vld [vmem:[#allocation9 + $0x172c] sm:$0xf0] }
 0x449   :  { %6189 = vmatpush.bf16.msrb.mxu2 %v10649_v10  ;;  %v10685_v8 = vor.u32 %v12286_v6, %v10682_v58  ;;  %v10793_v37 = vor.u32 %v12316_v11, %v10792_v45  ;;  %v10842_v6 = vld [vmem:[#allocation9 + $0x1790] sm:$0xf0]  ;;  %v10432_v45 = vld [vmem:[#allocation9 + $0x1448] sm:$0xf]  ;;  %v12225_v11 = vld [vmem:[#allocation9 + $0x1454] sm:$0xf0] }
 0x44b   :  { %6211 = vmatpush.bf16.msra.mxu0 %v10461_v23  ;;  %v12254_v23 = vld [vmem:[#allocation9 + $0x1544] sm:$0xf] }
 0x44c   :  { %6225 = vmatpush.bf16.msra.mxu1 %v10573_v22  ;;  %v10557_v25 = vor.u32 %v12254_v23, %v10554_v5  ;;  %v10666_v22 = vld [vmem:[#allocation9 + $0x1630] sm:$0xf0] }
 0x44d   :  { %v5184_v9 = vpop.f32.mrf.mxu1  ;;  %v5223_v21 = vpop.f32.mrf.mxu0  ;;  %6234 = vmatpush.bf16.msra.mxu2 %v10765_v15  ;;  %v12245_v15 = vld [vmem:[#allocation9 + $0x14f4] sm:$0xf0] }
 0x44e   :  { %v10872_v9 = vld [vmem:[#allocation9 + $0x17c0] sm:$0xf]  ;;  %v12336_v21 = vld [vmem:[#allocation9 + $0x17cc] sm:$0xf0] }
 0x44f   :  { %6212 = vmatpush.bf16.msra.mxu0 %v10445_v62  ;;  %v10873_v61 = vor.u32 %v12336_v21, %v10872_v9  ;;  %v12250_v62 = vld [vmem:[#allocation9 + $0x1524] sm:$0xf] }
 0x450   :  { %6226 = vmatpush.bf16.msra.mxu1 %v10557_v25  ;;  %v10541_v33 = vor.u32 %v12250_v62, %v10538_v43  ;;  %v10650_v25 = vld [vmem:[#allocation9 + $0x1610] sm:$0xf0] }
 0x451   :  { %6196 = vmatpush.bf16.msrb.mxu3 %v10873_v61  ;;  %6235 = vmatpush.bf16.msra.mxu2 %v10749_v28  ;;  %v10776_v61 = vld [vmem:[#allocation9 + $0x1700] sm:$0xf]  ;;  %v10890_v62 = vld [vmem:[#allocation9 + $0x17f0] sm:$0xf0] }
 0x452   :  { %v10893_v43 = vor.u32 %v12338_v26, %v10890_v62  ;;  %v12217_v62 = vld [vmem:[#allocation9 + $0x1414] sm:$0xf0] }
 0x453   :  { %6213 = vmatpush.bf16.msra.mxu0 %v10429_v44  ;;  %v10841_v44 = vor.u32 %v12328_v18, %v10840_v38  ;;  %v12237_v38 = vld [vmem:[#allocation9 + $0x14b4] sm:$0xf0]  ;;  %v12334_v18 = vld [vmem:[#allocation9 + $0x17c4] sm:$0xf] }
 0x454   :  { %6227 = vmatpush.bf16.msra.mxu1 %v10541_v33 }
 0x455   :  { %v13050_v12 = vpop.f32.mrf.mxu1  ;;  %6197 = vmatpush.bf16.msrb.mxu3 %v10857_v30  ;;  %6236 = vmatpush.bf16.msra.mxu2 %v10733_v35  ;;  %v10653_v30 = vor.u32 %v12278_v49, %v10650_v25  ;;  %v10480_v35 = vld [vmem:[#allocation9 + $0x14a8] sm:$0xf]  ;;  %v10810_v49 = vld [vmem:[#allocation9 + $0x1750] sm:$0xf0] }
 0x457   :  { %v13052_v59 = vpop.f32.mrf.mxu0  ;;  %6214 = vmatpush.bf16.msra.mxu0 %v10413_v3  ;;  %v4512_v3 = vperm.slane %v13058_v4, 0 }
 0x458   :  { %6228 = vmatpush.bf16.msra.mxu1 %v10525_v47  ;;  %v10481_v47 = vor.u32 %v12237_v38, %v10480_v35  ;;  %v10794_v35 = vld [vmem:[#allocation9 + $0x1730] sm:$0xf0]  ;;  %v12243_v38 = vld [vmem:[#allocation9 + $0x14ec] sm:$0xf] }
 0x459   :  { %6198 = vmatpush.bf16.msrb.mxu3 %v10841_v44  ;;  %6237 = vmatpush.bf16.msra.mxu2 %v10717_v24  ;;  %v5170_v55 = vadd.f32 %v13044_v63, %v4512_v3  ;;  %v12282_v63 = vld [vmem:[#allocation9 + $0x1624] sm:$0xf]  ;;  %v10874_v44 = vld [vmem:[#allocation9 + $0x17d0] sm:$0xf0]  ;;  %v5235_v24 = vadd.f32 %v13050_v12, %v5222_v57  ;;  %v12233_v3 = vld [vmem:[#allocation9 + $0x1494] sm:$0xf0] }
 0x45a   :  { %v10877_v41 = vor.u32 %v12334_v18, %v10874_v44  ;;  %v10514_v18 = vld [vmem:[#allocation9 + $0x14f8] sm:$0xf0] }
 0x45b   :  { %v13054_v52 = vpop.f32.mrf.mxu2  ;;  %6215 = vmatpush.bf16.msra.mxu0 %v10397_v2  ;;  %v10808_v2 = vld [vmem:[#allocation9 + $0x1740] sm:$0xf]  ;;  %v5183_v7 = vadd.f32 %v13046_v60, %v5170_v55  ;;  %v12312_v60 = vld [vmem:[#allocation9 + $0x170c] sm:$0xf0]  ;;  %v10448_v55 = vld [vmem:[#allocation9 + $0x1468] sm:$0xf] }
 0x45c   :  { %v10777_v5 = vor.u32 %v12312_v60, %v10776_v61  ;;  %v12221_v61 = vld [vmem:[#allocation9 + $0x1434] sm:$0xf0]  ;;  %v10608_v60 = vld [vmem:[#allocation9 + $0x15a8] sm:$0xf] }
 0x45d   :  { %v5236_v1 = vpop.f32.mrf.mxu1  ;;  %6199 = vmatpush.bf16.msrb.mxu3 %v10825_v19  ;;  %6238 = vmatpush.bf16.msra.mxu2 %v10701_v53  ;;  %v5196_v10 = vadd.f32 %v13054_v52, %v5183_v7  ;;  %v10513_v52 = vor.u32 %v12245_v15, %v10512_v13  ;;  %v10861_v19 = vor.u32 %v12330_v50, %v10858_v0  ;;  %v4514_v13 = vperm.slane %v13058_v4, 2  ;;  %v10768_v50 = vld [vmem:[#allocation9 + $0x16e8] sm:$0xf]  ;;  %v12310_v0 = vld [vmem:[#allocation9 + $0x1704] sm:$0xf] }
 0x45e   :  { %v10465_v53 = vor.u32 %v12233_v3, %v10464_v20  ;;  %v12261_v20 = vld [vmem:[#allocation9 + $0x1574] sm:$0xf0] }
 0x45f   :  { %v5275_v31 = vpop.f32.mrf.mxu0  ;;  %v5274_v26 = vadd.f32 %v13052_v59, %v4514_v13  ;;  %v12301_v13 = vld [vmem:[#allocation9 + $0x16b4] sm:$0xf0] }
 0x460   :  { %v10809_v31 = vor.u32 %v12320_v36, %v10808_v2  ;;  %v12277_v36 = vld [vmem:[#allocation9 + $0x15f4] sm:$0xf0] }
 0x461   :  { %6239 = vmatpush.bf16.msra.mxu2 %v10685_v8  ;;  %v10449_v8 = vor.u32 %v12229_v48, %v10448_v55 }
 0x462   :  { %6200 = vmatpush.bf16.msrb.mxu3 %v10809_v31  ;;  %v12326_v31 = vld [vmem:[#allocation9 + $0x1784] sm:$0xf] }
 0x463   :  { %v5197_v16 = vpop.f32.mrf.mxu2  ;;  %v10845_v58 = vor.u32 %v12326_v31, %v10842_v6  ;;  %v10560_v31 = vld [vmem:[#allocation9 + $0x1548] sm:$0xf]  ;;  %v12257_v6 = vld [vmem:[#allocation9 + $0x1554] sm:$0xf0] }
 0x464   :  { %v10669_v16 = vor.u32 %v12282_v63, %v10666_v22  ;;  %v12322_v63 = vld [vmem:[#allocation9 + $0x1764] sm:$0xf]  ;;  %v10826_v22 = vld [vmem:[#allocation9 + $0x1770] sm:$0xf0] }
 0x465   :  { %v13056_v51 = vpop.f32.mrf.mxu1 }
 0x466   :  { %6201 = vmatpush.bf16.msrb.mxu3 %v10793_v37  ;;  %6240 = vmatpush.bf16.msra.mxu2 %v10669_v16  ;;  %v12273_v37 = vld [vmem:[#allocation9 + $0x15d4] sm:$0xf0]  ;;  %v10433_v16 = vor.u32 %v12225_v11, %v10432_v45  ;;  %v5287_v14 = vadd.f32 %v13056_v51, %v5274_v26  ;;  %v10517_v51 = vor.u32 %v12243_v38, %v10514_v18  ;;  %v10450_v26 = vld [vmem:[#allocation9 + $0x1478] sm:$0xf0]  ;;  %v12271_v18 = vld [vmem:[#allocation9 + $0x15cc] sm:$0xf] }
 0x467   :  { %v10561_v45 = vor.u32 %v12257_v6, %v10560_v31  ;;  %v10434_v38 = vld [vmem:[#allocation9 + $0x1458] sm:$0xf0] }
 0x468   :  { %v10594_v31 = vld [vmem:[#allocation9 + $0x1598] sm:$0xf0] }
 0x46a   :  { %6202 = vmatpush.bf16.msrb.mxu3 %v10777_v5  ;;  %6241 = vmatpush.bf16.msra.mxu2 %v10653_v30  ;;  %v12318_v5 = vld [vmem:[#allocation9 + $0x1744] sm:$0xf]  ;;  %v10400_v30 = vld [vmem:[#allocation9 + $0x1408] sm:$0xf] }
 0x46b   :  { %v13060_v27 = vpop.f32.mrf.mxu2  ;;  %v10813_v25 = vor.u32 %v12318_v5, %v10810_v49  ;;  %v10401_v57 = vor.u32 %v12217_v62, %v10400_v30  ;;  %v10720_v5 = vld [vmem:[#allocation9 + $0x1688] sm:$0xf]  ;;  %v12297_v49 = vld [vmem:[#allocation9 + $0x1694] sm:$0xf0] }
 0x46c   :  { %v5248_v40 = vadd.f32 %v13060_v27, %v5235_v24  ;;  %v10624_v27 = vld [vmem:[#allocation9 + $0x15c8] sm:$0xf]  ;;  %v10721_v62 = vor.u32 %v12297_v49, %v10720_v5  ;;  %v12303_v5 = vld [vmem:[#allocation9 + $0x16cc] sm:$0xf]  ;;  %v10754_v49 = vld [vmem:[#allocation9 + $0x16d8] sm:$0xf0] }
 0x46d   :  { %v5288_v46 = vpop.f32.mrf.mxu1 }
 0x46e   :  { %6247 = vmatpush.bf16.msra.mxu3 %v10893_v43  ;;  %v10592_v43 = vld [vmem:[#allocation9 + $0x1588] sm:$0xf] }
 0x472   :  { %6248 = vmatpush.bf16.msra.mxu3 %v10877_v41 }
 0x473   :  { %v5249_v1 = vpop.f32.mrf.mxu2 }
 0x474   :  { %v10640_v1 = vld [vmem:[#allocation9 + $0x15e8] sm:$0xf] }
 0x475   :  { %v13063_v39 = vpop.f32.mrf.mxu0 }
 0x476   :  { %6249 = vmatpush.bf16.msra.mxu3 %v10861_v19  ;;  %v10778_v19 = vld [vmem:[#allocation9 + $0x1710] sm:$0xf0] }
 0x477   :  { %v10781_v55 = vor.u32 %v12310_v0, %v10778_v19  ;;  %v10610_v0 = vld [vmem:[#allocation9 + $0x15b8] sm:$0xf0] }
 0x47a   :  { %6250 = vmatpush.bf16.msra.mxu3 %v10845_v58  ;;  %v10752_v58 = vld [vmem:[#allocation9 + $0x16c8] sm:$0xf] }
 0x47b   :  { %v5208_v42 = vpop.f32.mrf.mxu3 }
 0x47c   :  { %v5209_v32 = vadd.f32 %v5208_v42, %v5196_v10  ;;  %v10641_v10 = vor.u32 %v12277_v36, %v10640_v1 }
 0x47d   :  { %v5327_v9 = vpop.f32.mrf.mxu0 }
 0x47e   :  { %v5368_v21 = vmax.f32 %v5209_v32, 0.0  ;;  %v13068_v23 = vpop.f32.mrf.mxu2  ;;  %v10829_v32 = vor.u32 %v12322_v63, %v10826_v22  ;;  %v10625_v9 = vor.u32 %v12273_v37, %v10624_v27  ;;  %v10544_v63 = vld [vmem:[#allocation9 + $0x1528] sm:$0xf]  ;;  %v12253_v22 = vld [vmem:[#allocation9 + $0x1534] sm:$0xf0] }
 0x47f   :  { %v5300_v41 = vadd.f32 %v13068_v23, %v5287_v14  ;;  %v10704_v14 = vld [vmem:[#allocation9 + $0x1668] sm:$0xf] }
 0x480   :  { %v13070_v28 = vpack.c.bf16 %v5368_v21, %v5368_v21  ;;  %v10416_v21 = vld [vmem:[#allocation9 + $0x1428] sm:$0xf]  ;;  %6251 = vmatpush.bf16.msra.mxu3 %v10829_v32 }
 0x481   :  { %v10417_v29 = vor.u32 %v12221_v61, %v10416_v21  ;;  %v10736_v32 = vld [vmem:[#allocation9 + $0x16a8] sm:$0xf] }
 0x482   :  { %6164 = vmatmul.bf16.vlgmr.msrb.gmra.mxu0 %v13070_v28  ;;  %v10737_v21 = vor.u32 %v12301_v13, %v10736_v32 }
 0x483   :  { %6260 = vmatpush.bf16.msrb.mxu0 %v10513_v52  ;;  %v5210_v33 = vpop.f32.mrf.mxu3  ;;  %v12269_v52 = vld [vmem:[#allocation9 + $0x15b4] sm:$0xf0] }
 0x484   :  { %v10609_v17 = vor.u32 %v12269_v52, %v10608_v60  ;;  %v12265_v33 = vld [vmem:[#allocation9 + $0x1594] sm:$0xf0]  ;;  %6252 = vmatpush.bf16.msra.mxu3 %v10813_v25  ;;  %v10528_v60 = vld [vmem:[#allocation9 + $0x1508] sm:$0xf]  ;;  %v12227_v25 = vld [vmem:[#allocation9 + $0x146c] sm:$0xf] }
 0x485   :  { %v13075_v54 = vpop.f32.mrf.mxu1  ;;  %v12249_v52 = vld [vmem:[#allocation9 + $0x1514] sm:$0xf0] }
 0x486   :  { %v5301_v46 = vpop.f32.mrf.mxu2  ;;  %v10529_v30 = vor.u32 %v12249_v52, %v10528_v60  ;;  %v12255_v60 = vld [vmem:[#allocation9 + $0x154c] sm:$0xf]  ;;  %v10562_v52 = vld [vmem:[#allocation9 + $0x1558] sm:$0xf0] }
 0x487   :  { %6261 = vmatpush.bf16.msrb.mxu0 %v10497_v34  ;;  %v12314_v34 = vld [vmem:[#allocation9 + $0x1724] sm:$0xf]  ;;  %v10593_v46 = vor.u32 %v12265_v33, %v10592_v43  ;;  %v10453_v43 = vor.u32 %v12227_v25, %v10450_v26 }
 0x488   :  { %v10797_v44 = vor.u32 %v12314_v34, %v10794_v35  ;;  %v12293_v34 = vld [vmem:[#allocation9 + $0x1674] sm:$0xf0]  ;;  %v12223_v35 = vld [vmem:[#allocation9 + $0x144c] sm:$0xf] }
 0x48a   :  { %6253 = vmatpush.bf16.msra.mxu3 %v10797_v44  ;;  %v10626_v44 = vld [vmem:[#allocation9 + $0x15d8] sm:$0xf0] }
 0x48b   :  { %6262 = vmatpush.bf16.msrb.mxu0 %v10481_v47  ;;  %v5260_v56 = vpop.f32.mrf.mxu3  ;;  %v10576_v47 = vld [vmem:[#allocation9 + $0x1568] sm:$0xf] }
 0x48c   :  { %v5261_v2 = vadd.f32 %v5260_v56, %v5248_v40  ;;  %v12309_v40 = vld [vmem:[#allocation9 + $0x16f4] sm:$0xf0]  ;;  %v12239_v56 = vld [vmem:[#allocation9 + $0x14cc] sm:$0xf]  ;;  %v10577_v48 = vor.u32 %v12261_v20, %v10576_v47  ;;  %v10629_v47 = vor.u32 %v12271_v18, %v10626_v44  ;;  %v10848_v18 = vld [vmem:[#allocation9 + $0x1788] sm:$0xf] }
 0x48d   :  { %v5340_v7 = vpop.f32.mrf.mxu1  ;;  %v12289_v20 = vld [vmem:[#allocation9 + $0x1654] sm:$0xf0] }
 0x48e   :  { %v5369_v12 = vmax.f32 %v5261_v2, 0.0  ;;  %v10769_v2 = vor.u32 %v12309_v40, %v10768_v50  ;;  %6254 = vmatpush.bf16.msra.mxu3 %v10781_v55  ;;  %v12235_v7 = vld [vmem:[#allocation9 + $0x14ac] sm:$0xf]  ;;  %v12329_v44 = vld [vmem:[#allocation9 + $0x1794] sm:$0xf0] }
 0x48f   :  { %6263 = vmatpush.bf16.msrb.mxu0 %v10465_v53  ;;  %v10498_v53 = vld [vmem:[#allocation9 + $0x14d8] sm:$0xf0]  ;;  %v12267_v50 = vld [vmem:[#allocation9 + $0x15ac] sm:$0xf] }
 0x490   :  { %v13079_v42 = vpack.c.bf16 %v5369_v12, %v5369_v12  ;;  %v10501_v36 = vor.u32 %v12239_v56, %v10498_v53  ;;  %v12305_v12 = vld [vmem:[#allocation9 + $0x16d4] sm:$0xf0]  ;;  %v10672_v56 = vld [vmem:[#allocation9 + $0x1628] sm:$0xf]  ;;  %v10613_v55 = vor.u32 %v12267_v50, %v10610_v0  ;;  %v12291_v0 = vld [vmem:[#allocation9 + $0x166c] sm:$0xf] }
 0x491   :  { %v10753_v27 = vor.u32 %v12305_v12, %v10752_v58  ;;  %v12325_v50 = vld [vmem:[#allocation9 + $0x1774] sm:$0xf0] }
 0x492   :  { %6177 = vmatmul.bf16.vlgmr.msrb.gmra.mxu1 %v13079_v42  ;;  %6216 = vmatmul.bf16.vlgmr.msra.gmra.mxu0 %v13070_v28 }
 0x493   :  { %6264 = vmatpush.bf16.msrb.mxu0 %v10449_v8  ;;  %6273 = vmatpush.bf16.msrb.mxu1 %v10641_v10  ;;  %v5262_v15 = vpop.f32.mrf.mxu3  ;;  %v10482_v8 = vld [vmem:[#allocation9 + $0x14b8] sm:$0xf0] }
 0x494   :  { %v10485_v37 = vor.u32 %v12235_v7, %v10482_v8  ;;  %v12231_v15 = vld [vmem:[#allocation9 + $0x148c] sm:$0xf]  ;;  %v10656_v7 = vld [vmem:[#allocation9 + $0x1608] sm:$0xf]  ;;  %v12281_v8 = vld [vmem:[#allocation9 + $0x1614] sm:$0xf0] }
 0x497   :  { %6265 = vmatpush.bf16.msrb.mxu0 %v10433_v16  ;;  %6274 = vmatpush.bf16.msrb.mxu1 %v10625_v9  ;;  %v10466_v16 = vld [vmem:[#allocation9 + $0x1498] sm:$0xf0]  ;;  %v10545_v9 = vor.u32 %v12253_v22, %v10544_v63  ;;  %v12307_v63 = vld [vmem:[#allocation9 + $0x16ec] sm:$0xf] }
 0x498   :  { %v10469_v61 = vor.u32 %v12231_v15, %v10466_v16  ;;  %v10770_v22 = vld [vmem:[#allocation9 + $0x16f8] sm:$0xf0] }
 0x49b   :  { %6266 = vmatpush.bf16.msrb.mxu0 %v10417_v29  ;;  %6275 = vmatpush.bf16.msrb.mxu1 %v10609_v17  ;;  %v5312_v59 = vpop.f32.mrf.mxu3  ;;  %v12275_v29 = vld [vmem:[#allocation9 + $0x15ec] sm:$0xf]  ;;  %v10642_v17 = vld [vmem:[#allocation9 + $0x15f8] sm:$0xf0] }
 0x49c   :  { %v5313_v24 = vadd.f32 %v5312_v59, %v5300_v41  ;;  %v13087_v3 = vpop.f32.mrf.mxu2  ;;  %v10645_v33 = vor.u32 %v12275_v29, %v10642_v17  ;;  %v4515_v41 = vperm.slane %v13058_v4, 3  ;;  %v10705_v59 = vor.u32 %v12293_v34, %v10704_v14  ;;  %v10546_v14 = vld [vmem:[#allocation9 + $0x1538] sm:$0xf0] }
 0x49d   :  { %v10565_v29 = vor.u32 %v12255_v60, %v10562_v52  ;;  %v10757_v17 = vor.u32 %v12303_v5, %v10754_v49  ;;  %v10738_v34 = vld [vmem:[#allocation9 + $0x16b8] sm:$0xf0]  ;;  %v12323_v60 = vld [vmem:[#allocation9 + $0x176c] sm:$0xf]  ;;  %v11016_v5 = vld [vmem:[#allocation9 + $0x18e0] sm:$0xf] }
 0x49e   :  { %v5370_v23 = vmax.f32 %v5313_v24, 0.0  ;;  %v12219_v24 = vld [vmem:[#allocation9 + $0x142c] sm:$0xf]  ;;  %v5326_v19 = vadd.f32 %v13063_v39, %v4515_v41  ;;  %v10834_v52 = vld [vmem:[#allocation9 + $0x1778] sm:$0xf0] }
 0x49f   :  { %6267 = vmatpush.bf16.msrb.mxu0 %v10401_v57  ;;  %6276 = vmatpush.bf16.msrb.mxu1 %v10593_v46  ;;  %v10437_v57 = vor.u32 %v12223_v35, %v10434_v38  ;;  %v10688_v46 = vld [vmem:[#allocation9 + $0x1648] sm:$0xf]  ;;  %v12247_v41 = vld [vmem:[#allocation9 + $0x150c] sm:$0xf]  ;;  %v12372_v49 = vld [vmem:[#allocation9 + $0x18ec] sm:$0xf0] }
 0x4a0   :  { %v13089_v1 = vpack.c.bf16 %v5370_v23, %v5370_v23  ;;  %v10689_v4 = vor.u32 %v12289_v20, %v10688_v46  ;;  %v5339_v53 = vadd.f32 %v13075_v54, %v5326_v19  ;;  %v12285_v23 = vld [vmem:[#allocation9 + $0x1634] sm:$0xf0]  ;;  %v10896_v54 = vld [vmem:[#allocation9 + $0x17e8] sm:$0xf]  ;;  %v10722_v46 = vld [vmem:[#allocation9 + $0x1698] sm:$0xf0] }
 0x4a1   :  { %v10673_v39 = vor.u32 %v12285_v23, %v10672_v56  ;;  %v10706_v19 = vld [vmem:[#allocation9 + $0x1678] sm:$0xf0]  ;;  %v10816_v56 = vld [vmem:[#allocation9 + $0x1748] sm:$0xf] }
 0x4a2   :  { %6190 = vmatmul.bf16.vlgmr.msrb.gmra.mxu2 %v13089_v1  ;;  %6229 = vmatmul.bf16.vlgmr.msra.gmra.mxu1 %v13079_v42  ;;  %v5352_v6 = vadd.f32 %v13087_v3, %v5339_v53  ;;  %v10657_v3 = vor.u32 %v12281_v8, %v10656_v7  ;;  %v12321_v53 = vld [vmem:[#allocation9 + $0x1754] sm:$0xf0]  ;;  %v10690_v23 = vld [vmem:[#allocation9 + $0x1658] sm:$0xf0]  ;;  %v10784_v7 = vld [vmem:[#allocation9 + $0x1708] sm:$0xf] }
 0x4a3   :  { %6312 = vmatpush.bf16.msra.mxu0 %v10517_v51  ;;  %6277 = vmatpush.bf16.msrb.mxu1 %v10577_v48  ;;  %v5314_v10 = vpop.f32.mrf.mxu3  ;;  %v10418_v51 = vld [vmem:[#allocation9 + $0x1438] sm:$0xf0]  ;;  %v12215_v48 = vld [vmem:[#allocation9 + $0x140c] sm:$0xf]  ;;  %v12313_v8 = vld [vmem:[#allocation9 + $0x1714] sm:$0xf0] }
 0x4a4   :  { %6268 = vmatmul.bf16.vlgmr.msrb.gmra.mxu0 %v13070_v28  ;;  %6286 = vmatpush.bf16.msrb.mxu2 %v10769_v2  ;;  %v5353_v11 = vpop.f32.mrf.mxu2  ;;  %v10421_v40 = vor.u32 %v12219_v24, %v10418_v51  ;;  %v10402_v2 = vld [vmem:[#allocation9 + $0x1418] sm:$0xf0]  ;;  %v10832_v51 = vld [vmem:[#allocation9 + $0x1768] sm:$0xf] }
 0x4a5   :  { %v10405_v12 = vor.u32 %v12215_v48, %v10402_v2  ;;  %v12341_v11 = vld [vmem:[#allocation9 + $0x17f4] sm:$0xf0]  ;;  %v10817_v48 = vor.u32 %v12321_v53, %v10816_v56  ;;  %v11128_v56 = vld [vmem:[#allocation9 + $0x19c0] sm:$0xf] }
 0x4a6   :  { %v10897_v13 = vor.u32 %v12341_v11, %v10896_v54  ;;  %v12339_v54 = vld [vmem:[#allocation9 + $0x17ec] sm:$0xf]  ;;  %v10898_v11 = vld [vmem:[#allocation9 + $0x17f8] sm:$0xf0] }
 0x4a7   :  { %6313 = vmatpush.bf16.msra.mxu0 %v10501_v36  ;;  %6278 = vmatpush.bf16.msrb.mxu1 %v10561_v45  ;;  %v12263_v36 = vld [vmem:[#allocation9 + $0x158c] sm:$0xf] }
 0x4a8   :  { %6287 = vmatpush.bf16.msrb.mxu2 %v10753_v27  ;;  %v10597_v45 = vor.u32 %v12263_v36, %v10594_v31  ;;  %v12259_v27 = vld [vmem:[#allocation9 + $0x156c] sm:$0xf]  ;;  %v10800_v36 = vld [vmem:[#allocation9 + $0x1728] sm:$0xf]  ;;  %v12317_v31 = vld [vmem:[#allocation9 + $0x1734] sm:$0xf0] }
 0x4ab   :  { %6314 = vmatpush.bf16.msra.mxu0 %v10485_v37  ;;  %6279 = vmatpush.bf16.msrb.mxu1 %v10545_v9  ;;  %v10578_v37 = vld [vmem:[#allocation9 + $0x1578] sm:$0xf0]  ;;  %v10773_v9 = vor.u32 %v12307_v63, %v10770_v22  ;;  %v12335_v63 = vld [vmem:[#allocation9 + $0x17cc] sm:$0xf] }
 0x4ac   :  { %6288 = vmatpush.bf16.msrb.mxu2 %v10737_v21  ;;  %v10581_v16 = vor.u32 %v12259_v27, %v10578_v37  ;;  %v10880_v21 = vld [vmem:[#allocation9 + $0x17c8] sm:$0xf]  ;;  %v10785_v27 = vor.u32 %v12313_v8, %v10784_v7  ;;  %v10901_v37 = vor.u32 %v12339_v54, %v10898_v11  ;;  %v10882_v22 = vld [vmem:[#allocation9 + $0x17d8] sm:$0xf0]  ;;  %v11096_v7 = vld [vmem:[#allocation9 + $0x1980] sm:$0xf] }
 0x4ad   :  { %v11018_v54 = vld [vmem:[#allocation9 + $0x18f0] sm:$0xf0] }
 0x4af   :  { %6315 = vmatpush.bf16.msra.mxu0 %v10469_v61  ;;  %6280 = vmatpush.bf16.msrb.mxu1 %v10529_v30  ;;  %v12337_v61 = vld [vmem:[#allocation9 + $0x17d4] sm:$0xf0]  ;;  %v10864_v30 = vld [vmem:[#allocation9 + $0x17a8] sm:$0xf] }
 0x4b0   :  { %6289 = vmatpush.bf16.msrb.mxu2 %v10721_v62  ;;  %v10881_v26 = vor.u32 %v12337_v61, %v10880_v21  ;;  %v12333_v62 = vld [vmem:[#allocation9 + $0x17b4] sm:$0xf0]  ;;  %v10850_v21 = vld [vmem:[#allocation9 + $0x1798] sm:$0xf0] }
 0x4b1   :  { %v10865_v35 = vor.u32 %v12333_v62, %v10864_v30  ;;  %v12315_v62 = vld [vmem:[#allocation9 + $0x172c] sm:$0xf] }
 0x4b2   :  { %6242 = vmatmul.bf16.vlgmr.msra.gmra.mxu2 %v13089_v1  ;;  %6281 = vmatmul.bf16.vlgmr.msrb.gmra.mxu1 %v13079_v42 }
 0x4b3   :  { %6316 = vmatpush.bf16.msra.mxu0 %v10453_v43  ;;  %6325 = vmatpush.bf16.msra.mxu1 %v10645_v33  ;;  %v12251_v43 = vld [vmem:[#allocation9 + $0x152c] sm:$0xf] }
 0x4b4   :  { %6290 = vmatpush.bf16.msrb.mxu2 %v10705_v59  ;;  %v12299_v33 = vld [vmem:[#allocation9 + $0x16ac] sm:$0xf]  ;;  %v10530_v59 = vld [vmem:[#allocation9 + $0x1518] sm:$0xf0] }
 0x4b5   :  { %v10741_v38 = vor.u32 %v12299_v33, %v10738_v34  ;;  %v10533_v20 = vor.u32 %v12247_v41, %v10530_v59  ;;  %v10968_v59 = vld [vmem:[#allocation9 + $0x1880] sm:$0xf] }
 0x4b7   :  { %6317 = vmatpush.bf16.msra.mxu0 %v10437_v57  ;;  %6326 = vmatpush.bf16.msra.mxu1 %v10629_v47  ;;  %v12295_v57 = vld [vmem:[#allocation9 + $0x168c] sm:$0xf]  ;;  %v10849_v47 = vor.u32 %v12329_v44, %v10848_v18  ;;  %v10786_v18 = vld [vmem:[#allocation9 + $0x1718] sm:$0xf0] }
 0x4b8   :  { %6291 = vmatpush.bf16.msrb.mxu2 %v10689_v4  ;;  %v10725_v24 = vor.u32 %v12295_v57, %v10722_v46  ;;  %v10833_v4 = vor.u32 %v12325_v50, %v10832_v51  ;;  %v12360_v57 = vld [vmem:[#allocation9 + $0x188c] sm:$0xf0]  ;;  %v10952_v46 = vld [vmem:[#allocation9 + $0x1860] sm:$0xf] }
 0x4b9   :  { %v12404_v51 = vld [vmem:[#allocation9 + $0x19ec] sm:$0xf0] }
 0x4bb   :  { %v5364_v58 = vpop.f32.mrf.mxu3  ;;  %6318 = vmatpush.bf16.msra.mxu0 %v10421_v40  ;;  %6327 = vmatpush.bf16.msra.mxu1 %v10613_v55  ;;  %v10709_v40 = vor.u32 %v12291_v0, %v10706_v19  ;;  %v12287_v55 = vld [vmem:[#allocation9 + $0x164c] sm:$0xf] }
 0x4bc   :  { %v5365_v10 = vadd.f32 %v5364_v58, %v5352_v6  ;;  %6292 = vmatpush.bf16.msrb.mxu2 %v10673_v39  ;;  %v10693_v2 = vor.u32 %v12287_v55, %v10690_v23  ;;  %v12283_v6 = vld [vmem:[#allocation9 + $0x162c] sm:$0xf]  ;;  %v10674_v58 = vld [vmem:[#allocation9 + $0x1638] sm:$0xf0]  ;;  %v10801_v39 = vor.u32 %v12317_v31, %v10800_v36  ;;  %v12400_v55 = vld [vmem:[#allocation9 + $0x19cc] sm:$0xf0] }
 0x4bd   :  { %v11129_v23 = vor.u32 %v12400_v55, %v11128_v56  ;;  %v11112_v36 = vld [vmem:[#allocation9 + $0x19a0] sm:$0xf]  ;;  %v12350_v55 = vld [vmem:[#allocation9 + $0x1844] sm:$0xf] }
 0x4be   :  { %v5371_v32 = vmax.f32 %v5365_v10, 0.0  ;;  %v12279_v10 = vld [vmem:[#allocation9 + $0x160c] sm:$0xf]  ;;  %v11208_v56 = vld [vmem:[#allocation9 + $0x1a60] sm:$0xf] }
 0x4bf   :  { %6319 = vmatpush.bf16.msra.mxu0 %v10405_v12  ;;  %6328 = vmatpush.bf16.msra.mxu1 %v10597_v45  ;;  %v10677_v12 = vor.u32 %v12283_v6, %v10674_v58  ;;  %v10658_v45 = vld [vmem:[#allocation9 + $0x1618] sm:$0xf0]  ;;  %v12396_v6 = vld [vmem:[#allocation9 + $0x19ac] sm:$0xf0] }
 0x4c0   :  { %v13100_v15 = vpack.c.bf16 %v5371_v32, %v5371_v32  ;;  %6293 = vmatpush.bf16.msrb.mxu2 %v10657_v3  ;;  %v10885_v32 = vor.u32 %v12335_v63, %v10882_v22  ;;  %v12331_v3 = vld [vmem:[#allocation9 + $0x17ac] sm:$0xf]  ;;  %v11272_v63 = vld [vmem:[#allocation9 + $0x1ae0] sm:$0xf] }
 0x4c2   :  { %6203 = vmatmul.bf16.vlgmr.msrb.gmra.mxu3 %v13100_v15  ;;  %6320 = vmatmul.bf16.vlgmr.msra.gmra.mxu0 %v13070_v28  ;;  %v10549_v28 = vor.u32 %v12251_v43, %v10546_v14  ;;  %v11000_v43 = vld [vmem:[#allocation9 + $0x18c0] sm:$0xf]  ;;  %v12368_v14 = vld [vmem:[#allocation9 + $0x18cc] sm:$0xf0] }
 0x4c3   :  { %6299 = vmatpush.bf16.msrb.mxu3 %v10897_v13  ;;  %v5366_v25 = vpop.f32.mrf.mxu3  ;;  %6329 = vmatpush.bf16.msra.mxu1 %v10581_v16  ;;  %v10866_v13 = vld [vmem:[#allocation9 + $0x17b8] sm:$0xf0]  ;;  %v11001_v34 = vor.u32 %v12368_v14, %v11000_v43  ;;  %v11240_v43 = vld [vmem:[#allocation9 + $0x1aa0] sm:$0xf] }
 0x4c4   :  { %6338 = vmatpush.bf16.msra.mxu2 %v10773_v9  ;;  %v10869_v16 = vor.u32 %v12331_v3, %v10866_v13  ;;  %v12327_v9 = vld [vmem:[#allocation9 + $0x178c] sm:$0xf]  ;;  %v11017_v25 = vor.u32 %v12372_v49, %v11016_v5  ;;  %v12366_v3 = vld [vmem:[#allocation9 + $0x18c4] sm:$0xf]  ;;  %v11002_v13 = vld [vmem:[#allocation9 + $0x18d0] sm:$0xf0] }
 0x4c5   :  { %6294 = vmatmul.bf16.vlgmr.msrb.gmra.mxu2 %v13089_v1  ;;  %v10853_v61 = vor.u32 %v12327_v9, %v10850_v21  ;;  %v11256_v5 = vld [vmem:[#allocation9 + $0x1ac0] sm:$0xf] }
 0x4c6   :  { %7152 = vmatpush.bf16.msrb.mxu0 %v11017_v25  ;;  %v12432_v25 = vld [vmem:[#allocation9 + $0x1acc] sm:$0xf0] }
 0x4c7   :  { %6300 = vmatpush.bf16.msrb.mxu3 %v10881_v26  ;;  %6330 = vmatpush.bf16.msra.mxu1 %v10565_v29  ;;  %v10837_v26 = vor.u32 %v12323_v60, %v10834_v52  ;;  %v12319_v29 = vld [vmem:[#allocation9 + $0x174c] sm:$0xf]  ;;  %v11064_v60 = vld [vmem:[#allocation9 + $0x1940] sm:$0xf]  ;;  %v12384_v52 = vld [vmem:[#allocation9 + $0x194c] sm:$0xf0] }
 0x4c8   :  { %6339 = vmatpush.bf16.msra.mxu2 %v10757_v17  ;;  %v10818_v17 = vld [vmem:[#allocation9 + $0x1758] sm:$0xf0]  ;;  %v11065_v49 = vor.u32 %v12384_v52, %v11064_v60  ;;  %v11098_v60 = vld [vmem:[#allocation9 + $0x1990] sm:$0xf0] }
 0x4c9   :  { %v10821_v30 = vor.u32 %v12319_v29, %v10818_v17  ;;  %v10986_v29 = vld [vmem:[#allocation9 + $0x18b0] sm:$0xf0]  ;;  %v11257_v17 = vor.u32 %v12432_v25, %v11256_v5  ;;  %v12408_v25 = vld [vmem:[#allocation9 + $0x1a0c] sm:$0xf0] }
 0x4ca   :  { %7153 = vmatpush.bf16.msrb.mxu0 %v11001_v34  ;;  %v12358_v34 = vld [vmem:[#allocation9 + $0x1884] sm:$0xf] }
 0x4cb   :  { %6301 = vmatpush.bf16.msrb.mxu3 %v10865_v35  ;;  %6331 = vmatpush.bf16.msra.mxu1 %v10549_v28  ;;  %v10984_v35 = vld [vmem:[#allocation9 + $0x18a0] sm:$0xf]  ;;  %v12364_v28 = vld [vmem:[#allocation9 + $0x18ac] sm:$0xf0] }
 0x4cc   :  { %6340 = vmatpush.bf16.msra.mxu2 %v10741_v38  ;;  %v12311_v38 = vld [vmem:[#allocation9 + $0x170c] sm:$0xf]  ;;  %v10985_v44 = vor.u32 %v12364_v28, %v10984_v35  ;;  %v10970_v35 = vld [vmem:[#allocation9 + $0x1890] sm:$0xf0] }
 0x4cd   :  { %v10789_v41 = vor.u32 %v12311_v38, %v10786_v18 }
 0x4ce   :  { %7154 = vmatpush.bf16.msrb.mxu0 %v10985_v44  ;;  %v10973_v44 = vor.u32 %v12358_v34, %v10970_v35 }
 0x4cf   :  { %6302 = vmatpush.bf16.msrb.mxu3 %v10849_v47  ;;  %6332 = vmatpush.bf16.msra.mxu1 %v10533_v20  ;;  %v10969_v47 = vor.u32 %v12360_v57, %v10968_v59  ;;  %v12356_v20 = vld [vmem:[#allocation9 + $0x186c] sm:$0xf0]  ;;  %v11224_v57 = vld [vmem:[#allocation9 + $0x1a80] sm:$0xf] }
 0x4d0   :  { %6341 = vmatpush.bf16.msra.mxu2 %v10725_v24  ;;  %v11144_v24 = vld [vmem:[#allocation9 + $0x19e0] sm:$0xf]  ;;  %v10953_v0 = vor.u32 %v12356_v20, %v10952_v46  ;;  %v12376_v59 = vld [vmem:[#allocation9 + $0x190c] sm:$0xf0] }
 0x4d1   :  { %v11145_v50 = vor.u32 %v12404_v51, %v11144_v24  ;;  %v12424_v46 = vld [vmem:[#allocation9 + $0x1a8c] sm:$0xf0]  ;;  %v12354_v24 = vld [vmem:[#allocation9 + $0x1864] sm:$0xf]  ;;  %v10954_v51 = vld [vmem:[#allocation9 + $0x1870] sm:$0xf0] }
 0x4d2   :  { %6255 = vmatmul.bf16.vlgmr.msra.gmra.mxu3 %v13100_v15  ;;  %6333 = vmatmul.bf16.vlgmr.msra.gmra.mxu1 %v13079_v42  ;;  %v10661_v42 = vor.u32 %v12279_v10, %v10658_v45  ;;  %v12392_v10 = vld [vmem:[#allocation9 + $0x198c] sm:$0xf0]  ;;  %v12370_v45 = vld [vmem:[#allocation9 + $0x18e4] sm:$0xf]  ;;  %v11225_v20 = vor.u32 %v12424_v46, %v11224_v57 }
 0x4d3   :  { %6303 = vmatpush.bf16.msrb.mxu3 %v10833_v4  ;;  %7155 = vmatpush.bf16.msrb.mxu0 %v10969_v47  ;;  %v10936_v4 = vld [vmem:[#allocation9 + $0x1840] sm:$0xf]  ;;  %v11097_v11 = vor.u32 %v12392_v10, %v11096_v7  ;;  %v10922_v10 = vld [vmem:[#allocation9 + $0x1830] sm:$0xf0] }
 0x4d4   :  { %6342 = vmatpush.bf16.msra.mxu2 %v10709_v40  ;;  %7165 = vmatpush.bf16.msrb.mxu1 %v11145_v50  ;;  %v12352_v40 = vld [vmem:[#allocation9 + $0x184c] sm:$0xf0]  ;;  %v12402_v50 = vld [vmem:[#allocation9 + $0x19e4] sm:$0xf] }
 0x4d5   :  { %v10937_v53 = vor.u32 %v12352_v40, %v10936_v4  ;;  %v11146_v4 = vld [vmem:[#allocation9 + $0x19f0] sm:$0xf0] }
 0x4d6   :  { %v11149_v40 = vor.u32 %v12402_v50, %v11146_v4  ;;  %v11050_v4 = vld [vmem:[#allocation9 + $0x1930] sm:$0xf0] }
 0x4d7   :  { %6304 = vmatpush.bf16.msrb.mxu3 %v10817_v48  ;;  %7156 = vmatpush.bf16.msrb.mxu0 %v10953_v0  ;;  %v10920_v48 = vld [vmem:[#allocation9 + $0x1820] sm:$0xf]  ;;  %v10957_v0 = vor.u32 %v12354_v24, %v10954_v51  ;;  %v12460_v51 = vld [vmem:[#allocation9 + $0x1bac] sm:$0xf0] }
 0x4d8   :  { %6343 = vmatpush.bf16.msra.mxu2 %v10693_v2  ;;  %7166 = vmatpush.bf16.msrb.mxu1 %v11129_v23  ;;  %v12348_v2 = vld [vmem:[#allocation9 + $0x182c] sm:$0xf0]  ;;  %v11368_v24 = vld [vmem:[#allocation9 + $0x1ba0] sm:$0xf] }
 0x4d9   :  { %v10921_v31 = vor.u32 %v12348_v2, %v10920_v48  ;;  %v10938_v48 = vld [vmem:[#allocation9 + $0x1850] sm:$0xf0]  ;;  %v12398_v2 = vld [vmem:[#allocation9 + $0x19c4] sm:$0xf]  ;;  %v11369_v50 = vor.u32 %v12460_v51, %v11368_v24  ;;  %v11008_v24 = vld [vmem:[#allocation9 + $0x18c8] sm:$0xf] }
 0x4da   :  { %v12369_v51 = vld [vmem:[#allocation9 + $0x18d4] sm:$0xf0] }
 0x4db   :  { %6305 = vmatpush.bf16.msrb.mxu3 %v10801_v39  ;;  %7157 = vmatpush.bf16.msrb.mxu0 %v10937_v53  ;;  %v11113_v39 = vor.u32 %v12396_v6, %v11112_v36  ;;  %v12420_v53 = vld [vmem:[#allocation9 + $0x1a6c] sm:$0xf0]  ;;  %v11130_v36 = vld [vmem:[#allocation9 + $0x19d0] sm:$0xf0]  ;;  %v10941_v6 = vor.u32 %v12350_v55, %v10938_v48 }
 0x4dc   :  { %6344 = vmatpush.bf16.msra.mxu2 %v10677_v12  ;;  %v12344_v12 = vld [vmem:[#allocation9 + $0x180c] sm:$0xf0]  ;;  %v11209_v23 = vor.u32 %v12420_v53, %v11208_v56  ;;  %v11242_v53 = vld [vmem:[#allocation9 + $0x1ab0] sm:$0xf0] }
 0x4dd   :  { %7167 = vmatpush.bf16.msrb.mxu1 %v11113_v39 }
 0x4df   :  { %6306 = vmatpush.bf16.msrb.mxu3 %v10785_v27  ;;  %7158 = vmatpush.bf16.msrb.mxu0 %v10921_v31  ;;  %v11021_v27 = vor.u32 %v12370_v45, %v11018_v54  ;;  %v12394_v45 = vld [vmem:[#allocation9 + $0x19a4] sm:$0xf] }
 0x4e0   :  { %6345 = vmatpush.bf16.msra.mxu2 %v10661_v42  ;;  %v11080_v42 = vld [vmem:[#allocation9 + $0x1960] sm:$0xf] }
 0x4e1   :  { %7168 = vmatpush.bf16.msrb.mxu1 %v11097_v11  ;;  %v11114_v11 = vld [vmem:[#allocation9 + $0x19b0] sm:$0xf0] }
 0x4e2   :  { %6307 = vmatmul.bf16.vlgmr.msrb.gmra.mxu3 %v13100_v15 }
 0x4e3   :  { %6351 = vmatpush.bf16.msra.mxu3 %v10901_v37  ;;  %6346 = vmatmul.bf16.vlgmr.msra.gmra.mxu2 %v13089_v1  ;;  %v10802_v1 = vld [vmem:[#allocation9 + $0x1738] sm:$0xf0]  ;;  %v12388_v37 = vld [vmem:[#allocation9 + $0x196c] sm:$0xf0] }
 0x4e4   :  { %v10805_v33 = vor.u32 %v12315_v62, %v10802_v1  ;;  %v11081_v22 = vor.u32 %v12388_v37, %v11080_v42  ;;  %v11048_v62 = vld [vmem:[#allocation9 + $0x1920] sm:$0xf]  ;;  %v12380_v1 = vld [vmem:[#allocation9 + $0x192c] sm:$0xf0] }
 0x4e5   :  { %v11049_v14 = vor.u32 %v12380_v1, %v11048_v62  ;;  %v11176_v37 = vld [vmem:[#allocation9 + $0x1a20] sm:$0xf]  ;;  %v11082_v62 = vld [vmem:[#allocation9 + $0x1970] sm:$0xf0] }
 0x4e6   :  { %7169 = vmatpush.bf16.msrb.mxu1 %v11081_v22 }
 0x4e7   :  { %6352 = vmatpush.bf16.msra.mxu3 %v10885_v32  ;;  %v12436_v32 = vld [vmem:[#allocation9 + $0x1aec] sm:$0xf0] }
 0x4e8   :  { %v11273_v21 = vor.u32 %v12436_v32, %v11272_v63  ;;  %v12412_v63 = vld [vmem:[#allocation9 + $0x1a2c] sm:$0xf0]  ;;  %v12342_v32 = vld [vmem:[#allocation9 + $0x1804] sm:$0xf] }
 0x4e9   :  { %v11177_v22 = vor.u32 %v12412_v63, %v11176_v37  ;;  %v12418_v63 = vld [vmem:[#allocation9 + $0x1a64] sm:$0xf] }
 0x4ea   :  { %7178 = vmatpush.bf16.msrb.mxu2 %v11273_v21  ;;  %7170 = vmatpush.bf16.msrb.mxu1 %v11065_v49  ;;  %v11160_v49 = vld [vmem:[#allocation9 + $0x1a00] sm:$0xf] }
 0x4eb   :  { %6353 = vmatpush.bf16.msra.mxu3 %v10869_v16 }
 0x4ee   :  { %7179 = vmatpush.bf16.msrb.mxu2 %v11257_v17  ;;  %7171 = vmatpush.bf16.msrb.mxu1 %v11049_v14  ;;  %v12468_v17 = vld [vmem:[#allocation9 + $0x1bec] sm:$0xf0]  ;;  %v12434_v14 = vld [vmem:[#allocation9 + $0x1ae4] sm:$0xf] }
 0x4ef   :  { %6354 = vmatpush.bf16.msra.mxu3 %v10853_v61  ;;  %v11005_v61 = vor.u32 %v12366_v3, %v11002_v13  ;;  %v10906_v3 = vld [vmem:[#allocation9 + $0x1810] sm:$0xf0]  ;;  %v12390_v13 = vld [vmem:[#allocation9 + $0x1984] sm:$0xf] }
 0x4f0   :  { %v11101_v5 = vor.u32 %v12390_v13, %v11098_v60  ;;  %v12448_v60 = vld [vmem:[#allocation9 + $0x1b4c] sm:$0xf0] }
 0x4f3   :  { %6355 = vmatpush.bf16.msra.mxu3 %v10837_v26  ;;  %v12362_v26 = vld [vmem:[#allocation9 + $0x18a4] sm:$0xf] }
 0x4f7   :  { %6356 = vmatpush.bf16.msra.mxu3 %v10821_v30  ;;  %v10989_v30 = vor.u32 %v12362_v26, %v10986_v29  ;;  %v11400_v26 = vld [vmem:[#allocation9 + $0x1be0] sm:$0xf]  ;;  %v11161_v29 = vor.u32 %v12408_v25, %v11160_v49  ;;  %v11194_v49 = vld [vmem:[#allocation9 + $0x1a50] sm:$0xf0] }
 0x4f8   :  { %v11401_v1 = vor.u32 %v12468_v17, %v11400_v26  ;;  %v11304_v17 = vld [vmem:[#allocation9 + $0x1b20] sm:$0xf] }
 0x4fb   :  { %6357 = vmatpush.bf16.msra.mxu3 %v10805_v33  ;;  %v12428_v33 = vld [vmem:[#allocation9 + $0x1aac] sm:$0xf0] }
 0x4fc   :  { %v11241_v18 = vor.u32 %v12428_v33, %v11240_v43  ;;  %v11274_v33 = vld [vmem:[#allocation9 + $0x1af0] sm:$0xf0] }
 0x4fd   :  { %v11277_v34 = vor.u32 %v12434_v14, %v11274_v33  ;;  %v11024_v33 = vld [vmem:[#allocation9 + $0x18e8] sm:$0xf] }
 0x4fe   :  { %7180 = vmatpush.bf16.msrb.mxu2 %v11241_v18 }
 0x4ff   :  { %6358 = vmatpush.bf16.msra.mxu3 %v10789_v41  ;;  %v13110_v19 = vpop.f32.mrf.mxu0  ;;  %v11032_v41 = vld [vmem:[#allocation9 + $0x1900] sm:$0xf] }
 0x500   :  { %v11033_v47 = vor.u32 %v12376_v59, %v11032_v41  ;;  %v11066_v41 = vld [vmem:[#allocation9 + $0x1950] sm:$0xf0]  ;;  %v12430_v59 = vld [vmem:[#allocation9 + $0x1ac4] sm:$0xf] }
 0x502   :  { %6359 = vmatmul.bf16.vlgmr.msra.gmra.mxu3 %v13100_v15  ;;  %v10904_v15 = vld [vmem:[#allocation9 + $0x1800] sm:$0xf]  ;;  %7172 = vmatpush.bf16.msrb.mxu1 %v11033_v47  ;;  %v11258_v47 = vld [vmem:[#allocation9 + $0x1ad0] sm:$0xf0] }
 0x503   :  { %v10905_v8 = vor.u32 %v12344_v12, %v10904_v15  ;;  %7181 = vmatpush.bf16.msrb.mxu2 %v11225_v20  ;;  %v11192_v15 = vld [vmem:[#allocation9 + $0x1a40] sm:$0xf]  ;;  %v12416_v12 = vld [vmem:[#allocation9 + $0x1a4c] sm:$0xf0]  ;;  %7191 = vmatpush.bf16.msrb.mxu3 %v11401_v1  ;;  %v11261_v20 = vor.u32 %v12430_v59, %v11258_v47  ;;  %v12406_v59 = vld [vmem:[#allocation9 + $0x1a04] sm:$0xf] }
 0x504   :  { %v11193_v7 = vor.u32 %v12416_v12, %v11192_v15  ;;  %v11034_v15 = vld [vmem:[#allocation9 + $0x1910] sm:$0xf0]  ;;  %v12422_v12 = vld [vmem:[#allocation9 + $0x1a84] sm:$0xf] }
 0x505   :  { %7159 = vmatpush.bf16.msrb.mxu0 %v10905_v8  ;;  %v12346_v8 = vld [vmem:[#allocation9 + $0x1824] sm:$0xf] }
 0x506   :  { %7217 = vmatpush.bf16.msra.mxu1 %v11149_v40  ;;  %v10925_v54 = vor.u32 %v12346_v8, %v10922_v10  ;;  %v12426_v40 = vld [vmem:[#allocation9 + $0x1aa4] sm:$0xf]  ;;  %v11226_v10 = vld [vmem:[#allocation9 + $0x1a90] sm:$0xf0] }
 0x507   :  { %v6167_v58 = vpop.f32.mrf.mxu0  ;;  %7182 = vmatpush.bf16.msrb.mxu2 %v11209_v23  ;;  %v11245_v55 = vor.u32 %v12426_v40, %v11242_v53  ;;  %v13124_v23 = vld [vmem:[#allocation11 + $0x14] sm:$0xf]  ;;  %v12466_v47 = vld [vmem:[#allocation9 + $0x1be4] sm:$0xf]  ;;  %v11009_v53 = vor.u32 %v12369_v51, %v11008_v24 }
 0x508   :  { %v11133_v58 = vor.u32 %v12398_v2, %v11130_v36  ;;  %v11352_v2 = vld [vmem:[#allocation9 + $0x1b80] sm:$0xf]  ;;  %v12456_v36 = vld [vmem:[#allocation9 + $0x1b8c] sm:$0xf0]  ;;  %v5509_v40 = vperm.slane %v13124_v23, 1 }
 0x509   :  { %7204 = vmatpush.bf16.msra.mxu0 %v11021_v27  ;;  %v11117_v27 = vor.u32 %v12394_v45, %v11114_v11  ;;  %v11229_v45 = vor.u32 %v12422_v12, %v11226_v10  ;;  %v11336_v11 = vld [vmem:[#allocation9 + $0x1b60] sm:$0xf]  ;;  %v10976_v10 = vld [vmem:[#allocation9 + $0x1888] sm:$0xf] }
 0x50a   :  { %7218 = vmatpush.bf16.msra.mxu1 %v11133_v58  ;;  %v12374_v58 = vld [vmem:[#allocation9 + $0x1904] sm:$0xf] }
 0x50b   :  { %7183 = vmatpush.bf16.msrb.mxu2 %v11193_v7  ;;  %v11037_v8 = vor.u32 %v12374_v58, %v11034_v15 }
 0x50d   :  { %7205 = vmatpush.bf16.msra.mxu0 %v11005_v61  ;;  %v10909_v61 = vor.u32 %v12342_v32, %v10906_v3 }
 0x50e   :  { %7219 = vmatpush.bf16.msra.mxu1 %v11117_v27  ;;  %v12452_v27 = vld [vmem:[#allocation9 + $0x1b6c] sm:$0xf0] }
 0x50f   :  { %v13112_v16 = vpop.f32.mrf.mxu1  ;;  %v13114_v9 = vpop.f32.mrf.mxu0  ;;  %7184 = vmatpush.bf16.msrb.mxu2 %v11177_v22  ;;  %v11337_v37 = vor.u32 %v12452_v27, %v11336_v11  ;;  %v11210_v22 = vld [vmem:[#allocation9 + $0x1a70] sm:$0xf0]  ;;  %v12458_v11 = vld [vmem:[#allocation9 + $0x1ba4] sm:$0xf] }
 0x510   :  { %v11213_v32 = vor.u32 %v12418_v63, %v11210_v22  ;;  %v6218_v15 = vadd.f32 %v13114_v9, %v5509_v40  ;;  %v11370_v27 = vld [vmem:[#allocation9 + $0x1bb0] sm:$0xf0]  ;;  %v12357_v9 = vld [vmem:[#allocation9 + $0x1874] sm:$0xf0] }
 0x511   :  { %7206 = vmatpush.bf16.msra.mxu0 %v10989_v30  ;;  %v12386_v30 = vld [vmem:[#allocation9 + $0x1964] sm:$0xf] }
 0x512   :  { %7220 = vmatpush.bf16.msra.mxu1 %v11101_v5  ;;  %v11085_v43 = vor.u32 %v12386_v30, %v11082_v62  ;;  %v12414_v5 = vld [vmem:[#allocation9 + $0x1a44] sm:$0xf]  ;;  %v12444_v30 = vld [vmem:[#allocation9 + $0x1b2c] sm:$0xf0] }
 0x513   :  { %7185 = vmatpush.bf16.msrb.mxu2 %v11161_v29  ;;  %v11197_v26 = vor.u32 %v12414_v5, %v11194_v49  ;;  %v11305_v1 = vor.u32 %v12444_v30, %v11304_v17  ;;  %v11354_v5 = vld [vmem:[#allocation9 + $0x1b90] sm:$0xf0]  ;;  %v10944_v17 = vld [vmem:[#allocation9 + $0x1848] sm:$0xf]  ;;  %v12353_v30 = vld [vmem:[#allocation9 + $0x1854] sm:$0xf0] }
 0x515   :  { %7207 = vmatpush.bf16.msra.mxu0 %v10973_v44  ;;  %v12382_v44 = vld [vmem:[#allocation9 + $0x1944] sm:$0xf] }
 0x516   :  { %7221 = vmatpush.bf16.msra.mxu1 %v11085_v43  ;;  %v11069_v46 = vor.u32 %v12382_v44, %v11066_v41  ;;  %v11178_v43 = vld [vmem:[#allocation9 + $0x1a30] sm:$0xf0] }
 0x517   :  { %v6180_v28 = vpop.f32.mrf.mxu1  ;;  %v6219_v38 = vpop.f32.mrf.mxu0  ;;  %7230 = vmatpush.bf16.msra.mxu2 %v11277_v34  ;;  %v12373_v34 = vld [vmem:[#allocation9 + $0x18f4] sm:$0xf0] }
 0x518   :  { %v11384_v28 = vld [vmem:[#allocation9 + $0x1bc0] sm:$0xf]  ;;  %v12464_v38 = vld [vmem:[#allocation9 + $0x1bcc] sm:$0xf0] }
 0x519   :  { %7208 = vmatpush.bf16.msra.mxu0 %v10957_v0  ;;  %v11385_v18 = vor.u32 %v12464_v38, %v11384_v28  ;;  %v12378_v0 = vld [vmem:[#allocation9 + $0x1924] sm:$0xf] }
 0x51a   :  { %7222 = vmatpush.bf16.msra.mxu1 %v11069_v46  ;;  %v11053_v56 = vor.u32 %v12378_v0, %v11050_v4  ;;  %v11162_v46 = vld [vmem:[#allocation9 + $0x1a10] sm:$0xf0] }
 0x51b   :  { %7192 = vmatpush.bf16.msrb.mxu3 %v11385_v18  ;;  %7231 = vmatpush.bf16.msra.mxu2 %v11261_v20  ;;  %v11288_v18 = vld [vmem:[#allocation9 + $0x1b00] sm:$0xf]  ;;  %v11402_v0 = vld [vmem:[#allocation9 + $0x1bf0] sm:$0xf0] }
 0x51c   :  { %v11405_v4 = vor.u32 %v12466_v47, %v11402_v0  ;;  %v12345_v0 = vld [vmem:[#allocation9 + $0x1814] sm:$0xf0] }
 0x51d   :  { %7209 = vmatpush.bf16.msra.mxu0 %v10941_v6  ;;  %v11353_v6 = vor.u32 %v12456_v36, %v11352_v2  ;;  %v12365_v2 = vld [vmem:[#allocation9 + $0x18b4] sm:$0xf0]  ;;  %v12462_v36 = vld [vmem:[#allocation9 + $0x1bc4] sm:$0xf] }
 0x51e   :  { %7223 = vmatpush.bf16.msra.mxu1 %v11053_v56 }
 0x51f   :  { %v13116_v31 = vpop.f32.mrf.mxu1  ;;  %7193 = vmatpush.bf16.msrb.mxu3 %v11369_v50  ;;  %7232 = vmatpush.bf16.msra.mxu2 %v11245_v55  ;;  %v11165_v50 = vor.u32 %v12406_v59, %v11162_v46  ;;  %v10992_v55 = vld [vmem:[#allocation9 + $0x18a8] sm:$0xf]  ;;  %v11322_v59 = vld [vmem:[#allocation9 + $0x1b50] sm:$0xf0] }
 0x521   :  { %v13118_v39 = vpop.f32.mrf.mxu0  ;;  %7210 = vmatpush.bf16.msra.mxu0 %v10925_v54  ;;  %v5508_v54 = vperm.slane %v13124_v23, 0 }
 0x522   :  { %7224 = vmatpush.bf16.msra.mxu1 %v11037_v8  ;;  %v10993_v8 = vor.u32 %v12365_v2, %v10992_v55  ;;  %v11306_v55 = vld [vmem:[#allocation9 + $0x1b30] sm:$0xf0]  ;;  %v12371_v2 = vld [vmem:[#allocation9 + $0x18ec] sm:$0xf] }
 0x523   :  { %7194 = vmatpush.bf16.msrb.mxu3 %v11353_v6  ;;  %7233 = vmatpush.bf16.msra.mxu2 %v11229_v45  ;;  %v6166_v13 = vadd.f32 %v13110_v19, %v5508_v54  ;;  %v12410_v19 = vld [vmem:[#allocation9 + $0x1a24] sm:$0xf]  ;;  %v11386_v6 = vld [vmem:[#allocation9 + $0x1bd0] sm:$0xf0]  ;;  %v6231_v45 = vadd.f32 %v13116_v31, %v6218_v15  ;;  %v12361_v54 = vld [vmem:[#allocation9 + $0x1894] sm:$0xf0] }
 0x524   :  { %v11389_v58 = vor.u32 %v12462_v36, %v11386_v6  ;;  %v11026_v36 = vld [vmem:[#allocation9 + $0x18f8] sm:$0xf0] }
 0x525   :  { %v13120_v42 = vpop.f32.mrf.mxu2  ;;  %7211 = vmatpush.bf16.msra.mxu0 %v10909_v61  ;;  %v11320_v61 = vld [vmem:[#allocation9 + $0x1b40] sm:$0xf]  ;;  %v6179_v25 = vadd.f32 %v13112_v16, %v6166_v13  ;;  %v12440_v16 = vld [vmem:[#allocation9 + $0x1b0c] sm:$0xf0]  ;;  %v10960_v13 = vld [vmem:[#allocation9 + $0x1868] sm:$0xf] }
 0x526   :  { %v11289_v41 = vor.u32 %v12440_v16, %v11288_v18  ;;  %v12349_v18 = vld [vmem:[#allocation9 + $0x1834] sm:$0xf0]  ;;  %v11120_v16 = vld [vmem:[#allocation9 + $0x19a8] sm:$0xf] }
 0x527   :  { %v6232_v21 = vpop.f32.mrf.mxu1  ;;  %7195 = vmatpush.bf16.msrb.mxu3 %v11337_v37  ;;  %7234 = vmatpush.bf16.msra.mxu2 %v11213_v32  ;;  %v6192_v29 = vadd.f32 %v13120_v42, %v6179_v25  ;;  %v11025_v42 = vor.u32 %v12373_v34, %v11024_v33  ;;  %v11373_v37 = vor.u32 %v12458_v11, %v11370_v27  ;;  %v5510_v33 = vperm.slane %v13124_v23, 2  ;;  %v11280_v11 = vld [vmem:[#allocation9 + $0x1ae8] sm:$0xf]  ;;  %v12438_v27 = vld [vmem:[#allocation9 + $0x1b04] sm:$0xf] }
 0x528   :  { %v10977_v32 = vor.u32 %v12361_v54, %v10976_v10  ;;  %v12389_v10 = vld [vmem:[#allocation9 + $0x1974] sm:$0xf0] }
 0x529   :  { %v6271_v52 = vpop.f32.mrf.mxu0  ;;  %v6270_v47 = vadd.f32 %v13118_v39, %v5510_v33  ;;  %v12429_v33 = vld [vmem:[#allocation9 + $0x1ab4] sm:$0xf0] }
 0x52a   :  { %v11321_v52 = vor.u32 %v12448_v60, %v11320_v61  ;;  %v12405_v60 = vld [vmem:[#allocation9 + $0x19f4] sm:$0xf0] }
 0x52b   :  { %7235 = vmatpush.bf16.msra.mxu2 %v11197_v26  ;;  %v10961_v26 = vor.u32 %v12357_v9, %v10960_v13 }
 0x52c   :  { %7196 = vmatpush.bf16.msrb.mxu3 %v11321_v52  ;;  %v12454_v52 = vld [vmem:[#allocation9 + $0x1b84] sm:$0xf] }
 0x52d   :  { %v6193_v35 = vpop.f32.mrf.mxu2  ;;  %v11357_v49 = vor.u32 %v12454_v52, %v11354_v5  ;;  %v11072_v52 = vld [vmem:[#allocation9 + $0x1948] sm:$0xf]  ;;  %v12385_v5 = vld [vmem:[#allocation9 + $0x1954] sm:$0xf0] }
 0x52e   :  { %v11181_v35 = vor.u32 %v12410_v19, %v11178_v43  ;;  %v12450_v19 = vld [vmem:[#allocation9 + $0x1b64] sm:$0xf]  ;;  %v11338_v43 = vld [vmem:[#allocation9 + $0x1b70] sm:$0xf0] }
 0x52f   :  { %v13122_v57 = vpop.f32.mrf.mxu1 }
 0x530   :  { %7197 = vmatpush.bf16.msrb.mxu3 %v11305_v1  ;;  %7236 = vmatpush.bf16.msra.mxu2 %v11181_v35  ;;  %v12401_v1 = vld [vmem:[#allocation9 + $0x19d4] sm:$0xf0]  ;;  %v10945_v35 = vor.u32 %v12353_v30, %v10944_v17  ;;  %v6283_v40 = vadd.f32 %v13122_v57, %v6270_v47  ;;  %v11029_v57 = vor.u32 %v12371_v2, %v11026_v36  ;;  %v10962_v47 = vld [vmem:[#allocation9 + $0x1878] sm:$0xf0]  ;;  %v12399_v36 = vld [vmem:[#allocation9 + $0x19cc] sm:$0xf] }
 0x531   :  { %v11073_v17 = vor.u32 %v12385_v5, %v11072_v52  ;;  %v10946_v2 = vld [vmem:[#allocation9 + $0x1858] sm:$0xf0] }
 0x532   :  { %v11106_v52 = vld [vmem:[#allocation9 + $0x1998] sm:$0xf0] }
 0x534   :  { %7198 = vmatpush.bf16.msrb.mxu3 %v11289_v41  ;;  %7237 = vmatpush.bf16.msra.mxu2 %v11165_v50  ;;  %v12446_v41 = vld [vmem:[#allocation9 + $0x1b44] sm:$0xf]  ;;  %v10912_v50 = vld [vmem:[#allocation9 + $0x1808] sm:$0xf] }
 0x535   :  { %v13126_v48 = vpop.f32.mrf.mxu2  ;;  %v11325_v46 = vor.u32 %v12446_v41, %v11322_v59  ;;  %v10913_v15 = vor.u32 %v12345_v0, %v10912_v50  ;;  %v11232_v41 = vld [vmem:[#allocation9 + $0x1a88] sm:$0xf]  ;;  %v12425_v59 = vld [vmem:[#allocation9 + $0x1a94] sm:$0xf0] }
 0x536   :  { %v6244_v63 = vadd.f32 %v13126_v48, %v6231_v45  ;;  %v11136_v48 = vld [vmem:[#allocation9 + $0x19c8] sm:$0xf]  ;;  %v11233_v0 = vor.u32 %v12425_v59, %v11232_v41  ;;  %v12431_v41 = vld [vmem:[#allocation9 + $0x1acc] sm:$0xf]  ;;  %v11266_v59 = vld [vmem:[#allocation9 + $0x1ad8] sm:$0xf0] }
 0x537   :  { %v6284_v7 = vpop.f32.mrf.mxu1 }
 0x538   :  { %7243 = vmatpush.bf16.msra.mxu3 %v11405_v4  ;;  %v11104_v4 = vld [vmem:[#allocation9 + $0x1988] sm:$0xf] }
 0x53c   :  { %7244 = vmatpush.bf16.msra.mxu3 %v11389_v58 }
 0x53d   :  { %v6245_v21 = vpop.f32.mrf.mxu2 }
 0x53e   :  { %v11152_v21 = vld [vmem:[#allocation9 + $0x19e8] sm:$0xf] }
 0x53f   :  { %v13129_v3 = vpop.f32.mrf.mxu0 }
 0x540   :  { %7245 = vmatpush.bf16.msra.mxu3 %v11373_v37  ;;  %v11290_v37 = vld [vmem:[#allocation9 + $0x1b10] sm:$0xf0] }
 0x541   :  { %v11293_v13 = vor.u32 %v12438_v27, %v11290_v37  ;;  %v11122_v27 = vld [vmem:[#allocation9 + $0x19b8] sm:$0xf0] }
 0x544   :  { %7246 = vmatpush.bf16.msra.mxu3 %v11357_v49  ;;  %v11264_v49 = vld [vmem:[#allocation9 + $0x1ac8] sm:$0xf] }
 0x545   :  { %v6204_v62 = vpop.f32.mrf.mxu3 }
 0x546   :  { %v6205_v14 = vadd.f32 %v6204_v62, %v6192_v29  ;;  %v11153_v29 = vor.u32 %v12405_v60, %v11152_v21 }
 0x547   :  { %v6323_v28 = vpop.f32.mrf.mxu0 }
 0x548   :  { %v6364_v38 = vmax.f32 %v6205_v14, 0.0  ;;  %v13134_v44 = vpop.f32.mrf.mxu2  ;;  %v11341_v14 = vor.u32 %v12450_v19, %v11338_v43  ;;  %v11137_v28 = vor.u32 %v12401_v1, %v11136_v48  ;;  %v11056_v19 = vld [vmem:[#allocation9 + $0x1928] sm:$0xf]  ;;  %v12381_v43 = vld [vmem:[#allocation9 + $0x1934] sm:$0xf0] }
 0x549   :  { %v6296_v58 = vadd.f32 %v13134_v44, %v6283_v40  ;;  %v11216_v40 = vld [vmem:[#allocation9 + $0x1a68] sm:$0xf] }
 0x54a   :  { %v13136_v20 = vpack.c.bf16 %v6364_v38, %v6364_v38  ;;  %v10928_v38 = vld [vmem:[#allocation9 + $0x1828] sm:$0xf]  ;;  %7247 = vmatpush.bf16.msra.mxu3 %v11341_v14 }
 0x54b   :  { %v10929_v24 = vor.u32 %v12349_v18, %v10928_v38  ;;  %v11248_v14 = vld [vmem:[#allocation9 + $0x1aa8] sm:$0xf] }
 0x54c   :  { %7160 = vmatmul.bf16.vlgmr.msrb.gmra.mxu0 %v13136_v20  ;;  %v11249_v38 = vor.u32 %v12429_v33, %v11248_v14 }
 0x54d   :  { %7256 = vmatpush.bf16.msrb.mxu0 %v11025_v42  ;;  %v6206_v56 = vpop.f32.mrf.mxu3  ;;  %v12397_v42 = vld [vmem:[#allocation9 + $0x19b4] sm:$0xf0] }
 0x54e   :  { %v11121_v51 = vor.u32 %v12397_v42, %v11120_v16  ;;  %v12393_v56 = vld [vmem:[#allocation9 + $0x1994] sm:$0xf0]  ;;  %7248 = vmatpush.bf16.msra.mxu3 %v11325_v46  ;;  %v11040_v16 = vld [vmem:[#allocation9 + $0x1908] sm:$0xf]  ;;  %v12355_v46 = vld [vmem:[#allocation9 + $0x186c] sm:$0xf] }
 0x54f   :  { %v13141_v12 = vpop.f32.mrf.mxu1  ;;  %v12377_v42 = vld [vmem:[#allocation9 + $0x1914] sm:$0xf0] }
 0x550   :  { %v6297_v7 = vpop.f32.mrf.mxu2  ;;  %v11041_v50 = vor.u32 %v12377_v42, %v11040_v16  ;;  %v12383_v16 = vld [vmem:[#allocation9 + $0x194c] sm:$0xf]  ;;  %v11074_v42 = vld [vmem:[#allocation9 + $0x1958] sm:$0xf0] }
 0x551   :  { %7257 = vmatpush.bf16.msrb.mxu0 %v11009_v53  ;;  %v12442_v53 = vld [vmem:[#allocation9 + $0x1b24] sm:$0xf]  ;;  %v11105_v7 = vor.u32 %v12393_v56, %v11104_v4  ;;  %v10965_v4 = vor.u32 %v12355_v46, %v10962_v47 }
 0x552   :  { %v11309_v6 = vor.u32 %v12442_v53, %v11306_v55  ;;  %v12421_v53 = vld [vmem:[#allocation9 + $0x1a74] sm:$0xf0]  ;;  %v12351_v55 = vld [vmem:[#allocation9 + $0x184c] sm:$0xf] }
 0x554   :  { %7249 = vmatpush.bf16.msra.mxu3 %v11309_v6  ;;  %v11138_v6 = vld [vmem:[#allocation9 + $0x19d8] sm:$0xf0] }
 0x555   :  { %7258 = vmatpush.bf16.msrb.mxu0 %v10993_v8  ;;  %v6256_v22 = vpop.f32.mrf.mxu3  ;;  %v11088_v8 = vld [vmem:[#allocation9 + $0x1968] sm:$0xf] }
 0x556   :  { %v6257_v61 = vadd.f32 %v6256_v22, %v6244_v63  ;;  %v12437_v63 = vld [vmem:[#allocation9 + $0x1af4] sm:$0xf0]  ;;  %v12367_v22 = vld [vmem:[#allocation9 + $0x18cc] sm:$0xf]  ;;  %v11089_v9 = vor.u32 %v12389_v10, %v11088_v8  ;;  %v11141_v8 = vor.u32 %v12399_v36, %v11138_v6  ;;  %v11360_v36 = vld [vmem:[#allocation9 + $0x1b88] sm:$0xf] }
 0x557   :  { %v6336_v25 = vpop.f32.mrf.mxu1  ;;  %v12417_v10 = vld [vmem:[#allocation9 + $0x1a54] sm:$0xf0] }
 0x558   :  { %v6365_v31 = vmax.f32 %v6257_v61, 0.0  ;;  %v11281_v61 = vor.u32 %v12437_v63, %v11280_v11  ;;  %7250 = vmatpush.bf16.msra.mxu3 %v11293_v13  ;;  %v12363_v25 = vld [vmem:[#allocation9 + $0x18ac] sm:$0xf]  ;;  %v12457_v6 = vld [vmem:[#allocation9 + $0x1b94] sm:$0xf0] }
 0x559   :  { %7259 = vmatpush.bf16.msrb.mxu0 %v10977_v32  ;;  %v11010_v32 = vld [vmem:[#allocation9 + $0x18d8] sm:$0xf0]  ;;  %v12395_v11 = vld [vmem:[#allocation9 + $0x19ac] sm:$0xf] }
 0x55a   :  { %v13145_v62 = vpack.c.bf16 %v6365_v31, %v6365_v31  ;;  %v11013_v60 = vor.u32 %v12367_v22, %v11010_v32  ;;  %v12433_v31 = vld [vmem:[#allocation9 + $0x1ad4] sm:$0xf0]  ;;  %v11184_v22 = vld [vmem:[#allocation9 + $0x1a28] sm:$0xf]  ;;  %v11125_v13 = vor.u32 %v12395_v11, %v11122_v27  ;;  %v12419_v27 = vld [vmem:[#allocation9 + $0x1a6c] sm:$0xf] }
 0x55b   :  { %v11265_v48 = vor.u32 %v12433_v31, %v11264_v49  ;;  %v12453_v11 = vld [vmem:[#allocation9 + $0x1b74] sm:$0xf0] }
 0x55c   :  { %7173 = vmatmul.bf16.vlgmr.msrb.gmra.mxu1 %v13145_v62  ;;  %7212 = vmatmul.bf16.vlgmr.msra.gmra.mxu0 %v13136_v20 }
 0x55d   :  { %7260 = vmatpush.bf16.msrb.mxu0 %v10961_v26  ;;  %7269 = vmatpush.bf16.msrb.mxu1 %v11153_v29  ;;  %v6258_v34 = vpop.f32.mrf.mxu3  ;;  %v10994_v26 = vld [vmem:[#allocation9 + $0x18b8] sm:$0xf0] }
 0x55e   :  { %v10997_v1 = vor.u32 %v12363_v25, %v10994_v26  ;;  %v12359_v34 = vld [vmem:[#allocation9 + $0x188c] sm:$0xf]  ;;  %v11168_v25 = vld [vmem:[#allocation9 + $0x1a08] sm:$0xf]  ;;  %v12409_v26 = vld [vmem:[#allocation9 + $0x1a14] sm:$0xf0] }
 0x561   :  { %7261 = vmatpush.bf16.msrb.mxu0 %v10945_v35  ;;  %7270 = vmatpush.bf16.msrb.mxu1 %v11137_v28  ;;  %v10978_v35 = vld [vmem:[#allocation9 + $0x1898] sm:$0xf0]  ;;  %v11057_v28 = vor.u32 %v12381_v43, %v11056_v19  ;;  %v12435_v19 = vld [vmem:[#allocation9 + $0x1aec] sm:$0xf] }
 0x562   :  { %v10981_v18 = vor.u32 %v12359_v34, %v10978_v35  ;;  %v11282_v43 = vld [vmem:[#allocation9 + $0x1af8] sm:$0xf0] }
 0x565   :  { %7262 = vmatpush.bf16.msrb.mxu0 %v10929_v24  ;;  %7271 = vmatpush.bf16.msrb.mxu1 %v11121_v51  ;;  %v6308_v39 = vpop.f32.mrf.mxu3  ;;  %v12403_v24 = vld [vmem:[#allocation9 + $0x19ec] sm:$0xf]  ;;  %v11154_v51 = vld [vmem:[#allocation9 + $0x19f8] sm:$0xf0] }
 0x566   :  { %v6309_v45 = vadd.f32 %v6308_v39, %v6296_v58  ;;  %v13153_v54 = vpop.f32.mrf.mxu2  ;;  %v11157_v56 = vor.u32 %v12403_v24, %v11154_v51  ;;  %v5511_v58 = vperm.slane %v13124_v23, 3  ;;  %v11217_v39 = vor.u32 %v12421_v53, %v11216_v40  ;;  %v11058_v40 = vld [vmem:[#allocation9 + $0x1938] sm:$0xf0] }
 0x567   :  { %v11077_v24 = vor.u32 %v12383_v16, %v11074_v42  ;;  %v11269_v51 = vor.u32 %v12431_v41, %v11266_v59  ;;  %v11250_v53 = vld [vmem:[#allocation9 + $0x1ab8] sm:$0xf0]  ;;  %v12451_v16 = vld [vmem:[#allocation9 + $0x1b6c] sm:$0xf] }
 0x568   :  { %v6366_v44 = vmax.f32 %v6309_v45, 0.0  ;;  %v12347_v45 = vld [vmem:[#allocation9 + $0x182c] sm:$0xf]  ;;  %v6322_v37 = vadd.f32 %v13129_v3, %v5511_v58  ;;  %v11346_v42 = vld [vmem:[#allocation9 + $0x1b78] sm:$0xf0] }
 0x569   :  { %7263 = vmatpush.bf16.msrb.mxu0 %v10913_v15  ;;  %7272 = vmatpush.bf16.msrb.mxu1 %v11105_v7  ;;  %v10949_v15 = vor.u32 %v12351_v55, %v10946_v2  ;;  %v11200_v7 = vld [vmem:[#allocation9 + $0x1a48] sm:$0xf]  ;;  %v12375_v58 = vld [vmem:[#allocation9 + $0x190c] sm:$0xf]  ;;  %v11349_v41 = vor.u32 %v12451_v16, %v11346_v42 }
 0x56a   :  { %v13155_v21 = vpack.c.bf16 %v6366_v44, %v6366_v44  ;;  %v11201_v23 = vor.u32 %v12417_v10, %v11200_v7  ;;  %v6335_v32 = vadd.f32 %v13141_v12, %v6322_v37  ;;  %v12413_v44 = vld [vmem:[#allocation9 + $0x1a34] sm:$0xf0]  ;;  %v11408_v12 = vld [vmem:[#allocation9 + $0x1be8] sm:$0xf]  ;;  %v11234_v7 = vld [vmem:[#allocation9 + $0x1a98] sm:$0xf0] }
 0x56b   :  { %v11185_v3 = vor.u32 %v12413_v44, %v11184_v22  ;;  %v11218_v37 = vld [vmem:[#allocation9 + $0x1a78] sm:$0xf0]  ;;  %v11328_v22 = vld [vmem:[#allocation9 + $0x1b48] sm:$0xf]  ;;  %v12447_v59 = vld [vmem:[#allocation9 + $0x1b4c] sm:$0xf] }
 0x56c   :  { %7186 = vmatmul.bf16.vlgmr.msrb.gmra.mxu2 %v13155_v21  ;;  %7225 = vmatmul.bf16.vlgmr.msra.gmra.mxu1 %v13145_v62  ;;  %v6348_v5 = vadd.f32 %v13153_v54, %v6335_v32  ;;  %v11169_v54 = vor.u32 %v12409_v26, %v11168_v25  ;;  %v12449_v32 = vld [vmem:[#allocation9 + $0x1b54] sm:$0xf0]  ;;  %v11202_v44 = vld [vmem:[#allocation9 + $0x1a58] sm:$0xf0]  ;;  %v11296_v25 = vld [vmem:[#allocation9 + $0x1b08] sm:$0xf] }
 0x56d   :  { %7308 = vmatpush.bf16.msra.mxu0 %v11029_v57  ;;  %7273 = vmatpush.bf16.msrb.mxu1 %v11089_v9  ;;  %v6310_v29 = vpop.f32.mrf.mxu3  ;;  %v10930_v57 = vld [vmem:[#allocation9 + $0x1838] sm:$0xf0]  ;;  %v12343_v9 = vld [vmem:[#allocation9 + $0x180c] sm:$0xf]  ;;  %v12441_v26 = vld [vmem:[#allocation9 + $0x1b14] sm:$0xf0] }
 0x56e   :  { %7264 = vmatmul.bf16.vlgmr.msrb.gmra.mxu0 %v13136_v20  ;;  %7282 = vmatpush.bf16.msrb.mxu2 %v11281_v61  ;;  %v6349_v30 = vpop.f32.mrf.mxu2  ;;  %v10933_v63 = vor.u32 %v12347_v45, %v10930_v57  ;;  %v10914_v61 = vld [vmem:[#allocation9 + $0x1818] sm:$0xf0]  ;;  %v11344_v57 = vld [vmem:[#allocation9 + $0x1b68] sm:$0xf] }
 0x56f   :  { %v10917_v31 = vor.u32 %v12343_v9, %v10914_v61  ;;  %v12469_v30 = vld [vmem:[#allocation9 + $0x1bf4] sm:$0xf0]  ;;  %v11329_v9 = vor.u32 %v12449_v32, %v11328_v22 }
 0x570   :  { %v11409_v33 = vor.u32 %v12469_v30, %v11408_v12  ;;  %v12467_v12 = vld [vmem:[#allocation9 + $0x1bec] sm:$0xf]  ;;  %v11410_v30 = vld [vmem:[#allocation9 + $0x1bf8] sm:$0xf0]  ;;  %v12481_v32 = vld [vmem:[#allocation12 + $0x58] sm:$0xff] }
 0x571   :  { %7309 = vmatpush.bf16.msra.mxu0 %v11013_v60  ;;  %7274 = vmatpush.bf16.msrb.mxu1 %v11073_v17  ;;  %v12391_v60 = vld [vmem:[#allocation9 + $0x198c] sm:$0xf] }
 0x572   :  { %7283 = vmatpush.bf16.msrb.mxu2 %v11265_v48  ;;  %v11109_v17 = vor.u32 %v12391_v60, %v11106_v52  ;;  %v12387_v48 = vld [vmem:[#allocation9 + $0x196c] sm:$0xf]  ;;  %v11312_v60 = vld [vmem:[#allocation9 + $0x1b28] sm:$0xf]  ;;  %v12445_v52 = vld [vmem:[#allocation9 + $0x1b34] sm:$0xf0] }
 0x575   :  { %7310 = vmatpush.bf16.msra.mxu0 %v10997_v1  ;;  %7275 = vmatpush.bf16.msrb.mxu1 %v11057_v28  ;;  %v11090_v1 = vld [vmem:[#allocation9 + $0x1978] sm:$0xf0]  ;;  %v11285_v28 = vor.u32 %v12435_v19, %v11282_v43  ;;  %v12463_v19 = vld [vmem:[#allocation9 + $0x1bcc] sm:$0xf] }
 0x576   :  { %7284 = vmatpush.bf16.msrb.mxu2 %v11249_v38  ;;  %v11093_v35 = vor.u32 %v12387_v48, %v11090_v1  ;;  %v11392_v38 = vld [vmem:[#allocation9 + $0x1bc8] sm:$0xf]  ;;  %v11297_v48 = vor.u32 %v12441_v26, %v11296_v25  ;;  %v11413_v1 = vor.u32 %v12467_v12, %v11410_v30  ;;  %v11394_v43 = vld [vmem:[#allocation9 + $0x1bd8] sm:$0xf0]  ;;  %v13184_v25 = vld [vmem:[#allocation11 + $0x18] sm:$0xf] }
 0x577   :  { %v12488_v12 = vld [vmem:[#allocation12 + $0x90] sm:$0xff]  ;;  %v6505_v42 = vperm.slane %v13184_v25, 1 }
 0x579   :  { %7311 = vmatpush.bf16.msra.mxu0 %v10981_v18  ;;  %7276 = vmatpush.bf16.msrb.mxu1 %v11041_v50  ;;  %v12465_v18 = vld [vmem:[#allocation9 + $0x1bd4] sm:$0xf0]  ;;  %v11376_v50 = vld [vmem:[#allocation9 + $0x1ba8] sm:$0xf] }
 0x57a   :  { %7285 = vmatpush.bf16.msrb.mxu2 %v11233_v0  ;;  %v11393_v47 = vor.u32 %v12465_v18, %v11392_v38  ;;  %v12461_v0 = vld [vmem:[#allocation9 + $0x1bb4] sm:$0xf0]  ;;  %v11362_v38 = vld [vmem:[#allocation9 + $0x1b98] sm:$0xf0] }
 0x57b   :  { %v11377_v55 = vor.u32 %v12461_v0, %v11376_v50  ;;  %v12439_v0 = vld [vmem:[#allocation9 + $0x1b0c] sm:$0xf] }
 0x57c   :  { %7238 = vmatmul.bf16.vlgmr.msra.gmra.mxu2 %v13155_v21  ;;  %7277 = vmatmul.bf16.vlgmr.msrb.gmra.mxu1 %v13145_v62 }
 0x57d   :  { %7312 = vmatpush.bf16.msra.mxu0 %v10965_v4  ;;  %7321 = vmatpush.bf16.msra.mxu1 %v11157_v56  ;;  %v12379_v4 = vld [vmem:[#allocation9 + $0x192c] sm:$0xf] }
 0x57e   :  { %7286 = vmatpush.bf16.msrb.mxu2 %v11217_v39  ;;  %v12427_v56 = vld [vmem:[#allocation9 + $0x1aac] sm:$0xf]  ;;  %v11042_v39 = vld [vmem:[#allocation9 + $0x1918] sm:$0xf0] }
 0x57f   :  { %v11253_v2 = vor.u32 %v12427_v56, %v11250_v53  ;;  %v11045_v10 = vor.u32 %v12375_v58, %v11042_v39  ;;  %v12477_v53 = vld [vmem:[#allocation12 + $0x38] sm:$0xff] }
 0x581   :  { %7313 = vmatpush.bf16.msra.mxu0 %v10949_v15  ;;  %7322 = vmatpush.bf16.msra.mxu1 %v11141_v8  ;;  %v12423_v15 = vld [vmem:[#allocation9 + $0x1a8c] sm:$0xf]  ;;  %v11361_v8 = vor.u32 %v12457_v6, %v11360_v36  ;;  %v12475_v36 = vld [vmem:[#allocation12 + $0x28] sm:$0xff]  ;;  %v12474_v6 = vld [vmem:[#allocation12 + $0x20] sm:$0xff] }
 0x582   :  { %7287 = vmatpush.bf16.msrb.mxu2 %v11201_v23  ;;  %v11237_v45 = vor.u32 %v12423_v15, %v11234_v7  ;;  %v11345_v23 = vor.u32 %v12453_v11, %v11344_v57  ;;  %v12473_v15 = vld [vmem:[#allocation12 + $0x18] sm:$0xff]  ;;  %v12471_v57 = vld [vmem:[#allocation12 + $0x8] sm:$0xff] }
 0x583   :  { %v12485_v7 = vld [vmem:[#allocation12 + $0x78] sm:$0xff]  ;;  %v12483_v11 = vld [vmem:[#allocation12 + $0x68] sm:$0xff] }
 0x585   :  { %v6360_v49 = vpop.f32.mrf.mxu3  ;;  %7314 = vmatpush.bf16.msra.mxu0 %v10933_v63  ;;  %7323 = vmatpush.bf16.msra.mxu1 %v11125_v13  ;;  %v11221_v63 = vor.u32 %v12419_v27, %v11218_v37  ;;  %v12415_v13 = vld [vmem:[#allocation9 + $0x1a4c] sm:$0xf]  ;;  %v12470_v37 = vld [vmem:[#allocation12] sm:$0xff] }
 0x586   :  { %v6361_v29 = vadd.f32 %v6360_v49, %v6348_v5  ;;  %7288 = vmatpush.bf16.msrb.mxu2 %v11185_v3  ;;  %v11205_v61 = vor.u32 %v12415_v13, %v11202_v44  ;;  %v12411_v5 = vld [vmem:[#allocation9 + $0x1a2c] sm:$0xf]  ;;  %v11186_v49 = vld [vmem:[#allocation9 + $0x1a38] sm:$0xf0]  ;;  %v11313_v3 = vor.u32 %v12445_v52, %v11312_v60  ;;  %v12493_v13 = vld [vmem:[#allocation12 + $0xb8] sm:$0xff] }
 0x587   :  { %v12479_v52 = vld [vmem:[#allocation12 + $0x48] sm:$0xff] }
 0x588   :  { %v6367_v14 = vmax.f32 %v6361_v29, 0.0  ;;  %v12407_v29 = vld [vmem:[#allocation9 + $0x1a0c] sm:$0xf] }
 0x589   :  { %7315 = vmatpush.bf16.msra.mxu0 %v10917_v31  ;;  %7324 = vmatpush.bf16.msra.mxu1 %v11109_v17  ;;  %v11189_v31 = vor.u32 %v12411_v5, %v11186_v49  ;;  %v11170_v17 = vld [vmem:[#allocation9 + $0x1a18] sm:$0xf0]  ;;  %v12491_v5 = vld [vmem:[#allocation12 + $0xa8] sm:$0xff] }
 0x58a   :  { %v13166_v34 = vpack.c.bf16 %v6367_v14, %v6367_v14  ;;  %7289 = vmatpush.bf16.msrb.mxu2 %v11169_v54  ;;  %v11397_v14 = vor.u32 %v12463_v19, %v11394_v43  ;;  %v12459_v54 = vld [vmem:[#allocation9 + $0x1bac] sm:$0xf]  ;;  %v12487_v43 = vld [vmem:[#allocation12 + $0x88] sm:$0xff] }
 0x58c   :  { %7199 = vmatmul.bf16.vlgmr.msrb.gmra.mxu3 %v13166_v34  ;;  %7316 = vmatmul.bf16.vlgmr.msra.gmra.mxu0 %v13136_v20  ;;  %v11061_v20 = vor.u32 %v12379_v4, %v11058_v40 }
 0x58d   :  { %7295 = vmatpush.bf16.msrb.mxu3 %v11409_v33  ;;  %v6362_v46 = vpop.f32.mrf.mxu3  ;;  %7325 = vmatpush.bf16.msra.mxu1 %v11093_v35  ;;  %v11378_v33 = vld [vmem:[#allocation9 + $0x1bb8] sm:$0xf0] }
 0x58e   :  { %7334 = vmatpush.bf16.msra.mxu2 %v11285_v28  ;;  %v11381_v35 = vor.u32 %v12459_v54, %v11378_v33  ;;  %v12455_v28 = vld [vmem:[#allocation9 + $0x1b8c] sm:$0xf]  ;;  %v11330_v46 = vld [vmem:[#allocation9 + $0x1b58] sm:$0xf0]  ;;  %7628 = vmatpush.bf16.msrb.mxu0 %v12477_v53 }
 0x58f   :  { %7290 = vmatmul.bf16.vlgmr.msrb.gmra.mxu2 %v13155_v21  ;;  %v11365_v18 = vor.u32 %v12455_v28, %v11362_v38  ;;  %v12486_v28 = vld [vmem:[#allocation12 + $0x80] sm:$0xff]  ;;  %v12501_v38 = vld [vmem:[#allocation12 + $0xf8] sm:$0xff] }
 0x591   :  { %7296 = vmatpush.bf16.msrb.mxu3 %v11393_v47  ;;  %7326 = vmatpush.bf16.msra.mxu1 %v11077_v24  ;;  %v11333_v47 = vor.u32 %v12447_v59, %v11330_v46  ;;  %v12443_v24 = vld [vmem:[#allocation9 + $0x1b2c] sm:$0xf]  ;;  %v12499_v46 = vld [vmem:[#allocation12 + $0xe8] sm:$0xff] }
 0x592   :  { %7335 = vmatpush.bf16.msra.mxu2 %v11269_v51  ;;  %v11314_v51 = vld [vmem:[#allocation9 + $0x1b38] sm:$0xf0] }
 0x593   :  { %v11317_v50 = vor.u32 %v12443_v24, %v11314_v51 }
 0x595   :  { %7297 = vmatpush.bf16.msrb.mxu3 %v11377_v55  ;;  %7327 = vmatpush.bf16.msra.mxu1 %v11061_v20  ;;  %v12476_v55 = vld [vmem:[#allocation12 + $0x30] sm:$0xff] }
 0x596   :  { %7336 = vmatpush.bf16.msra.mxu2 %v11253_v2  ;;  %7629 = vmatpush.bf16.msrb.mxu0 %v12476_v55 }
 0x599   :  { %7298 = vmatpush.bf16.msrb.mxu3 %v11361_v8  ;;  %7328 = vmatpush.bf16.msra.mxu1 %v11045_v10  ;;  %v12484_v8 = vld [vmem:[#allocation12 + $0x70] sm:$0xff] }
 0x59a   :  { %7337 = vmatpush.bf16.msra.mxu2 %v11237_v45  ;;  %7630 = vmatpush.bf16.msrb.mxu0 %v12475_v36  ;;  %v12496_v36 = vld [vmem:[#allocation12 + $0xd0] sm:$0xff] }
 0x59c   :  { %7251 = vmatmul.bf16.vlgmr.msra.gmra.mxu3 %v13166_v34  ;;  %7329 = vmatmul.bf16.vlgmr.msra.gmra.mxu1 %v13145_v62  ;;  %v11173_v62 = vor.u32 %v12407_v29, %v11170_v17  ;;  %v6504_v29 = vperm.slane %v13184_v25, 0  ;;  %v12489_v17 = vld [vmem:[#allocation12 + $0x98] sm:$0xff] }
 0x59d   :  { %7299 = vmatpush.bf16.msrb.mxu3 %v11345_v23  ;;  %7641 = vmatpush.bf16.msrb.mxu1 %v12485_v7  ;;  %v12482_v23 = vld [vmem:[#allocation12 + $0x60] sm:$0xff] }
 0x59e   :  { %7338 = vmatpush.bf16.msra.mxu2 %v11221_v63  ;;  %7631 = vmatpush.bf16.msrb.mxu0 %v12474_v6  ;;  %v6506_v6 = vperm.slane %v13184_v25, 2 }
 0x5a1   :  { %7300 = vmatpush.bf16.msrb.mxu3 %v11329_v9  ;;  %7642 = vmatpush.bf16.msrb.mxu1 %v12484_v8  ;;  %v12480_v9 = vld [vmem:[#allocation12 + $0x50] sm:$0xff] }
 0x5a2   :  { %7339 = vmatpush.bf16.msra.mxu2 %v11205_v61  ;;  %7632 = vmatpush.bf16.msrb.mxu0 %v12473_v15  ;;  %v12492_v61 = vld [vmem:[#allocation12 + $0xb0] sm:$0xff] }
 0x5a5   :  { %7301 = vmatpush.bf16.msrb.mxu3 %v11313_v3  ;;  %7643 = vmatpush.bf16.msrb.mxu1 %v12483_v11  ;;  %v12478_v3 = vld [vmem:[#allocation12 + $0x40] sm:$0xff] }
 0x5a6   :  { %7340 = vmatpush.bf16.msra.mxu2 %v11189_v31  ;;  %v12490_v31 = vld [vmem:[#allocation12 + $0xa0] sm:$0xff] }
 0x5a9   :  { %7302 = vmatpush.bf16.msrb.mxu3 %v11297_v48  ;;  %7644 = vmatpush.bf16.msrb.mxu1 %v12482_v23 }
 0x5aa   :  { %7341 = vmatpush.bf16.msra.mxu2 %v11173_v62 }
 0x5ac   :  { %7303 = vmatmul.bf16.vlgmr.msrb.gmra.mxu3 %v13166_v34 }
 0x5ad   :  { %7347 = vmatpush.bf16.msra.mxu3 %v11413_v1  ;;  %7342 = vmatmul.bf16.vlgmr.msra.gmra.mxu2 %v13155_v21  ;;  %v11298_v21 = vld [vmem:[#allocation9 + $0x1b18] sm:$0xf0] }
 0x5ae   :  { %v11301_v4 = vor.u32 %v12439_v0, %v11298_v21  ;;  %7645 = vmatpush.bf16.msrb.mxu1 %v12481_v32  ;;  %7654 = vmatpush.bf16.msrb.mxu2 %v12493_v13  ;;  %v12498_v0 = vld [vmem:[#allocation12 + $0xe0] sm:$0xff] }
 0x5b1   :  { %7348 = vmatpush.bf16.msra.mxu3 %v11397_v14 }
 0x5b2   :  { %7646 = vmatpush.bf16.msrb.mxu1 %v12480_v9  ;;  %7655 = vmatpush.bf16.msrb.mxu2 %v12492_v61 }
 0x5b5   :  { %7349 = vmatpush.bf16.msra.mxu3 %v11381_v35 }
 0x5b6   :  { %7647 = vmatpush.bf16.msrb.mxu1 %v12479_v52  ;;  %7656 = vmatpush.bf16.msrb.mxu2 %v12491_v5 }
 0x5b9   :  { %7350 = vmatpush.bf16.msra.mxu3 %v11365_v18 }
 0x5ba   :  { %7648 = vmatpush.bf16.msrb.mxu1 %v12478_v3  ;;  %7657 = vmatpush.bf16.msrb.mxu2 %v12490_v31 }
 0x5bd   :  { %7351 = vmatpush.bf16.msra.mxu3 %v11349_v41  ;;  %v12500_v41 = vld [vmem:[#allocation12 + $0xf0] sm:$0xff] }
 0x5be   :  { %7658 = vmatpush.bf16.msrb.mxu2 %v12489_v17 }
 0x5c1   :  { %7352 = vmatpush.bf16.msra.mxu3 %v11333_v47 }
 0x5c2   :  { %7659 = vmatpush.bf16.msrb.mxu2 %v12488_v12 }
 0x5c5   :  { %7353 = vmatpush.bf16.msra.mxu3 %v11317_v50 }
 0x5c6   :  { %7660 = vmatpush.bf16.msrb.mxu2 %v12487_v43 }
 0x5c9   :  { %7354 = vmatpush.bf16.msra.mxu3 %v11301_v4  ;;  %v7161_v40 = vpop.f32.mrf.mxu0 }
 0x5ca   :  { %v7162_v48 = vadd.f32 %v7161_v40, %v6504_v29  ;;  %7661 = vmatpush.bf16.msrb.mxu2 %v12486_v28  ;;  %v12515_v29 = vld [vmem:[#allocation14] ss:$0 sm:$0xff] }
 0x5cc   :  { %7355 = vmatmul.bf16.vlgmr.msra.gmra.mxu3 %v13166_v34  ;;  %v12472_v34 = vld [vmem:[#allocation12 + $0x10] sm:$0xff] }
 0x5cd   :  { %7633 = vmatpush.bf16.msrb.mxu0 %v12472_v34  ;;  %7667 = vmatpush.bf16.msrb.mxu3 %v12501_v38  ;;  %v12494_v34 = vld [vmem:[#allocation12 + $0xc0] sm:$0xff] }
 0x5d1   :  { %v7163_v56 = vpop.f32.mrf.mxu0  ;;  %7634 = vmatpush.bf16.msrb.mxu0 %v12471_v57  ;;  %7668 = vmatpush.bf16.msrb.mxu3 %v12500_v41 }
 0x5d2   :  { %v12497_v56 = vld [vmem:[#allocation12 + $0xd8] sm:$0xff] }
 0x5d5   :  { %7635 = vmatpush.bf16.msrb.mxu0 %v12470_v37  ;;  %7669 = vmatpush.bf16.msrb.mxu3 %v12499_v46 }
 0x5d9   :  { %v7174_v20 = vpop.f32.mrf.mxu1  ;;  %v13176_v2 = vpop.f32.mrf.mxu0  ;;  %7670 = vmatpush.bf16.msrb.mxu3 %v12498_v0 }
 0x5da   :  { %v7175_v1 = vadd.f32 %v7174_v20, %v7162_v48  ;;  %v7214_v47 = vadd.f32 %v13176_v2, %v6505_v42 }
 0x5dd   :  { %7671 = vmatpush.bf16.msrb.mxu3 %v12497_v56 }
 0x5e1   :  { %v7176_v58 = vpop.f32.mrf.mxu1  ;;  %v7215_v39 = vpop.f32.mrf.mxu0  ;;  %7672 = vmatpush.bf16.msrb.mxu3 %v12496_v36 }
 0x5e2   :  { %v12495_v39 = vld [vmem:[#allocation12 + $0xc8] sm:$0xff] }
 0x5e5   :  { %7673 = vmatpush.bf16.msrb.mxu3 %v12495_v39 }
 0x5e9   :  { %v13178_v10 = vpop.f32.mrf.mxu1  ;;  %7674 = vmatpush.bf16.msrb.mxu3 %v12494_v34 }
 0x5ea   :  { %v7227_v50 = vadd.f32 %v13178_v10, %v7214_v47 }
 0x5eb   :  { %v13180_v45 = vpop.f32.mrf.mxu0 }
 0x5ec   :  { %v7266_v58 = vadd.f32 %v13180_v45, %v6506_v6 }
 0x5ef   :  { %v7187_v27 = vpop.f32.mrf.mxu2 }
 0x5f0   :  { %v7188_v19 = vadd.f32 %v7187_v27, %v7175_v1 }
 0x5f1   :  { %v7228_v63 = vpop.f32.mrf.mxu1 }
 0x5f2   :  { %v6507_v63 = vperm.slane %v13184_v25, 3 }
 0x5f3   :  { %v7267_v22 = vpop.f32.mrf.mxu0 }
 0x5f7   :  { %v7189_v44 = vpop.f32.mrf.mxu2 }
 0x5f9   :  { %v13182_v60 = vpop.f32.mrf.mxu1 }
 0x5fa   :  { %v7279_v15 = vadd.f32 %v13182_v60, %v7266_v58 }
 0x5ff   :  { %v7239_v49 = vpop.f32.mrf.mxu2 }
 0x600   :  { %v7240_v21 = vadd.f32 %v7239_v49, %v7227_v50 }
 0x601   :  { %v7280_v26 = vpop.f32.mrf.mxu1 }
 0x607   :  { %v7241_v62 = vpop.f32.mrf.mxu2 }
 0x609   :  { %v7317_v30 = vpop.f32.mrf.mxu0 }
 0x60a   :  { %v7318_v22 = vadd.f32 %v7317_v30, %v6507_v63 }
 0x60f   :  { %v7200_v14 = vpop.f32.mrf.mxu3 }
 0x610   :  { %v7201_v54 = vadd.f32 %v7200_v14, %v7188_v19 }
 0x611   :  { %v7319_v33 = vpop.f32.mrf.mxu0 }
 0x612   :  { %v7360_v35 = vmax.f32 %v7201_v54, 0.0  ;;  %v7291_v18 = vpop.f32.mrf.mxu2 }
 0x613   :  { %v7292_v7 = vadd.f32 %v7291_v18, %v7279_v15 }
 0x614   :  { %v7364_v16 = vpack.c.bf16 %v7360_v35, %v7360_v35 }
 0x616   :  { %7636 = vmatmul.bf16.vlgmr.msrb.gmra.mxu0 %v7364_v16 }
 0x617   :  { %v7202_v59 = vpop.f32.mrf.mxu3 }
 0x619   :  { %v7330_v24 = vpop.f32.mrf.mxu1 }
 0x61a   :  { %v7293_v51 = vpop.f32.mrf.mxu2  ;;  %v7331_v32 = vadd.f32 %v7330_v24, %v7318_v22 }
 0x61f   :  { %v7252_v4 = vpop.f32.mrf.mxu3 }
 0x620   :  { %v7253_v40 = vadd.f32 %v7252_v4, %v7240_v21 }
 0x621   :  { %v7332_v55 = vpop.f32.mrf.mxu1 }
 0x622   :  { %v7361_v53 = vmax.f32 %v7253_v40, 0.0 }
 0x624   :  { %v7365_v20 = vpack.c.bf16 %v7361_v53, %v7361_v53 }
 0x626   :  { %7649 = vmatmul.bf16.vlgmr.msrb.gmra.mxu1 %v7365_v20 }
 0x627   :  { %v7254_v2 = vpop.f32.mrf.mxu3 }
 0x62f   :  { %v7304_v8 = vpop.f32.mrf.mxu3 }
 0x630   :  { %v7305_v10 = vadd.f32 %v7304_v8, %v7292_v7  ;;  %v7343_v57 = vpop.f32.mrf.mxu2 }
 0x631   :  { %v7344_v45 = vadd.f32 %v7343_v57, %v7331_v32 }
 0x632   :  { %v7362_v11 = vmax.f32 %v7305_v10, 0.0 }
 0x634   :  { %v7366_v27 = vpack.c.bf16 %v7362_v11, %v7362_v11 }
 0x636   :  { %7662 = vmatmul.bf16.vlgmr.msrb.gmra.mxu2 %v7366_v27 }
 0x637   :  { %v7306_v37 = vpop.f32.mrf.mxu3 }
 0x638   :  { %v7345_v23 = vpop.f32.mrf.mxu2 }
 0x64f   :  { %v7356_v13 = vpop.f32.mrf.mxu3 }
 0x650   :  { %v7357_v44 = vadd.f32 %v7356_v13, %v7344_v45 }
 0x652   :  { %v7363_v9 = vmax.f32 %v7357_v44, 0.0 }
 0x654   :  { %v7367_v61 = vpack.c.bf16 %v7363_v9, %v7363_v9 }
 0x656   :  { %7675 = vmatmul.bf16.vlgmr.msrb.gmra.mxu3 %v7367_v61 }
 0x657   :  { %v7358_v60 = vpop.f32.mrf.mxu3 }
 0x693   :  { %v7637_v52 = vpop.f32.mrf.mxu0 }
 0x694   :  { %v7638_v17 = vadd.f32 %v12515_v29, %v7637_v52 }
 0x69b   :  { %v7639_v5 = vpop.f32.mrf.mxu0 }
 0x6a3   :  { %v7650_v49 = vpop.f32.mrf.mxu1 }
 0x6a4   :  { %v7651_v12 = vadd.f32 %v7650_v49, %v7638_v17 }
 0x6ab   :  { %v7652_v3 = vpop.f32.mrf.mxu1 }
 0x6b9   :  { %v7663_v31 = vpop.f32.mrf.mxu2 }
 0x6ba   :  { %v7664_v25 = vadd.f32 %v7663_v31, %v7651_v12 }
 0x6c1   :  { %v7665_v26 = vpop.f32.mrf.mxu2 }
 0x6d9   :  { %v7676_v30 = vpop.f32.mrf.mxu3 }
 0x6da   :  { %v7677_v48 = vadd.f32 %v7676_v30, %v7664_v25 }
 0x6dc   :  { %7681 = vst.msk [vmem:[#allocation15] sm:$0x3] %vm7680_vm1, %v7677_v48 }
 0x6dd   :  { %7692 = dma.vmem_to_hbm [thread:$0]  %s7688_s6, 32, %s7690_s14, [#allocation5]  }
 0x6e1   :  { %v7678_v62 = vpop.f32.mrf.mxu3 }
 0x6e2   :  { %12716 = dma.done.wait [#allocation5], 32  }
 0x6e3   :  { %12717 = vsyncadd [#allocation5], 4294967264 }
 0x6e4   :  { %7697 = vsyncpa [#allocation4], 1 }
 0x6e5   :  { %7698 = vsyncpa [#allocation7], 1 }
 0x6e6   :  { %7699 = vsyncpa [#allocation10], 1 }
 0x6e7   :  { %7700 = vsyncpa [#allocation13], 1 }
 0x6e8   :  { %7701 = vsyncpa [#allocation5], 1 }

</bundles_post_ra>
